<compile_context>
chip_gen: v7x
topology: tpu7x:2x2x1
jax: 0.10.0
libtpu: 0.0.40
codegen_flags: <defaults>
</compile_context>

<pallas_src>
import functools

import jax
import jax.numpy as jnp
import numpy as np
from jax.experimental import pallas as pl
from jax.experimental.pallas import tpu as pltpu


def _pick_seq_tile(n, cap=128):
    for t in (cap, 128, 64, 32, 16, 8):
        if t <= cap and n % t == 0:
            return t
    return n  # full extent (always a legal block size)


# ----------------------------------------------------------------------------
# Kernel 1: QKV projection, head-separated output layout (b, 3*h, n, d).
# One grid step handles one (batch, q-row-tile): the x tile is read from HBM
# exactly once and all 3*h per-head projections are produced from it.
# ----------------------------------------------------------------------------
def _qkv_proj_kernel(x_ref, w_ref, o_ref):
    xt = x_ref[0]                                   # (tq, dim)
    for j in range(o_ref.shape[1]):                 # 3 * heads small static loop
        o_ref[0, j] = jnp.dot(
            xt, w_ref[j], preferred_element_type=jnp.float32
        ).astype(o_ref.dtype)


def qkv_projection(x, w_qkv, heads, dim_head):
    b, n, dim = x.shape
    h, d = heads, dim_head
    tq = _pick_seq_tile(n)
    # (dim, 3*h*d) -> (3*h, dim, d); ordering matches torch chunk(3) + head-major.
    w3 = w_qkv.reshape(dim, 3, h, d).transpose(1, 2, 0, 3).reshape(3 * h, dim, d)
    return pl.pallas_call(
        _qkv_proj_kernel,
        out_shape=jax.ShapeDtypeStruct((b, 3 * h, n, d), x.dtype),
        grid=(b, n // tq),
        in_specs=[
            pl.BlockSpec((1, tq, dim), lambda bi, qi: (bi, qi, 0)),
            pl.BlockSpec((3 * h, dim, d), lambda bi, qi: (0, 0, 0)),
        ],
        out_specs=pl.BlockSpec((1, 3 * h, tq, d), lambda bi, qi: (bi, 0, qi, 0)),
        compiler_params=pltpu.CompilerParams(
            dimension_semantics=("parallel", "parallel")),
    )(x, w3)


# ----------------------------------------------------------------------------
# Kernel 2: fused flash attention + output projection.
# grid = (b, q_tiles, heads, kv_tiles); scratch carries the online-softmax
# state per (b, q_tile, head) and the projected-output accumulator per
# (b, q_tile).  The only HBM output is the final (b, n, dim) tensor.
# ----------------------------------------------------------------------------
def _attn_kernel(q_ref, k_ref, v_ref, wo_ref, bo_ref, o_ref,
                 m_sc, l_sc, acc_sc, out_sc, *, scale, heads):
    hi = pl.program_id(2)
    ki = pl.program_id(3)
    nk = pl.num_programs(3)

    @pl.when(jnp.logical_and(hi == 0, ki == 0))
    def _():
        out_sc[...] = jnp.zeros(out_sc.shape, out_sc.dtype)

    @pl.when(ki == 0)
    def _():
        m_sc[...] = jnp.full(m_sc.shape, -jnp.inf, m_sc.dtype)
        l_sc[...] = jnp.zeros(l_sc.shape, l_sc.dtype)
        acc_sc[...] = jnp.zeros(acc_sc.shape, acc_sc.dtype)

    q = q_ref[0, 0].astype(jnp.float32) * scale     # (tq, d)
    k = k_ref[0, 0]                                 # (tk, d)
    v = v_ref[0, 0]                                 # (tk, d)

    s = jax.lax.dot_general(q, k, (((1,), (1,)), ((), ())),
                            preferred_element_type=jnp.float32)   # (tq, tk)

    m_prev = m_sc[...]
    m_new = jnp.maximum(m_prev, s.max(axis=-1, keepdims=True))
    alpha = jnp.exp(m_prev - m_new)
    p = jnp.exp(s - m_new)
    l_sc[...] = alpha * l_sc[...] + p.sum(axis=-1, keepdims=True)
    acc_sc[...] = alpha * acc_sc[...] + jnp.dot(
        p.astype(v.dtype), v, preferred_element_type=jnp.float32)
    m_sc[...] = m_new

    @pl.when(ki == nk - 1)
    def _():
        head_out = acc_sc[...] / l_sc[...]          # (tq, d)
        out_sc[...] += jnp.dot(head_out, wo_ref[0],
                               preferred_element_type=jnp.float32)

    @pl.when(jnp.logical_and(hi == heads - 1, ki == nk - 1))
    def _():
        o_ref[0] = (out_sc[...] + bo_ref[...]).astype(o_ref.dtype)


def flash_attention_projected(qkv, w_out, b_out, heads, dim_head, dim):
    b, three_h, n, d = qkv.shape
    h = heads
    assert three_h == 3 * h and d == dim_head
    tq = _pick_seq_tile(n)
    tk = _pick_seq_tile(n)
    scale = float(dim_head) ** -0.5
    wo_r = w_out.reshape(h, d, dim)                 # head-major rows of (h*d, dim)
    bo_r = b_out.reshape(1, dim)

    return pl.pallas_call(
        functools.partial(_attn_kernel, scale=scale, heads=h),
        out_shape=jax.ShapeDtypeStruct((b, n, dim), qkv.dtype),
        grid=(b, n // tq, h, n // tk),
        in_specs=[
            pl.BlockSpec((1, 1, tq, d), lambda bi, qi, hi, ki: (bi, hi, qi, 0)),
            pl.BlockSpec((1, 1, tk, d), lambda bi, qi, hi, ki: (bi, h + hi, ki, 0)),
            pl.BlockSpec((1, 1, tk, d), lambda bi, qi, hi, ki: (bi, 2 * h + hi, ki, 0)),
            pl.BlockSpec((1, d, dim), lambda bi, qi, hi, ki: (hi, 0, 0)),
            pl.BlockSpec((1, dim), lambda bi, qi, hi, ki: (0, 0)),
        ],
        out_specs=pl.BlockSpec((1, tq, dim), lambda bi, qi, hi, ki: (bi, qi, 0)),
        scratch_shapes=[
            pltpu.VMEM((tq, 1), jnp.float32),       # running max
            pltpu.VMEM((tq, 1), jnp.float32),       # running denom
            pltpu.VMEM((tq, d), jnp.float32),       # per-head context accumulator
            pltpu.VMEM((tq, dim), jnp.float32),     # projected-output accumulator
        ],
        compiler_params=pltpu.CompilerParams(
            dimension_semantics=("parallel", "parallel", "arbitrary", "arbitrary")),
    )(qkv, qkv, qkv, wo_r, bo_r)


# ----------------------------------------------------------------------------
# Attention.forward
# ----------------------------------------------------------------------------
def attention_forward(x, params, *, heads, dim_head):
    b, n, dim = x.shape
    inner = heads * dim_head
    assert params["w_qkv"].shape == (dim, 3 * inner)
    qkv = qkv_projection(x, params["w_qkv"], heads, dim_head)
    out = flash_attention_projected(qkv, params["w_out"], params["b_out"],
                                    heads, dim_head, dim)
    return out


# ----------------------------------------------------------------------------
# Deterministic parameter init (math layout: y = x @ W, i.e. torch weight.T)
# ----------------------------------------------------------------------------
def init_params(key, dim, heads=8, dim_head=64):
    inner = heads * dim_head
    k1, k2, k3 = jax.random.split(key, 3)
    return {
        "w_qkv": jax.random.normal(k1, (dim, 3 * inner), jnp.float32) / np.sqrt(dim),
        "w_out": jax.random.normal(k2, (inner, dim), jnp.float32) / np.sqrt(inner),
        "b_out": jax.random.normal(k3, (dim,), jnp.float32) * 0.02,
    }


# ----------------------------------------------------------------------------
# Pure-JAX reference for the numerical check
# ----------------------------------------------------------------------------
def ref_forward(x, params, *, heads, dim_head):
    b, n, dim = x.shape
    h, d = heads, dim_head
    qkv = x @ params["w_qkv"]                       # (b, n, 3*h*d)
    q, k, v = jnp.split(qkv, 3, axis=-1)

    def split_heads(t):
        return t.reshape(b, n, h, d).transpose(0, 2, 1, 3)

    q, k, v = map(split_heads, (q, k, v))
    s = jnp.einsum("bhid,bhjd->bhij", q, k) * (float(d) ** -0.5)
    a = jax.nn.softmax(s, axis=-1)
    o = jnp.einsum("bhij,bhjd->bhid", a, v)
    o = o.transpose(0, 2, 1, 3).reshape(b, n, h * d)
    return o @ params["w_out"] + params["b_out"]


if __name__ == "__main__":
    key = jax.random.PRNGKey(0)
    kx, kp = jax.random.split(key)

    b, n, dim = 2, 256, 128
    heads, dim_head = 8, 64                         # module defaults
    x = jax.random.normal(kx, (b, n, dim), jnp.float32)
    params = init_params(kp, dim, heads, dim_head)

    fwd = jax.jit(functools.partial(attention_forward, heads=heads,
                                    dim_head=dim_head))
    out = fwd(x, params)
    jax.block_until_ready(out)
    assert out.shape == (b, n, dim)

    out_ref = ref_forward(x, params, heads=heads, dim_head=dim_head)
    np.testing.assert_allclose(np.asarray(out), np.asarray(out_ref),
                               atol=2e-3, rtol=2e-3)

    print("KERNEL_OK")
</pallas_src>

<mosaic_0001>
module attributes {stable_mosaic.version = 11 : i64} {
  func.func @_qkv_proj_kernel(%arg0: i32, %arg1: i32, %arg2: memref<1x128x128xf32, #tpu.memory_space<vmem>>, %arg3: memref<24x128x64xf32, #tpu.memory_space<vmem>>, %arg4: memref<1x24x128x64xf32, #tpu.memory_space<vmem>>) attributes {dimension_semantics = [#tpu.dimension_semantics<parallel>, #tpu.dimension_semantics<parallel>], iteration_bounds = array<i64: 2, 2>, scalar_prefetch = 0 : i64, scratch_operands = 0 : i64, tpu.core_type = #tpu.core_type<tc>, window_params = [{transform_indices = @transform_0, window_bounds = array<i64: 1, 128, 128>}, {pipeline_mode = #tpu.pipeline_mode<synchronous>, transform_indices = @transform_1, window_bounds = array<i64: 24, 128, 64>}, {transform_indices = @transform_2, window_bounds = array<i64: 1, 24, 128, 64>}]} {
    %c0 = arith.constant 0 : index
    %c0_0 = arith.constant 0 : index
    %c0_1 = arith.constant 0 : index
    %0 = vector.load %arg2[%c0, %c0_0, %c0_1] : memref<1x128x128xf32, #tpu.memory_space<vmem>>, vector<1x128x128xf32>
    %1 = vector.shape_cast %0 : vector<1x128x128xf32> to vector<128x128xf32>
    %c0_2 = arith.constant 0 : index
    %c0_3 = arith.constant 0 : index
    %c0_4 = arith.constant 0 : index
    %2 = vector.load %arg3[%c0_2, %c0_3, %c0_4] : memref<24x128x64xf32, #tpu.memory_space<vmem>>, vector<1x128x64xf32>
    %3 = vector.shape_cast %2 : vector<1x128x64xf32> to vector<128x64xf32>
    %cst = arith.constant dense<0.000000e+00> : vector<128x64xf32>
    %4 = tpu.matmul %1, %3, %cst {dimension_numbers = #tpu.dot_dimension_numbers<[1], [0], [0], [1], [0, 0, 1, 1], [], []>} : vector<128x128xf32>, vector<128x64xf32>, vector<128x64xf32> -> vector<128x64xf32>
    %c0_5 = arith.constant 0 : index
    %c0_6 = arith.constant 0 : index
    %c0_7 = arith.constant 0 : index
    %c0_8 = arith.constant 0 : index
    %5 = vector.load %arg4[%c0_5, %c0_6, %c0_7, %c0_8] : memref<1x24x128x64xf32, #tpu.memory_space<vmem>>, vector<1x1x128x64xf32>
    %6 = vector.shape_cast %5 : vector<1x1x128x64xf32> to vector<128x64xf32>
    %7 = vector.shape_cast %4 : vector<128x64xf32> to vector<1x1x128x64xf32>
    tpu.vector_store %arg4[%c0_5, %c0_6, %c0_7, %c0_8], %7 {strides = array<i32>} : memref<1x24x128x64xf32, #tpu.memory_space<vmem>>, vector<1x1x128x64xf32>,
    %c1 = arith.constant 1 : index
    %c0_9 = arith.constant 0 : index
    %c0_10 = arith.constant 0 : index
    %8 = vector.load %arg3[%c1, %c0_9, %c0_10] : memref<24x128x64xf32, #tpu.memory_space<vmem>>, vector<1x128x64xf32>
    %9 = vector.shape_cast %8 : vector<1x128x64xf32> to vector<128x64xf32>
    %cst_11 = arith.constant dense<0.000000e+00> : vector<128x64xf32>
    %10 = tpu.matmul %1, %9, %cst_11 {dimension_numbers = #tpu.dot_dimension_numbers<[1], [0], [0], [1], [0, 0, 1, 1], [], []>} : vector<128x128xf32>, vector<128x64xf32>, vector<128x64xf32> -> vector<128x64xf32>
    %c0_12 = arith.constant 0 : index
    %c1_13 = arith.constant 1 : index
    %c0_14 = arith.constant 0 : index
    %c0_15 = arith.constant 0 : index
    %11 = vector.load %arg4[%c0_12, %c1_13, %c0_14, %c0_15] : memref<1x24x128x64xf32, #tpu.memory_space<vmem>>, vector<1x1x128x64xf32>
    %12 = vector.shape_cast %11 : vector<1x1x128x64xf32> to vector<128x64xf32>
    %13 = vector.shape_cast %10 : vector<128x64xf32> to vector<1x1x128x64xf32>
    tpu.vector_store %arg4[%c0_12, %c1_13, %c0_14, %c0_15], %13 {strides = array<i32>} : memref<1x24x128x64xf32, #tpu.memory_space<vmem>>, vector<1x1x128x64xf32>,
    %c2 = arith.constant 2 : index
    %c0_16 = arith.constant 0 : index
    %c0_17 = arith.constant 0 : index
    %14 = vector.load %arg3[%c2, %c0_16, %c0_17] : memref<24x128x64xf32, #tpu.memory_space<vmem>>, vector<1x128x64xf32>
    %15 = vector.shape_cast %14 : vector<1x128x64xf32> to vector<128x64xf32>
    %cst_18 = arith.constant dense<0.000000e+00> : vector<128x64xf32>
    %16 = tpu.matmul %1, %15, %cst_18 {dimension_numbers = #tpu.dot_dimension_numbers<[1], [0], [0], [1], [0, 0, 1, 1], [], []>} : vector<128x128xf32>, vector<128x64xf32>, vector<128x64xf32> -> vector<128x64xf32>
    %c0_19 = arith.constant 0 : index
    %c2_20 = arith.constant 2 : index
    %c0_21 = arith.constant 0 : index
    %c0_22 = arith.constant 0 : index
    %17 = vector.load %arg4[%c0_19, %c2_20, %c0_21, %c0_22] : memref<1x24x128x64xf32, #tpu.memory_space<vmem>>, vector<1x1x128x64xf32>
    %18 = vector.shape_cast %17 : vector<1x1x128x64xf32> to vector<128x64xf32>
    %19 = vector.shape_cast %16 : vector<128x64xf32> to vector<1x1x128x64xf32>
    tpu.vector_store %arg4[%c0_19, %c2_20, %c0_21, %c0_22], %19 {strides = array<i32>} : memref<1x24x128x64xf32, #tpu.memory_space<vmem>>, vector<1x1x128x64xf32>,
    %c3 = arith.constant 3 : index
    %c0_23 = arith.constant 0 : index
    %c0_24 = arith.constant 0 : index
    %20 = vector.load %arg3[%c3, %c0_23, %c0_24] : memref<24x128x64xf32, #tpu.memory_space<vmem>>, vector<1x128x64xf32>
    %21 = vector.shape_cast %20 : vector<1x128x64xf32> to vector<128x64xf32>
    %cst_25 = arith.constant dense<0.000000e+00> : vector<128x64xf32>
    %22 = tpu.matmul %1, %21, %cst_25 {dimension_numbers = #tpu.dot_dimension_numbers<[1], [0], [0], [1], [0, 0, 1, 1], [], []>} : vector<128x128xf32>, vector<128x64xf32>, vector<128x64xf32> -> vector<128x64xf32>
    %c0_26 = arith.constant 0 : index
    %c3_27 = arith.constant 3 : index
    %c0_28 = arith.constant 0 : index
    %c0_29 = arith.constant 0 : index
    %23 = vector.load %arg4[%c0_26, %c3_27, %c0_28, %c0_29] : memref<1x24x128x64xf32, #tpu.memory_space<vmem>>, vector<1x1x128x64xf32>
    %24 = vector.shape_cast %23 : vector<1x1x128x64xf32> to vector<128x64xf32>
    %25 = vector.shape_cast %22 : vector<128x64xf32> to vector<1x1x128x64xf32>
    tpu.vector_store %arg4[%c0_26, %c3_27, %c0_28, %c0_29], %25 {strides = array<i32>} : memref<1x24x128x64xf32, #tpu.memory_space<vmem>>, vector<1x1x128x64xf32>,
    %c4 = arith.constant 4 : index
    %c0_30 = arith.constant 0 : index
    %c0_31 = arith.constant 0 : index
    %26 = vector.load %arg3[%c4, %c0_30, %c0_31] : memref<24x128x64xf32, #tpu.memory_space<vmem>>, vector<1x128x64xf32>
    %27 = vector.shape_cast %26 : vector<1x128x64xf32> to vector<128x64xf32>
    %cst_32 = arith.constant dense<0.000000e+00> : vector<128x64xf32>
    %28 = tpu.matmul %1, %27, %cst_32 {dimension_numbers = #tpu.dot_dimension_numbers<[1], [0], [0], [1], [0, 0, 1, 1], [], []>} : vector<128x128xf32>, vector<128x64xf32>, vector<128x64xf32> -> vector<128x64xf32>
    %c0_33 = arith.constant 0 : index
    %c4_34 = arith.constant 4 : index
    %c0_35 = arith.constant 0 : index
    %c0_36 = arith.constant 0 : index
    %29 = vector.load %arg4[%c0_33, %c4_34, %c0_35, %c0_36] : memref<1x24x128x64xf32, #tpu.memory_space<vmem>>, vector<1x1x128x64xf32>
    %30 = vector.shape_cast %29 : vector<1x1x128x64xf32> to vector<128x64xf32>
    %31 = vector.shape_cast %28 : vector<128x64xf32> to vector<1x1x128x64xf32>
    tpu.vector_store %arg4[%c0_33, %c4_34, %c0_35, %c0_36], %31 {strides = array<i32>} : memref<1x24x128x64xf32, #tpu.memory_space<vmem>>, vector<1x1x128x64xf32>,
    %c5 = arith.constant 5 : index
    %c0_37 = arith.constant 0 : index
    %c0_38 = arith.constant 0 : index
    %32 = vector.load %arg3[%c5, %c0_37, %c0_38] : memref<24x128x64xf32, #tpu.memory_space<vmem>>, vector<1x128x64xf32>
    %33 = vector.shape_cast %32 : vector<1x128x64xf32> to vector<128x64xf32>
    %cst_39 = arith.constant dense<0.000000e+00> : vector<128x64xf32>
    %34 = tpu.matmul %1, %33, %cst_39 {dimension_numbers = #tpu.dot_dimension_numbers<[1], [0], [0], [1], [0, 0, 1, 1], [], []>} : vector<128x128xf32>, vector<128x64xf32>, vector<128x64xf32> -> vector<128x64xf32>
    %c0_40 = arith.constant 0 : index
    %c5_41 = arith.constant 5 : index
    %c0_42 = arith.constant 0 : index
    %c0_43 = arith.constant 0 : index
    %35 = vector.load %arg4[%c0_40, %c5_41, %c0_42, %c0_43] : memref<1x24x128x64xf32, #tpu.memory_space<vmem>>, vector<1x1x128x64xf32>
    %36 = vector.shape_cast %35 : vector<1x1x128x64xf32> to vector<128x64xf32>
    %37 = vector.shape_cast %34 : vector<128x64xf32> to vector<1x1x128x64xf32>
    tpu.vector_store %arg4[%c0_40, %c5_41, %c0_42, %c0_43], %37 {strides = array<i32>} : memref<1x24x128x64xf32, #tpu.memory_space<vmem>>, vector<1x1x128x64xf32>,
    %c6 = arith.constant 6 : index
    %c0_44 = arith.constant 0 : index
    %c0_45 = arith.constant 0 : index
    %38 = vector.load %arg3[%c6, %c0_44, %c0_45] : memref<24x128x64xf32, #tpu.memory_space<vmem>>, vector<1x128x64xf32>
    %39 = vector.shape_cast %38 : vector<1x128x64xf32> to vector<128x64xf32>
    %cst_46 = arith.constant dense<0.000000e+00> : vector<128x64xf32>
    %40 = tpu.matmul %1, %39, %cst_46 {dimension_numbers = #tpu.dot_dimension_numbers<[1], [0], [0], [1], [0, 0, 1, 1], [], []>} : vector<128x128xf32>, vector<128x64xf32>, vector<128x64xf32> -> vector<128x64xf32>
    %c0_47 = arith.constant 0 : index
    %c6_48 = arith.constant 6 : index
    %c0_49 = arith.constant 0 : index
    %c0_50 = arith.constant 0 : index
    %41 = vector.load %arg4[%c0_47, %c6_48, %c0_49, %c0_50] : memref<1x24x128x64xf32, #tpu.memory_space<vmem>>, vector<1x1x128x64xf32>
    %42 = vector.shape_cast %41 : vector<1x1x128x64xf32> to vector<128x64xf32>
    %43 = vector.shape_cast %40 : vector<128x64xf32> to vector<1x1x128x64xf32>
    tpu.vector_store %arg4[%c0_47, %c6_48, %c0_49, %c0_50], %43 {strides = array<i32>} : memref<1x24x128x64xf32, #tpu.memory_space<vmem>>, vector<1x1x128x64xf32>,
    %c7 = arith.constant 7 : index
    %c0_51 = arith.constant 0 : index
    %c0_52 = arith.constant 0 : index
    %44 = vector.load %arg3[%c7, %c0_51, %c0_52] : memref<24x128x64xf32, #tpu.memory_space<vmem>>, vector<1x128x64xf32>
    %45 = vector.shape_cast %44 : vector<1x128x64xf32> to vector<128x64xf32>
    %cst_53 = arith.constant dense<0.000000e+00> : vector<128x64xf32>
    %46 = tpu.matmul %1, %45, %cst_53 {dimension_numbers = #tpu.dot_dimension_numbers<[1], [0], [0], [1], [0, 0, 1, 1], [], []>} : vector<128x128xf32>, vector<128x64xf32>, vector<128x64xf32> -> vector<128x64xf32>
    %c0_54 = arith.constant 0 : index
    %c7_55 = arith.constant 7 : index
    %c0_56 = arith.constant 0 : index
    %c0_57 = arith.constant 0 : index
    %47 = vector.load %arg4[%c0_54, %c7_55, %c0_56, %c0_57] : memref<1x24x128x64xf32, #tpu.memory_space<vmem>>, vector<1x1x128x64xf32>
    %48 = vector.shape_cast %47 : vector<1x1x128x64xf32> to vector<128x64xf32>
    %49 = vector.shape_cast %46 : vector<128x64xf32> to vector<1x1x128x64xf32>
    tpu.vector_store %arg4[%c0_54, %c7_55, %c0_56, %c0_57], %49 {strides = array<i32>} : memref<1x24x128x64xf32, #tpu.memory_space<vmem>>, vector<1x1x128x64xf32>,
    %c8 = arith.constant 8 : index
    %c0_58 = arith.constant 0 : index
    %c0_59 = arith.constant 0 : index
    %50 = vector.load %arg3[%c8, %c0_58, %c0_59] : memref<24x128x64xf32, #tpu.memory_space<vmem>>, vector<1x128x64xf32>
    %51 = vector.shape_cast %50 : vector<1x128x64xf32> to vector<128x64xf32>
    %cst_60 = arith.constant dense<0.000000e+00> : vector<128x64xf32>
    %52 = tpu.matmul %1, %51, %cst_60 {dimension_numbers = #tpu.dot_dimension_numbers<[1], [0], [0], [1], [0, 0, 1, 1], [], []>} : vector<128x128xf32>, vector<128x64xf32>, vector<128x64xf32> -> vector<128x64xf32>
    %c0_61 = arith.constant 0 : index
    %c8_62 = arith.constant 8 : index
    %c0_63 = arith.constant 0 : index
    %c0_64 = arith.constant 0 : index
    %53 = vector.load %arg4[%c0_61, %c8_62, %c0_63, %c0_64] : memref<1x24x128x64xf32, #tpu.memory_space<vmem>>, vector<1x1x128x64xf32>
    %54 = vector.shape_cast %53 : vector<1x1x128x64xf32> to vector<128x64xf32>
    %55 = vector.shape_cast %52 : vector<128x64xf32> to vector<1x1x128x64xf32>
    tpu.vector_store %arg4[%c0_61, %c8_62, %c0_63, %c0_64], %55 {strides = array<i32>} : memref<1x24x128x64xf32, #tpu.memory_space<vmem>>, vector<1x1x128x64xf32>,
    %c9 = arith.constant 9 : index
    %c0_65 = arith.constant 0 : index
    %c0_66 = arith.constant 0 : index
    %56 = vector.load %arg3[%c9, %c0_65, %c0_66] : memref<24x128x64xf32, #tpu.memory_space<vmem>>, vector<1x128x64xf32>
    %57 = vector.shape_cast %56 : vector<1x128x64xf32> to vector<128x64xf32>
    %cst_67 = arith.constant dense<0.000000e+00> : vector<128x64xf32>
    %58 = tpu.matmul %1, %57, %cst_67 {dimension_numbers = #tpu.dot_dimension_numbers<[1], [0], [0], [1], [0, 0, 1, 1], [], []>} : vector<128x128xf32>, vector<128x64xf32>, vector<128x64xf32> -> vector<128x64xf32>
    %c0_68 = arith.constant 0 : index
    %c9_69 = arith.constant 9 : index
    %c0_70 = arith.constant 0 : index
    %c0_71 = arith.constant 0 : index
    %59 = vector.load %arg4[%c0_68, %c9_69, %c0_70, %c0_71] : memref<1x24x128x64xf32, #tpu.memory_space<vmem>>, vector<1x1x128x64xf32>
    %60 = vector.shape_cast %59 : vector<1x1x128x64xf32> to vector<128x64xf32>
    %61 = vector.shape_cast %58 : vector<128x64xf32> to vector<1x1x128x64xf32>
    tpu.vector_store %arg4[%c0_68, %c9_69, %c0_70, %c0_71], %61 {strides = array<i32>} : memref<1x24x128x64xf32, #tpu.memory_space<vmem>>, vector<1x1x128x64xf32>,
    %c10 = arith.constant 10 : index
    %c0_72 = arith.constant 0 : index
    %c0_73 = arith.constant 0 : index
    %62 = vector.load %arg3[%c10, %c0_72, %c0_73] : memref<24x128x64xf32, #tpu.memory_space<vmem>>, vector<1x128x64xf32>
    %63 = vector.shape_cast %62 : vector<1x128x64xf32> to vector<128x64xf32>
    %cst_74 = arith.constant dense<0.000000e+00> : vector<128x64xf32>
    %64 = tpu.matmul %1, %63, %cst_74 {dimension_numbers = #tpu.dot_dimension_numbers<[1], [0], [0], [1], [0, 0, 1, 1], [], []>} : vector<128x128xf32>, vector<128x64xf32>, vector<128x64xf32> -> vector<128x64xf32>
    %c0_75 = arith.constant 0 : index
    %c10_76 = arith.constant 10 : index
    %c0_77 = arith.constant 0 : index
    %c0_78 = arith.constant 0 : index
    %65 = vector.load %arg4[%c0_75, %c10_76, %c0_77, %c0_78] : memref<1x24x128x64xf32, #tpu.memory_space<vmem>>, vector<1x1x128x64xf32>
    %66 = vector.shape_cast %65 : vector<1x1x128x64xf32> to vector<128x64xf32>
    %67 = vector.shape_cast %64 : vector<128x64xf32> to vector<1x1x128x64xf32>
    tpu.vector_store %arg4[%c0_75, %c10_76, %c0_77, %c0_78], %67 {strides = array<i32>} : memref<1x24x128x64xf32, #tpu.memory_space<vmem>>, vector<1x1x128x64xf32>,
    %c11 = arith.constant 11 : index
    %c0_79 = arith.constant 0 : index
    %c0_80 = arith.constant 0 : index
    %68 = vector.load %arg3[%c11, %c0_79, %c0_80] : memref<24x128x64xf32, #tpu.memory_space<vmem>>, vector<1x128x64xf32>
    %69 = vector.shape_cast %68 : vector<1x128x64xf32> to vector<128x64xf32>
    %cst_81 = arith.constant dense<0.000000e+00> : vector<128x64xf32>
    %70 = tpu.matmul %1, %69, %cst_81 {dimension_numbers = #tpu.dot_dimension_numbers<[1], [0], [0], [1], [0, 0, 1, 1], [], []>} : vector<128x128xf32>, vector<128x64xf32>, vector<128x64xf32> -> vector<128x64xf32>
    %c0_82 = arith.constant 0 : index
    %c11_83 = arith.constant 11 : index
    %c0_84 = arith.constant 0 : index
    %c0_85 = arith.constant 0 : index
    %71 = vector.load %arg4[%c0_82, %c11_83, %c0_84, %c0_85] : memref<1x24x128x64xf32, #tpu.memory_space<vmem>>, vector<1x1x128x64xf32>
    %72 = vector.shape_cast %71 : vector<1x1x128x64xf32> to vector<128x64xf32>
    %73 = vector.shape_cast %70 : vector<128x64xf32> to vector<1x1x128x64xf32>
    tpu.vector_store %arg4[%c0_82, %c11_83, %c0_84, %c0_85], %73 {strides = array<i32>} : memref<1x24x128x64xf32, #tpu.memory_space<vmem>>, vector<1x1x128x64xf32>,
    %c12 = arith.constant 12 : index
    %c0_86 = arith.constant 0 : index
    %c0_87 = arith.constant 0 : index
    %74 = vector.load %arg3[%c12, %c0_86, %c0_87] : memref<24x128x64xf32, #tpu.memory_space<vmem>>, vector<1x128x64xf32>
    %75 = vector.shape_cast %74 : vector<1x128x64xf32> to vector<128x64xf32>
    %cst_88 = arith.constant dense<0.000000e+00> : vector<128x64xf32>
    %76 = tpu.matmul %1, %75, %cst_88 {dimension_numbers = #tpu.dot_dimension_numbers<[1], [0], [0], [1], [0, 0, 1, 1], [], []>} : vector<128x128xf32>, vector<128x64xf32>, vector<128x64xf32> -> vector<128x64xf32>
    %c0_89 = arith.constant 0 : index
    %c12_90 = arith.constant 12 : index
    %c0_91 = arith.constant 0 : index
    %c0_92 = arith.constant 0 : index
    %77 = vector.load %arg4[%c0_89, %c12_90, %c0_91, %c0_92] : memref<1x24x128x64xf32, #tpu.memory_space<vmem>>, vector<1x1x128x64xf32>
    %78 = vector.shape_cast %77 : vector<1x1x128x64xf32> to vector<128x64xf32>
    %79 = vector.shape_cast %76 : vector<128x64xf32> to vector<1x1x128x64xf32>
    tpu.vector_store %arg4[%c0_89, %c12_90, %c0_91, %c0_92], %79 {strides = array<i32>} : memref<1x24x128x64xf32, #tpu.memory_space<vmem>>, vector<1x1x128x64xf32>,
    %c13 = arith.constant 13 : index
    %c0_93 = arith.constant 0 : index
    %c0_94 = arith.constant 0 : index
    %80 = vector.load %arg3[%c13, %c0_93, %c0_94] : memref<24x128x64xf32, #tpu.memory_space<vmem>>, vector<1x128x64xf32>
    %81 = vector.shape_cast %80 : vector<1x128x64xf32> to vector<128x64xf32>
    %cst_95 = arith.constant dense<0.000000e+00> : vector<128x64xf32>
    %82 = tpu.matmul %1, %81, %cst_95 {dimension_numbers = #tpu.dot_dimension_numbers<[1], [0], [0], [1], [0, 0, 1, 1], [], []>} : vector<128x128xf32>, vector<128x64xf32>, vector<128x64xf32> -> vector<128x64xf32>
    %c0_96 = arith.constant 0 : index
    %c13_97 = arith.constant 13 : index
    %c0_98 = arith.constant 0 : index
    %c0_99 = arith.constant 0 : index
    %83 = vector.load %arg4[%c0_96, %c13_97, %c0_98, %c0_99] : memref<1x24x128x64xf32, #tpu.memory_space<vmem>>, vector<1x1x128x64xf32>
    %84 = vector.shape_cast %83 : vector<1x1x128x64xf32> to vector<128x64xf32>
    %85 = vector.shape_cast %82 : vector<128x64xf32> to vector<1x1x128x64xf32>
    tpu.vector_store %arg4[%c0_96, %c13_97, %c0_98, %c0_99], %85 {strides = array<i32>} : memref<1x24x128x64xf32, #tpu.memory_space<vmem>>, vector<1x1x128x64xf32>,
    %c14 = arith.constant 14 : index
    %c0_100 = arith.constant 0 : index
    %c0_101 = arith.constant 0 : index
    %86 = vector.load %arg3[%c14, %c0_100, %c0_101] : memref<24x128x64xf32, #tpu.memory_space<vmem>>, vector<1x128x64xf32>
    %87 = vector.shape_cast %86 : vector<1x128x64xf32> to vector<128x64xf32>
    %cst_102 = arith.constant dense<0.000000e+00> : vector<128x64xf32>
    %88 = tpu.matmul %1, %87, %cst_102 {dimension_numbers = #tpu.dot_dimension_numbers<[1], [0], [0], [1], [0, 0, 1, 1], [], []>} : vector<128x128xf32>, vector<128x64xf32>, vector<128x64xf32> -> vector<128x64xf32>
    %c0_103 = arith.constant 0 : index
    %c14_104 = arith.constant 14 : index
    %c0_105 = arith.constant 0 : index
    %c0_106 = arith.constant 0 : index
    %89 = vector.load %arg4[%c0_103, %c14_104, %c0_105, %c0_106] : memref<1x24x128x64xf32, #tpu.memory_space<vmem>>, vector<1x1x128x64xf32>
    %90 = vector.shape_cast %89 : vector<1x1x128x64xf32> to vector<128x64xf32>
    %91 = vector.shape_cast %88 : vector<128x64xf32> to vector<1x1x128x64xf32>
    tpu.vector_store %arg4[%c0_103, %c14_104, %c0_105, %c0_106], %91 {strides = array<i32>} : memref<1x24x128x64xf32, #tpu.memory_space<vmem>>, vector<1x1x128x64xf32>,
    %c15 = arith.constant 15 : index
    %c0_107 = arith.constant 0 : index
    %c0_108 = arith.constant 0 : index
    %92 = vector.load %arg3[%c15, %c0_107, %c0_108] : memref<24x128x64xf32, #tpu.memory_space<vmem>>, vector<1x128x64xf32>
    %93 = vector.shape_cast %92 : vector<1x128x64xf32> to vector<128x64xf32>
    %cst_109 = arith.constant dense<0.000000e+00> : vector<128x64xf32>
    %94 = tpu.matmul %1, %93, %cst_109 {dimension_numbers = #tpu.dot_dimension_numbers<[1], [0], [0], [1], [0, 0, 1, 1], [], []>} : vector<128x128xf32>, vector<128x64xf32>, vector<128x64xf32> -> vector<128x64xf32>
    %c0_110 = arith.constant 0 : index
    %c15_111 = arith.constant 15 : index
    %c0_112 = arith.constant 0 : index
    %c0_113 = arith.constant 0 : index
    %95 = vector.load %arg4[%c0_110, %c15_111, %c0_112, %c0_113] : memref<1x24x128x64xf32, #tpu.memory_space<vmem>>, vector<1x1x128x64xf32>
    %96 = vector.shape_cast %95 : vector<1x1x128x64xf32> to vector<128x64xf32>
    %97 = vector.shape_cast %94 : vector<128x64xf32> to vector<1x1x128x64xf32>
    tpu.vector_store %arg4[%c0_110, %c15_111, %c0_112, %c0_113], %97 {strides = array<i32>} : memref<1x24x128x64xf32, #tpu.memory_space<vmem>>, vector<1x1x128x64xf32>,
    %c16 = arith.constant 16 : index
    %c0_114 = arith.constant 0 : index
    %c0_115 = arith.constant 0 : index
    %98 = vector.load %arg3[%c16, %c0_114, %c0_115] : memref<24x128x64xf32, #tpu.memory_space<vmem>>, vector<1x128x64xf32>
    %99 = vector.shape_cast %98 : vector<1x128x64xf32> to vector<128x64xf32>
    %cst_116 = arith.constant dense<0.000000e+00> : vector<128x64xf32>
    %100 = tpu.matmul %1, %99, %cst_116 {dimension_numbers = #tpu.dot_dimension_numbers<[1], [0], [0], [1], [0, 0, 1, 1], [], []>} : vector<128x128xf32>, vector<128x64xf32>, vector<128x64xf32> -> vector<128x64xf32>
    %c0_117 = arith.constant 0 : index
    %c16_118 = arith.constant 16 : index
    %c0_119 = arith.constant 0 : index
    %c0_120 = arith.constant 0 : index
    %101 = vector.load %arg4[%c0_117, %c16_118, %c0_119, %c0_120] : memref<1x24x128x64xf32, #tpu.memory_space<vmem>>, vector<1x1x128x64xf32>
    %102 = vector.shape_cast %101 : vector<1x1x128x64xf32> to vector<128x64xf32>
    %103 = vector.shape_cast %100 : vector<128x64xf32> to vector<1x1x128x64xf32>
    tpu.vector_store %arg4[%c0_117, %c16_118, %c0_119, %c0_120], %103 {strides = array<i32>} : memref<1x24x128x64xf32, #tpu.memory_space<vmem>>, vector<1x1x128x64xf32>,
    %c17 = arith.constant 17 : index
    %c0_121 = arith.constant 0 : index
    %c0_122 = arith.constant 0 : index
    %104 = vector.load %arg3[%c17, %c0_121, %c0_122] : memref<24x128x64xf32, #tpu.memory_space<vmem>>, vector<1x128x64xf32>
    %105 = vector.shape_cast %104 : vector<1x128x64xf32> to vector<128x64xf32>
    %cst_123 = arith.constant dense<0.000000e+00> : vector<128x64xf32>
    %106 = tpu.matmul %1, %105, %cst_123 {dimension_numbers = #tpu.dot_dimension_numbers<[1], [0], [0], [1], [0, 0, 1, 1], [], []>} : vector<128x128xf32>, vector<128x64xf32>, vector<128x64xf32> -> vector<128x64xf32>
    %c0_124 = arith.constant 0 : index
    %c17_125 = arith.constant 17 : index
    %c0_126 = arith.constant 0 : index
    %c0_127 = arith.constant 0 : index
    %107 = vector.load %arg4[%c0_124, %c17_125, %c0_126, %c0_127] : memref<1x24x128x64xf32, #tpu.memory_space<vmem>>, vector<1x1x128x64xf32>
    %108 = vector.shape_cast %107 : vector<1x1x128x64xf32> to vector<128x64xf32>
    %109 = vector.shape_cast %106 : vector<128x64xf32> to vector<1x1x128x64xf32>
    tpu.vector_store %arg4[%c0_124, %c17_125, %c0_126, %c0_127], %109 {strides = array<i32>} : memref<1x24x128x64xf32, #tpu.memory_space<vmem>>, vector<1x1x128x64xf32>,
    %c18 = arith.constant 18 : index
    %c0_128 = arith.constant 0 : index
    %c0_129 = arith.constant 0 : index
    %110 = vector.load %arg3[%c18, %c0_128, %c0_129] : memref<24x128x64xf32, #tpu.memory_space<vmem>>, vector<1x128x64xf32>
    %111 = vector.shape_cast %110 : vector<1x128x64xf32> to vector<128x64xf32>
    %cst_130 = arith.constant dense<0.000000e+00> : vector<128x64xf32>
    %112 = tpu.matmul %1, %111, %cst_130 {dimension_numbers = #tpu.dot_dimension_numbers<[1], [0], [0], [1], [0, 0, 1, 1], [], []>} : vector<128x128xf32>, vector<128x64xf32>, vector<128x64xf32> -> vector<128x64xf32>
    %c0_131 = arith.constant 0 : index
    %c18_132 = arith.constant 18 : index
    %c0_133 = arith.constant 0 : index
    %c0_134 = arith.constant 0 : index
    %113 = vector.load %arg4[%c0_131, %c18_132, %c0_133, %c0_134] : memref<1x24x128x64xf32, #tpu.memory_space<vmem>>, vector<1x1x128x64xf32>
    %114 = vector.shape_cast %113 : vector<1x1x128x64xf32> to vector<128x64xf32>
    %115 = vector.shape_cast %112 : vector<128x64xf32> to vector<1x1x128x64xf32>
    tpu.vector_store %arg4[%c0_131, %c18_132, %c0_133, %c0_134], %115 {strides = array<i32>} : memref<1x24x128x64xf32, #tpu.memory_space<vmem>>, vector<1x1x128x64xf32>,
    %c19 = arith.constant 19 : index
    %c0_135 = arith.constant 0 : index
    %c0_136 = arith.constant 0 : index
    %116 = vector.load %arg3[%c19, %c0_135, %c0_136] : memref<24x128x64xf32, #tpu.memory_space<vmem>>, vector<1x128x64xf32>
    %117 = vector.shape_cast %116 : vector<1x128x64xf32> to vector<128x64xf32>
    %cst_137 = arith.constant dense<0.000000e+00> : vector<128x64xf32>
    %118 = tpu.matmul %1, %117, %cst_137 {dimension_numbers = #tpu.dot_dimension_numbers<[1], [0], [0], [1], [0, 0, 1, 1], [], []>} : vector<128x128xf32>, vector<128x64xf32>, vector<128x64xf32> -> vector<128x64xf32>
    %c0_138 = arith.constant 0 : index
    %c19_139 = arith.constant 19 : index
    %c0_140 = arith.constant 0 : index
    %c0_141 = arith.constant 0 : index
    %119 = vector.load %arg4[%c0_138, %c19_139, %c0_140, %c0_141] : memref<1x24x128x64xf32, #tpu.memory_space<vmem>>, vector<1x1x128x64xf32>
    %120 = vector.shape_cast %119 : vector<1x1x128x64xf32> to vector<128x64xf32>
    %121 = vector.shape_cast %118 : vector<128x64xf32> to vector<1x1x128x64xf32>
    tpu.vector_store %arg4[%c0_138, %c19_139, %c0_140, %c0_141], %121 {strides = array<i32>} : memref<1x24x128x64xf32, #tpu.memory_space<vmem>>, vector<1x1x128x64xf32>,
    %c20 = arith.constant 20 : index
    %c0_142 = arith.constant 0 : index
    %c0_143 = arith.constant 0 : index
    %122 = vector.load %arg3[%c20, %c0_142, %c0_143] : memref<24x128x64xf32, #tpu.memory_space<vmem>>, vector<1x128x64xf32>
    %123 = vector.shape_cast %122 : vector<1x128x64xf32> to vector<128x64xf32>
    %cst_144 = arith.constant dense<0.000000e+00> : vector<128x64xf32>
    %124 = tpu.matmul %1, %123, %cst_144 {dimension_numbers = #tpu.dot_dimension_numbers<[1], [0], [0], [1], [0, 0, 1, 1], [], []>} : vector<128x128xf32>, vector<128x64xf32>, vector<128x64xf32> -> vector<128x64xf32>
    %c0_145 = arith.constant 0 : index
    %c20_146 = arith.constant 20 : index
    %c0_147 = arith.constant 0 : index
    %c0_148 = arith.constant 0 : index
    %125 = vector.load %arg4[%c0_145, %c20_146, %c0_147, %c0_148] : memref<1x24x128x64xf32, #tpu.memory_space<vmem>>, vector<1x1x128x64xf32>
    %126 = vector.shape_cast %125 : vector<1x1x128x64xf32> to vector<128x64xf32>
    %127 = vector.shape_cast %124 : vector<128x64xf32> to vector<1x1x128x64xf32>
    tpu.vector_store %arg4[%c0_145, %c20_146, %c0_147, %c0_148], %127 {strides = array<i32>} : memref<1x24x128x64xf32, #tpu.memory_space<vmem>>, vector<1x1x128x64xf32>,
    %c21 = arith.constant 21 : index
    %c0_149 = arith.constant 0 : index
    %c0_150 = arith.constant 0 : index
    %128 = vector.load %arg3[%c21, %c0_149, %c0_150] : memref<24x128x64xf32, #tpu.memory_space<vmem>>, vector<1x128x64xf32>
    %129 = vector.shape_cast %128 : vector<1x128x64xf32> to vector<128x64xf32>
    %cst_151 = arith.constant dense<0.000000e+00> : vector<128x64xf32>
    %130 = tpu.matmul %1, %129, %cst_151 {dimension_numbers = #tpu.dot_dimension_numbers<[1], [0], [0], [1], [0, 0, 1, 1], [], []>} : vector<128x128xf32>, vector<128x64xf32>, vector<128x64xf32> -> vector<128x64xf32>
    %c0_152 = arith.constant 0 : index
    %c21_153 = arith.constant 21 : index
    %c0_154 = arith.constant 0 : index
    %c0_155 = arith.constant 0 : index
    %131 = vector.load %arg4[%c0_152, %c21_153, %c0_154, %c0_155] : memref<1x24x128x64xf32, #tpu.memory_space<vmem>>, vector<1x1x128x64xf32>
    %132 = vector.shape_cast %131 : vector<1x1x128x64xf32> to vector<128x64xf32>
    %133 = vector.shape_cast %130 : vector<128x64xf32> to vector<1x1x128x64xf32>
    tpu.vector_store %arg4[%c0_152, %c21_153, %c0_154, %c0_155], %133 {strides = array<i32>} : memref<1x24x128x64xf32, #tpu.memory_space<vmem>>, vector<1x1x128x64xf32>,
    %c22 = arith.constant 22 : index
    %c0_156 = arith.constant 0 : index
    %c0_157 = arith.constant 0 : index
    %134 = vector.load %arg3[%c22, %c0_156, %c0_157] : memref<24x128x64xf32, #tpu.memory_space<vmem>>, vector<1x128x64xf32>
    %135 = vector.shape_cast %134 : vector<1x128x64xf32> to vector<128x64xf32>
    %cst_158 = arith.constant dense<0.000000e+00> : vector<128x64xf32>
    %136 = tpu.matmul %1, %135, %cst_158 {dimension_numbers = #tpu.dot_dimension_numbers<[1], [0], [0], [1], [0, 0, 1, 1], [], []>} : vector<128x128xf32>, vector<128x64xf32>, vector<128x64xf32> -> vector<128x64xf32>
    %c0_159 = arith.constant 0 : index
    %c22_160 = arith.constant 22 : index
    %c0_161 = arith.constant 0 : index
    %c0_162 = arith.constant 0 : index
    %137 = vector.load %arg4[%c0_159, %c22_160, %c0_161, %c0_162] : memref<1x24x128x64xf32, #tpu.memory_space<vmem>>, vector<1x1x128x64xf32>
    %138 = vector.shape_cast %137 : vector<1x1x128x64xf32> to vector<128x64xf32>
    %139 = vector.shape_cast %136 : vector<128x64xf32> to vector<1x1x128x64xf32>
    tpu.vector_store %arg4[%c0_159, %c22_160, %c0_161, %c0_162], %139 {strides = array<i32>} : memref<1x24x128x64xf32, #tpu.memory_space<vmem>>, vector<1x1x128x64xf32>,
    %c23 = arith.constant 23 : index
    %c0_163 = arith.constant 0 : index
    %c0_164 = arith.constant 0 : index
    %140 = vector.load %arg3[%c23, %c0_163, %c0_164] : memref<24x128x64xf32, #tpu.memory_space<vmem>>, vector<1x128x64xf32>
    %141 = vector.shape_cast %140 : vector<1x128x64xf32> to vector<128x64xf32>
    %cst_165 = arith.constant dense<0.000000e+00> : vector<128x64xf32>
    %142 = tpu.matmul %1, %141, %cst_165 {dimension_numbers = #tpu.dot_dimension_numbers<[1], [0], [0], [1], [0, 0, 1, 1], [], []>} : vector<128x128xf32>, vector<128x64xf32>, vector<128x64xf32> -> vector<128x64xf32>
    %c0_166 = arith.constant 0 : index
    %c23_167 = arith.constant 23 : index
    %c0_168 = arith.constant 0 : index
    %c0_169 = arith.constant 0 : index
    %143 = vector.load %arg4[%c0_166, %c23_167, %c0_168, %c0_169] : memref<1x24x128x64xf32, #tpu.memory_space<vmem>>, vector<1x1x128x64xf32>
    %144 = vector.shape_cast %143 : vector<1x1x128x64xf32> to vector<128x64xf32>
    %145 = vector.shape_cast %142 : vector<128x64xf32> to vector<1x1x128x64xf32>
    tpu.vector_store %arg4[%c0_166, %c23_167, %c0_168, %c0_169], %145 {strides = array<i32>} : memref<1x24x128x64xf32, #tpu.memory_space<vmem>>, vector<1x1x128x64xf32>,
    return
  }
  func.func @transform_0(%arg0: i32, %arg1: i32) -> (i32, i32, i32) {
    %c0_i32 = arith.constant 0 : i32
    %c0_i32_0 = arith.constant 0 : i32
    return %arg0, %arg1, %c0_i32 : i32, i32, i32
  }
  func.func @transform_1(%arg0: i32, %arg1: i32) -> (i32, i32, i32) {
    %c0_i32 = arith.constant 0 : i32
    %c0_i32_0 = arith.constant 0 : i32
    %c0_i32_1 = arith.constant 0 : i32
    %c0_i32_2 = arith.constant 0 : i32
    return %c0_i32, %c0_i32_0, %c0_i32_1 : i32, i32, i32
  }
  func.func @transform_2(%arg0: i32, %arg1: i32) -> (i32, i32, i32, i32) {
    %c0_i32 = arith.constant 0 : i32
    %c0_i32_0 = arith.constant 0 : i32
    %c0_i32_1 = arith.constant 0 : i32
    return %arg0, %c0_i32, %arg1, %c0_i32_0 : i32, i32, i32, i32
  }
}

module attributes {stable_mosaic.version = 11 : i64} {
  func.func @_attn_kernel(%arg0: i32, %arg1: i32, %arg2: i32, %arg3: i32, %arg4: memref<1x1x128x64xf32, #tpu.memory_space<vmem>>, %arg5: memref<1x1x128x64xf32, #tpu.memory_space<vmem>>, %arg6: memref<1x1x128x64xf32, #tpu.memory_space<vmem>>, %arg7: memref<1x64x128xf32, #tpu.memory_space<vmem>>, %arg8: memref<1x128xf32, #tpu.memory_space<vmem>>, %arg9: memref<1x128x128xf32, #tpu.memory_space<vmem>>, %arg10: memref<128x1xf32, #tpu.memory_space<vmem>>, %arg11: memref<128x1xf32, #tpu.memory_space<vmem>>, %arg12: memref<128x64xf32, #tpu.memory_space<vmem>>, %arg13: memref<128x128xf32, #tpu.memory_space<vmem>>) attributes {dimension_semantics = [#tpu.dimension_semantics<parallel>, #tpu.dimension_semantics<parallel>, #tpu.dimension_semantics<arbitrary>, #tpu.dimension_semantics<arbitrary>], iteration_bounds = array<i64: 2, 2, 8, 2>, scalar_prefetch = 0 : i64, scratch_operands = 4 : i64, tpu.core_type = #tpu.core_type<tc>, window_params = [{transform_indices = @transform_0, window_bounds = array<i64: 1, 1, 128, 64>}, {transform_indices = @transform_1, window_bounds = array<i64: 1, 1, 128, 64>}, {transform_indices = @transform_2, window_bounds = array<i64: 1, 1, 128, 64>}, {transform_indices = @transform_3, window_bounds = array<i64: 1, 64, 128>}, {pipeline_mode = #tpu.pipeline_mode<synchronous>, transform_indices = @transform_4, window_bounds = array<i64: 1, 128>}, {transform_indices = @transform_5, window_bounds = array<i64: 1, 128, 128>}]} {
    %c0_i32 = arith.constant 0 : i32
    %0 = arith.cmpi eq, %arg2, %c0_i32 : i32
    %c0_i32_0 = arith.constant 0 : i32
    %1 = arith.cmpi eq, %arg3, %c0_i32_0 : i32
    %2 = arith.andi %0, %1 : i1
    %3 = arith.extui %2 : i1 to i32
    %c0_i32_1 = arith.constant 0 : i32
    %4 = arith.cmpi ne, %3, %c0_i32_1 : i32
    scf.if %4 {
      %cst_34 = arith.constant 0.000000e+00 : f32
      %47 = vector.broadcast %cst_34 : f32 to vector<128x128xf32>
      %c0_35 = arith.constant 0 : index
      %c0_36 = arith.constant 0 : index
      %48 = vector.load %arg13[%c0_35, %c0_36] : memref<128x128xf32, #tpu.memory_space<vmem>>, vector<128x128xf32>
      tpu.vector_store %arg13[%c0_35, %c0_36], %47 {strides = array<i32>} : memref<128x128xf32, #tpu.memory_space<vmem>>, vector<128x128xf32>,
    } else {
    }
    %c0_i32_2 = arith.constant 0 : i32
    %5 = arith.cmpi eq, %arg3, %c0_i32_2 : i32
    %6 = arith.extui %5 : i1 to i32
    %c0_i32_3 = arith.constant 0 : i32
    %7 = arith.cmpi ne, %6, %c0_i32_3 : i32
    scf.if %7 {
      %cst_34 = arith.constant 0xFF800000 : f32
      %47 = vector.broadcast %cst_34 : f32 to vector<128x1xf32>
      %c0_35 = arith.constant 0 : index
      %c0_36 = arith.constant 0 : index
      %48 = vector.load %arg10[%c0_35, %c0_36] : memref<128x1xf32, #tpu.memory_space<vmem>>, vector<128x1xf32>
      tpu.vector_store %arg10[%c0_35, %c0_36], %47 {strides = array<i32>} : memref<128x1xf32, #tpu.memory_space<vmem>>, vector<128x1xf32>,
      %cst_37 = arith.constant 0.000000e+00 : f32
      %49 = vector.broadcast %cst_37 : f32 to vector<128x1xf32>
      %c0_38 = arith.constant 0 : index
      %c0_39 = arith.constant 0 : index
      %50 = vector.load %arg11[%c0_38, %c0_39] : memref<128x1xf32, #tpu.memory_space<vmem>>, vector<128x1xf32>
      tpu.vector_store %arg11[%c0_38, %c0_39], %49 {strides = array<i32>} : memref<128x1xf32, #tpu.memory_space<vmem>>, vector<128x1xf32>,
      %cst_40 = arith.constant 0.000000e+00 : f32
      %51 = vector.broadcast %cst_40 : f32 to vector<128x64xf32>
      %c0_41 = arith.constant 0 : index
      %c0_42 = arith.constant 0 : index
      %52 = vector.load %arg12[%c0_41, %c0_42] : memref<128x64xf32, #tpu.memory_space<vmem>>, vector<128x64xf32>
      tpu.vector_store %arg12[%c0_41, %c0_42], %51 {strides = array<i32>} : memref<128x64xf32, #tpu.memory_space<vmem>>, vector<128x64xf32>,
    } else {
    }
    %c0 = arith.constant 0 : index
    %c0_4 = arith.constant 0 : index
    %c0_5 = arith.constant 0 : index
    %c0_6 = arith.constant 0 : index
    %8 = vector.load %arg4[%c0, %c0_4, %c0_5, %c0_6] : memref<1x1x128x64xf32, #tpu.memory_space<vmem>>, vector<1x1x128x64xf32>
    %9 = vector.shape_cast %8 : vector<1x1x128x64xf32> to vector<128x64xf32>
    %cst = arith.constant 1.250000e-01 : f32
    %10 = vector.broadcast %cst : f32 to vector<128x64xf32>
    %11 = arith.mulf %9, %10 : vector<128x64xf32>
    %c0_7 = arith.constant 0 : index
    %c0_8 = arith.constant 0 : index
    %c0_9 = arith.constant 0 : index
    %c0_10 = arith.constant 0 : index
    %12 = vector.load %arg5[%c0_7, %c0_8, %c0_9, %c0_10] : memref<1x1x128x64xf32, #tpu.memory_space<vmem>>, vector<1x1x128x64xf32>
    %13 = vector.shape_cast %12 : vector<1x1x128x64xf32> to vector<128x64xf32>
    %c0_11 = arith.constant 0 : index
    %c0_12 = arith.constant 0 : index
    %c0_13 = arith.constant 0 : index
    %c0_14 = arith.constant 0 : index
    %14 = vector.load %arg6[%c0_11, %c0_12, %c0_13, %c0_14] : memref<1x1x128x64xf32, #tpu.memory_space<vmem>>, vector<1x1x128x64xf32>
    %15 = vector.shape_cast %14 : vector<1x1x128x64xf32> to vector<128x64xf32>
    %cst_15 = arith.constant dense<0.000000e+00> : vector<128x128xf32>
    %16 = tpu.matmul %11, %13, %cst_15 {dimension_numbers = #tpu.dot_dimension_numbers<[1], [1], [0], [0], [0, 0, 1, 0], [], []>} : vector<128x64xf32>, vector<128x64xf32>, vector<128x128xf32> -> vector<128x128xf32>
    %c0_16 = arith.constant 0 : index
    %c0_17 = arith.constant 0 : index
    %17 = vector.load %arg10[%c0_16, %c0_17] : memref<128x1xf32, #tpu.memory_space<vmem>>, vector<128x1xf32>
    %cst_18 = arith.constant dense<0xFF800000> : vector<128xf32>
    %18 = vector.multi_reduction <maximumf>, %16, %cst_18 [1] : vector<128x128xf32> to vector<128xf32>
    %19 = vector.shape_cast %18 : vector<128xf32> to vector<128x1xf32>
    %20 = arith.maximumf %17, %19 : vector<128x1xf32>
    %21 = arith.subf %17, %20 : vector<128x1xf32>
    %22 = math.exp %21 : vector<128x1xf32>
    %23 = vector.broadcast %20 : vector<128x1xf32> to vector<128x128xf32>
    %24 = arith.subf %16, %23 : vector<128x128xf32>
    %25 = math.exp %24 : vector<128x128xf32>
    %c0_19 = arith.constant 0 : index
    %c0_20 = arith.constant 0 : index
    %26 = vector.load %arg11[%c0_19, %c0_20] : memref<128x1xf32, #tpu.memory_space<vmem>>, vector<128x1xf32>
    %27 = arith.mulf %22, %26 : vector<128x1xf32>
    %cst_21 = arith.constant dense<0.000000e+00> : vector<128xf32>
    %28 = vector.multi_reduction <add>, %25, %cst_21 [1] : vector<128x128xf32> to vector<128xf32>
    %29 = vector.shape_cast %28 : vector<128xf32> to vector<128x1xf32>
    %30 = arith.addf %27, %29 : vector<128x1xf32>
    %c0_22 = arith.constant 0 : index
    %c0_23 = arith.constant 0 : index
    %31 = vector.load %arg11[%c0_22, %c0_23] : memref<128x1xf32, #tpu.memory_space<vmem>>, vector<128x1xf32>
    tpu.vector_store %arg11[%c0_22, %c0_23], %30 {strides = array<i32>} : memref<128x1xf32, #tpu.memory_space<vmem>>, vector<128x1xf32>,
    %c0_24 = arith.constant 0 : index
    %c0_25 = arith.constant 0 : index
    %32 = vector.load %arg12[%c0_24, %c0_25] : memref<128x64xf32, #tpu.memory_space<vmem>>, vector<128x64xf32>
    %33 = vector.broadcast %22 : vector<128x1xf32> to vector<128x64xf32>
    %34 = arith.mulf %33, %32 : vector<128x64xf32>
    %cst_26 = arith.constant dense<0.000000e+00> : vector<128x64xf32>
    %35 = tpu.matmul %25, %15, %cst_26 {dimension_numbers = #tpu.dot_dimension_numbers<[1], [0], [0], [1], [0, 0, 1, 1], [], []>} : vector<128x128xf32>, vector<128x64xf32>, vector<128x64xf32> -> vector<128x64xf32>
    %36 = arith.addf %34, %35 : vector<128x64xf32>
    %c0_27 = arith.constant 0 : index
    %c0_28 = arith.constant 0 : index
    %37 = vector.load %arg12[%c0_27, %c0_28] : memref<128x64xf32, #tpu.memory_space<vmem>>, vector<128x64xf32>
    tpu.vector_store %arg12[%c0_27, %c0_28], %36 {strides = array<i32>} : memref<128x64xf32, #tpu.memory_space<vmem>>, vector<128x64xf32>,
    %c0_29 = arith.constant 0 : index
    %c0_30 = arith.constant 0 : index
    %38 = vector.load %arg10[%c0_29, %c0_30] : memref<128x1xf32, #tpu.memory_space<vmem>>, vector<128x1xf32>
    tpu.vector_store %arg10[%c0_29, %c0_30], %20 {strides = array<i32>} : memref<128x1xf32, #tpu.memory_space<vmem>>, vector<128x1xf32>,
    %c1_i32 = arith.constant 1 : i32
    %39 = arith.cmpi eq, %arg3, %c1_i32 : i32
    %40 = arith.extui %39 : i1 to i32
    %c0_i32_31 = arith.constant 0 : i32
    %41 = arith.cmpi ne, %40, %c0_i32_31 : i32
    scf.if %41 {
      %c0_34 = arith.constant 0 : index
      %c0_35 = arith.constant 0 : index
      %47 = vector.load %arg12[%c0_34, %c0_35] : memref<128x64xf32, #tpu.memory_space<vmem>>, vector<128x64xf32>
      %c0_36 = arith.constant 0 : index
      %c0_37 = arith.constant 0 : index
      %48 = vector.load %arg11[%c0_36, %c0_37] : memref<128x1xf32, #tpu.memory_space<vmem>>, vector<128x1xf32>
      %49 = vector.broadcast %48 : vector<128x1xf32> to vector<128x64xf32>
      %50 = arith.divf %47, %49 : vector<128x64xf32>
      %c0_38 = arith.constant 0 : index
      %c0_39 = arith.constant 0 : index
      %51 = vector.load %arg13[%c0_38, %c0_39] : memref<128x128xf32, #tpu.memory_space<vmem>>, vector<128x128xf32>
      %c0_40 = arith.constant 0 : index
      %c0_41 = arith.constant 0 : index
      %c0_42 = arith.constant 0 : index
      %52 = vector.load %arg7[%c0_40, %c0_41, %c0_42] : memref<1x64x128xf32, #tpu.memory_space<vmem>>, vector<1x64x128xf32>
      %53 = vector.shape_cast %52 : vector<1x64x128xf32> to vector<64x128xf32>
      %cst_43 = arith.constant dense<0.000000e+00> : vector<128x128xf32>
      %54 = tpu.matmul %50, %53, %cst_43 {dimension_numbers = #tpu.dot_dimension_numbers<[1], [0], [0], [1], [0, 0, 1, 1], [], []>} : vector<128x64xf32>, vector<64x128xf32>, vector<128x128xf32> -> vector<128x128xf32>
      %55 = arith.addf %51, %54 : vector<128x128xf32>
      %c0_44 = arith.constant 0 : index
      %c0_45 = arith.constant 0 : index
      %56 = vector.load %arg13[%c0_44, %c0_45] : memref<128x128xf32, #tpu.memory_space<vmem>>, vector<128x128xf32>
      tpu.vector_store %arg13[%c0_44, %c0_45], %55 {strides = array<i32>} : memref<128x128xf32, #tpu.memory_space<vmem>>, vector<128x128xf32>,
    } else {
    }
    %c7_i32 = arith.constant 7 : i32
    %42 = arith.cmpi eq, %arg2, %c7_i32 : i32
    %c1_i32_32 = arith.constant 1 : i32
    %43 = arith.cmpi eq, %arg3, %c1_i32_32 : i32
    %44 = arith.andi %42, %43 : i1
    %45 = arith.extui %44 : i1 to i32
    %c0_i32_33 = arith.constant 0 : i32
    %46 = arith.cmpi ne, %45, %c0_i32_33 : i32
    scf.if %46 {
      %c0_34 = arith.constant 0 : index
      %c0_35 = arith.constant 0 : index
      %47 = vector.load %arg13[%c0_34, %c0_35] : memref<128x128xf32, #tpu.memory_space<vmem>>, vector<128x128xf32>
      %c0_36 = arith.constant 0 : index
      %c0_37 = arith.constant 0 : index
      %48 = vector.load %arg8[%c0_36, %c0_37] : memref<1x128xf32, #tpu.memory_space<vmem>>, vector<1x128xf32>
      %49 = vector.broadcast %48 : vector<1x128xf32> to vector<128x128xf32>
      %50 = arith.addf %47, %49 : vector<128x128xf32>
      %c0_38 = arith.constant 0 : index
      %c0_39 = arith.constant 0 : index
      %c0_40 = arith.constant 0 : index
      %51 = vector.load %arg9[%c0_38, %c0_39, %c0_40] : memref<1x128x128xf32, #tpu.memory_space<vmem>>, vector<1x128x128xf32>
      %52 = vector.shape_cast %51 : vector<1x128x128xf32> to vector<128x128xf32>
      %53 = vector.shape_cast %50 : vector<128x128xf32> to vector<1x128x128xf32>
      tpu.vector_store %arg9[%c0_38, %c0_39, %c0_40], %53 {strides = array<i32>} : memref<1x128x128xf32, #tpu.memory_space<vmem>>, vector<1x128x128xf32>,
    } else {
    }
    return
  }
  func.func @transform_0(%arg0: i32, %arg1: i32, %arg2: i32, %arg3: i32) -> (i32, i32, i32, i32) {
    %c0_i32 = arith.constant 0 : i32
    %c0_i32_0 = arith.constant 0 : i32
    return %arg0, %arg2, %arg1, %c0_i32 : i32, i32, i32, i32
  }
  func.func @transform_1(%arg0: i32, %arg1: i32, %arg2: i32, %arg3: i32) -> (i32, i32, i32, i32) {
    %c8_i32 = arith.constant 8 : i32
    %0 = arith.addi %c8_i32, %arg2 : i32
    %c0_i32 = arith.constant 0 : i32
    %c0_i32_0 = arith.constant 0 : i32
    return %arg0, %0, %arg3, %c0_i32 : i32, i32, i32, i32
  }
  func.func @transform_2(%arg0: i32, %arg1: i32, %arg2: i32, %arg3: i32) -> (i32, i32, i32, i32) {
    %c16_i32 = arith.constant 16 : i32
    %0 = arith.addi %c16_i32, %arg2 : i32
    %c0_i32 = arith.constant 0 : i32
    %c0_i32_0 = arith.constant 0 : i32
    return %arg0, %0, %arg3, %c0_i32 : i32, i32, i32, i32
  }
  func.func @transform_3(%arg0: i32, %arg1: i32, %arg2: i32, %arg3: i32) -> (i32, i32, i32) {
    %c0_i32 = arith.constant 0 : i32
    %c0_i32_0 = arith.constant 0 : i32
    %c0_i32_1 = arith.constant 0 : i32
    return %arg2, %c0_i32, %c0_i32_0 : i32, i32, i32
  }
  func.func @transform_4(%arg0: i32, %arg1: i32, %arg2: i32, %arg3: i32) -> (i32, i32) {
    %c0_i32 = arith.constant 0 : i32
    %c0_i32_0 = arith.constant 0 : i32
    %c0_i32_1 = arith.constant 0 : i32
    return %c0_i32, %c0_i32_0 : i32, i32
  }
  func.func @transform_5(%arg0: i32, %arg1: i32, %arg2: i32, %arg3: i32) -> (i32, i32, i32) {
    %c0_i32 = arith.constant 0 : i32
    %c0_i32_0 = arith.constant 0 : i32
    return %arg0, %arg1, %c0_i32 : i32, i32, i32
  }
}

</mosaic_0001>

<bundles_post_ra>
// kernel: attention_forward.3
= control target key start
LH: loop header
LB: loop body
LE: loop exit
PB: predicated region body
PF: predicated region fallthrough
CT: control target
= control target key end

     0   :  { %s3622_s0 = inlined_call_operand.vmem [shape: f32[2,24,256,64], index: 0, kind: input, shape index: {}, may-alias: {0,1,2}]   ;;  %s3623_s1 = inlined_call_operand.vmem [shape: f32[2,24,256,64], index: 1, kind: input, shape index: {}, may-alias: {0,1,2}]   ;;  %s3624_s2 = inlined_call_operand.vmem [shape: f32[2,24,256,64], index: 2, kind: input, shape index: {}, may-alias: {0,1,2}]   ;;  %s3625_s3 = inlined_call_operand.vmem [shape: f32[8,64,128], index: 3, kind: input, shape index: {}]   ;;  %s3626_s4 = inlined_call_operand.vmem [shape: f32[1,128], index: 4, kind: input, shape index: {}]   ;;  %s3627_s5 = inlined_call_operand.hbm [shape: f32[2,256,128], index: 5, kind: output, shape index: {}]  }
   0x1   :  { %3641 = sst [smem:[#allocation22_spill]] %s3622_s0 }
   0x2   :  { %3642 = sst [smem:[#allocation23_spill]] %s3627_s5 }
   0x3   :  { %10 = vsyncpa [#allocation7], 0 }
   0x4   :  { %12 = vsyncpa [#allocation7 + $0x1], 0  ;;  %s2868_s18 = smov 0   ;;  %s2870_s19 = smov 0  }
   0x5   :  { %s2872_s20 = smov 0   ;;  %s2874_s21 = smov 0  }
   0x6   :  { %s2876_s22 = smov 0   ;;  %s2878_s23 = smov 0  }
   0x7   :  { %s2880_s24 = smov 0   ;;  %s2882_s25 = smov 0  }
   0x8   :  { %s2884_s26 = smov 0   ;;  %s2886_s27 = smov 0  }
   0x9   :  { %s2888_s28 = smov 0   ;;  %s2890_s29 = smov 0  }
   0xa LB: > { %3643 = sst [smem:[#allocation9_spill]] %s2784_s18  ;;  %s2072_s30 = sadd.s32 4294967295, %s2828_s29   ;;  %s2828_s29 = sphi %s2890_s29, %s18_s29   ;;  %s2824_s28 = sphi %s2888_s28, %s3675_s28   ;;  %s2820_s27 = sphi %s2886_s27, %s3674_s27   ;;  %s2816_s26 = sphi %s2884_s26, %s3673_s26   ;;  %s2812_s25 = sphi %s2882_s25, %s3672_s25   ;;  %s2808_s24 = sphi %s2880_s24, %s3671_s24   ;;  %s2804_s23 = sphi %s2878_s23, %s3670_s23   ;;  %s2800_s22 = sphi %s2876_s22, %s3678_s22   ;;  %s2796_s21 = sphi %s2874_s21, %s3668_s21   ;;  %s2792_s20 = sphi %s2872_s20, %s3667_s20   ;;  %s2788_s19 = sphi %s2870_s19, %s3677_s19   ;;  %s2784_s18 = sphi %s2868_s18, %s3676_s18  }
   0xb   : > { %3644 = sst [smem:[#allocation10_spill]] %s2792_s20  ;;  %s2073_s6 = sadd.s32 4294967294, %s2828_s29  }
   0xc   : > { %3645 = sst [smem:[#allocation11_spill]] %s2812_s25  ;;  %s33_s7 = sadd.s32 1, %s2812_s25 }
   0xd   : > { %3646 = sst [smem:[#allocation12_spill]] %s2816_s26  ;;  %p34_p0 = scmp.ge.s32.totalorder %s33_s7, 2 }
   0xe   : > { %3647 = sst [smem:[#allocation13_spill]] %s2820_s27  ;;  %s36_s8 = sadd.s32 1, %s2816_s26 }
   0xf   : > { %3648 = sst [smem:[#allocation14_spill]] %s2824_s28  ;;  %s40_s9 = sadd.s32 1, %s2820_s27 }
  0x10   : > { %3649 = sst [smem:[#allocation15_spill]] %s2828_s29  ;;  %s44_s10 = sadd.s32 1, %s2824_s28 }
  0x11   : > { %s3680_s7 = smov (%p34_p0, %s33_s7), 0  ;;  %s3682_s8 = smov (!%p34_p0, %s36_s8), %s2816_s26 }
  0x12   : > { %3650 = sst [smem:[#allocation16_spill]] %s3680_s7  ;;  %p204_p1 = scmp.ne.s32.totalorder %s2792_s20, %s2788_s19 }
  0x13   : > { %p205_p2 = scmp.eq.s32.totalorder %s2072_s30, 63  ;;  %p38_p3 = scmp.ge.s32.totalorder %s3682_s8, 8 }
  0x14   : > { %p210_p4 = scmp.ne.s32.totalorder %s2788_s19, %s2784_s18  ;;  %p211_p6 = scmp.eq.s32.totalorder %s2073_s6, 63 }
  0x15   : > { %p2941_p5 = por %p205_p2, %p204_p1  ;;  %s3684_s8 = smov (%p38_p3, %s3682_s8), 0 }
  0x16   : > { %3652 = sst [smem:[#allocation17_spill]] %s3684_s8  ;;  %s3686_s9 = smov (!%p38_p3, %s40_s9), %s2820_s27 }
  0x17   : > { %p2948_p7 = por %p211_p6, %p210_p4  ;;  %p2076_p8 = scmp.ge.s32.totalorder %s2828_s29, 1 }
  0x18   : > { %p42_p9 = scmp.ge.s32.totalorder %s3686_s9, 2  ;;  %p295_p10 = scmp.lt.s32.totalorder %s2828_s29, 65 }
  0x19   : > { %s3653_s12 = scalar_select %p2948_p7, 1, 0 }
  0x1a   : > { %s3688_s9 = smov (%p42_p9, %s3686_s9), 0  ;;  %s3690_s10 = smov (!%p42_p9, %s44_s10), %s2824_s28 }
  0x1b   : > { %3654 = sst [smem:[#allocation18_spill]] %s3653_s12  ;;  %p296_p11 = pnand %p2076_p8, %p295_p10 }
  0x1c   : > { %3655 = sst [smem:[#allocation19_spill]] %s3688_s9  ;;  %p46_p12 = scmp.ge.s32.totalorder %s3690_s10, 2 }
  0x1d   : > { %s190_s13 = ssub.s32 %s2820_s27, %s3688_s9  ;;  %s194_s16 = sadd.s32 1, %s2792_s20 }
  0x1e   : > { %s3692_s10 = smov (%p46_p12, %s3690_s10), 0  ;;  %s3630_s30 = sand.u32 (!%p296_p11), 1, %s2788_s19  }
  0x1f   : > { %3656 = sst [smem:[#allocation20_spill]] %s3692_s10  ;;  %s189_s14 = ssub.s32 %s2824_s28, %s3692_s10 }
  0x20   : > { %s191_s15 = sor.u32 %s190_s13, %s189_s14  ;;  %299 = sbr.rel (%p296_p11) target bundleno = 1307 (0x51b), region = 40 }
  0x21   : > { %p192_p13 = scmp.eq.s32.totalorder %s191_s15, 0  ;;  %s2969_s6 = sshll.u32 (!%p296_p11), %s2804_s23, 4 }
  0x22   : > { %s2973_s13 = sshll.u32 (!%p296_p11), %s3630_s30, 7  ;;  %p365_p0 = scmp.lt.s32.totalorder (!%p296_p11), %s2808_s24, 1 }
  0x23   : > { %s2965_s17 = scalar_select %p192_p13, %s2792_s20, %s194_s16  }
  0x24   : > { %p367_p1 = scmp.lt.s32.totalorder (!%p296_p11), %s2800_s22, 23  ;;  %p369_p2 = scmp.lt.s32.totalorder (!%p296_p11), %s2969_s6, 31 }
  0x25   : > { %3657 = sst [smem:[#allocation21_spill]] %s2965_s17  ;;  %s378_s9 = sadd.s32 (!%p296_p11), 8, %s2800_s22 }
  0x26   : > { %s2081_s8 = sshll.u32 (!%p296_p11), %s2796_s21, 4  ;;  %p382_p3 = scmp.lt.s32.totalorder (!%p296_p11), %s378_s9, 23 }
  0x27   : > { %s366_s14 = scalar_select %p365_p0, %s2808_s24, 1 }
  0x28   : > { %s368_s15 = scalar_select %p367_p1, %s2800_s22, 23 }
  0x29   : > { %s2980_s16 = smul.u32 768, %s366_s14  ;;  %p384_p4 = scmp.lt.s32.totalorder %s2081_s8, 31 }
  0x2a   : > { %s2079_s10 = sshll.u32 %s368_s15, 5  ;;  %s394_s28 = sadd.s32 16, %s2800_s22 }
  0x2b   : > { %s370_s23 = scalar_select %p369_p2, %s2969_s6, 31 }
  0x2c   : > { %s3658_s0 = sld [smem:[#allocation22_spill]]  ;;  %p398_p6 = scmp.lt.s32.totalorder %s394_s28, 23 }
  0x2d   : > { %s372_s7 = sadd.s32 %s2079_s10, %s370_s23  ;;  %s3694_s9 = smov (!%p382_p3, %s378_s9), 23 }
  0x2e   : > { %s374_s30 = sadd.s32 %s2980_s16, %s372_s7  ;;  %s3696_s8 = smov (!%p384_p4, %s2081_s8), 31 }
  0x2f   : > { %s2080_s27 = sshll.u32 %s374_s30, 3  ;;  %s2082_s15 = sshll.u32 %s3694_s9, 5 }
  0x30   : > { %p416_p8 = scmp.eq.s32.totalorder %s2800_s22, 0  ;;  %s387_s17 = sadd.s32 %s2082_s15, %s3696_s8 }
  0x31   : > { %p417_p9 = scmp.eq.s32.totalorder %s2796_s21, 0  ;;  %s389_s10 = sadd.s32 %s2980_s16, %s387_s17 }
  0x32   : > { %s2990_s14 = scalar_lea.vmem %s3658_s0, %s2080_s27  ;;  %p410_p10 = scmp.lt.s32.totalorder %s2800_s22, 7 }
  0x33   : > { %s2083_s7 = sshll.u32 %s389_s10, 3  ;;  %p418_p11 = pnand %p417_p9, %p416_p8 }
  0x34   : > { %s2999_s20 = scalar_lea.vmem %s3623_s1, %s2083_s7  ;;  %s3698_s28 = smov (!%p398_p6, %s394_s28), 23  ;;  %v2830_v0 = vmov (!%p418_p11), 0.0  }
  0x35   : > { %s411_s25 = scalar_select %p410_p10, %s2800_s22, 7 }
  0x36   : > { %s2085_s26 = sshll.u32 %s3698_s28, 5  ;;  %s3014_s23 = scalar_lea.vmem [#allocation6], %s2973_s13  ;;  %422 = vst [vmem:[#allocation5] sm:$0xff] (!%p418_p11), %v2830_v0  ;;  %423 = vst [vmem:[#allocation5 + $0x8] sm:$0xff] (!%p418_p11), %v2830_v0 }
  0x37   : > { %s403_s27 = sadd.s32 %s2085_s26, %s3696_s8  ;;  %s2146_s0 = sshll.u32 %s411_s25, 6  ;;  %424 = vst [vmem:[#allocation5 + $0x10] sm:$0xff] (!%p418_p11), %v2830_v0  ;;  %425 = vst [vmem:[#allocation5 + $0x18] sm:$0xff] (!%p418_p11), %v2830_v0 }
  0x38   : > { %s405_s12 = sadd.s32 %s2980_s16, %s403_s27  ;;  %s3006_s15 = scalar_lea.vmem %s3625_s3, %s2146_s0  ;;  %426 = vst [vmem:[#allocation5 + $0x20] sm:$0xff] (!%p418_p11), %v2830_v0  ;;  %427 = vst [vmem:[#allocation5 + $0x28] sm:$0xff] (!%p418_p11), %v2830_v0 }
  0x39   : > { %s2086_s17 = sshll.u32 %s405_s12, 3  ;;  %421 = sbr.rel (%p418_p11) target bundleno = 64 (0x40), region = 44  ;;  %428 = vst [vmem:[#allocation5 + $0x30] sm:$0xff] (!%p418_p11), %v2830_v0  ;;  %429 = vst [vmem:[#allocation5 + $0x38] sm:$0xff] (!%p418_p11), %v2830_v0 }
  0x3a   : > { %s3011_s5 = scalar_lea.vmem %s3624_s2, %s2086_s17  ;;  %430 = vst [vmem:[#allocation5 + $0x40] sm:$0xff] (!%p418_p11), %v2830_v0  ;;  %431 = vst [vmem:[#allocation5 + $0x48] sm:$0xff] (!%p418_p11), %v2830_v0 }
  0x3b   : > { %432 = vst [vmem:[#allocation5 + $0x50] sm:$0xff] (!%p418_p11), %v2830_v0  ;;  %433 = vst [vmem:[#allocation5 + $0x58] sm:$0xff] (!%p418_p11), %v2830_v0 }
  0x3c   : > { %434 = vst [vmem:[#allocation5 + $0x60] sm:$0xff] (!%p418_p11), %v2830_v0  ;;  %435 = vst [vmem:[#allocation5 + $0x68] sm:$0xff] (!%p418_p11), %v2830_v0 }
  0x3d   : > { %436 = vst [vmem:[#allocation5 + $0x70] sm:$0xff] (!%p418_p11), %v2830_v0  ;;  %437 = vst [vmem:[#allocation5 + $0x78] sm:$0xff] (!%p418_p11), %v2830_v0 }
  0x40 PF: > { %p2089_p12 = scmp.ne.s32.totalorder %s2796_s21, 0 }
  0x41   : > { %vm441_vm0 = vcmask (!%p2089_p12), 7168   ;;  %vm474_vm1 = vcmask (!%p2089_p12), 523264   ;;  %v2831_v1 = vmov (!%p2089_p12), -inf   ;;  %v2832_v2 = vmov (!%p2089_p12), 0.0  }
  0x42   : > { %440 = sbr.rel (%p2089_p12) target bundleno = 90 (0x5a), region = 48  ;;  %442 = vst.msk [vmem:[#allocation2] sm:$0xff] (!%p2089_p12), %vm441_vm0, %v2831_v1  ;;  %443 = vst.msk [vmem:[#allocation2 + $0x8] sm:$0xff] (!%p2089_p12), %vm441_vm0, %v2831_v1 }
  0x43   : > { %444 = vst.msk [vmem:[#allocation2 + $0x10] sm:$0xff] (!%p2089_p12), %vm441_vm0, %v2831_v1  ;;  %445 = vst.msk [vmem:[#allocation2 + $0x18] sm:$0xff] (!%p2089_p12), %vm441_vm0, %v2831_v1 }
  0x44   : > { %446 = vst.msk [vmem:[#allocation2 + $0x20] sm:$0xff] (!%p2089_p12), %vm441_vm0, %v2831_v1  ;;  %447 = vst.msk [vmem:[#allocation2 + $0x28] sm:$0xff] (!%p2089_p12), %vm441_vm0, %v2831_v1 }
  0x45   : > { %448 = vst.msk [vmem:[#allocation2 + $0x30] sm:$0xff] (!%p2089_p12), %vm441_vm0, %v2831_v1  ;;  %449 = vst.msk [vmem:[#allocation2 + $0x38] sm:$0xff] (!%p2089_p12), %vm441_vm0, %v2831_v1 }
  0x46   : > { %450 = vst.msk [vmem:[#allocation2 + $0x40] sm:$0xff] (!%p2089_p12), %vm441_vm0, %v2831_v1  ;;  %451 = vst.msk [vmem:[#allocation2 + $0x48] sm:$0xff] (!%p2089_p12), %vm441_vm0, %v2831_v1 }
  0x47   : > { %452 = vst.msk [vmem:[#allocation2 + $0x50] sm:$0xff] (!%p2089_p12), %vm441_vm0, %v2831_v1  ;;  %453 = vst.msk [vmem:[#allocation2 + $0x58] sm:$0xff] (!%p2089_p12), %vm441_vm0, %v2831_v1 }
  0x48   : > { %454 = vst.msk [vmem:[#allocation2 + $0x60] sm:$0xff] (!%p2089_p12), %vm441_vm0, %v2831_v1  ;;  %455 = vst.msk [vmem:[#allocation2 + $0x68] sm:$0xff] (!%p2089_p12), %vm441_vm0, %v2831_v1 }
  0x49   : > { %456 = vst.msk [vmem:[#allocation2 + $0x70] sm:$0xff] %vm441_vm0, %v2831_v1  ;;  %457 = vst.msk [vmem:[#allocation2 + $0x78] sm:$0xff] %vm441_vm0, %v2831_v1 }
  0x4a   : > { %458 = vst.msk [vmem:[#allocation3] sm:$0xff] %vm441_vm0, %v2832_v2  ;;  %459 = vst.msk [vmem:[#allocation3 + $0x8] sm:$0xff] %vm441_vm0, %v2832_v2 }
  0x4b   : > { %460 = vst.msk [vmem:[#allocation3 + $0x10] sm:$0xff] %vm441_vm0, %v2832_v2  ;;  %461 = vst.msk [vmem:[#allocation3 + $0x18] sm:$0xff] %vm441_vm0, %v2832_v2 }
  0x4c   : > { %462 = vst.msk [vmem:[#allocation3 + $0x20] sm:$0xff] %vm441_vm0, %v2832_v2  ;;  %463 = vst.msk [vmem:[#allocation3 + $0x28] sm:$0xff] %vm441_vm0, %v2832_v2 }
  0x4d   : > { %464 = vst.msk [vmem:[#allocation3 + $0x30] sm:$0xff] %vm441_vm0, %v2832_v2  ;;  %465 = vst.msk [vmem:[#allocation3 + $0x38] sm:$0xff] %vm441_vm0, %v2832_v2 }
  0x4e   : > { %466 = vst.msk [vmem:[#allocation3 + $0x40] sm:$0xff] %vm441_vm0, %v2832_v2  ;;  %467 = vst.msk [vmem:[#allocation3 + $0x48] sm:$0xff] %vm441_vm0, %v2832_v2 }
  0x4f   : > { %468 = vst.msk [vmem:[#allocation3 + $0x50] sm:$0xff] %vm441_vm0, %v2832_v2  ;;  %469 = vst.msk [vmem:[#allocation3 + $0x58] sm:$0xff] %vm441_vm0, %v2832_v2 }
  0x50   : > { %470 = vst.msk [vmem:[#allocation3 + $0x60] sm:$0xff] %vm441_vm0, %v2832_v2  ;;  %471 = vst.msk [vmem:[#allocation3 + $0x68] sm:$0xff] %vm441_vm0, %v2832_v2 }
  0x51   : > { %472 = vst.msk [vmem:[#allocation3 + $0x70] sm:$0xff] %vm441_vm0, %v2832_v2  ;;  %473 = vst.msk [vmem:[#allocation3 + $0x78] sm:$0xff] %vm441_vm0, %v2832_v2 }
  0x52   : > { %475 = vst.msk [vmem:[#allocation4] sm:$0xff] %vm474_vm1, %v2832_v2  ;;  %476 = vst.msk [vmem:[#allocation4 + $0x8] sm:$0xff] %vm474_vm1, %v2832_v2 }
  0x53   : > { %477 = vst.msk [vmem:[#allocation4 + $0x10] sm:$0xff] %vm474_vm1, %v2832_v2  ;;  %478 = vst.msk [vmem:[#allocation4 + $0x18] sm:$0xff] %vm474_vm1, %v2832_v2 }
  0x54   : > { %479 = vst.msk [vmem:[#allocation4 + $0x20] sm:$0xff] %vm474_vm1, %v2832_v2  ;;  %480 = vst.msk [vmem:[#allocation4 + $0x28] sm:$0xff] %vm474_vm1, %v2832_v2 }
  0x55   : > { %481 = vst.msk [vmem:[#allocation4 + $0x30] sm:$0xff] %vm474_vm1, %v2832_v2  ;;  %482 = vst.msk [vmem:[#allocation4 + $0x38] sm:$0xff] %vm474_vm1, %v2832_v2 }
  0x56   : > { %483 = vst.msk [vmem:[#allocation4 + $0x40] sm:$0xff] %vm474_vm1, %v2832_v2  ;;  %484 = vst.msk [vmem:[#allocation4 + $0x48] sm:$0xff] %vm474_vm1, %v2832_v2 }
  0x57   : > { %485 = vst.msk [vmem:[#allocation4 + $0x50] sm:$0xff] %vm474_vm1, %v2832_v2  ;;  %486 = vst.msk [vmem:[#allocation4 + $0x58] sm:$0xff] %vm474_vm1, %v2832_v2 }
  0x58   : > { %487 = vst.msk [vmem:[#allocation4 + $0x60] sm:$0xff] %vm474_vm1, %v2832_v2  ;;  %488 = vst.msk [vmem:[#allocation4 + $0x68] sm:$0xff] %vm474_vm1, %v2832_v2 }
  0x59   : > { %489 = vst.msk [vmem:[#allocation4 + $0x70] sm:$0xff] %vm474_vm1, %v2832_v2  ;;  %490 = vst.msk [vmem:[#allocation4 + $0x78] sm:$0xff] %vm474_vm1, %v2832_v2 }
  0x5a PF: > { %v523_v3 = vld [vmem:[%s2999_s20] sm:$0xff]  ;;  %v524_v4 = vld [vmem:[%s2999_s20 + $0x8] sm:$0xff]  ;;  %vm555_vm2 = vcmask 523264   ;;  %v525_v5 = vld [vmem:[%s2999_s20 + $0x10] sm:$0xff]  ;;  %vm1117_vm4 = vcmask 7168   ;;  %p1439_p13 = scmp.eq.s32.totalorder %s2796_s21, 1 }
  0x5b   : > { %v2387_v6 = vpack.c.bf16 %v524_v4, %v523_v3  ;;  %vm3070_vm3 = vmpackc.low %vm555_vm2, %vm555_vm2  ;;  %v526_v8 = vld [vmem:[%s2999_s20 + $0x18] sm:$0xff]  ;;  %v491_v10 = vld [vmem:[%s2990_s14] sm:$0xff]  ;;  %p2122_p0 = scmp.ne.s32.totalorder %s2796_s21, 1 }
  0x5c   : > { %v2393_v9 = vpack.c.bf16 %v526_v8, %v525_v5  ;;  %v527_v11 = vld [vmem:[%s2999_s20 + $0x20] sm:$0xff]  ;;  %v528_v12 = vld [vmem:[%s2999_s20 + $0x28] sm:$0xff]  ;;  %v507_v13 = vmul.f32 0.125, %v491_v10  ;;  %v529_v15 = vld [vmem:[%s2999_s20 + $0x30] sm:$0xff] }
  0x5d   : > { %2389 = vmatprep.subr.msk.bf16.mxu0 %vm3070_vm3, %v2387_v6  ;;  %v2399_v14 = vpack.c.bf16 %v528_v12, %v527_v11  ;;  %v530_v16 = vld [vmem:[%s2999_s20 + $0x38] sm:$0xff]  ;;  %v531_v18 = vld [vmem:[%s2999_s20 + $0x40] sm:$0xff]  ;;  %v532_v19 = vld [vmem:[%s2999_s20 + $0x48] sm:$0xff] }
  0x5e   : > { %2392 = vmatpush3.bf16.xpose.msk.msra.mxu0 %vm3070_vm3, %v2387_v6  ;;  %2267 = vmatprep.mubr.msk.f32.mxu0 %vm555_vm2, %v507_v13  ;;  %v2405_v17 = vpack.c.bf16 %v530_v16, %v529_v15  ;;  %v2411_v20 = vpack.c.bf16 %v532_v19, %v531_v18  ;;  %v533_v21 = vld [vmem:[%s2999_s20 + $0x50] sm:$0xff]  ;;  %v534_v22 = vld [vmem:[%s2999_s20 + $0x58] sm:$0xff]  ;;  %v535_v24 = vld [vmem:[%s2999_s20 + $0x60] sm:$0xff]  ;;  %v2833_v6 = vmov 0  }
  0x5f   : > { %2395 = vmatprep.subr.msk.bf16.mxu0 %vm3070_vm3, %v2393_v9  ;;  %v2417_v23 = vpack.c.bf16 %v534_v22, %v533_v21  ;;  %v536_v25 = vld [vmem:[%s2999_s20 + $0x68] sm:$0xff]  ;;  %v537_v27 = vld [vmem:[%s2999_s20 + $0x70] sm:$0xff]  ;;  %v538_v28 = vld [vmem:[%s2999_s20 + $0x78] sm:$0xff]  ;;  %2602 = vset.pattern.permute.xlu0 %v2833_v6 }
  0x60   : > { %v2423_v26 = vpack.c.bf16 %v536_v25, %v535_v24  ;;  %v2429_v29 = vpack.c.bf16 %v538_v28, %v537_v27  ;;  %v492_v30 = vld [vmem:[%s2990_s14 + $0x8] sm:$0xff]  ;;  %v493_v31 = vld [vmem:[%s2990_s14 + $0x10] sm:$0xff]  ;;  %v494_v34 = vld [vmem:[%s2990_s14 + $0x18] sm:$0xff]  ;;  %2603 = vset.pattern.permute.xlu1 %v2833_v6 }
  0x61   : > { %v508_v32 = vmul.f32 0.125, %v492_v30  ;;  %v509_v33 = vmul.f32 0.125, %v493_v31  ;;  %v495_v35 = vld [vmem:[%s2990_s14 + $0x20] sm:$0xff]  ;;  %v510_v36 = vmul.f32 0.125, %v494_v34  ;;  %v496_v38 = vld [vmem:[%s2990_s14 + $0x28] sm:$0xff]  ;;  %v497_v39 = vld [vmem:[%s2990_s14 + $0x30] sm:$0xff] }
  0x62   : > { %v511_v37 = vmul.f32 0.125, %v495_v35  ;;  %v512_v40 = vmul.f32 0.125, %v496_v38  ;;  %v513_v41 = vmul.f32 0.125, %v497_v39  ;;  %v498_v42 = vld [vmem:[%s2990_s14 + $0x38] sm:$0xff]  ;;  %v499_v43 = vld [vmem:[%s2990_s14 + $0x40] sm:$0xff]  ;;  %v500_v46 = vld [vmem:[%s2990_s14 + $0x48] sm:$0xff] }
  0x63   : > { %v514_v44 = vmul.f32 0.125, %v498_v42  ;;  %v515_v45 = vmul.f32 0.125, %v499_v43  ;;  %v501_v47 = vld [vmem:[%s2990_s14 + $0x50] sm:$0xff]  ;;  %v516_v48 = vmul.f32 0.125, %v500_v46  ;;  %v502_v50 = vld [vmem:[%s2990_s14 + $0x58] sm:$0xff]  ;;  %v503_v51 = vld [vmem:[%s2990_s14 + $0x60] sm:$0xff] }
  0x64   : > { %v517_v49 = vmul.f32 0.125, %v501_v47  ;;  %v518_v52 = vmul.f32 0.125, %v502_v50  ;;  %v519_v53 = vmul.f32 0.125, %v503_v51  ;;  %v504_v54 = vld [vmem:[%s2990_s14 + $0x68] sm:$0xff]  ;;  %v505_v55 = vld [vmem:[%s2990_s14 + $0x70] sm:$0xff]  ;;  %v506_v58 = vld [vmem:[%s2990_s14 + $0x78] sm:$0xff] }
  0x65   : > { %v520_v56 = vmul.f32 0.125, %v504_v54  ;;  %v521_v57 = vmul.f32 0.125, %v505_v55  ;;  %v522_v59 = vmul.f32 0.125, %v506_v58  ;;  %v539_v13 = vld [vmem:[%s3011_s5] sm:$0xff]  ;;  %v541_v15 = vld [vmem:[%s3011_s5 + $0x10] sm:$0xff]  ;;  %v3212_v28 = vld [vmem:[#allocation2 + $0x18] sm:$0xff] }
  0x66   : > { %2398 = vmatpush3.bf16.xpose.msk.msra.mxu0 %vm3070_vm3, %v2393_v9  ;;  %v543_v19 = vld [vmem:[%s3011_s5 + $0x20] sm:$0xff]  ;;  %v545_v22 = vld [vmem:[%s3011_s5 + $0x30] sm:$0xff]  ;;  %v552_v50 = vld [vmem:[%s3011_s5 + $0x68] sm:$0xff] }
  0x67   : > { %2401 = vmatprep.subr.msk.bf16.mxu0 %vm3070_vm3, %v2399_v14  ;;  %v3207_v25 = vld [vmem:[#allocation2] sm:$0xff]  ;;  %v3248_v47 = vld [vmem:[#allocation2 + $0x30] sm:$0xff]  ;;  %v3256_v54 = vld [vmem:[#allocation2 + $0x38] sm:$0xff] }
  0x68   : > { %v547_v31 = vld [vmem:[%s3011_s5 + $0x40] sm:$0xff]  ;;  %v553_v58 = vld [vmem:[%s3011_s5 + $0x70] sm:$0xff] }
  0x69   : > { %v3231_v38 = vld [vmem:[#allocation2 + $0x20] sm:$0xff] }
  0x6e   : > { %2404 = vmatpush3.bf16.xpose.msk.msra.mxu0 %vm3070_vm3, %v2399_v14  ;;  %v540_v14 = vld [vmem:[%s3011_s5 + $0x8] sm:$0xff] }
  0x6f   : > { %2407 = vmatprep.subr.msk.bf16.mxu0 %vm3070_vm3, %v2405_v17  ;;  %v2435_v16 = vpack.c.bf16 %v540_v14, %v539_v13 }
  0x71   : > { %2436 = vmatprep.subr.bf16.mxu1 %v2435_v16 }
  0x72   : > { %2438 = vmatpush3.bf16.msra.mxu1 %v2435_v16 }
  0x76   : > { %2410 = vmatpush3.bf16.xpose.msk.msra.mxu0 %vm3070_vm3, %v2405_v17  ;;  %v542_v17 = vld [vmem:[%s3011_s5 + $0x18] sm:$0xff] }
  0x77   : > { %2413 = vmatprep.subr.msk.bf16.mxu0 %vm3070_vm3, %v2411_v20  ;;  %v2439_v18 = vpack.c.bf16 %v542_v17, %v541_v15  ;;  %v806_v15 = vld [vmem:[#allocation2 + $0x48] sm:$0xff]  ;;  %v3274_v17 = vld [vmem:[#allocation2 + $0x50] sm:$0xff] }
  0x79   : > { %2440 = vmatprep.subr.bf16.mxu1 %v2439_v18 }
  0x7a   : > { %2442 = vmatpush3.bf16.msra.mxu1 %v2439_v18 }
  0x7e   : > { %2416 = vmatpush3.bf16.xpose.msk.msra.mxu0 %vm3070_vm3, %v2411_v20  ;;  %v544_v20 = vld [vmem:[%s3011_s5 + $0x28] sm:$0xff] }
  0x7f   : > { %2419 = vmatprep.subr.msk.bf16.mxu0 %vm3070_vm3, %v2417_v23  ;;  %v2443_v21 = vpack.c.bf16 %v544_v20, %v543_v19 }
  0x81   : > { %2444 = vmatprep.subr.bf16.mxu1 %v2443_v21 }
  0x82   : > { %2446 = vmatpush3.bf16.msra.mxu1 %v2443_v21 }
  0x86   : > { %2422 = vmatpush3.bf16.xpose.msk.msra.mxu0 %vm3070_vm3, %v2417_v23  ;;  %v546_v23 = vld [vmem:[%s3011_s5 + $0x38] sm:$0xff] }
  0x87   : > { %2425 = vmatprep.subr.msk.bf16.mxu0 %vm3070_vm3, %v2423_v26  ;;  %v2447_v24 = vpack.c.bf16 %v546_v23, %v545_v22  ;;  %v808_v22 = vld [vmem:[#allocation2 + $0x58] sm:$0xff] }
  0x89   : > { %2448 = vmatprep.subr.bf16.mxu1 %v2447_v24 }
  0x8a   : > { %2450 = vmatpush3.bf16.msra.mxu1 %v2447_v24  ;;  %v3284_v24 = vld [vmem:[#allocation2 + $0x60] sm:$0xff] }
  0x8e   : > { %2428 = vmatpush3.bf16.xpose.msk.msra.mxu0 %vm3070_vm3, %v2423_v26 }
  0x8f   : > { %2431 = vmatprep.subr.msk.bf16.mxu0 %vm3070_vm3, %v2429_v29 }
  0x96   : > { %2434 = vmatpush3.bf16.xpose.msk.msra.mxu0 %vm3070_vm3, %v2429_v29  ;;  %v3214_v29 = vld [vmem:[#allocation2 + $0x8] sm:$0xff] }
  0x9d   : > { %2268 = vmatmul.mubr.msk.f32.vlgmr.msra.gmra.mrb[0].mxu0 %vm555_vm2, %v508_v32  ;;  %v548_v32 = vld [vmem:[%s3011_s5 + $0x48] sm:$0xff] }
  0x9e   : > { %2270 = vmatprep.mubr.msk.f32.mxu0 %vm555_vm2, %v509_v33  ;;  %v2451_v35 = vpack.c.bf16 %v548_v32, %v547_v31  ;;  %v810_v32 = vld [vmem:[#allocation2 + $0x68] sm:$0xff] }
  0xa0   : > { %2452 = vmatprep.subr.bf16.mxu1 %v2451_v35 }
  0xa1   : > { %2271 = vmatmul.mubr.msk.f32.gmra.mrb[2].mxu0 %vm555_vm2, %v510_v36  ;;  %2454 = vmatpush3.bf16.msra.mxu1 %v2451_v35  ;;  %v3295_v35 = vld [vmem:[#allocation2 + $0x70] sm:$0xff] }
  0xa2   : > { %2273 = vmatprep.mubr.msk.f32.mxu0 %vm555_vm2, %v511_v37  ;;  %v3227_v37 = vld [vmem:[#allocation2 + $0x10] sm:$0xff] }
  0xa5   : > { %2274 = vmatmul.mubr.msk.f32.gmra.mrb[4].mxu0 %vm555_vm2, %v512_v40  ;;  %v549_v40 = vld [vmem:[%s3011_s5 + $0x50] sm:$0xff] }
  0xa6   : > { %2276 = vmatprep.mubr.msk.f32.mxu0 %vm555_vm2, %v513_v41  ;;  %v550_v41 = vld [vmem:[%s3011_s5 + $0x58] sm:$0xff] }
  0xa9   : > { %2277 = vmatmul.mubr.msk.f32.gmra.mrb[6].mxu0 %vm555_vm2, %v514_v44  ;;  %v2455_v44 = vpack.c.bf16 %v550_v41, %v549_v40 }
  0xaa   : > { %2279 = vmatprep.mubr.msk.f32.mxu0 %vm555_vm2, %v515_v45  ;;  %v3241_v45 = vld [vmem:[#allocation2 + $0x28] sm:$0xff] }
  0xab   : > { %2456 = vmatprep.subr.bf16.mxu1 %v2455_v44 }
  0xac   : > { %2458 = vmatpush3.bf16.msra.mxu1 %v2455_v44 }
  0xad   : > { %2280 = vmatmul.mubr.msk.f32.gmra.mrb[8].mxu0 %vm555_vm2, %v516_v48 }
  0xae   : > { %2282 = vmatprep.mubr.msk.f32.mxu0 %vm555_vm2, %v517_v49  ;;  %v551_v49 = vld [vmem:[%s3011_s5 + $0x60] sm:$0xff] }
  0xb1   : > { %2283 = vmatmul.mubr.msk.f32.gmra.mrb[10].mxu0 %vm555_vm2, %v518_v52 }
  0xb2   : > { %2285 = vmatprep.mubr.msk.f32.mxu0 %vm555_vm2, %v519_v53  ;;  %v2459_v53 = vpack.c.bf16 %v552_v50, %v551_v49 }
  0xb4   : > { %2460 = vmatprep.subr.bf16.mxu1 %v2459_v53 }
  0xb5   : > { %2286 = vmatmul.mubr.msk.f32.gmra.mrb[12].mxu0 %vm555_vm2, %v520_v56  ;;  %v3262_v56 = vld [vmem:[#allocation2 + $0x40] sm:$0xff]  ;;  %2462 = vmatpush3.bf16.msra.mxu1 %v2459_v53 }
  0xb6   : > { %2288 = vmatprep.mubr.msk.f32.mxu0 %vm555_vm2, %v521_v57 }
  0xb9   : > { %2289 = vmatmul.mubr.msk.f32.gmra.mrb[14].mxu0 %vm555_vm2, %v522_v59  ;;  %v554_v59 = vld [vmem:[%s3011_s5 + $0x78] sm:$0xff] }
  0xba   : > { %v2463_v14 = vpack.c.bf16 %v554_v59, %v553_v58 }
  0xbc   : > { %2464 = vmatprep.subr.bf16.mxu1 %v2463_v14 }
  0xbd   : > { %2466 = vmatpush3.bf16.msra.mxu1 %v2463_v14 }
 0x170   : > { %v3151_v60 = vpop.f32.mrb[0].mxu0 }
 0x171   : > { %v3153_v61 = vpop.f32.mrb[1].mxu0 }
 0x172   : > { %813 = vmax.xlane.f32.xlu0 %v3153_v61 }
 0x174   : > { %v3156_v62 = vpop.f32.mrb[2].mxu0 }
 0x175   : > { %819 = vmax.xlane.f32.xlu1 %v3156_v62  ;;  %v3159_v63 = vpop.f32.mrb[3].mxu0 }
 0x176   : > { %815 = vmax.xlane.f32.xlu0 %v3151_v60 }
 0x178   : > { %v3162_v0 = vpop.f32.mrb[4].mxu0 }
 0x179   : > { %817 = vmax.xlane.f32.xlu1 %v3159_v63  ;;  %v3165_v1 = vpop.f32.mrb[5].mxu0 }
 0x17a   : > { %821 = vmax.xlane.f32.xlu0 %v3165_v1 }
 0x17c   : > { %v3168_v2 = vpop.f32.mrb[6].mxu0 }
 0x17d   : > { %823 = vmax.xlane.f32.xlu1 %v3162_v0  ;;  %v3171_v3 = vpop.f32.mrb[7].mxu0 }
 0x17e   : > { %825 = vmax.xlane.f32.xlu0 %v3171_v3 }
 0x180   : > { %v3174_v4 = vpop.f32.mrb[8].mxu0 }
 0x181   : > { %827 = vmax.xlane.f32.xlu1 %v3168_v2  ;;  %v3177_v5 = vpop.f32.mrb[9].mxu0 }
 0x182   : > { %829 = vmax.xlane.f32.xlu0 %v3177_v5 }
 0x184   : > { %v3180_v7 = vpop.f32.mrb[10].mxu0 }
 0x185   : > { %831 = vmax.xlane.f32.xlu1 %v3174_v4  ;;  %v3183_v8 = vpop.f32.mrb[11].mxu0 }
 0x186   : > { %833 = vmax.xlane.f32.xlu0 %v3183_v8 }
 0x188   : > { %v3186_v9 = vpop.f32.mrb[12].mxu0 }
 0x189   : > { %835 = vmax.xlane.f32.xlu1 %v3180_v7  ;;  %v3189_v10 = vpop.f32.mrb[13].mxu0 }
 0x18a   : > { %837 = vmax.xlane.f32.xlu0 %v3189_v10 }
 0x18c   : > { %v3192_v11 = vpop.f32.mrb[14].mxu0 }
 0x18d   : > { %839 = vmax.xlane.f32.xlu1 %v3186_v9  ;;  %v3195_v12 = vpop.f32.mrb[15].mxu0 }
 0x18e   : > { %841 = vmax.xlane.f32.xlu0 %v3195_v12 }
 0x191   : > { %843 = vmax.xlane.f32.xlu1 %v3192_v11 }
 0x1ff   : > { %v814_v26 = vpop.xlane.xlu0 %813 }
 0x200   : > { %v3210_v27 = vmax.f32 %v3207_v25, %v814_v26 }
 0x202   : > { %1423 = vst.msk [vmem:[#allocation2] sm:$0xff] %vm1117_vm4, %v3210_v27  ;;  %v820_v30 = vpop.xlane.xlu1 %819  ;;  %911 = vperm.xlu0 %2602, %v3210_v27   ;;  %v861_v18 = vsub.f32 %v3207_v25, %v3210_v27 }
 0x203   : > { %v3222_v33 = vmax.f32 %v3212_v28, %v820_v30  ;;  %v816_v34 = vpop.xlane.xlu0 %815 }
 0x204   : > { %v3225_v36 = vmax.f32 %v3214_v29, %v816_v34  ;;  %v877_v26 = vmul.f32 1.442695, %v861_v18 }
 0x205   : > { %1426 = vst.msk [vmem:[#allocation2 + $0x18] sm:$0xff] %vm1117_vm4, %v3222_v33  ;;  %v864_v25 = vsub.f32 %v3212_v28, %v3222_v33 }
 0x206   : > { %1424 = vst.msk [vmem:[#allocation2 + $0x8] sm:$0xff] %vm1117_vm4, %v3225_v36  ;;  %v818_v39 = vpop.xlane.xlu1 %817  ;;  %916 = vperm.xlu1 %2603, %v3225_v36   ;;  %2604 = vpow2.f32 %v877_v26 }
 0x207   : > { %v3239_v42 = vmax.f32 %v3227_v37, %v818_v39  ;;  %v822_v43 = vpop.xlane.xlu0 %821  ;;  %v883_v39 = vmul.f32 1.442695, %v864_v25 }
 0x208   : > { %v3244_v46 = vmax.f32 %v3231_v38, %v822_v43  ;;  %v3300_v43 = vld [vmem:[#allocation2 + $0x78] sm:$0xff] }
 0x209   : > { %1425 = vst.msk [vmem:[#allocation2 + $0x10] sm:$0xff] %vm1117_vm4, %v3239_v42  ;;  %2606 = vpow2.f32 %v883_v39 }
 0x20a   : > { %v824_v48 = vpop.xlane.xlu1 %823  ;;  %926 = vperm.xlu1 %2603, %v3222_v33   ;;  %1427 = vst.msk [vmem:[#allocation2 + $0x20] sm:$0xff] %vm1117_vm4, %v3244_v46  ;;  %v865_v14 = vsub.f32 %v3231_v38, %v3244_v46 }
 0x20b   : > { %v850_v51 = vmax.f32 %v3241_v45, %v824_v48  ;;  %v826_v52 = vpop.xlane.xlu0 %825 }
 0x20c   : > { %v3259_v55 = vmax.f32 %v3248_v47, %v826_v52  ;;  %v885_v18 = vmul.f32 1.442695, %v865_v14 }
 0x20d   : > { %1428 = vst.msk [vmem:[#allocation2 + $0x28] sm:$0xff] %vm1117_vm4, %v850_v51  ;;  %v866_v28 = vsub.f32 %v3241_v45, %v850_v51 }
 0x20e   : > { %v828_v57 = vpop.xlane.xlu1 %827  ;;  %921 = vperm.xlu1 %2603, %v3239_v42   ;;  %1429 = vst.msk [vmem:[#allocation2 + $0x30] sm:$0xff] %vm1117_vm4, %v3259_v55 }
 0x20f   : > { %v852_v6 = vmax.f32 %v3256_v54, %v828_v57  ;;  %v830_v13 = vpop.xlane.xlu0 %829  ;;  %v887_v48 = vmul.f32 1.442695, %v866_v28 }
 0x210   : > { %v3271_v16 = vmax.f32 %v3262_v56, %v830_v13 }
 0x211   : > { %1430 = vst.msk [vmem:[#allocation2 + $0x38] sm:$0xff] %vm1117_vm4, %v852_v6  ;;  %v868_v49 = vsub.f32 %v3256_v54, %v852_v6  ;;  %2608 = vpow2.f32 %v887_v48 }
 0x212   : > { %v832_v19 = vpop.xlane.xlu1 %831  ;;  %936 = vperm.xlu1 %2603, %v850_v51   ;;  %1431 = vst.msk [vmem:[#allocation2 + $0x40] sm:$0xff] %vm1117_vm4, %v3271_v16  ;;  %v862_v51 = vsub.f32 %v3214_v29, %v3225_v36  ;;  %v863_v29 = vsub.f32 %v3227_v37, %v3239_v42  ;;  %v3325_v36 = vpop.eup %2604 }
 0x213   : > { %v854_v20 = vmax.f32 %v806_v15, %v832_v19  ;;  %v834_v21 = vpop.xlane.xlu0 %833  ;;  %v891_v54 = vmul.f32 1.442695, %v868_v49  ;;  %v867_v19 = vsub.f32 %v3248_v47, %v3259_v55 }
 0x214   : > { %v3281_v23 = vmax.f32 %v3274_v17, %v834_v21  ;;  %v879_v58 = vmul.f32 1.442695, %v862_v51  ;;  %v881_v13 = vmul.f32 1.442695, %v863_v29  ;;  %v869_v21 = vsub.f32 %v3262_v56, %v3271_v16 }
 0x215   : > { %1432 = vst.msk [vmem:[#allocation2 + $0x48] sm:$0xff] %vm1117_vm4, %v854_v20  ;;  %956 = vperm.xlu0 %2602, %v854_v20   ;;  %v870_v57 = vsub.f32 %v806_v15, %v854_v20  ;;  %2610 = vpow2.f32 %v891_v54  ;;  %v3331_v15 = vpop.eup %2606 }
 0x216   : > { %v836_v27 = vpop.xlane.xlu1 %835  ;;  %931 = vperm.xlu1 %2603, %v3244_v46   ;;  %1433 = vst.msk [vmem:[#allocation2 + $0x50] sm:$0xff] %vm1117_vm4, %v3281_v23  ;;  %2612 = vpow2.f32 %v879_v58  ;;  %v889_v46 = vmul.f32 1.442695, %v867_v19  ;;  %v893_v47 = vmul.f32 1.442695, %v869_v21 }
 0x217   : > { %v856_v30 = vmax.f32 %v808_v22, %v836_v27  ;;  %v838_v31 = vpop.xlane.xlu0 %837  ;;  %v895_v59 = vmul.f32 1.442695, %v870_v57 }
 0x218   : > { %v3292_v34 = vmax.f32 %v3284_v24, %v838_v31 }
 0x219   : > { %1434 = vst.msk [vmem:[#allocation2 + $0x58] sm:$0xff] %vm1117_vm4, %v856_v30  ;;  %966 = vperm.xlu0 %2602, %v856_v30   ;;  %2614 = vpow2.f32 %v895_v59 }
 0x21a   : > { %v840_v33 = vpop.xlane.xlu1 %839  ;;  %946 = vperm.xlu1 %2603, %v852_v6   ;;  %1435 = vst.msk [vmem:[#allocation2 + $0x60] sm:$0xff] %vm1117_vm4, %v3292_v34  ;;  %v872_v6 = vsub.f32 %v808_v22, %v856_v30  ;;  %2616 = vpow2.f32 %v881_v13 }
 0x21b   : > { %v858_v40 = vmax.f32 %v810_v32, %v840_v33  ;;  %v842_v41 = vpop.xlane.xlu0 %841  ;;  %v3337_v20 = vpop.eup %2608 }
 0x21c   : > { %v3303_v44 = vmax.f32 %v3295_v35, %v842_v41  ;;  %v899_v37 = vmul.f32 1.442695, %v872_v6 }
 0x21d   : > { %1436 = vst.msk [vmem:[#allocation2 + $0x68] sm:$0xff] %vm1117_vm4, %v858_v40  ;;  %976 = vperm.xlu0 %2602, %v858_v40   ;;  %v874_v42 = vsub.f32 %v810_v32, %v858_v40 }
 0x21e   : > { %941 = vperm.xlu1 %2603, %v3259_v55   ;;  %v844_v45 = vpop.xlane.xlu1 %843  ;;  %v875_v50 = vsub.f32 %v3295_v35, %v3303_v44  ;;  %1437 = vst.msk [vmem:[#allocation2 + $0x70] sm:$0xff] %vm1117_vm4, %v3303_v44  ;;  %2618 = vpow2.f32 %v899_v37  ;;  %v871_v55 = vsub.f32 %v3274_v17, %v3281_v23 }
 0x21f   : > { %v3315_v52 = vmax.f32 %v3300_v43, %v844_v45  ;;  %v903_v38 = vmul.f32 1.442695, %v874_v42  ;;  %2620 = vpow2.f32 %v885_v18  ;;  %v3343_v22 = vpop.eup %2610 }
 0x220   : > { %v3345_v26 = vpop.eup %2612  ;;  %v897_v56 = vmul.f32 1.442695, %v871_v55 }
 0x221   : > { %v876_v53 = vsub.f32 %v3300_v43, %v3315_v52  ;;  %1438 = vst.msk [vmem:[#allocation2 + $0x78] sm:$0xff] %vm1117_vm4, %v3315_v52  ;;  %986 = vperm.xlu0 %2602, %v3315_v52   ;;  %2622 = vpow2.f32 %v903_v38 }
 0x222   : > { %951 = vperm.xlu1 %2603, %v3271_v16   ;;  %2624 = vpow2.f32 %v889_v46  ;;  %v873_v16 = vsub.f32 %v3284_v24, %v3292_v34 }
 0x223   : > { %v3351_v25 = vpop.eup %2614  ;;  %2626 = vpow2.f32 %v893_v47 }
 0x224   : > { %v3353_v27 = vpop.eup %2616  ;;  %2628 = vpow2.f32 %v897_v56  ;;  %v901_v17 = vmul.f32 1.442695, %v873_v16 }
 0x225   : > { %1152 = vperm.xlu0 %2602, %v3325_v36  }
 0x226   : > { %961 = vperm.xlu1 %2603, %v3281_v23   ;;  %2630 = vpow2.f32 %v901_v17 }
 0x228   : > { %v3359_v30 = vpop.eup %2618 }
 0x229   : > { %1167 = vperm.xlu0 %2602, %v3331_v15   ;;  %v3361_v31 = vpop.eup %2620 }
 0x22a   : > { %971 = vperm.xlu1 %2603, %v3292_v34  }
 0x22b   : > { %v3365_v23 = vpop.eup %2622 }
 0x22c   : > { %v3367_v32 = vpop.eup %2624 }
 0x22d   : > { %1177 = vperm.xlu0 %2602, %v3337_v20   ;;  %v3371_v24 = vpop.eup %2626 }
 0x22e   : > { %981 = vperm.xlu1 %2603, %v3303_v44   ;;  %v3374_v34 = vpop.eup %2628 }
 0x230   : > { %v3377_v39 = vpop.eup %2630 }
 0x231   : > { %1187 = vperm.xlu0 %2602, %v3343_v22  }
 0x232   : > { %1157 = vperm.xlu1 %2603, %v3345_v26  }
 0x235   : > { %1197 = vperm.xlu0 %2602, %v3351_v25  }
 0x236   : > { %1162 = vperm.xlu1 %2603, %v3353_v27  }
 0x239   : > { %1207 = vperm.xlu0 %2602, %v3359_v30  }
 0x23a   : > { %1172 = vperm.xlu1 %2603, %v3361_v31  }
 0x23d   : > { %1217 = vperm.xlu0 %2602, %v3365_v23  }
 0x23e   : > { %1182 = vperm.xlu1 %2603, %v3367_v32  }
 0x242   : > { %1192 = vperm.xlu1 %2603, %v3371_v24  }
 0x246   : > { %1202 = vperm.xlu1 %2603, %v3374_v34  }
 0x24a   : > { %1212 = vperm.xlu1 %2603, %v3377_v39  }
 0x281   : > { %v912_v28 = vpop.permute.xlu0 %911 }
 0x282   : > { %v989_v33 = vsub.f32 %v3153_v61, %v912_v28 }
 0x284   : > { %v1005_v40 = vmul.f32 1.442695, %v989_v33 }
 0x285   : > { %v917_v41 = vpop.permute.xlu1 %916 }
 0x286   : > { %2632 = vpow2.f32 %v1005_v40  ;;  %v990_v48 = vsub.f32 %v3151_v60, %v917_v41 }
 0x288   : > { %v1007_v49 = vmul.f32 1.442695, %v990_v48 }
 0x289   : > { %v927_v45 = vpop.permute.xlu1 %926 }
 0x28a   : > { %2634 = vpow2.f32 %v1007_v49  ;;  %v992_v51 = vsub.f32 %v3156_v62, %v927_v45 }
 0x28c   : > { %v1011_v54 = vmul.f32 1.442695, %v992_v51 }
 0x28d   : > { %v922_v57 = vpop.permute.xlu1 %921 }
 0x28e   : > { %2636 = vpow2.f32 %v1011_v54  ;;  %v991_v58 = vsub.f32 %v3159_v63, %v922_v57 }
 0x290   : > { %v2633_v29 = vpop.eup %2632  ;;  %v1009_v59 = vmul.f32 1.442695, %v991_v58 }
 0x291   : > { %v937_v6 = vpop.permute.xlu1 %936  ;;  %1069 = vadd.xlane.f32.xlu1 %v2633_v29  ;;  %2323 = vmatprep.mubr.f32.mxu1 %v2633_v29 }
 0x292   : > { %2638 = vpow2.f32 %v1009_v59  ;;  %v994_v61 = vsub.f32 %v3162_v0, %v937_v6 }
 0x294   : > { %v2635_v13 = vpop.eup %2634  ;;  %v1015_v60 = vmul.f32 1.442695, %v994_v61  ;;  %v957_v14 = vpop.permute.xlu0 %956 }
 0x295   : > { %v932_v37 = vpop.permute.xlu1 %931  ;;  %1071 = vadd.xlane.f32.xlu0 %v2635_v13  ;;  %2324 = vmatmul.mubr.f32.vlgmr.msra.gmra.mrb[0].mxu1 %v2635_v13  ;;  %v998_v46 = vsub.f32 %v3174_v4, %v957_v14 }
 0x296   : > { %2640 = vpow2.f32 %v1015_v60  ;;  %v993_v62 = vsub.f32 %v3165_v1, %v932_v37 }
 0x297   : > { %v1023_v1 = vmul.f32 1.442695, %v998_v46 }
 0x298   : > { %v2637_v42 = vpop.eup %2636  ;;  %v1013_v18 = vmul.f32 1.442695, %v993_v62  ;;  %v967_v63 = vpop.permute.xlu0 %966 }
 0x299   : > { %v947_v19 = vpop.permute.xlu1 %946  ;;  %1075 = vadd.xlane.f32.xlu1 %v2637_v42  ;;  %v1000_v16 = vsub.f32 %v3180_v7, %v967_v63 }
 0x29a   : > { %2642 = vpow2.f32 %v1013_v18  ;;  %v996_v38 = vsub.f32 %v3168_v2, %v947_v19  ;;  %v907_v18 = vmul.f32 1.442695, %v876_v53 }
 0x29b   : > { %v1027_v4 = vmul.f32 1.442695, %v1000_v16 }
 0x29c   : > { %v2639_v0 = vpop.eup %2638  ;;  %v1019_v21 = vmul.f32 1.442695, %v996_v38  ;;  %v977_v55 = vpop.permute.xlu0 %976 }
 0x29d   : > { %v942_v47 = vpop.permute.xlu1 %941  ;;  %1073 = vadd.xlane.f32.xlu0 %v2639_v0  ;;  %2326 = vmatprep.mubr.f32.mxu1 %v2639_v0  ;;  %v1002_v40 = vsub.f32 %v3186_v9, %v977_v55 }
 0x29e   : > { %2644 = vpow2.f32 %v1019_v21  ;;  %v995_v56 = vsub.f32 %v3171_v3, %v942_v47  ;;  %2327 = vmatmul.mubr.f32.gmra.mrb[2].mxu1 %v2637_v42  ;;  %v905_v42 = vmul.f32 1.442695, %v875_v50 }
 0x29f   : > { %v1031_v7 = vmul.f32 1.442695, %v1002_v40 }
 0x2a0   : > { %v2641_v17 = vpop.eup %2640  ;;  %v1017_v28 = vmul.f32 1.442695, %v995_v56  ;;  %v987_v48 = vpop.permute.xlu0 %986 }
 0x2a1   : > { %v952_v33 = vpop.permute.xlu1 %951  ;;  %1079 = vadd.xlane.f32.xlu1 %v2641_v17  ;;  %v1004_v51 = vsub.f32 %v3192_v11, %v987_v48 }
 0x2a2   : > { %2646 = vpow2.f32 %v1017_v28  ;;  %v997_v2 = vsub.f32 %v3177_v5, %v952_v33  ;;  %v1038_v33 = vld [vmem:[#allocation3 + $0x8] sm:$0xff] }
 0x2a3   : > { %2648 = vpow2.f32 %v1023_v1  ;;  %v1035_v58 = vmul.f32 1.442695, %v1004_v51  ;;  %v1037_v1 = vld [vmem:[#allocation3] sm:$0xff] }
 0x2a4   : > { %v2643_v41 = vpop.eup %2642  ;;  %v1021_v49 = vmul.f32 1.442695, %v997_v2  ;;  %v3410_v44 = vpop.permute.xlu0 %1152  ;;  %v1053_v16 = vmul.f32 %v3325_v36, %v1037_v1  ;;  %v1047_v1 = vld [vmem:[#allocation3 + $0x50] sm:$0xff] }
 0x2a5   : > { %v962_v45 = vpop.permute.xlu1 %961  ;;  %1077 = vadd.xlane.f32.xlu0 %v2643_v41  ;;  %2329 = vmatprep.mubr.f32.mxu1 %v2643_v41  ;;  %v1040_v41 = vld [vmem:[#allocation3 + $0x18] sm:$0xff] }
 0x2a6   : > { %2650 = vpow2.f32 %v1021_v49  ;;  %v999_v3 = vsub.f32 %v3183_v8, %v962_v45  ;;  %2330 = vmatmul.mubr.f32.gmra.mrb[4].mxu1 %v2641_v17  ;;  %v1056_v49 = vmul.f32 %v3331_v15, %v1040_v41 }
 0x2a7   : > { %2652 = vpow2.f32 %v1027_v4  ;;  %v1054_v4 = vmul.f32 %v3345_v26, %v1038_v33  ;;  %v1063_v33 = vmul.f32 %v3374_v34, %v1047_v1  ;;  %v1051_v34 = vld [vmem:[#allocation3 + $0x70] sm:$0xff] }
 0x2a8   : > { %v2645_v54 = vpop.eup %2644  ;;  %v1025_v5 = vmul.f32 1.442695, %v999_v3  ;;  %v3414_v38 = vpop.permute.xlu0 %1167  ;;  %v1039_v3 = vld [vmem:[#allocation3 + $0x10] sm:$0xff] }
 0x2a9   : > { %v972_v57 = vpop.permute.xlu1 %971  ;;  %1083 = vadd.xlane.f32.xlu1 %v2645_v54  ;;  %v1055_v36 = vmul.f32 %v3353_v27, %v1039_v3 }
 0x2aa   : > { %2654 = vpow2.f32 %v1025_v5  ;;  %v1001_v9 = vsub.f32 %v3189_v10, %v972_v57 }
 0x2ab   : > { %2656 = vpow2.f32 %v1031_v7 }
 0x2ac   : > { %v2647_v29 = vpop.eup %2646  ;;  %v1029_v59 = vmul.f32 1.442695, %v1001_v9  ;;  %v3418_v52 = vpop.permute.xlu0 %1177  ;;  %v1041_v9 = vld [vmem:[#allocation3 + $0x20] sm:$0xff] }
 0x2ad   : > { %v2649_v6 = vpop.eup %2648  ;;  %1081 = vadd.xlane.f32.xlu0 %v2647_v29  ;;  %v982_v61 = vpop.permute.xlu1 %981  ;;  %2332 = vmatprep.mubr.f32.mxu1 %v2647_v29  ;;  %v1057_v15 = vmul.f32 %v3361_v31, %v1041_v9 }
 0x2ae   : > { %2658 = vpow2.f32 %v1029_v59  ;;  %v1003_v8 = vsub.f32 %v3195_v12, %v982_v61  ;;  %1087 = vadd.xlane.f32.xlu1 %v2649_v6  ;;  %2333 = vmatmul.mubr.f32.gmra.mrb[6].mxu1 %v2645_v54  ;;  %v1042_v54 = vld [vmem:[#allocation3 + $0x28] sm:$0xff]  ;;  %v1044_v59 = vld [vmem:[#allocation3 + $0x38] sm:$0xff] }
 0x2af   : > { %2660 = vpow2.f32 %v1035_v58  ;;  %v1058_v26 = vmul.f32 %v3337_v20, %v1042_v54  ;;  %v1060_v27 = vmul.f32 %v3343_v22, %v1044_v59  ;;  %v1136_v59 = vld [vmem:[#allocation4 + $0x10] sm:$0xff] }
 0x2b0   : > { %v2651_v11 = vpop.eup %2650  ;;  %v1033_v13 = vmul.f32 1.442695, %v1003_v8  ;;  %v3422_v46 = vpop.permute.xlu0 %1187  ;;  %v1043_v8 = vld [vmem:[#allocation3 + $0x30] sm:$0xff] }
 0x2b1   : > { %v2653_v60 = vpop.eup %2652  ;;  %1085 = vadd.xlane.f32.xlu0 %v2651_v11  ;;  %2335 = vmatprep.mubr.f32.mxu1 %v2651_v11  ;;  %v3408_v35 = vpop.permute.xlu1 %1157  ;;  %v1059_v20 = vmul.f32 %v3367_v32, %v1043_v8 }
 0x2b2   : > { %2662 = vpow2.f32 %v1033_v13  ;;  %1091 = vadd.xlane.f32.xlu1 %v2653_v60  ;;  %2336 = vmatmul.mubr.f32.gmra.mrb[8].mxu1 %v2649_v6  ;;  %v1046_v13 = vld [vmem:[#allocation3 + $0x48] sm:$0xff] }
 0x2b3   : > { %2664 = vpow2.f32 %v905_v42 }
 0x2b4   : > { %v2655_v10 = vpop.eup %2654  ;;  %2666 = vpow2.f32 %v907_v18  ;;  %v3426_v21 = vpop.permute.xlu0 %1197 }
 0x2b5   : > { %v2657_v14 = vpop.eup %2656  ;;  %1089 = vadd.xlane.f32.xlu0 %v2655_v10  ;;  %2338 = vmatprep.mubr.f32.mxu1 %v2655_v10  ;;  %v3412_v50 = vpop.permute.xlu1 %1162 }
 0x2b6   : > { %1095 = vadd.xlane.f32.xlu1 %v2657_v14  ;;  %2339 = vmatmul.mubr.f32.gmra.mrb[10].mxu1 %v2653_v60  ;;  %v1062_v60 = vmul.f32 %v3351_v25, %v1046_v13  ;;  %v1138_v13 = vld [vmem:[#allocation4 + $0x20] sm:$0xff] }
 0x2b8   : > { %v2659_v37 = vpop.eup %2658  ;;  %v3431_v55 = vpop.permute.xlu0 %1207 }
 0x2b9   : > { %v2661_v62 = vpop.eup %2660  ;;  %1093 = vadd.xlane.f32.xlu0 %v2659_v37  ;;  %2341 = vmatprep.mubr.f32.mxu1 %v2659_v37  ;;  %v3416_v43 = vpop.permute.xlu1 %1172 }
 0x2ba   : > { %1099 = vadd.xlane.f32.xlu1 %v2661_v62  ;;  %2342 = vmatmul.mubr.f32.gmra.mrb[12].mxu1 %v2657_v14  ;;  %v1045_v14 = vld [vmem:[#allocation3 + $0x40] sm:$0xff] }
 0x2bb   : > { %v1061_v22 = vmul.f32 %v3371_v24, %v1045_v14  ;;  %v1049_v24 = vld [vmem:[#allocation3 + $0x60] sm:$0xff] }
 0x2bc   : > { %v2663_v12 = vpop.eup %2662  ;;  %v3436_v17 = vpop.permute.xlu0 %1217 }
 0x2bd   : > { %1097 = vadd.xlane.f32.xlu0 %v2663_v12  ;;  %2344 = vmatprep.mubr.f32.mxu1 %v2663_v12  ;;  %v3402_v63 = vpop.eup %2664  ;;  %v3420_v53 = vpop.permute.xlu1 %1182 }
 0x2be   : > { %2345 = vmatmul.mubr.f32.gmra.mrb[14].mxu1 %v2661_v62  ;;  %v3405_v19 = vpop.eup %2666  ;;  %v1048_v62 = vld [vmem:[#allocation3 + $0x58] sm:$0xff] }
 0x2bf   : > { %v1064_v42 = vmul.f32 %v3359_v30, %v1048_v62 }
 0x2c1   : > { %v3424_v0 = vpop.permute.xlu1 %1192 }
 0x2c5   : > { %v3428_v47 = vpop.permute.xlu1 %1202 }
 0x2c9   : > { %v3433_v56 = vpop.permute.xlu1 %1212 }
 0x2cb   : > { %1222 = vperm.xlu1 %2603, %v3402_v63  }
 0x2d3   : > { %1227 = vperm.xlu0 %2602, %v3405_v19  }
 0x31e   : > { %v1070_v28 = vpop.xlane.xlu1 %1069 }
 0x31f   : > { %v1101_v2 = vadd.f32 %v1070_v28, %v1053_v16  ;;  %v1050_v28 = vld [vmem:[#allocation3 + $0x68] sm:$0xff] }
 0x321   : > { %1118 = vst.msk [vmem:[#allocation3] sm:$0xff] %vm1117_vm4, %v1101_v2  ;;  %v1066_v2 = vmul.f32 %v3365_v23, %v1050_v28  ;;  %v1067_v23 = vmul.f32 %v3402_v63, %v1051_v34  ;;  %v1137_v63 = vld [vmem:[#allocation4 + $0x18] sm:$0xff] }
 0x322   : > { %v1072_v40 = vpop.xlane.xlu0 %1071 }
 0x323   : > { %v1102_v48 = vadd.f32 %v1072_v40, %v1054_v4 }
 0x325   : > { %1119 = vst.msk [vmem:[#allocation3 + $0x8] sm:$0xff] %vm1117_vm4, %v1102_v48  ;;  %v1052_v48 = vld [vmem:[#allocation3 + $0x78] sm:$0xff] }
 0x326   : > { %v1076_v45 = vpop.xlane.xlu1 %1075 }
 0x327   : > { %v1104_v7 = vadd.f32 %v1076_v45, %v1056_v49  ;;  %v1065_v49 = vmul.f32 %v3377_v39, %v1049_v24  ;;  %v1068_v45 = vmul.f32 %v3405_v19, %v1052_v48  ;;  %v1135_v39 = vld [vmem:[#allocation4 + $0x8] sm:$0xff] }
 0x328   : > { %v1147_v24 = vld [vmem:[#allocation4 + $0x68] sm:$0xff] }
 0x329   : > { %1121 = vst.msk [vmem:[#allocation3 + $0x18] sm:$0xff] %vm1117_vm4, %v1104_v7 }
 0x32a   : > { %v1074_v51 = vpop.xlane.xlu0 %1073 }
 0x32b   : > { %v1103_v5 = vadd.f32 %v1074_v51, %v1055_v36 }
 0x32d   : > { %1120 = vst.msk [vmem:[#allocation3 + $0x10] sm:$0xff] %vm1117_vm4, %v1103_v5 }
 0x32e   : > { %v1080_v57 = vpop.xlane.xlu1 %1079 }
 0x32f   : > { %v1106_v58 = vadd.f32 %v1080_v57, %v1058_v26  ;;  %v1134_v26 = vld [vmem:[#allocation4] sm:$0xff]  ;;  %v1231_v57 = vmul.f32 %v3408_v35, %v1135_v39 }
 0x330   : > { %v1230_v19 = vmul.f32 %v3410_v44, %v1134_v26  ;;  %v1139_v44 = vld [vmem:[#allocation4 + $0x28] sm:$0xff] }
 0x331   : > { %1123 = vst.msk [vmem:[#allocation3 + $0x28] sm:$0xff] %vm1117_vm4, %v1106_v58 }
 0x332   : > { %v1078_v29 = vpop.xlane.xlu0 %1077 }
 0x333   : > { %v1105_v6 = vadd.f32 %v1078_v29, %v1057_v15 }
 0x335   : > { %1122 = vst.msk [vmem:[#allocation3 + $0x20] sm:$0xff] %vm1117_vm4, %v1105_v6  ;;  %v1233_v6 = vmul.f32 %v3414_v38, %v1137_v63  ;;  %v1604_v63 = vld [vmem:[%s3006_s15 + $0x8] sm:$0xff] (!%p2122_p0) }
 0x336   : > { %v1084_v61 = vpop.xlane.xlu1 %1083 }
 0x337   : > { %v1108_v11 = vadd.f32 %v1084_v61, %v1060_v27  ;;  %v1232_v27 = vmul.f32 %v3412_v50, %v1136_v59  ;;  %v1141_v50 = vld [vmem:[#allocation4 + $0x38] sm:$0xff] }
 0x338   : > { %v1237_v62 = vmul.f32 %v3422_v46, %v1141_v50 }
 0x339   : > { %1125 = vst.msk [vmem:[#allocation3 + $0x38] sm:$0xff] %vm1117_vm4, %v1108_v11 }
 0x33a   : > { %v1082_v10 = vpop.xlane.xlu0 %1081 }
 0x33b   : > { %v1088_v31 = vpop.xlane.xlu1 %1087  ;;  %v1107_v37 = vadd.f32 %v1082_v10, %v1059_v20  ;;  %v1235_v20 = vmul.f32 %v3418_v52, %v1139_v44  ;;  %v1608_v44 = vld [vmem:[%s3006_s15 + $0x28] sm:$0xff] (!%p2122_p0) }
 0x33c   : > { %v1110_v12 = vadd.f32 %v1088_v31, %v1062_v60  ;;  %v1234_v60 = vmul.f32 %v3416_v43, %v1138_v13 }
 0x33d   : > { %1124 = vst.msk [vmem:[#allocation3 + $0x30] sm:$0xff] %vm1117_vm4, %v1107_v37  ;;  %v1140_v37 = vld [vmem:[#allocation4 + $0x30] sm:$0xff] }
 0x33e   : > { %1127 = vst.msk [vmem:[#allocation3 + $0x48] sm:$0xff] %vm1117_vm4, %v1110_v12  ;;  %v1086_v18 = vpop.xlane.xlu0 %1085  ;;  %v1143_v12 = vld [vmem:[#allocation4 + $0x48] sm:$0xff] }
 0x33f   : > { %v1092_v16 = vpop.xlane.xlu1 %1091  ;;  %v1109_v32 = vadd.f32 %v1086_v18, %v1061_v22  ;;  %v1236_v22 = vmul.f32 %v3420_v53, %v1140_v37  ;;  %v1142_v18 = vld [vmem:[#allocation4 + $0x40] sm:$0xff] }
 0x340   : > { %v1112_v25 = vadd.f32 %v1092_v16, %v1064_v42  ;;  %v1239_v16 = vmul.f32 %v3426_v21, %v1143_v12  ;;  %v1238_v28 = vmul.f32 %v3424_v0, %v1142_v18  ;;  %v1466_v18 = vld [vmem:[#allocation3 + $0x38] sm:$0xff] (!%p2122_p0) }
 0x341   : > { %1126 = vst.msk [vmem:[#allocation3 + $0x40] sm:$0xff] %vm1117_vm4, %v1109_v32  ;;  %v1145_v32 = vld [vmem:[#allocation4 + $0x58] sm:$0xff] }
 0x342   : > { %1129 = vst.msk [vmem:[#allocation3 + $0x58] sm:$0xff] %vm1117_vm4, %v1112_v25  ;;  %v1090_v4 = vpop.xlane.xlu0 %1089  ;;  %v1241_v53 = vmul.f32 %v3431_v55, %v1145_v32 }
 0x343   : > { %v1096_v40 = vpop.xlane.xlu1 %1095  ;;  %v1111_v41 = vadd.f32 %v1090_v4, %v1063_v33  ;;  %v1144_v33 = vld [vmem:[#allocation4 + $0x50] sm:$0xff] }
 0x344   : > { %v1114_v30 = vadd.f32 %v1096_v40, %v1066_v2  ;;  %v1240_v40 = vmul.f32 %v3428_v47, %v1144_v33 }
 0x345   : > { %1128 = vst.msk [vmem:[#allocation3 + $0x50] sm:$0xff] %vm1117_vm4, %v1111_v41  ;;  %v1146_v41 = vld [vmem:[#allocation4 + $0x60] sm:$0xff] }
 0x346   : > { %1131 = vst.msk [vmem:[#allocation3 + $0x68] sm:$0xff] %vm1117_vm4, %v1114_v30  ;;  %v1094_v3 = vpop.xlane.xlu0 %1093 }
 0x347   : > { %v1100_v7 = vpop.xlane.xlu1 %1099  ;;  %v1113_v36 = vadd.f32 %v1094_v3, %v1065_v49  ;;  %v1243_v49 = vmul.f32 %v3436_v17, %v1147_v24  ;;  %v1149_v3 = vld [vmem:[#allocation4 + $0x78] sm:$0xff] }
 0x348   : > { %v1116_v51 = vadd.f32 %v1100_v7, %v1068_v45  ;;  %v1242_v45 = vmul.f32 %v3433_v56, %v1146_v41  ;;  %v1148_v7 = vld [vmem:[#allocation4 + $0x70] sm:$0xff] }
 0x349   : > { %1130 = vst.msk [vmem:[#allocation3 + $0x60] sm:$0xff] %vm1117_vm4, %v1113_v36  ;;  %v1470_v13 = vld [vmem:[#allocation3 + $0x58] sm:$0xff] (!%p2122_p0) }
 0x34a   : > { %1133 = vst.msk [vmem:[#allocation3 + $0x78] sm:$0xff] %vm1117_vm4, %v1116_v51  ;;  %v1098_v54 = vpop.xlane.xlu0 %1097 }
 0x34b   : > { %v1115_v5 = vadd.f32 %v1098_v54, %v1067_v23  ;;  %v1223_v47 = vpop.permute.xlu1 %1222 }
 0x34d   : > { %1132 = vst.msk [vmem:[#allocation3 + $0x70] sm:$0xff] %vm1117_vm4, %v1115_v5  ;;  %v1244_v5 = vmul.f32 %v1223_v47, %v1148_v7  ;;  %v1472_v37 = vld [vmem:[#allocation3 + $0x68] sm:$0xff] (!%p2122_p0) }
 0x352   : > { %v1228_v55 = vpop.permute.xlu0 %1227 }
 0x353   : > { %v1245_v54 = vmul.f32 %v1228_v55, %v1149_v3 }
 0x354   : > { %v1473_v12 = vld [vmem:[#allocation3 + $0x70] sm:$0xff] (!%p2122_p0) }
 0x368   : > { %v2325_v9 = vpop.f32.mrb[0].mxu1 }
 0x369   : > { %v1392_v58 = vadd.f32 %v2325_v9, %v1231_v57  ;;  %v1312_v15 = vpop.f32.mrb[1].mxu1  ;;  %v1460_v57 = vld [vmem:[#allocation3 + $0x8] sm:$0xff] (!%p2122_p0)  ;;  %v2834_v9 = vmov (!%p2122_p0), 0  }
 0x36a   : > { %v1391_v29 = vadd.f32 %v1312_v15, %v1230_v19  ;;  %v1459_v19 = vld [vmem:[#allocation3] sm:$0xff] (!%p2122_p0)  ;;  %2669 = vset.pattern.permute.xlu1 (!%p2122_p0), %v2834_v9  ;;  %2668 = vset.pattern.permute.xlu0 (!%p2122_p0), %v2834_v9 }
 0x36b   : > { %1408 = vst.msk [vmem:[#allocation4 + $0x8] sm:$0xff] %vm555_vm2, %v1392_v58  ;;  %1482 = vperm.xlu1 (!%p2122_p0), %2669, %v1460_v57   ;;  %1477 = vperm.xlu0 (!%p2122_p0), %2668, %v1459_v19   ;;  %v1468_v58 = vld [vmem:[#allocation3 + $0x48] sm:$0xff] (!%p2122_p0)  ;;  %v1467_v15 = vld [vmem:[#allocation3 + $0x40] sm:$0xff] (!%p2122_p0) }
 0x36c   : > { %1407 = vst.msk [vmem:[#allocation4] sm:$0xff] %vm555_vm2, %v1391_v29  ;;  %v1603_v29 = vld [vmem:[%s3006_s15] sm:$0xff] (!%p2122_p0) }
 0x36d   : > { %v2467_v59 = vpack.c.bf16 (!%p2122_p0), %v1604_v63, %v1603_v29 }
 0x36f   : > { %1522 = vperm.xlu1 (!%p2122_p0), %2669, %v1468_v58   ;;  %1517 = vperm.xlu0 (!%p2122_p0), %2668, %v1467_v15  }
 0x370   : > { %2468 = vmatprep.subr.bf16.mxu0 (!%p2122_p0), %v2467_v59  ;;  %2483 = vmatprep.subr.bf16.mxu1 (!%p2122_p0), %v2467_v59 }
 0x371   : > { %v2328_v61 = vpop.f32.mrb[2].mxu1  ;;  %2470 = vmatpush3.bf16.msra.mxu0 (!%p2122_p0), %v2467_v59  ;;  %2487 = vmatpush3.bf16.msra.mxu1 (!%p2122_p0), %v2467_v59 }
 0x372   : > { %v1394_v8 = vadd.f32 %v2328_v61, %v1233_v6  ;;  %v1322_v11 = vpop.f32.mrb[3].mxu1  ;;  %v1605_v6 = vld [vmem:[%s3006_s15 + $0x10] sm:$0xff] (!%p2122_p0) }
 0x373   : > { %v1393_v35 = vadd.f32 %v1322_v11, %v1232_v27  ;;  %v1606_v27 = vld [vmem:[%s3006_s15 + $0x18] sm:$0xff] (!%p2122_p0)  ;;  %v1469_v61 = vld [vmem:[#allocation3 + $0x50] sm:$0xff] (!%p2122_p0)  ;;  %v1443_v33 = vld [vmem:[#allocation4] sm:$0xff] (!%p2122_p0) }
 0x374   : > { %1410 = vst.msk [vmem:[#allocation4 + $0x18] sm:$0xff] %vm555_vm2, %v1394_v8  ;;  %v1461_v8 = vld [vmem:[#allocation3 + $0x10] sm:$0xff] (!%p2122_p0)  ;;  %v2471_v11 = vpack.c.bf16 (!%p2122_p0), %v1606_v27, %v1605_v6  ;;  %1527 = vperm.xlu1 (!%p2122_p0), %2669, %v1469_v61  }
 0x375   : > { %1409 = vst.msk [vmem:[#allocation4 + $0x10] sm:$0xff] %vm555_vm2, %v1393_v35  ;;  %v1607_v35 = vld [vmem:[%s3006_s15 + $0x20] sm:$0xff] (!%p2122_p0)  ;;  %1487 = vperm.xlu0 (!%p2122_p0), %2668, %v1461_v8  }
 0x376   : > { %2472 = vmatprep.subr.bf16.mxu0 (!%p2122_p0), %v2471_v11  ;;  %2484 = vmatprep.subr.bf16.mxu1 (!%p2122_p0), %v2471_v11 }
 0x377   : > { %2474 = vmatpush3.bf16.msra.mxu0 (!%p2122_p0), %v2471_v11  ;;  %2488 = vmatpush3.bf16.msra.mxu1 (!%p2122_p0), %v2471_v11 }
 0x378   : > { %1532 = vperm.xlu1 (!%p2122_p0), %2669, %v1470_v13  }
 0x379   : > { %v2331_v10 = vpop.f32.mrb[4].mxu1 }
 0x37a   : > { %v1396_v14 = vadd.f32 %v2331_v10, %v1235_v20  ;;  %v1332_v31 = vpop.f32.mrb[5].mxu1  ;;  %v1462_v20 = vld [vmem:[#allocation3 + $0x18] sm:$0xff] (!%p2122_p0)  ;;  %v1609_v10 = vld [vmem:[%s3006_s15 + $0x30] sm:$0xff] (!%p2122_p0) }
 0x37b   : > { %v1395_v38 = vadd.f32 %v1332_v31, %v1234_v60  ;;  %v2475_v60 = vpack.c.bf16 (!%p2122_p0), %v1608_v44, %v1607_v35  ;;  %1492 = vperm.xlu0 (!%p2122_p0), %2668, %v1462_v20   ;;  %v1471_v31 = vld [vmem:[#allocation3 + $0x60] sm:$0xff] (!%p2122_p0) }
 0x37c   : > { %1412 = vst.msk [vmem:[#allocation4 + $0x28] sm:$0xff] %vm555_vm2, %v1396_v14  ;;  %v1610_v14 = vld [vmem:[%s3006_s15 + $0x38] sm:$0xff] (!%p2122_p0)  ;;  %1537 = vperm.xlu1 (!%p2122_p0), %2669, %v1471_v31  }
 0x37d   : > { %1411 = vst.msk [vmem:[#allocation4 + $0x20] sm:$0xff] %vm555_vm2, %v1395_v38  ;;  %v1463_v38 = vld [vmem:[#allocation3 + $0x20] sm:$0xff] (!%p2122_p0)  ;;  %2476 = vmatprep.subr.bf16.mxu0 (!%p2122_p0), %v2475_v60  ;;  %2485 = vmatprep.subr.bf16.mxu1 (!%p2122_p0), %v2475_v60  ;;  %v2479_v50 = vpack.c.bf16 (!%p2122_p0), %v1610_v14, %v1609_v10 }
 0x37e   : > { %2478 = vmatpush3.bf16.msra.mxu0 (!%p2122_p0), %v2475_v60  ;;  %2489 = vmatpush3.bf16.msra.mxu1 (!%p2122_p0), %v2475_v60 }
 0x37f   : > { %1497 = vperm.xlu0 (!%p2122_p0), %2668, %v1463_v38   ;;  %2480 = vmatprep.subr.bf16.mxu0 (!%p2122_p0), %v2479_v50 }
 0x380   : > { %2486 = vmatprep.subr.bf16.mxu1 (!%p2122_p0), %v2479_v50  ;;  %1542 = vperm.xlu1 (!%p2122_p0), %2669, %v1472_v37  }
 0x381   : > { %v2334_v42 = vpop.f32.mrb[6].mxu1 }
 0x382   : > { %v1398_v52 = vadd.f32 %v2334_v42, %v1237_v62  ;;  %v1342_v1 = vpop.f32.mrb[7].mxu1  ;;  %v1464_v62 = vld [vmem:[#allocation3 + $0x28] sm:$0xff] (!%p2122_p0)  ;;  %2482 = vmatpush3.bf16.msra.mxu0 (!%p2122_p0), %v2479_v50  ;;  %2490 = vmatpush3.bf16.msra.mxu1 (!%p2122_p0), %v2479_v50  ;;  %v1474_v42 = vld [vmem:[#allocation3 + $0x78] sm:$0xff] (!%p2122_p0) }
 0x383   : > { %v1397_v43 = vadd.f32 %v1342_v1, %v1236_v22  ;;  %1502 = vperm.xlu0 (!%p2122_p0), %2668, %v1464_v62   ;;  %v1465_v22 = vld [vmem:[#allocation3 + $0x30] sm:$0xff] (!%p2122_p0)  ;;  %v1448_v11 = vld [vmem:[#allocation4 + $0x28] sm:$0xff] (!%p2122_p0) }
 0x384   : > { %1414 = vst.msk [vmem:[#allocation4 + $0x38] sm:$0xff] %vm555_vm2, %v1398_v52  ;;  %1547 = vperm.xlu1 (!%p2122_p0), %2669, %v1473_v12   ;;  %v1447_v15 = vld [vmem:[#allocation4 + $0x20] sm:$0xff] (!%p2122_p0) }
 0x385   : > { %1413 = vst.msk [vmem:[#allocation4 + $0x30] sm:$0xff] %vm555_vm2, %v1397_v43  ;;  %v2337_v25 = vpop.f32.mrb[8].mxu1 }
 0x386   : > { %v1400_v46 = vadd.f32 %v2337_v25, %v1239_v16  ;;  %v1352_v2 = vpop.f32.mrb[9].mxu1  ;;  %v1444_v25 = vld [vmem:[#allocation4 + $0x8] sm:$0xff] (!%p2122_p0) }
 0x387   : > { %v1399_v4 = vadd.f32 %v1352_v2, %v1238_v28  ;;  %1507 = vperm.xlu0 (!%p2122_p0), %2668, %v1465_v22  }
 0x388   : > { %1416 = vst.msk [vmem:[#allocation4 + $0x48] sm:$0xff] %vm555_vm2, %v1400_v46  ;;  %1552 = vperm.xlu1 (!%p2122_p0), %2669, %v1474_v42  }
 0x389   : > { %1415 = vst.msk [vmem:[#allocation4 + $0x40] sm:$0xff] %vm555_vm2, %v1399_v4  ;;  %v2340_v21 = vpop.f32.mrb[10].mxu1 }
 0x38a   : > { %v1402_v48 = vadd.f32 %v2340_v21, %v1241_v53  ;;  %v1362_v0 = vpop.f32.mrb[11].mxu1 }
 0x38b   : > { %v1401_v30 = vadd.f32 %v1362_v0, %v1240_v40  ;;  %1512 = vperm.xlu0 (!%p2122_p0), %2668, %v1466_v18   ;;  %v1450_v62 = vld [vmem:[#allocation4 + $0x38] sm:$0xff] (!%p2122_p0) }
 0x38c   : > { %1418 = vst.msk [vmem:[#allocation4 + $0x58] sm:$0xff] %vm555_vm2, %v1402_v48  ;;  %v1449_v10 = vld [vmem:[#allocation4 + $0x30] sm:$0xff] (!%p2122_p0) }
 0x38d   : > { %1417 = vst.msk [vmem:[#allocation4 + $0x50] sm:$0xff] %vm555_vm2, %v1401_v30  ;;  %v2343_v34 = vpop.f32.mrb[12].mxu1 }
 0x38e   : > { %v1404_v36 = vadd.f32 %v2343_v34, %v1243_v49  ;;  %v1372_v51 = vpop.f32.mrb[13].mxu1  ;;  %v1445_v34 = vld [vmem:[#allocation4 + $0x10] sm:$0xff] (!%p2122_p0) }
 0x38f   : > { %v1403_v23 = vadd.f32 %v1372_v51, %v1242_v45  ;;  %1442 = sbr.rel (%p2122_p0) target bundleno = 1264 (0x4f0), region = 52  ;;  %v1452_v21 = vld [vmem:[#allocation4 + $0x48] sm:$0xff] (!%p2122_p0) }
 0x390   : > { %1420 = vst.msk [vmem:[#allocation4 + $0x68] sm:$0xff] %vm555_vm2, %v1404_v36  ;;  %v1451_v41 = vld [vmem:[#allocation4 + $0x40] sm:$0xff] (!%p2122_p0) }
 0x391   : > { %1419 = vst.msk [vmem:[#allocation4 + $0x60] sm:$0xff] %vm555_vm2, %v1403_v23  ;;  %v2346_v17 = vpop.f32.mrb[14].mxu1 }
 0x392   : > { %v1406_v39 = vadd.f32 %v2346_v17, %v1245_v54  ;;  %v1382_v26 = vpop.f32.mrb[15].mxu1  ;;  %v1446_v17 = vld [vmem:[#allocation4 + $0x18] sm:$0xff] (!%p2122_p0) }
 0x393   : > { %v1405_v56 = vadd.f32 %v1382_v26, %v1244_v5  ;;  %v1454_v5 = vld [vmem:[#allocation4 + $0x58] sm:$0xff] (!%p2122_p0) }
 0x394   : > { %1422 = vst.msk [vmem:[#allocation4 + $0x78] sm:$0xff] %vm555_vm2, %v1406_v39  ;;  %v1453_v55 = vld [vmem:[#allocation4 + $0x50] sm:$0xff] (!%p2122_p0) }
 0x395   : > { %1421 = vst.msk [vmem:[#allocation4 + $0x70] sm:$0xff] %vm555_vm2, %v1405_v56 }
 0x397   : > { %v1456_v8 = vld [vmem:[#allocation4 + $0x68] sm:$0xff] }
 0x398   : > { %v1455_v58 = vld [vmem:[#allocation4 + $0x60] sm:$0xff] }
 0x39b   : > { %v1458_v37 = vld [vmem:[#allocation4 + $0x78] sm:$0xff] }
 0x39c   : > { %v1457_v60 = vld [vmem:[#allocation4 + $0x70] sm:$0xff] }
 0x3ea   : > { %v1483_v52 = vpop.permute.xlu1 %1482  ;;  %v1478_v1 = vpop.permute.xlu0 %1477 }
 0x3eb   : > { %2670 = vrcp.f32 %v1483_v52  ;;  %v1588_v52 = vld [vmem:[#allocation5 + $0x8] sm:$0xff] }
 0x3ec   : > { %2672 = vrcp.f32 %v1478_v1  ;;  %v1587_v1 = vld [vmem:[#allocation5] sm:$0xff] }
 0x3ee   : > { %v1523_v43 = vpop.permute.xlu1 %1522  ;;  %v1518_v16 = vpop.permute.xlu0 %1517 }
 0x3ef   : > { %2674 = vrcp.f32 %v1523_v43 }
 0x3f0   : > { %2676 = vrcp.f32 %v1518_v16 }
 0x3f3   : > { %v1528_v32 = vpop.permute.xlu1 %1527 }
 0x3f4   : > { %v1488_v28 = vpop.permute.xlu0 %1487  ;;  %2678 = vrcp.f32 %v1528_v32 }
 0x3f5   : > { %2680 = vrcp.f32 %v1488_v28  ;;  %v2671_v46 = vpop.eup %2670 }
 0x3f6   : > { %v2673_v2 = vpop.eup %2672  ;;  %v1558_v24 = vmul.f32 %v2671_v46, %v1444_v25  ;;  %v1596_v25 = vld [vmem:[#allocation5 + $0x48] sm:$0xff] }
 0x3f7   : > { %v1533_v4 = vpop.permute.xlu1 %1532  ;;  %v1556_v40 = vmul.f32 %v2673_v2, %v1443_v33  ;;  %v1595_v33 = vld [vmem:[#allocation5 + $0x40] sm:$0xff] }
 0x3f8   : > { %2682 = vrcp.f32 %v1533_v4 }
 0x3f9   : > { %v2675_v48 = vpop.eup %2674  ;;  %2363 = vmatprep.mubr.msk.f32.mxu0 %vm555_vm2, %v1556_v40  ;;  %v1590_v40 = vld [vmem:[#allocation5 + $0x18] sm:$0xff] }
 0x3fa   : > { %v1493_v53 = vpop.permute.xlu0 %1492  ;;  %v2677_v0 = vpop.eup %2676  ;;  %2364 = vmatmul.mubr.msk.f32.vlgmr.msra.gmra.mrb[0].mxu0 %vm555_vm2, %v1558_v24  ;;  %v1574_v45 = vmul.f32 %v2675_v48, %v1452_v21  ;;  %v1598_v24 = vld [vmem:[#allocation5 + $0x58] sm:$0xff]  ;;  %v1597_v21 = vld [vmem:[#allocation5 + $0x50] sm:$0xff] }
 0x3fb   : > { %2684 = vrcp.f32 %v1493_v53  ;;  %v1538_v30 = vpop.permute.xlu1 %1537  ;;  %v1572_v3 = vmul.f32 %v2677_v0, %v1451_v41  ;;  %v1589_v48 = vld [vmem:[#allocation5 + $0x10] sm:$0xff] }
 0x3fc   : > { %2686 = vrcp.f32 %v1538_v30 }
 0x3fd   : > { %2375 = vmatprep.mubr.msk.f32.mxu1 %vm555_vm2, %v1572_v3 }
 0x3fe   : > { %v1498_v49 = vpop.permute.xlu0 %1497  ;;  %v2679_v7 = vpop.eup %2678  ;;  %2376 = vmatmul.mubr.msk.f32.vlgmr.msra.gmra.mrb[0].mxu1 %vm555_vm2, %v1574_v45 }
 0x3ff   : > { %2688 = vrcp.f32 %v1498_v49  ;;  %v2681_v47 = vpop.eup %2680  ;;  %v1543_v36 = vpop.permute.xlu1 %1542  ;;  %v1576_v23 = vmul.f32 %v2679_v7, %v1453_v55  ;;  %v1600_v7 = vld [vmem:[#allocation5 + $0x68] sm:$0xff] }
 0x400   : > { %2690 = vrcp.f32 %v1543_v36  ;;  %v1560_v54 = vmul.f32 %v2681_v47, %v1445_v34  ;;  %v1592_v47 = vld [vmem:[#allocation5 + $0x28] sm:$0xff]  ;;  %v1599_v36 = vld [vmem:[#allocation5 + $0x60] sm:$0xff] }
 0x401   : > { %2378 = vmatprep.mubr.msk.f32.mxu1 %vm555_vm2, %v1576_v23  ;;  %v1591_v23 = vld [vmem:[#allocation5 + $0x20] sm:$0xff] }
 0x402   : > { %v1503_v51 = vpop.permute.xlu0 %1502  ;;  %v2683_v39 = vpop.eup %2682  ;;  %2366 = vmatprep.mubr.msk.f32.mxu0 %vm555_vm2, %v1560_v54 }
 0x403   : > { %2692 = vrcp.f32 %v1503_v51  ;;  %v1548_v56 = vpop.permute.xlu1 %1547  ;;  %v1578_v19 = vmul.f32 %v2683_v39, %v1454_v5 }
 0x404   : > { %2694 = vrcp.f32 %v1548_v56 }
 0x405   : > { %v2685_v26 = vpop.eup %2684  ;;  %2379 = vmatmul.mubr.msk.f32.gmra.mrb[2].mxu1 %vm555_vm2, %v1578_v19  ;;  %v1602_v19 = vld [vmem:[#allocation5 + $0x78] sm:$0xff] }
 0x406   : > { %v1508_v57 = vpop.permute.xlu0 %1507  ;;  %v1562_v9 = vmul.f32 %v2685_v26, %v1446_v17  ;;  %v2687_v29 = vpop.eup %2686 }
 0x407   : > { %2696 = vrcp.f32 %v1508_v57  ;;  %v1553_v59 = vpop.permute.xlu1 %1552  ;;  %v1580_v27 = vmul.f32 %v2687_v29, %v1455_v58  ;;  %v1601_v58 = vld [vmem:[#allocation5 + $0x70] sm:$0xff] }
 0x408   : > { %2367 = vmatmul.mubr.msk.f32.gmra.mrb[2].mxu0 %vm555_vm2, %v1562_v9  ;;  %2698 = vrcp.f32 %v1553_v59  ;;  %v1594_v9 = vld [vmem:[#allocation5 + $0x38] sm:$0xff]  ;;  %v1593_v29 = vld [vmem:[#allocation5 + $0x30] sm:$0xff] }
 0x409   : > { %v2689_v63 = vpop.eup %2688  ;;  %2381 = vmatprep.mubr.msk.f32.mxu1 %vm555_vm2, %v1580_v27 }
 0x40a   : > { %v1513_v6 = vpop.permute.xlu0 %1512  ;;  %v1564_v61 = vmul.f32 %v2689_v63, %v1447_v15  ;;  %v2691_v35 = vpop.eup %2690 }
 0x40b   : > { %2700 = vrcp.f32 %v1513_v6  ;;  %v1582_v13 = vmul.f32 %v2691_v35, %v1456_v8 }
 0x40c   : > { %2369 = vmatprep.mubr.msk.f32.mxu0 %vm555_vm2, %v1564_v61 }
 0x40d   : > { %v2693_v44 = vpop.eup %2692  ;;  %2382 = vmatmul.mubr.msk.f32.gmra.mrb[4].mxu1 %vm555_vm2, %v1582_v13 }
 0x40e   : > { %v1566_v20 = vmul.f32 %v2693_v44, %v1448_v11  ;;  %v2695_v14 = vpop.eup %2694 }
 0x40f   : > { %v1584_v38 = vmul.f32 %v2695_v14, %v1457_v60 }
 0x410   : > { %2370 = vmatmul.mubr.msk.f32.gmra.mrb[4].mxu0 %vm555_vm2, %v1566_v20 }
 0x411   : > { %v2697_v31 = vpop.eup %2696  ;;  %2384 = vmatprep.mubr.msk.f32.mxu1 %vm555_vm2, %v1584_v38 }
 0x412   : > { %v1568_v50 = vmul.f32 %v2697_v31, %v1449_v10  ;;  %v2699_v12 = vpop.eup %2698 }
 0x413   : > { %v1586_v42 = vmul.f32 %v2699_v12, %v1458_v37 }
 0x414   : > { %2372 = vmatprep.mubr.msk.f32.mxu0 %vm555_vm2, %v1568_v50 }
 0x415   : > { %v2701_v22 = vpop.eup %2700  ;;  %2385 = vmatmul.mubr.msk.f32.gmra.mrb[6].mxu1 %vm555_vm2, %v1586_v42 }
 0x416   : > { %v1570_v18 = vmul.f32 %v2701_v22, %v1450_v62 }
 0x418   : > { %2373 = vmatmul.mubr.msk.f32.gmra.mrb[6].mxu0 %vm555_vm2, %v1570_v18 }
 0x4cd   : > { %v2365_v43 = vpop.f32.mrb[0].mxu0 }
 0x4ce   : > { %v1805_v16 = vadd.f32 %v2365_v43, %v1588_v52  ;;  %v1725_v32 = vpop.f32.mrb[1].mxu0 }
 0x4cf   : > { %v1804_v28 = vadd.f32 %v1725_v32, %v1587_v1 }
 0x4d0   : > { %1821 = vst [vmem:[#allocation5 + $0x8] sm:$0xff] %v1805_v16 }
 0x4d1   : > { %1820 = vst [vmem:[#allocation5] sm:$0xff] %v1804_v28  ;;  %v2377_v46 = vpop.f32.mrb[0].mxu1 }
 0x4d2   : > { %v1813_v2 = vadd.f32 %v2377_v46, %v1596_v25  ;;  %v1765_v4 = vpop.f32.mrb[1].mxu1 }
 0x4d3   : > { %v1812_v53 = vadd.f32 %v1765_v4, %v1595_v33 }
 0x4d4   : > { %1829 = vst [vmem:[#allocation5 + $0x48] sm:$0xff] %v1813_v2 }
 0x4d5   : > { %1828 = vst [vmem:[#allocation5 + $0x40] sm:$0xff] %v1812_v53 }
 0x4d8   : > { %v2380_v41 = vpop.f32.mrb[2].mxu1 }
 0x4d9   : > { %v1815_v30 = vadd.f32 %v2380_v41, %v1598_v24  ;;  %v1775_v49 = vpop.f32.mrb[3].mxu1 }
 0x4da   : > { %v1814_v55 = vadd.f32 %v1775_v49, %v1597_v21 }
 0x4db   : > { %v2368_v0 = vpop.f32.mrb[2].mxu0  ;;  %1831 = vst [vmem:[#allocation5 + $0x58] sm:$0xff] %v1815_v30 }
 0x4dc   : > { %v1807_v45 = vadd.f32 %v2368_v0, %v1590_v40  ;;  %v1735_v3 = vpop.f32.mrb[3].mxu0  ;;  %1830 = vst [vmem:[#allocation5 + $0x50] sm:$0xff] %v1814_v55 }
 0x4dd   : > { %v1806_v34 = vadd.f32 %v1735_v3, %v1589_v48 }
 0x4de   : > { %1823 = vst [vmem:[#allocation5 + $0x18] sm:$0xff] %v1807_v45 }
 0x4df   : > { %1822 = vst [vmem:[#allocation5 + $0x10] sm:$0xff] %v1806_v34 }
 0x4e0   : > { %v2383_v51 = vpop.f32.mrb[4].mxu1 }
 0x4e1   : > { %v1817_v5 = vadd.f32 %v2383_v51, %v1600_v7  ;;  %v1785_v17 = vpop.f32.mrb[5].mxu1 }
 0x4e2   : > { %v1816_v56 = vadd.f32 %v1785_v17, %v1599_v36 }
 0x4e3   : > { %v2371_v54 = vpop.f32.mrb[4].mxu0  ;;  %1833 = vst [vmem:[#allocation5 + $0x68] sm:$0xff] %v1817_v5 }
 0x4e4   : > { %v1809_v39 = vadd.f32 %v2371_v54, %v1592_v47  ;;  %v1745_v26 = vpop.f32.mrb[5].mxu0  ;;  %1832 = vst [vmem:[#allocation5 + $0x60] sm:$0xff] %v1816_v56 }
 0x4e5   : > { %v1808_v57 = vadd.f32 %v1745_v26, %v1591_v23 }
 0x4e6   : > { %1825 = vst [vmem:[#allocation5 + $0x28] sm:$0xff] %v1809_v39 }
 0x4e7   : > { %1824 = vst [vmem:[#allocation5 + $0x20] sm:$0xff] %v1808_v57 }
 0x4e8   : > { %v2386_v15 = vpop.f32.mrb[6].mxu1 }
 0x4e9   : > { %v1819_v59 = vadd.f32 %v2386_v15, %v1602_v19  ;;  %v1795_v6 = vpop.f32.mrb[7].mxu1 }
 0x4ea   : > { %v1818_v8 = vadd.f32 %v1795_v6, %v1601_v58 }
 0x4eb   : > { %v2374_v63 = vpop.f32.mrb[6].mxu0  ;;  %1835 = vst [vmem:[#allocation5 + $0x78] sm:$0xff] %v1819_v59 }
 0x4ec   : > { %v1811_v27 = vadd.f32 %v2374_v63, %v1594_v9  ;;  %v1755_v61 = vpop.f32.mrb[7].mxu0  ;;  %1834 = vst [vmem:[#allocation5 + $0x70] sm:$0xff] %v1818_v8 }
 0x4ed   : > { %v1810_v11 = vadd.f32 %v1755_v61, %v1593_v29 }
 0x4ee   : > { %1827 = vst [vmem:[#allocation5 + $0x38] sm:$0xff] %v1811_v27 }
 0x4ef   : > { %1826 = vst [vmem:[#allocation5 + $0x30] sm:$0xff] %v1810_v11 }
 0x4f0 PF: > { %p1836_p1 = scmp.eq.s32.totalorder %s2800_s22, 7 }
 0x4f2   : > { %p1837_p2 = pnand %p1836_p1, %p1439_p13 }
 0x4f3   : > { %v1841_v35 = vld [vmem:[#allocation5] sm:$0xff] (!%p1837_p2)  ;;  %v1842_v13 = vld [vmem:[#allocation5 + $0x8] sm:$0xff] (!%p1837_p2)  ;;  %v1843_v10 = vld [vmem:[#allocation5 + $0x10] sm:$0xff] (!%p1837_p2) }
 0x4f4   : > { %1840 = sbr.rel (%p1837_p2) target bundleno = 1279 (0x4ff), region = 56  ;;  %v2139_v44 = vld [vmem:[%s3626_s4] ss:$0 sm:$0xff] (!%p1837_p2)  ;;  %v1844_v14 = vld [vmem:[#allocation5 + $0x18] sm:$0xff] (!%p1837_p2)  ;;  %v1846_v62 = vld [vmem:[#allocation5 + $0x28] sm:$0xff] (!%p1837_p2) }
 0x4f5   : > { %v1864_v20 = vadd.f32 (!%p1837_p2), %v2139_v44, %v1841_v35  ;;  %v1865_v60 = vadd.f32 (!%p1837_p2), %v2139_v44, %v1842_v13  ;;  %v1845_v31 = vld [vmem:[#allocation5 + $0x20] sm:$0xff] (!%p1837_p2)  ;;  %v1866_v38 = vadd.f32 (!%p1837_p2), %v2139_v44, %v1843_v10  ;;  %v1867_v50 = vadd.f32 (!%p1837_p2), %v2139_v44, %v1844_v14  ;;  %v1848_v22 = vld [vmem:[#allocation5 + $0x38] sm:$0xff] (!%p1837_p2)  ;;  %v1850_v43 = vld [vmem:[#allocation5 + $0x48] sm:$0xff] (!%p1837_p2) }
 0x4f6   : > { %v1868_v37 = vadd.f32 (!%p1837_p2), %v2139_v44, %v1845_v31  ;;  %v1847_v12 = vld [vmem:[#allocation5 + $0x30] sm:$0xff] (!%p1837_p2)  ;;  %v1869_v42 = vadd.f32 (!%p1837_p2), %v2139_v44, %v1846_v62  ;;  %v1871_v52 = vadd.f32 (!%p1837_p2), %v2139_v44, %v1848_v22  ;;  %v1849_v1 = vld [vmem:[#allocation5 + $0x40] sm:$0xff] (!%p1837_p2)  ;;  %v1873_v28 = vadd.f32 (!%p1837_p2), %v2139_v44, %v1850_v43  ;;  %v1852_v33 = vld [vmem:[#allocation5 + $0x58] sm:$0xff] (!%p1837_p2) }
 0x4f7   : > { %1880 = vst [vmem:[%s3014_s23] sm:$0xff] (!%p1837_p2), %v1864_v20  ;;  %1881 = vst [vmem:[%s3014_s23 + $0x8] sm:$0xff] (!%p1837_p2), %v1865_v60  ;;  %v1870_v18 = vadd.f32 (!%p1837_p2), %v2139_v44, %v1847_v12  ;;  %v1851_v16 = vld [vmem:[#allocation5 + $0x50] sm:$0xff] (!%p1837_p2)  ;;  %v1872_v32 = vadd.f32 (!%p1837_p2), %v2139_v44, %v1849_v1  ;;  %v1853_v46 = vld [vmem:[#allocation5 + $0x60] sm:$0xff] (!%p1837_p2)  ;;  %v1875_v4 = vadd.f32 (!%p1837_p2), %v2139_v44, %v1852_v33 }
 0x4f8   : > { %1882 = vst [vmem:[%s3014_s23 + $0x10] sm:$0xff] (!%p1837_p2), %v1866_v38  ;;  %1883 = vst [vmem:[%s3014_s23 + $0x18] sm:$0xff] (!%p1837_p2), %v1867_v50  ;;  %v1874_v25 = vadd.f32 (!%p1837_p2), %v2139_v44, %v1851_v16  ;;  %v1854_v2 = vld [vmem:[#allocation5 + $0x68] sm:$0xff] (!%p1837_p2)  ;;  %v1876_v53 = vadd.f32 (!%p1837_p2), %v2139_v44, %v1853_v46  ;;  %v1855_v40 = vld [vmem:[#allocation5 + $0x70] sm:$0xff] (!%p1837_p2) }
 0x4f9   : > { %1884 = vst [vmem:[%s3014_s23 + $0x20] sm:$0xff] (!%p1837_p2), %v1868_v37  ;;  %1885 = vst [vmem:[%s3014_s23 + $0x28] sm:$0xff] (!%p1837_p2), %v1869_v42  ;;  %v1877_v24 = vadd.f32 (!%p1837_p2), %v2139_v44, %v1854_v2  ;;  %v1856_v21 = vld [vmem:[#allocation5 + $0x78] sm:$0xff] (!%p1837_p2)  ;;  %v1878_v41 = vadd.f32 (!%p1837_p2), %v2139_v44, %v1855_v40 }
 0x4fa   : > { %1886 = vst [vmem:[%s3014_s23 + $0x30] sm:$0xff] (!%p1837_p2), %v1870_v18  ;;  %1887 = vst [vmem:[%s3014_s23 + $0x38] sm:$0xff] (!%p1837_p2), %v1871_v52  ;;  %v1879_v48 = vadd.f32 (!%p1837_p2), %v2139_v44, %v1856_v21 }
 0x4fb   : > { %1888 = vst [vmem:[%s3014_s23 + $0x40] sm:$0xff] %v1872_v32  ;;  %1889 = vst [vmem:[%s3014_s23 + $0x48] sm:$0xff] %v1873_v28 }
 0x4fc   : > { %1890 = vst [vmem:[%s3014_s23 + $0x50] sm:$0xff] %v1874_v25  ;;  %1891 = vst [vmem:[%s3014_s23 + $0x58] sm:$0xff] %v1875_v4 }
 0x4fd   : > { %1892 = vst [vmem:[%s3014_s23 + $0x60] sm:$0xff] %v1876_v53  ;;  %1893 = vst [vmem:[%s3014_s23 + $0x68] sm:$0xff] %v1877_v24 }
 0x4fe   : > { %1894 = vst [vmem:[%s3014_s23 + $0x70] sm:$0xff] %v1878_v41  ;;  %1895 = vst [vmem:[%s3014_s23 + $0x78] sm:$0xff] %v1879_v48 }
 0x4ff PF: > { %s2142_s18 = sshll.u32 %s2808_s24, 5  ;;  %s1912_s21 = sshll.u32 %s3014_s23, 4  ;;  %s3549_s21 = int_to_ptr.vmem [resolvable:$true] %s1912_s21 }
 0x500   : > { %s1909_s20 = sadd.s32 %s2142_s18, %s2969_s6  ;;  %s3661_s8 = sld [smem:[#allocation23_spill]] }
 0x501   : > { %s2143_s22 = sshll.u32 %s1909_s20, 7  ;;  %s3662_s13 = sand.u32 1, %s2788_s19  }
 0x502   : > { %s3558_s16 = scalar_lea.sflag [#allocation7], %s3662_s13  ;;  %s2702_s14 = scalar_lea.vmem %s3549_s21, 2048 }
 0x503   : > { %p2703_p3 = scmp.ne.s32.totalorder %s3549_s21, %s2702_s14  ;;  %s2835_s24 = smov [#allocation6]  }
 0x504   : > { %s2706_s6 = sshll.u32 %s2835_s24, 4  ;;  %s2707_s6 = int_to_ptr.vmem [resolvable:$false] %s2706_s6 }
 0x505   : > { %p2704_p4 = pnand %p2703_p3, %p2941_p5  ;;  %s2708_s7 = scalar_lea.vmem %s2707_s6, 4096 }
 0x506   : > { %s3554_s12 = scalar_lea.hbm %s3661_s8, %s2143_s22  ;;  %p2709_p8 = scmp.lt.s32.totalorder %s3549_s21, %s2707_s6 }
 0x507   : > { %p2705_p6 = pneg %p2704_p4  ;;  %p2710_p9 = scmp.lt.s32.totalorder %s2708_s7, %s2702_s14 }
 0x509   : > { %p2711_p10 = por %p2710_p9, %p2709_p8 }
 0x50b   : > { %p2712_p11 = pnand %p2711_p10, %p2705_p6 }
 0x50d   : > { %2715 = shalt.err (!%p2712_p11)
}
 0x50e   : > { %s2716_s30 = scalar_lea.hbm %s3554_s12, 2048  ;;  %s2720_s27 = scalar_lea.hbm %s3661_s8, 8192 }
 0x50f   : > { %p2717_p12 = scmp.ne.s32.totalorder %s3554_s12, %s2716_s30  ;;  %p2721_p1 = scmp.lt.u32.totalorder %s3554_s12, %s3661_s8 }
 0x510   : > { %p2722_p2 = scmp.lt.u32.totalorder %s2720_s27, %s2716_s30  ;;  %p2724_p4 = scmp.lt.u32.totalorder %s2716_s30, %s3554_s12 }
 0x511   : > { %p2718_p13 = pnand %p2717_p12, %p2941_p5 }
 0x512   : > { %p2723_p3 = por %p2722_p2, %p2721_p1 }
 0x513   : > { %p2719_p0 = pneg %p2718_p13 }
 0x514   : > { %p2725_p6 = por %p2724_p4, %p2723_p3 }
 0x516   : > { %p2726_p8 = pnand %p2725_p6, %p2719_p0 }
 0x518   : > { %2729 = shalt.err (!%p2726_p8)
}
 0x519   : > { %s2836_s17 = smov 128   ;;  %s2837_s10 = smov 8  }
 0x51a   : > { %2492 = dma.vmem_to_hbm [thread:$0]  (%p2941_p5), %s3549_s21, 2048, %s3554_s12, %s3558_s16, %s2836_s17, %s2836_s17, %s2837_s10  }
 0x51b PF: > { %s3663_s23 = sld [smem:[#allocation15_spill]]  ;;  %s3664_s0 = sld [smem:[#allocation9_spill]] }
 0x521   : > { %p2498_p9 = scmp.ge.s32.totalorder %s3663_s23, 2  ;;  %s1927_s18 = sand.u32 1, %s3664_s0  }
 0x522   : > { %s1928_s20 = scalar_lea.sflag [#allocation7], %s1927_s18 }
 0x523   : > { %p2495_p10 = pnand %p2498_p9, %p2948_p7 }
 0x525   : > { %2779 = dma.done.wait (!%p2495_p10), %s1928_s20, 2048  }
 0x526   : > { %2781 = vsyncadd (!%p2495_p10), %s1928_s20, 4294965248  ;;  %s18_s29 = sadd.s32 1, %s3663_s23   ;;  %s3666_s22 = sld [smem:[#allocation10_spill]] }
 0x527   : > { %p15_p11 = scmp.ge.s32.totalorder %s18_s29, 66   ;;  %s3667_s20 = sld [smem:[#allocation21_spill]] }
 0x528   : > { %s3668_s21 = sld [smem:[#allocation11_spill]]  ;;  %s3669_s11 = sld [smem:[#allocation12_spill]] }
 0x529   : > { %s3670_s23 = sld [smem:[#allocation13_spill]]  ;;  %s3671_s24 = sld [smem:[#allocation14_spill]] }
 0x52a   : > { %s3672_s25 = sld [smem:[#allocation16_spill]]  ;;  %s3673_s26 = sld [smem:[#allocation17_spill]] }
 0x52b   : > { %s3674_s27 = sld [smem:[#allocation19_spill]]  ;;  %s3675_s28 = sld [smem:[#allocation20_spill]] }
 0x52c   : > { %s3676_s18 = smov %s2788_s19  ;;  %s3677_s19 = smov %s3666_s22 }
 0x52d   :  { %17 = sbr.rel (!%p15_p11) target bundleno = 10 (0xa), region = 100 }
 0x52e   : > { %s3678_s22 = smov %s3669_s11 }
 0x534   :  { %1933 = vsyncpa [#allocation7], 1 }
 0x535   :  { %1935 = vsyncpa [#allocation7 + $0x1], 1 }

// kernel: attention_forward.2
= control target key start
LH: loop header
LB: loop body
LE: loop exit
PB: predicated region body
PF: predicated region fallthrough
CT: control target
= control target key end

     0   :  { %7 = vsyncpa [#allocation3], 0  ;;  %s13385_s0 = inlined_call_operand.hbm [shape: f32[2,256,128], index: 0, kind: input, shape index: {}]   ;;  %s13386_s1 = inlined_call_operand.vmem [shape: f32[24,128,64], index: 1, kind: input, shape index: {}]   ;;  %s13387_s2 = inlined_call_operand.vmem [shape: f32[2,24,256,64], index: 2, kind: output, shape index: {}]  }
   0x1   :  { %9 = vsyncpa [#allocation3 + $0x1], 0  ;;  %s9998_s9 = smov 0   ;;  %s10000_s10 = smov 0  }
   0x2   :  { %s10002_s11 = smov 0   ;;  %s10004_s12 = smov 0  }
   0x3   :  { %s10006_s13 = smov 0   ;;  %s10008_s14 = smov 0  }
   0x4   :  { %s10010_s15 = smov 0   ;;  %s10012_s16 = smov 0  }
   0x5 LB: > { %s6144_s17 = sadd.s32 4294967295, %s9978_s16   ;;  %s24_s18 = sadd.s32 1, %s9970_s14  ;;  %s9978_s16 = sphi %s10012_s16, %s15_s16   ;;  %s9974_s15 = sphi %s10010_s15, %s13400_s15   ;;  %s9970_s14 = sphi %s10008_s14, %s13399_s14   ;;  %s9966_s13 = sphi %s10006_s13, %s13398_s13   ;;  %s9962_s12 = sphi %s10004_s12, %s13397_s12   ;;  %s9958_s11 = sphi %s10002_s11, %s13396_s11   ;;  %s9954_s10 = sphi %s10000_s10, %s13395_s10   ;;  %s9950_s9 = sphi %s9998_s9, %s13394_s9  }
   0x6   : > { %p25_p0 = scmp.ge.s32.totalorder %s24_s18, 2  ;;  %s27_s19 = sadd.s32 1, %s9974_s15 }
   0x7   : > { %s36_s20 = sadd.s32 1, %s9958_s11  ;;  %p43_p1 = scmp.ne.s32.totalorder %s9958_s11, %s9954_s10 }
   0x8   : > { %s13402_s18 = smov (%p25_p0, %s24_s18), 0  ;;  %s13404_s19 = smov (!%p25_p0, %s27_s19), %s9974_s15 }
   0x9   : > { %s32_s21 = ssub.s32 %s9970_s14, %s13402_s18  ;;  %p44_p2 = scmp.eq.s32.totalorder %s9978_s16, 0 }
   0xa   : > { %p29_p3 = scmp.ge.s32.totalorder %s13404_s19, 2  ;;  %p49_p4 = scmp.ne.s32.totalorder %s9954_s10, %s9950_s9 }
   0xb   : > { %p10052_p5 = por %p44_p2, %p43_p1  ;;  %p50_p6 = scmp.eq.s32.totalorder %s6144_s17, 0 }
   0xc   : > { %s13406_s19 = smov (%p29_p3, %s13404_s19), 0  ;;  %p96_p8 = scmp.eq.s32.totalorder %s6144_s17, 3 }
   0xd   : > { %p10058_p7 = por %p50_p6, %p49_p4  ;;  %s31_s24 = ssub.s32 %s9974_s15, %s13406_s19 }
   0xe   : > { %s33_s25 = sor.u32 %s32_s21, %s31_s24  ;;  %p10067_p9 = por %p96_p8, %p43_p1 }
   0xf   : > { %p34_p10 = scmp.eq.s32.totalorder %s33_s25, 0  ;;  %p9782_p11 = scmp.lt.s32.totalorder %s9978_s16, 4 }
  0x10   : > { %s13390_s26 = scalar_select %p10067_p9, 1, 0 }
  0x11   : > { %s125_s27 = sand.u32 1, %s9958_s11   ;;  %s6149_s28 = sshll.u32 %s9970_s14, 4 }
  0x12   : > { %s10075_s29 = scalar_select %p34_p10, %s9958_s11, %s36_s20  }
  0x13   : > { %s6148_s30 = sshll.u32 %s125_s27, 7  ;;  %s6150_s3 = sshll.u32 %s9974_s15, 5 }
  0x14   : > { %s135_s4 = sadd.s32 %s6150_s3, %s6149_s28  ;;  %s129_s5 = scalar_lea.vmem [#allocation2], %s6148_s30 }
  0x15   : > { %s138_s6 = sshll.u32 %s129_s5, 4  ;;  %s6151_s7 = sshll.u32 %s135_s4, 7  ;;  %s10078_s6 = int_to_ptr.vmem [resolvable:$true] %s138_s6 }
  0x16   : > { %s10083_s17 = scalar_lea.hbm %s13385_s0, %s6151_s7  ;;  %p10087_p12 = pnand %p9782_p11, %p10052_p5 }
  0x17   : > { %s10092_s21 = scalar_lea.sflag [#allocation3], %s125_s27  ;;  %s9882_s24 = scalar_lea.hbm %s10083_s17, 2048 }
  0x18   : > { %p9883_p0 = scmp.ne.s32.totalorder %s10083_s17, %s9882_s24  ;;  %p9884_p1 = pneg %p10087_p12 }
  0x19   : > { %s9887_s28 = scalar_lea.hbm %s13385_s0, 8192  ;;  %p9888_p4 = scmp.lt.u32.totalorder %s10083_s17, %s13385_s0 }
  0x1a   : > { %p9885_p2 = pnand %p9884_p1, %p9883_p0  ;;  %p9889_p5 = scmp.lt.u32.totalorder %s9887_s28, %s9882_s24 }
  0x1b   : > { %p9891_p8 = scmp.lt.u32.totalorder %s9882_s24, %s10083_s17 }
  0x1c   : > { %p9886_p3 = pneg %p9885_p2  ;;  %p9890_p6 = por %p9889_p5, %p9888_p4 }
  0x1e   : > { %p9892_p10 = por %p9891_p8, %p9890_p6 }
  0x20   : > { %p9893_p11 = pnand %p9892_p10, %p9886_p3 }
  0x22   : > { %9896 = shalt.err (!%p9893_p11)
}
  0x23   : > { %s9897_s27 = scalar_lea.vmem %s10078_s6, 2048  ;;  %s9980_s4 = smov [#allocation2]  }
  0x24   : > { %p9898_p0 = scmp.ne.s32.totalorder %s10078_s6, %s9897_s27  ;;  %s9902_s5 = sshll.u32 %s9980_s4, 4  ;;  %s9903_s5 = int_to_ptr.vmem [resolvable:$false] %s9902_s5 }
  0x25   : > { %s9904_s7 = scalar_lea.vmem %s9903_s5, 4096  ;;  %p9905_p9 = scmp.lt.s32.totalorder %s10078_s6, %s9903_s5 }
  0x26   : > { %p9900_p2 = pnand %p9898_p0, %p9884_p1  ;;  %p9906_p4 = scmp.lt.s32.totalorder %s9904_s7, %s9897_s27 }
  0x28   : > { %p9901_p13 = pneg %p9900_p2  ;;  %p9907_p5 = por %p9906_p4, %p9905_p9 }
  0x2a   : > { %p9908_p6 = pnand %p9907_p5, %p9901_p13 }
  0x2c   : > { %9911 = shalt.err (!%p9908_p6)
}
  0x2d   : > { %s9981_s8 = smov 128   ;;  %s9982_s9 = smov 8  }
  0x2e   : > { %9781 = dma.hbm_to_vmem [thread:$0]  (!%p10087_p12), %s10083_s17, 2048, %s10078_s6, %s10092_s21, %s9981_s8, %s9981_s8, %s9982_s9  }
  0x2f   : > { %p146_p1 = scmp.lt.s32.totalorder %s9978_s16, 5  ;;  %p13392_p3 = scmp.ge.s32.totalorder %s9978_s16, 1 }
  0x31   : > { %p147_p8 = pnand %p13392_p3, %p146_p1 }
  0x32   : > { %s10124_s24 = sand.u32 (!%p147_p8), 1, %s9954_s10  }
  0x33   : > { %150 = sbr.rel (%p147_p8) target bundleno = 851 (0x353), region = 28  ;;  %s6153_s22 = sshll.u32 (!%p147_p8), %s10124_s24, 7 }
  0x34   : > { %s153_s25 = scalar_lea.sflag (!%p147_p8), [#allocation3], %s10124_s24  ;;  %s10128_s28 = scalar_lea.vmem (!%p147_p8), [#allocation2], %s6153_s22 }
  0x3a   : > { %9945 = dma.done.wait (%p10058_p7), %s153_s25, 2048  }
  0x3b   : > { %9947 = vsyncadd (%p10058_p7), %s153_s25, 4294965248  ;;  %v194_v0 = vld [vmem:[%s13386_s1] sm:$0xff]  ;;  %v195_v1 = vld [vmem:[%s13386_s1 + $0x8] sm:$0xff]  ;;  %s9774_s9 = smul.u32 3072, %s10124_s24  ;;  %vm355_vm0 = vcmask 523264   ;;  %p13393_p7 = scmp.ne.s32.totalorder %s13390_s26, 0 }
  0x3c   : > { %v6154_v2 = vld [vmem:[%s13386_s1 + $0x80] sm:$0xff]  ;;  %v9006_v3 = vpack.c.bf16 %v195_v1, %v194_v0  ;;  %v6155_v4 = vld [vmem:[%s13386_s1 + $0x88] sm:$0xff]  ;;  %v196_v5 = vld [vmem:[%s13386_s1 + $0x10] sm:$0xff]  ;;  %s9775_s21 = smul.u32 (%p13393_p7), 768, %s9966_s13 }
  0x3d   : > { %v197_v6 = vld [vmem:[%s13386_s1 + $0x18] sm:$0xff]  ;;  %v9038_v7 = vpack.c.bf16 %v6155_v4, %v6154_v2  ;;  %v6156_v9 = vld [vmem:[%s13386_s1 + $0x90] sm:$0xff]  ;;  %v198_v11 = vld [vmem:[%s13386_s1 + $0x20] sm:$0xff]  ;;  %s11201_s23 = scalar_lea.vmem [#allocation4], %s9774_s9 }
  0x3e   : > { %v9010_v8 = vpack.c.bf16 %v197_v6, %v196_v5  ;;  %v6157_v10 = vld [vmem:[%s13386_s1 + $0x98] sm:$0xff]  ;;  %9007 = vmatprep.subr.bf16.mxu0 %v9006_v3  ;;  %v199_v13 = vld [vmem:[%s13386_s1 + $0x28] sm:$0xff]  ;;  %v6158_v14 = vld [vmem:[%s13386_s1 + $0xa0] sm:$0xff] }
  0x3f   : > { %v9042_v12 = vpack.c.bf16 %v6157_v10, %v6156_v9  ;;  %v6159_v15 = vld [vmem:[%s13386_s1 + $0xa8] sm:$0xff]  ;;  %9039 = vmatprep.subr.bf16.mxu1 %v9038_v7  ;;  %9009 = vmatpush3.bf16.msra.mxu0 %v9006_v3  ;;  %v9014_v16 = vpack.c.bf16 %v199_v13, %v198_v11  ;;  %v200_v18 = vld [vmem:[%s13386_s1 + $0x30] sm:$0xff]  ;;  %v201_v19 = vld [vmem:[%s13386_s1 + $0x38] sm:$0xff] }
  0x40   : > { %9041 = vmatpush3.bf16.msra.mxu1 %v9038_v7  ;;  %9011 = vmatprep.subr.bf16.mxu0 %v9010_v8  ;;  %v9046_v17 = vpack.c.bf16 %v6159_v15, %v6158_v14  ;;  %v6160_v20 = vld [vmem:[%s13386_s1 + $0xb0] sm:$0xff]  ;;  %v6161_v21 = vld [vmem:[%s13386_s1 + $0xb8] sm:$0xff]  ;;  %v9018_v22 = vpack.c.bf16 %v201_v19, %v200_v18  ;;  %v202_v24 = vld [vmem:[%s13386_s1 + $0x40] sm:$0xff] }
  0x41   : > { %9043 = vmatprep.subr.bf16.mxu1 %v9042_v12  ;;  %v9050_v23 = vpack.c.bf16 %v6161_v21, %v6160_v20  ;;  %v203_v25 = vld [vmem:[%s13386_s1 + $0x48] sm:$0xff]  ;;  %v10189_v26 = vld [vmem:[%s10128_s28] sm:$0xff]  ;;  %v204_v31 = vld [vmem:[%s13386_s1 + $0x50] sm:$0xff] }
  0x42   : > { %v6162_v27 = vld [vmem:[%s13386_s1 + $0xc0] sm:$0xff]  ;;  %v6163_v28 = vld [vmem:[%s13386_s1 + $0xc8] sm:$0xff]  ;;  %7694 = vmatprep.mubr.f32.mxu0 %v10189_v26  ;;  %7750 = vmatprep.mubr.f32.mxu1 %v10189_v26  ;;  %v9022_v29 = vpack.c.bf16 %v203_v25, %v202_v24  ;;  %v205_v32 = vld [vmem:[%s13386_s1 + $0x58] sm:$0xff] }
  0x43   : > { %9013 = vmatpush3.bf16.msra.mxu0 %v9010_v8  ;;  %v9054_v30 = vpack.c.bf16 %v6163_v28, %v6162_v27  ;;  %v6164_v33 = vld [vmem:[%s13386_s1 + $0xd0] sm:$0xff]  ;;  %v6165_v34 = vld [vmem:[%s13386_s1 + $0xd8] sm:$0xff]  ;;  %v9026_v35 = vpack.c.bf16 %v205_v32, %v204_v31  ;;  %v206_v37 = vld [vmem:[%s13386_s1 + $0x60] sm:$0xff] }
  0x44   : > { %9045 = vmatpush3.bf16.msra.mxu1 %v9042_v12  ;;  %9015 = vmatprep.subr.bf16.mxu0 %v9014_v16  ;;  %v9058_v36 = vpack.c.bf16 %v6165_v34, %v6164_v33  ;;  %v207_v38 = vld [vmem:[%s13386_s1 + $0x68] sm:$0xff]  ;;  %v6166_v39 = vld [vmem:[%s13386_s1 + $0xe0] sm:$0xff]  ;;  %v208_v43 = vld [vmem:[%s13386_s1 + $0x70] sm:$0xff] }
  0x45   : > { %9047 = vmatprep.subr.bf16.mxu1 %v9046_v17  ;;  %v6167_v40 = vld [vmem:[%s13386_s1 + $0xe8] sm:$0xff]  ;;  %v9030_v41 = vpack.c.bf16 %v207_v38, %v206_v37  ;;  %v209_v44 = vld [vmem:[%s13386_s1 + $0x78] sm:$0xff]  ;;  %v6168_v45 = vld [vmem:[%s13386_s1 + $0xf0] sm:$0xff] }
  0x46   : > { %v9062_v42 = vpack.c.bf16 %v6167_v40, %v6166_v39  ;;  %v6169_v46 = vld [vmem:[%s13386_s1 + $0xf8] sm:$0xff]  ;;  %v9034_v47 = vpack.c.bf16 %v209_v44, %v208_v43  ;;  %v6186_v49 = vld [vmem:[%s13386_s1 + $0x100] sm:$0xff]  ;;  %v6187_v50 = vld [vmem:[%s13386_s1 + $0x108] sm:$0xff] }
  0x47   : > { %9017 = vmatpush3.bf16.msra.mxu0 %v9014_v16  ;;  %v9066_v48 = vpack.c.bf16 %v6169_v46, %v6168_v45  ;;  %v6218_v51 = vld [vmem:[%s13386_s1 + $0x180] sm:$0xff]  ;;  %v6219_v52 = vld [vmem:[%s13386_s1 + $0x188] sm:$0xff]  ;;  %v9070_v53 = vpack.c.bf16 %v6187_v50, %v6186_v49  ;;  %v6188_v55 = vld [vmem:[%s13386_s1 + $0x110] sm:$0xff] }
  0x48   : > { %9049 = vmatpush3.bf16.msra.mxu1 %v9046_v17  ;;  %9019 = vmatprep.subr.bf16.mxu0 %v9018_v22  ;;  %v9102_v54 = vpack.c.bf16 %v6219_v52, %v6218_v51  ;;  %v6189_v56 = vld [vmem:[%s13386_s1 + $0x118] sm:$0xff]  ;;  %v10254_v57 = vld [vmem:[%s10128_s28 + $0x8] sm:$0xff]  ;;  %v6220_v58 = vld [vmem:[%s13386_s1 + $0x190] sm:$0xff] }
  0x49   : > { %9051 = vmatprep.subr.bf16.mxu1 %v9050_v23  ;;  %v6221_v59 = vld [vmem:[%s13386_s1 + $0x198] sm:$0xff]  ;;  %v10263_v60 = vld [vmem:[%s10128_s28 + $0x10] sm:$0xff]  ;;  %v9074_v61 = vpack.c.bf16 %v6189_v56, %v6188_v55  ;;  %v6190_v63 = vld [vmem:[%s13386_s1 + $0x120] sm:$0xff] }
  0x4a   : > { %v9106_v62 = vpack.c.bf16 %v6221_v59, %v6220_v58  ;;  %v6191_v0 = vld [vmem:[%s13386_s1 + $0x128] sm:$0xff]  ;;  %v10274_v1 = vld [vmem:[%s10128_s28 + $0x18] sm:$0xff]  ;;  %v6222_v2 = vld [vmem:[%s13386_s1 + $0x1a0] sm:$0xff] }
  0x4b   : > { %9021 = vmatpush3.bf16.msra.mxu0 %v9018_v22  ;;  %v6223_v3 = vld [vmem:[%s13386_s1 + $0x1a8] sm:$0xff]  ;;  %v10285_v4 = vld [vmem:[%s10128_s28 + $0x20] sm:$0xff]  ;;  %v9078_v5 = vpack.c.bf16 %v6191_v0, %v6190_v63  ;;  %v6192_v7 = vld [vmem:[%s13386_s1 + $0x130] sm:$0xff] }
  0x4c   : > { %9053 = vmatpush3.bf16.msra.mxu1 %v9050_v23  ;;  %9023 = vmatprep.subr.bf16.mxu0 %v9022_v29  ;;  %v9110_v6 = vpack.c.bf16 %v6223_v3, %v6222_v2  ;;  %v6193_v8 = vld [vmem:[%s13386_s1 + $0x138] sm:$0xff]  ;;  %v10296_v9 = vld [vmem:[%s10128_s28 + $0x28] sm:$0xff]  ;;  %v6224_v10 = vld [vmem:[%s13386_s1 + $0x1b0] sm:$0xff] }
  0x4d   : > { %9055 = vmatprep.subr.bf16.mxu1 %v9054_v30  ;;  %v6225_v11 = vld [vmem:[%s13386_s1 + $0x1b8] sm:$0xff]  ;;  %v10307_v12 = vld [vmem:[%s10128_s28 + $0x30] sm:$0xff]  ;;  %v9082_v13 = vpack.c.bf16 %v6193_v8, %v6192_v7  ;;  %v6194_v15 = vld [vmem:[%s13386_s1 + $0x140] sm:$0xff] }
  0x4e   : > { %v9114_v14 = vpack.c.bf16 %v6225_v11, %v6224_v10  ;;  %v6195_v16 = vld [vmem:[%s13386_s1 + $0x148] sm:$0xff]  ;;  %v10318_v17 = vld [vmem:[%s10128_s28 + $0x38] sm:$0xff]  ;;  %v6226_v18 = vld [vmem:[%s13386_s1 + $0x1c0] sm:$0xff] }
  0x4f   : > { %9025 = vmatpush3.bf16.msra.mxu0 %v9022_v29  ;;  %v6227_v19 = vld [vmem:[%s13386_s1 + $0x1c8] sm:$0xff]  ;;  %v10329_v20 = vld [vmem:[%s10128_s28 + $0x40] sm:$0xff]  ;;  %v9086_v21 = vpack.c.bf16 %v6195_v16, %v6194_v15  ;;  %v6196_v23 = vld [vmem:[%s13386_s1 + $0x150] sm:$0xff] }
  0x50   : > { %9057 = vmatpush3.bf16.msra.mxu1 %v9054_v30  ;;  %9027 = vmatprep.subr.bf16.mxu0 %v9026_v35  ;;  %v9118_v22 = vpack.c.bf16 %v6227_v19, %v6226_v18  ;;  %v6197_v24 = vld [vmem:[%s13386_s1 + $0x158] sm:$0xff]  ;;  %v10340_v25 = vld [vmem:[%s10128_s28 + $0x48] sm:$0xff]  ;;  %v6228_v27 = vld [vmem:[%s13386_s1 + $0x1d0] sm:$0xff] }
  0x51   : > { %9059 = vmatprep.subr.bf16.mxu1 %v9058_v36  ;;  %v6229_v28 = vld [vmem:[%s13386_s1 + $0x1d8] sm:$0xff]  ;;  %v10351_v29 = vld [vmem:[%s10128_s28 + $0x50] sm:$0xff]  ;;  %v9090_v30 = vpack.c.bf16 %v6197_v24, %v6196_v23  ;;  %v6198_v32 = vld [vmem:[%s13386_s1 + $0x160] sm:$0xff] }
  0x52   : > { %v9122_v31 = vpack.c.bf16 %v6229_v28, %v6228_v27  ;;  %v6199_v33 = vld [vmem:[%s13386_s1 + $0x168] sm:$0xff]  ;;  %v10362_v34 = vld [vmem:[%s10128_s28 + $0x58] sm:$0xff]  ;;  %v10373_v37 = vld [vmem:[%s10128_s28 + $0x60] sm:$0xff] }
  0x53   : > { %9029 = vmatpush3.bf16.msra.mxu0 %v9026_v35  ;;  %v6230_v35 = vld [vmem:[%s13386_s1 + $0x1e0] sm:$0xff]  ;;  %v9094_v38 = vpack.c.bf16 %v6199_v33, %v6198_v32  ;;  %v6200_v40 = vld [vmem:[%s13386_s1 + $0x170] sm:$0xff]  ;;  %v6233_v44 = vld [vmem:[%s13386_s1 + $0x1f8] sm:$0xff] }
  0x54   : > { %9061 = vmatpush3.bf16.msra.mxu1 %v9058_v36  ;;  %9031 = vmatprep.subr.bf16.mxu0 %v9030_v41  ;;  %v6231_v36 = vld [vmem:[%s13386_s1 + $0x1e8] sm:$0xff]  ;;  %v6232_v43 = vld [vmem:[%s13386_s1 + $0x1f0] sm:$0xff]  ;;  %v10406_v50 = vld [vmem:[%s10128_s28 + $0x78] sm:$0xff] }
  0x55   : > { %9063 = vmatprep.subr.bf16.mxu1 %v9062_v42  ;;  %v9126_v39 = vpack.c.bf16 %v6231_v36, %v6230_v35  ;;  %v10395_v45 = vld [vmem:[%s10128_s28 + $0x70] sm:$0xff]  ;;  %v6251_v49 = vld [vmem:[%s13386_s1 + $0x208] sm:$0xff]  ;;  %v6282_v51 = vld [vmem:[%s13386_s1 + $0x280] sm:$0xff] }
  0x56   : > { %v6283_v52 = vld [vmem:[%s13386_s1 + $0x288] sm:$0xff]  ;;  %v6252_v55 = vld [vmem:[%s13386_s1 + $0x210] sm:$0xff]  ;;  %v6253_v56 = vld [vmem:[%s13386_s1 + $0x218] sm:$0xff] }
  0x57   : > { %9033 = vmatpush3.bf16.msra.mxu0 %v9030_v41  ;;  %v6201_v41 = vld [vmem:[%s13386_s1 + $0x178] sm:$0xff]  ;;  %v6284_v58 = vld [vmem:[%s13386_s1 + $0x290] sm:$0xff]  ;;  %v6254_v63 = vld [vmem:[%s13386_s1 + $0x220] sm:$0xff] }
  0x58   : > { %9065 = vmatpush3.bf16.msra.mxu1 %v9062_v42  ;;  %9035 = vmatprep.subr.bf16.mxu0 %v9034_v47  ;;  %v10384_v42 = vld [vmem:[%s10128_s28 + $0x68] sm:$0xff]  ;;  %v9098_v46 = vpack.c.bf16 %v6201_v41, %v6200_v40  ;;  %v6285_v59 = vld [vmem:[%s13386_s1 + $0x298] sm:$0xff]  ;;  %v6286_v2 = vld [vmem:[%s13386_s1 + $0x2a0] sm:$0xff] }
  0x59   : > { %9067 = vmatprep.subr.bf16.mxu1 %v9066_v48  ;;  %v6255_v0 = vld [vmem:[%s13386_s1 + $0x228] sm:$0xff]  ;;  %v6256_v7 = vld [vmem:[%s13386_s1 + $0x230] sm:$0xff]  ;;  %v6257_v8 = vld [vmem:[%s13386_s1 + $0x238] sm:$0xff] }
  0x5a   : > { %v6287_v3 = vld [vmem:[%s13386_s1 + $0x2a8] sm:$0xff]  ;;  %v6288_v10 = vld [vmem:[%s13386_s1 + $0x2b0] sm:$0xff]  ;;  %v6289_v11 = vld [vmem:[%s13386_s1 + $0x2b8] sm:$0xff] }
  0x5b   : > { %9037 = vmatpush3.bf16.msra.mxu0 %v9034_v47  ;;  %v9130_v47 = vpack.c.bf16 %v6233_v44, %v6232_v43  ;;  %v6258_v15 = vld [vmem:[%s13386_s1 + $0x240] sm:$0xff]  ;;  %v6259_v16 = vld [vmem:[%s13386_s1 + $0x248] sm:$0xff]  ;;  %v6260_v23 = vld [vmem:[%s13386_s1 + $0x250] sm:$0xff] }
  0x5c   : > { %9069 = vmatpush3.bf16.msra.mxu1 %v9066_v48  ;;  %9071 = vmatprep.subr.bf16.mxu0 %v9070_v53  ;;  %v6250_v48 = vld [vmem:[%s13386_s1 + $0x200] sm:$0xff]  ;;  %v6291_v19 = vld [vmem:[%s13386_s1 + $0x2c8] sm:$0xff]  ;;  %v6261_v24 = vld [vmem:[%s13386_s1 + $0x258] sm:$0xff] }
  0x5d   : > { %9103 = vmatprep.subr.bf16.mxu1 %v9102_v54  ;;  %v6290_v18 = vld [vmem:[%s13386_s1 + $0x2c0] sm:$0xff]  ;;  %v6292_v27 = vld [vmem:[%s13386_s1 + $0x2d0] sm:$0xff]  ;;  %v6293_v28 = vld [vmem:[%s13386_s1 + $0x2d8] sm:$0xff] }
  0x5e   : > { %7695 = vmatmul.mubr.f32.vlgmr.msra.gmra.mrb[0].mxu0 %v10254_v57  ;;  %v6262_v32 = vld [vmem:[%s13386_s1 + $0x260] sm:$0xff]  ;;  %v6263_v33 = vld [vmem:[%s13386_s1 + $0x268] sm:$0xff]  ;;  %v6264_v40 = vld [vmem:[%s13386_s1 + $0x270] sm:$0xff] }
  0x5f   : > { %7751 = vmatmul.mubr.f32.vlgmr.msra.gmra.mrb[0].mxu1 %v10254_v57  ;;  %9073 = vmatpush3.bf16.msra.mxu0 %v9070_v53  ;;  %v9134_v53 = vpack.c.bf16 %v6251_v49, %v6250_v48  ;;  %v6294_v35 = vld [vmem:[%s13386_s1 + $0x2e0] sm:$0xff]  ;;  %v6295_v36 = vld [vmem:[%s13386_s1 + $0x2e8] sm:$0xff]  ;;  %v6265_v41 = vld [vmem:[%s13386_s1 + $0x278] sm:$0xff] }
  0x60   : > { %9105 = vmatpush3.bf16.msra.mxu1 %v9102_v54  ;;  %7697 = vmatprep.mubr.f32.mxu0 %v10263_v60  ;;  %v9166_v54 = vpack.c.bf16 %v6283_v52, %v6282_v51  ;;  %v6296_v43 = vld [vmem:[%s13386_s1 + $0x2f0] sm:$0xff]  ;;  %v6297_v44 = vld [vmem:[%s13386_s1 + $0x2f8] sm:$0xff]  ;;  %v6314_v48 = vld [vmem:[%s13386_s1 + $0x300] sm:$0xff] }
  0x61   : > { %7753 = vmatprep.mubr.f32.mxu1 %v10263_v60  ;;  %9075 = vmatprep.subr.bf16.mxu0 %v9074_v61  ;;  %v6315_v49 = vld [vmem:[%s13386_s1 + $0x308] sm:$0xff]  ;;  %v6346_v51 = vld [vmem:[%s13386_s1 + $0x380] sm:$0xff] }
  0x62   : > { %7698 = vmatmul.mubr.f32.gmra.mrb[2].mxu0 %v10274_v1  ;;  %9107 = vmatprep.subr.bf16.mxu1 %v9106_v62  ;;  %v6347_v52 = vld [vmem:[%s13386_s1 + $0x388] sm:$0xff] }
  0x63   : > { %7754 = vmatmul.mubr.f32.gmra.mrb[2].mxu1 %v10274_v1  ;;  %9077 = vmatpush3.bf16.msra.mxu0 %v9074_v61  ;;  %v9138_v61 = vpack.c.bf16 %v6253_v56, %v6252_v55  ;;  %v6316_v55 = vld [vmem:[%s13386_s1 + $0x310] sm:$0xff]  ;;  %v6317_v56 = vld [vmem:[%s13386_s1 + $0x318] sm:$0xff] }
  0x64   : > { %9109 = vmatpush3.bf16.msra.mxu1 %v9106_v62  ;;  %7700 = vmatprep.mubr.f32.mxu0 %v10285_v4  ;;  %v9170_v62 = vpack.c.bf16 %v6285_v59, %v6284_v58  ;;  %v6348_v58 = vld [vmem:[%s13386_s1 + $0x390] sm:$0xff]  ;;  %v6349_v59 = vld [vmem:[%s13386_s1 + $0x398] sm:$0xff] }
  0x65   : > { %7756 = vmatprep.mubr.f32.mxu1 %v10285_v4  ;;  %9079 = vmatprep.subr.bf16.mxu0 %v9078_v5 }
  0x66   : > { %7701 = vmatmul.mubr.f32.gmra.mrb[4].mxu0 %v10296_v9  ;;  %9111 = vmatprep.subr.bf16.mxu1 %v9110_v6 }
  0x67   : > { %7757 = vmatmul.mubr.f32.gmra.mrb[4].mxu1 %v10296_v9  ;;  %9081 = vmatpush3.bf16.msra.mxu0 %v9078_v5  ;;  %v9142_v5 = vpack.c.bf16 %v6255_v0, %v6254_v63  ;;  %v6318_v63 = vld [vmem:[%s13386_s1 + $0x320] sm:$0xff]  ;;  %v6319_v0 = vld [vmem:[%s13386_s1 + $0x328] sm:$0xff] }
  0x68   : > { %9113 = vmatpush3.bf16.msra.mxu1 %v9110_v6  ;;  %7703 = vmatprep.mubr.f32.mxu0 %v10307_v12  ;;  %v9174_v6 = vpack.c.bf16 %v6287_v3, %v6286_v2  ;;  %v6350_v2 = vld [vmem:[%s13386_s1 + $0x3a0] sm:$0xff]  ;;  %v6351_v3 = vld [vmem:[%s13386_s1 + $0x3a8] sm:$0xff] }
  0x69   : > { %7759 = vmatprep.mubr.f32.mxu1 %v10307_v12  ;;  %9083 = vmatprep.subr.bf16.mxu0 %v9082_v13 }
  0x6a   : > { %7704 = vmatmul.mubr.f32.gmra.mrb[6].mxu0 %v10318_v17  ;;  %9115 = vmatprep.subr.bf16.mxu1 %v9114_v14 }
  0x6b   : > { %7760 = vmatmul.mubr.f32.gmra.mrb[6].mxu1 %v10318_v17  ;;  %9085 = vmatpush3.bf16.msra.mxu0 %v9082_v13  ;;  %v9146_v13 = vpack.c.bf16 %v6257_v8, %v6256_v7  ;;  %v6320_v7 = vld [vmem:[%s13386_s1 + $0x330] sm:$0xff]  ;;  %v6321_v8 = vld [vmem:[%s13386_s1 + $0x338] sm:$0xff] }
  0x6c   : > { %9117 = vmatpush3.bf16.msra.mxu1 %v9114_v14  ;;  %7706 = vmatprep.mubr.f32.mxu0 %v10329_v20  ;;  %v9178_v14 = vpack.c.bf16 %v6289_v11, %v6288_v10  ;;  %v6352_v10 = vld [vmem:[%s13386_s1 + $0x3b0] sm:$0xff]  ;;  %v6353_v11 = vld [vmem:[%s13386_s1 + $0x3b8] sm:$0xff] }
  0x6d   : > { %7762 = vmatprep.mubr.f32.mxu1 %v10329_v20  ;;  %9087 = vmatprep.subr.bf16.mxu0 %v9086_v21 }
  0x6e   : > { %7707 = vmatmul.mubr.f32.gmra.mrb[8].mxu0 %v10340_v25  ;;  %9119 = vmatprep.subr.bf16.mxu1 %v9118_v22 }
  0x6f   : > { %7763 = vmatmul.mubr.f32.gmra.mrb[8].mxu1 %v10340_v25  ;;  %9089 = vmatpush3.bf16.msra.mxu0 %v9086_v21  ;;  %v9150_v21 = vpack.c.bf16 %v6259_v16, %v6258_v15  ;;  %v6322_v15 = vld [vmem:[%s13386_s1 + $0x340] sm:$0xff]  ;;  %v6323_v16 = vld [vmem:[%s13386_s1 + $0x348] sm:$0xff] }
  0x70   : > { %9121 = vmatpush3.bf16.msra.mxu1 %v9118_v22  ;;  %7709 = vmatprep.mubr.f32.mxu0 %v10351_v29  ;;  %v9182_v22 = vpack.c.bf16 %v6291_v19, %v6290_v18  ;;  %v6354_v18 = vld [vmem:[%s13386_s1 + $0x3c0] sm:$0xff]  ;;  %v6355_v19 = vld [vmem:[%s13386_s1 + $0x3c8] sm:$0xff] }
  0x71   : > { %7765 = vmatprep.mubr.f32.mxu1 %v10351_v29  ;;  %9091 = vmatprep.subr.bf16.mxu0 %v9090_v30 }
  0x72   : > { %7710 = vmatmul.mubr.f32.gmra.mrb[10].mxu0 %v10362_v34  ;;  %9123 = vmatprep.subr.bf16.mxu1 %v9122_v31 }
  0x73   : > { %7766 = vmatmul.mubr.f32.gmra.mrb[10].mxu1 %v10362_v34  ;;  %9093 = vmatpush3.bf16.msra.mxu0 %v9090_v30  ;;  %v9154_v30 = vpack.c.bf16 %v6261_v24, %v6260_v23  ;;  %v6324_v23 = vld [vmem:[%s13386_s1 + $0x350] sm:$0xff]  ;;  %v6325_v24 = vld [vmem:[%s13386_s1 + $0x358] sm:$0xff] }
  0x74   : > { %9125 = vmatpush3.bf16.msra.mxu1 %v9122_v31  ;;  %7712 = vmatprep.mubr.f32.mxu0 %v10373_v37  ;;  %v9186_v31 = vpack.c.bf16 %v6293_v28, %v6292_v27  ;;  %v6356_v27 = vld [vmem:[%s13386_s1 + $0x3d0] sm:$0xff]  ;;  %v6357_v28 = vld [vmem:[%s13386_s1 + $0x3d8] sm:$0xff] }
  0x75   : > { %7768 = vmatprep.mubr.f32.mxu1 %v10373_v37  ;;  %9095 = vmatprep.subr.bf16.mxu0 %v9094_v38 }
  0x76   : > { %7713 = vmatmul.mubr.f32.gmra.mrb[12].mxu0 %v10384_v42  ;;  %9127 = vmatprep.subr.bf16.mxu1 %v9126_v39 }
  0x77   : > { %7769 = vmatmul.mubr.f32.gmra.mrb[12].mxu1 %v10384_v42  ;;  %9097 = vmatpush3.bf16.msra.mxu0 %v9094_v38  ;;  %v9158_v38 = vpack.c.bf16 %v6263_v33, %v6262_v32  ;;  %v6326_v32 = vld [vmem:[%s13386_s1 + $0x360] sm:$0xff]  ;;  %v6327_v33 = vld [vmem:[%s13386_s1 + $0x368] sm:$0xff] }
  0x78   : > { %9129 = vmatpush3.bf16.msra.mxu1 %v9126_v39  ;;  %7715 = vmatprep.mubr.f32.mxu0 %v10395_v45  ;;  %v9190_v39 = vpack.c.bf16 %v6295_v36, %v6294_v35  ;;  %v6358_v35 = vld [vmem:[%s13386_s1 + $0x3e0] sm:$0xff]  ;;  %v6359_v36 = vld [vmem:[%s13386_s1 + $0x3e8] sm:$0xff] }
  0x79   : > { %7771 = vmatprep.mubr.f32.mxu1 %v10395_v45  ;;  %9099 = vmatprep.subr.bf16.mxu0 %v9098_v46 }
  0x7a   : > { %7716 = vmatmul.mubr.f32.gmra.mrb[14].mxu0 %v10406_v50  ;;  %9131 = vmatprep.subr.bf16.mxu1 %v9130_v47 }
  0x7b   : > { %7772 = vmatmul.mubr.f32.gmra.mrb[14].mxu1 %v10406_v50  ;;  %9101 = vmatpush3.bf16.msra.mxu0 %v9098_v46  ;;  %v9162_v46 = vpack.c.bf16 %v6265_v41, %v6264_v40  ;;  %v6328_v40 = vld [vmem:[%s13386_s1 + $0x370] sm:$0xff]  ;;  %v6329_v41 = vld [vmem:[%s13386_s1 + $0x378] sm:$0xff] }
  0x7c   : > { %9133 = vmatpush3.bf16.msra.mxu1 %v9130_v47  ;;  %7806 = vmatprep.mubr.f32.mxu0 %v10189_v26  ;;  %v9194_v47 = vpack.c.bf16 %v6297_v44, %v6296_v43  ;;  %v6360_v43 = vld [vmem:[%s13386_s1 + $0x3f0] sm:$0xff]  ;;  %v6361_v44 = vld [vmem:[%s13386_s1 + $0x3f8] sm:$0xff] }
  0x7d   : > { %7862 = vmatprep.mubr.f32.mxu1 %v10189_v26  ;;  %9135 = vmatprep.subr.bf16.mxu0 %v9134_v53 }
  0x7e   : > { %7807 = vmatmul.mubr.f32.vlgmr.msra.gmra.mrb[16].mxu0 %v10254_v57  ;;  %9167 = vmatprep.subr.bf16.mxu1 %v9166_v54 }
  0x7f   : > { %7863 = vmatmul.mubr.f32.vlgmr.msra.gmra.mrb[16].mxu1 %v10254_v57  ;;  %9137 = vmatpush3.bf16.msra.mxu0 %v9134_v53  ;;  %v9198_v53 = vpack.c.bf16 %v6315_v49, %v6314_v48  ;;  %v6378_v48 = vld [vmem:[%s13386_s1 + $0x400] sm:$0xff]  ;;  %v6379_v49 = vld [vmem:[%s13386_s1 + $0x408] sm:$0xff] }
  0x80   : > { %9169 = vmatpush3.bf16.msra.mxu1 %v9166_v54  ;;  %7809 = vmatprep.mubr.f32.mxu0 %v10263_v60  ;;  %v9230_v54 = vpack.c.bf16 %v6347_v52, %v6346_v51  ;;  %v6410_v51 = vld [vmem:[%s13386_s1 + $0x480] sm:$0xff]  ;;  %v6411_v52 = vld [vmem:[%s13386_s1 + $0x488] sm:$0xff] }
  0x81   : > { %7865 = vmatprep.mubr.f32.mxu1 %v10263_v60  ;;  %9139 = vmatprep.subr.bf16.mxu0 %v9138_v61 }
  0x82   : > { %7810 = vmatmul.mubr.f32.gmra.mrb[18].mxu0 %v10274_v1  ;;  %9171 = vmatprep.subr.bf16.mxu1 %v9170_v62 }
  0x83   : > { %7866 = vmatmul.mubr.f32.gmra.mrb[18].mxu1 %v10274_v1  ;;  %9141 = vmatpush3.bf16.msra.mxu0 %v9138_v61  ;;  %v9202_v61 = vpack.c.bf16 %v6317_v56, %v6316_v55  ;;  %v6380_v55 = vld [vmem:[%s13386_s1 + $0x410] sm:$0xff]  ;;  %v6381_v56 = vld [vmem:[%s13386_s1 + $0x418] sm:$0xff] }
  0x84   : > { %9173 = vmatpush3.bf16.msra.mxu1 %v9170_v62  ;;  %7812 = vmatprep.mubr.f32.mxu0 %v10285_v4  ;;  %v9234_v62 = vpack.c.bf16 %v6349_v59, %v6348_v58  ;;  %v6412_v58 = vld [vmem:[%s13386_s1 + $0x490] sm:$0xff]  ;;  %v6413_v59 = vld [vmem:[%s13386_s1 + $0x498] sm:$0xff] }
  0x85   : > { %7868 = vmatprep.mubr.f32.mxu1 %v10285_v4  ;;  %9143 = vmatprep.subr.bf16.mxu0 %v9142_v5 }
  0x86   : > { %7813 = vmatmul.mubr.f32.gmra.mrb[20].mxu0 %v10296_v9  ;;  %9175 = vmatprep.subr.bf16.mxu1 %v9174_v6 }
  0x87   : > { %7869 = vmatmul.mubr.f32.gmra.mrb[20].mxu1 %v10296_v9  ;;  %9145 = vmatpush3.bf16.msra.mxu0 %v9142_v5  ;;  %v9206_v5 = vpack.c.bf16 %v6319_v0, %v6318_v63  ;;  %v6382_v63 = vld [vmem:[%s13386_s1 + $0x420] sm:$0xff]  ;;  %v6383_v0 = vld [vmem:[%s13386_s1 + $0x428] sm:$0xff] }
  0x88   : > { %9177 = vmatpush3.bf16.msra.mxu1 %v9174_v6  ;;  %7815 = vmatprep.mubr.f32.mxu0 %v10307_v12  ;;  %v9238_v6 = vpack.c.bf16 %v6351_v3, %v6350_v2  ;;  %v6415_v2 = vld [vmem:[%s13386_s1 + $0x4a8] sm:$0xff]  ;;  %v9270_v3 = vpack.c.bf16 %v6383_v0, %v6382_v63  ;;  %v6446_v63 = vld [vmem:[%s13386_s1 + $0x520] sm:$0xff] }
  0x89   : > { %7871 = vmatprep.mubr.f32.mxu1 %v10307_v12  ;;  %9147 = vmatprep.subr.bf16.mxu0 %v9146_v13  ;;  %v6447_v0 = vld [vmem:[%s13386_s1 + $0x528] sm:$0xff] }
  0x8a   : > { %7816 = vmatmul.mubr.f32.gmra.mrb[22].mxu0 %v10318_v17  ;;  %9179 = vmatprep.subr.bf16.mxu1 %v9178_v14 }
  0x8b   : > { %7872 = vmatmul.mubr.f32.gmra.mrb[22].mxu1 %v10318_v17  ;;  %9149 = vmatpush3.bf16.msra.mxu0 %v9146_v13  ;;  %v9210_v13 = vpack.c.bf16 %v6321_v8, %v6320_v7  ;;  %v6385_v7 = vld [vmem:[%s13386_s1 + $0x438] sm:$0xff]  ;;  %v6416_v8 = vld [vmem:[%s13386_s1 + $0x4b0] sm:$0xff] }
  0x8c   : > { %9181 = vmatpush3.bf16.msra.mxu1 %v9178_v14  ;;  %7818 = vmatprep.mubr.f32.mxu0 %v10329_v20  ;;  %v9242_v14 = vpack.c.bf16 %v6353_v11, %v6352_v10  ;;  %v6417_v10 = vld [vmem:[%s13386_s1 + $0x4b8] sm:$0xff] }
  0x8d   : > { %7874 = vmatprep.mubr.f32.mxu1 %v10329_v20  ;;  %9151 = vmatprep.subr.bf16.mxu0 %v9150_v21 }
  0x8e   : > { %7819 = vmatmul.mubr.f32.gmra.mrb[24].mxu0 %v10340_v25  ;;  %9183 = vmatprep.subr.bf16.mxu1 %v9182_v22 }
  0x8f   : > { %7875 = vmatmul.mubr.f32.gmra.mrb[24].mxu1 %v10340_v25  ;;  %9153 = vmatpush3.bf16.msra.mxu0 %v9150_v21  ;;  %v9214_v21 = vpack.c.bf16 %v6323_v16, %v6322_v15  ;;  %v6387_v15 = vld [vmem:[%s13386_s1 + $0x448] sm:$0xff]  ;;  %v6418_v16 = vld [vmem:[%s13386_s1 + $0x4c0] sm:$0xff] }
  0x90   : > { %9185 = vmatpush3.bf16.msra.mxu1 %v9182_v22  ;;  %7821 = vmatprep.mubr.f32.mxu0 %v10351_v29  ;;  %v9246_v22 = vpack.c.bf16 %v6355_v19, %v6354_v18  ;;  %v6419_v18 = vld [vmem:[%s13386_s1 + $0x4c8] sm:$0xff] }
  0x91   : > { %7877 = vmatprep.mubr.f32.mxu1 %v10351_v29  ;;  %9155 = vmatprep.subr.bf16.mxu0 %v9154_v30 }
  0x92   : > { %7822 = vmatmul.mubr.f32.gmra.mrb[26].mxu0 %v10362_v34  ;;  %9187 = vmatprep.subr.bf16.mxu1 %v9186_v31 }
  0x93   : > { %7878 = vmatmul.mubr.f32.gmra.mrb[26].mxu1 %v10362_v34  ;;  %9157 = vmatpush3.bf16.msra.mxu0 %v9154_v30  ;;  %v9218_v30 = vpack.c.bf16 %v6325_v24, %v6324_v23  ;;  %v6389_v23 = vld [vmem:[%s13386_s1 + $0x458] sm:$0xff]  ;;  %v6420_v24 = vld [vmem:[%s13386_s1 + $0x4d0] sm:$0xff] }
  0x94   : > { %9189 = vmatpush3.bf16.msra.mxu1 %v9186_v31  ;;  %7824 = vmatprep.mubr.f32.mxu0 %v10373_v37  ;;  %v9250_v31 = vpack.c.bf16 %v6357_v28, %v6356_v27  ;;  %v6421_v27 = vld [vmem:[%s13386_s1 + $0x4d8] sm:$0xff] }
  0x95   : > { %7880 = vmatprep.mubr.f32.mxu1 %v10373_v37  ;;  %9159 = vmatprep.subr.bf16.mxu0 %v9158_v38 }
  0x96   : > { %7825 = vmatmul.mubr.f32.gmra.mrb[28].mxu0 %v10384_v42  ;;  %9191 = vmatprep.subr.bf16.mxu1 %v9190_v39 }
  0x97   : > { %7881 = vmatmul.mubr.f32.gmra.mrb[28].mxu1 %v10384_v42  ;;  %9161 = vmatpush3.bf16.msra.mxu0 %v9158_v38  ;;  %v9222_v38 = vpack.c.bf16 %v6327_v33, %v6326_v32  ;;  %v6391_v32 = vld [vmem:[%s13386_s1 + $0x468] sm:$0xff]  ;;  %v6422_v33 = vld [vmem:[%s13386_s1 + $0x4e0] sm:$0xff] }
  0x98   : > { %9193 = vmatpush3.bf16.msra.mxu1 %v9190_v39  ;;  %7827 = vmatprep.mubr.f32.mxu0 %v10395_v45  ;;  %v9254_v39 = vpack.c.bf16 %v6359_v36, %v6358_v35  ;;  %v6423_v35 = vld [vmem:[%s13386_s1 + $0x4e8] sm:$0xff] }
  0x99   : > { %7883 = vmatprep.mubr.f32.mxu1 %v10395_v45  ;;  %9163 = vmatprep.subr.bf16.mxu0 %v9162_v46 }
  0x9a   : > { %7828 = vmatmul.mubr.f32.gmra.mrb[30].mxu0 %v10406_v50  ;;  %9195 = vmatprep.subr.bf16.mxu1 %v9194_v47 }
  0x9b   : > { %7884 = vmatmul.mubr.f32.gmra.mrb[30].mxu1 %v10406_v50  ;;  %9165 = vmatpush3.bf16.msra.mxu0 %v9162_v46  ;;  %v9226_v46 = vpack.c.bf16 %v6329_v41, %v6328_v40  ;;  %v6393_v40 = vld [vmem:[%s13386_s1 + $0x478] sm:$0xff]  ;;  %v6424_v41 = vld [vmem:[%s13386_s1 + $0x4f0] sm:$0xff] }
  0x9c   : > { %9197 = vmatpush3.bf16.msra.mxu1 %v9194_v47  ;;  %7918 = vmatprep.mubr.f32.mxu0 %v10189_v26  ;;  %v9258_v47 = vpack.c.bf16 %v6361_v44, %v6360_v43  ;;  %v6425_v43 = vld [vmem:[%s13386_s1 + $0x4f8] sm:$0xff] }
  0x9d   : > { %7974 = vmatprep.mubr.f32.mxu1 %v10189_v26  ;;  %9199 = vmatprep.subr.bf16.mxu0 %v9198_v53 }
  0x9e   : > { %7919 = vmatmul.mubr.f32.vlgmr.msra.gmra.mrb[32].mxu0 %v10254_v57  ;;  %9231 = vmatprep.subr.bf16.mxu1 %v9230_v54 }
  0x9f   : > { %7975 = vmatmul.mubr.f32.vlgmr.msra.gmra.mrb[32].mxu1 %v10254_v57  ;;  %9201 = vmatpush3.bf16.msra.mxu0 %v9198_v53  ;;  %v9262_v53 = vpack.c.bf16 %v6379_v49, %v6378_v48  ;;  %v6443_v48 = vld [vmem:[%s13386_s1 + $0x508] sm:$0xff]  ;;  %v6474_v49 = vld [vmem:[%s13386_s1 + $0x580] sm:$0xff] }
  0xa0   : > { %9233 = vmatpush3.bf16.msra.mxu1 %v9230_v54  ;;  %7921 = vmatprep.mubr.f32.mxu0 %v10263_v60  ;;  %v9294_v54 = vpack.c.bf16 %v6411_v52, %v6410_v51  ;;  %v6475_v51 = vld [vmem:[%s13386_s1 + $0x588] sm:$0xff] }
  0xa1   : > { %7977 = vmatprep.mubr.f32.mxu1 %v10263_v60  ;;  %9203 = vmatprep.subr.bf16.mxu0 %v9202_v61 }
  0xa2   : > { %7922 = vmatmul.mubr.f32.gmra.mrb[34].mxu0 %v10274_v1  ;;  %9235 = vmatprep.subr.bf16.mxu1 %v9234_v62 }
  0xa3   : > { %7978 = vmatmul.mubr.f32.gmra.mrb[34].mxu1 %v10274_v1  ;;  %9205 = vmatpush3.bf16.msra.mxu0 %v9202_v61  ;;  %v9266_v61 = vpack.c.bf16 %v6381_v56, %v6380_v55  ;;  %v6445_v55 = vld [vmem:[%s13386_s1 + $0x518] sm:$0xff]  ;;  %v6476_v56 = vld [vmem:[%s13386_s1 + $0x590] sm:$0xff] }
  0xa4   : > { %9237 = vmatpush3.bf16.msra.mxu1 %v9234_v62  ;;  %7924 = vmatprep.mubr.f32.mxu0 %v10285_v4  ;;  %v9298_v62 = vpack.c.bf16 %v6413_v59, %v6412_v58  ;;  %v6477_v58 = vld [vmem:[%s13386_s1 + $0x598] sm:$0xff]  ;;  %v10815_v59 = vld [vmem:[%s10128_s28] sm:$0xff] }
  0xa5   : > { %7980 = vmatprep.mubr.f32.mxu1 %v10285_v4  ;;  %9207 = vmatprep.subr.bf16.mxu0 %v9206_v5 }
  0xa6   : > { %7925 = vmatmul.mubr.f32.gmra.mrb[36].mxu0 %v10296_v9  ;;  %9239 = vmatprep.subr.bf16.mxu1 %v9238_v6 }
  0xa7   : > { %7981 = vmatmul.mubr.f32.gmra.mrb[36].mxu1 %v10296_v9  ;;  %9209 = vmatpush3.bf16.msra.mxu0 %v9206_v5 }
  0xa8   : > { %9241 = vmatpush3.bf16.msra.mxu1 %v9238_v6  ;;  %7927 = vmatprep.mubr.f32.mxu0 %v10307_v12  ;;  %v6384_v6 = vld [vmem:[%s13386_s1 + $0x430] sm:$0xff] }
  0xa9   : > { %7983 = vmatprep.mubr.f32.mxu1 %v10307_v12  ;;  %9211 = vmatprep.subr.bf16.mxu0 %v9210_v13  ;;  %v9274_v11 = vpack.c.bf16 %v6385_v7, %v6384_v6  ;;  %v6449_v6 = vld [vmem:[%s13386_s1 + $0x538] sm:$0xff] }
  0xaa   : > { %7928 = vmatmul.mubr.f32.gmra.mrb[38].mxu0 %v10318_v17  ;;  %9243 = vmatprep.subr.bf16.mxu1 %v9242_v14  ;;  %v6481_v7 = vld [vmem:[%s13386_s1 + $0x5b8] sm:$0xff] }
  0xab   : > { %7984 = vmatmul.mubr.f32.gmra.mrb[38].mxu1 %v10318_v17  ;;  %9213 = vmatpush3.bf16.msra.mxu0 %v9210_v13  ;;  %v9306_v13 = vpack.c.bf16 %v6417_v10, %v6416_v8  ;;  %v6450_v10 = vld [vmem:[%s13386_s1 + $0x540] sm:$0xff] }
  0xac   : > { %9245 = vmatpush3.bf16.msra.mxu1 %v9242_v14  ;;  %7930 = vmatprep.mubr.f32.mxu0 %v10329_v20  ;;  %v6386_v14 = vld [vmem:[%s13386_s1 + $0x440] sm:$0xff] }
  0xad   : > { %7986 = vmatprep.mubr.f32.mxu1 %v10329_v20  ;;  %9215 = vmatprep.subr.bf16.mxu0 %v9214_v21  ;;  %v9278_v19 = vpack.c.bf16 %v6387_v15, %v6386_v14  ;;  %v6452_v15 = vld [vmem:[%s13386_s1 + $0x550] sm:$0xff] }
  0xae   : > { %7931 = vmatmul.mubr.f32.gmra.mrb[40].mxu0 %v10340_v25  ;;  %9247 = vmatprep.subr.bf16.mxu1 %v9246_v22 }
  0xaf   : > { %7987 = vmatmul.mubr.f32.gmra.mrb[40].mxu1 %v10340_v25  ;;  %9217 = vmatpush3.bf16.msra.mxu0 %v9214_v21  ;;  %v9310_v21 = vpack.c.bf16 %v6419_v18, %v6418_v16  ;;  %v6453_v16 = vld [vmem:[%s13386_s1 + $0x558] sm:$0xff] }
  0xb0   : > { %9249 = vmatpush3.bf16.msra.mxu1 %v9246_v22  ;;  %7933 = vmatprep.mubr.f32.mxu0 %v10351_v29  ;;  %v6388_v22 = vld [vmem:[%s13386_s1 + $0x450] sm:$0xff]  ;;  %v6485_v18 = vld [vmem:[%s13386_s1 + $0x5d8] sm:$0xff] }
  0xb1   : > { %7989 = vmatprep.mubr.f32.mxu1 %v10351_v29  ;;  %9219 = vmatprep.subr.bf16.mxu0 %v9218_v30  ;;  %v9282_v28 = vpack.c.bf16 %v6389_v23, %v6388_v22  ;;  %v6455_v22 = vld [vmem:[%s13386_s1 + $0x568] sm:$0xff] }
  0xb2   : > { %7934 = vmatmul.mubr.f32.gmra.mrb[42].mxu0 %v10362_v34  ;;  %9251 = vmatprep.subr.bf16.mxu1 %v9250_v31  ;;  %v6487_v23 = vld [vmem:[%s13386_s1 + $0x5e8] sm:$0xff] }
  0xb3   : > { %7990 = vmatmul.mubr.f32.gmra.mrb[42].mxu1 %v10362_v34  ;;  %9221 = vmatpush3.bf16.msra.mxu0 %v9218_v30  ;;  %v9314_v30 = vpack.c.bf16 %v6421_v27, %v6420_v24  ;;  %v6456_v27 = vld [vmem:[%s13386_s1 + $0x570] sm:$0xff] }
  0xb4   : > { %9253 = vmatpush3.bf16.msra.mxu1 %v9250_v31  ;;  %7936 = vmatprep.mubr.f32.mxu0 %v10373_v37  ;;  %v6390_v31 = vld [vmem:[%s13386_s1 + $0x460] sm:$0xff] }
  0xb5   : > { %7992 = vmatprep.mubr.f32.mxu1 %v10373_v37  ;;  %9223 = vmatprep.subr.bf16.mxu0 %v9222_v38  ;;  %v9286_v36 = vpack.c.bf16 %v6391_v32, %v6390_v31  ;;  %v6506_v32 = vld [vmem:[%s13386_s1 + $0x600] sm:$0xff] }
  0xb6   : > { %7937 = vmatmul.mubr.f32.gmra.mrb[44].mxu0 %v10384_v42  ;;  %9255 = vmatprep.subr.bf16.mxu1 %v9254_v39 }
  0xb7   : > { %7993 = vmatmul.mubr.f32.gmra.mrb[44].mxu1 %v10384_v42  ;;  %9225 = vmatpush3.bf16.msra.mxu0 %v9222_v38  ;;  %v9318_v38 = vpack.c.bf16 %v6423_v35, %v6422_v33  ;;  %v6507_v33 = vld [vmem:[%s13386_s1 + $0x608] sm:$0xff] }
  0xb8   : > { %9257 = vmatpush3.bf16.msra.mxu1 %v9254_v39  ;;  %7939 = vmatprep.mubr.f32.mxu0 %v10395_v45  ;;  %v6392_v39 = vld [vmem:[%s13386_s1 + $0x470] sm:$0xff]  ;;  %v6539_v35 = vld [vmem:[%s13386_s1 + $0x688] sm:$0xff] }
  0xb9   : > { %7995 = vmatprep.mubr.f32.mxu1 %v10395_v45  ;;  %9227 = vmatprep.subr.bf16.mxu0 %v9226_v46  ;;  %v9290_v44 = vpack.c.bf16 %v6393_v40, %v6392_v39  ;;  %v6509_v39 = vld [vmem:[%s13386_s1 + $0x618] sm:$0xff] }
  0xba   : > { %7940 = vmatmul.mubr.f32.gmra.mrb[46].mxu0 %v10406_v50  ;;  %9259 = vmatprep.subr.bf16.mxu1 %v9258_v47  ;;  %v6541_v40 = vld [vmem:[%s13386_s1 + $0x698] sm:$0xff] }
  0xbb   : > { %7996 = vmatmul.mubr.f32.gmra.mrb[46].mxu1 %v10406_v50  ;;  %9229 = vmatpush3.bf16.msra.mxu0 %v9226_v46  ;;  %v9322_v46 = vpack.c.bf16 %v6425_v43, %v6424_v41  ;;  %v10948_v43 = vld [vmem:[%s10128_s28 + $0x8] sm:$0xff] }
  0xbc   : > { %9261 = vmatpush3.bf16.msra.mxu1 %v9258_v47  ;;  %8030 = vmatprep.mubr.f32.mxu0 %v10189_v26  ;;  %v6442_v47 = vld [vmem:[%s13386_s1 + $0x500] sm:$0xff] }
  0xbd   : > { %8086 = vmatprep.mubr.f32.mxu1 %v10189_v26  ;;  %9263 = vmatprep.subr.bf16.mxu0 %v9262_v53  ;;  %v6414_v26 = vld [vmem:[%s13386_s1 + $0x4a0] sm:$0xff]  ;;  %v9326_v52 = vpack.c.bf16 %v6443_v48, %v6442_v47  ;;  %v6543_v48 = vld [vmem:[%s13386_s1 + $0x6a8] sm:$0xff] }
  0xbe   : > { %8031 = vmatmul.mubr.f32.vlgmr.msra.gmra.mrb[48].mxu0 %v10254_v57  ;;  %9295 = vmatprep.subr.bf16.mxu1 %v9294_v54  ;;  %v9302_v5 = vpack.c.bf16 %v6415_v2, %v6414_v26  ;;  %v6478_v26 = vld [vmem:[%s13386_s1 + $0x5a0] sm:$0xff]  ;;  %v6479_v2 = vld [vmem:[%s13386_s1 + $0x5a8] sm:$0xff] }
  0xbf   : > { %8087 = vmatmul.mubr.f32.vlgmr.msra.gmra.mrb[48].mxu1 %v10254_v57  ;;  %9265 = vmatpush3.bf16.msra.mxu0 %v9262_v53  ;;  %v9358_v53 = vpack.c.bf16 %v6475_v51, %v6474_v49  ;;  %v6542_v47 = vld [vmem:[%s13386_s1 + $0x6a0] sm:$0xff]  ;;  %v10965_v49 = vld [vmem:[%s10128_s28 + $0x10] sm:$0xff] }
  0xc0   : > { %9297 = vmatpush3.bf16.msra.mxu1 %v9294_v54  ;;  %8033 = vmatprep.mubr.f32.mxu0 %v10263_v60  ;;  %v6444_v54 = vld [vmem:[%s13386_s1 + $0x510] sm:$0xff] }
  0xc1   : > { %8089 = vmatprep.mubr.f32.mxu1 %v10263_v60  ;;  %9267 = vmatprep.subr.bf16.mxu0 %v9266_v61 }
  0xc2   : > { %8034 = vmatmul.mubr.f32.gmra.mrb[50].mxu0 %v10274_v1  ;;  %9299 = vmatprep.subr.bf16.mxu1 %v9298_v62 }
  0xc3   : > { %8090 = vmatmul.mubr.f32.gmra.mrb[50].mxu1 %v10274_v1  ;;  %9269 = vmatpush3.bf16.msra.mxu0 %v9266_v61  ;;  %v9330_v61 = vpack.c.bf16 %v6445_v55, %v6444_v54  ;;  %v6512_v54 = vld [vmem:[%s13386_s1 + $0x630] sm:$0xff]  ;;  %v6513_v55 = vld [vmem:[%s13386_s1 + $0x638] sm:$0xff] }
  0xc4   : > { %9301 = vmatpush3.bf16.msra.mxu1 %v9298_v62  ;;  %8036 = vmatprep.mubr.f32.mxu0 %v10285_v4  ;;  %v9362_v62 = vpack.c.bf16 %v6477_v58, %v6476_v56  ;;  %v6544_v56 = vld [vmem:[%s13386_s1 + $0x6b0] sm:$0xff]  ;;  %v6545_v58 = vld [vmem:[%s13386_s1 + $0x6b8] sm:$0xff] }
  0xc5   : > { %8092 = vmatprep.mubr.f32.mxu1 %v10285_v4  ;;  %9271 = vmatprep.subr.bf16.mxu0 %v9270_v3 }
  0xc6   : > { %8037 = vmatmul.mubr.f32.gmra.mrb[52].mxu0 %v10296_v9  ;;  %9303 = vmatprep.subr.bf16.mxu1 %v9302_v5 }
  0xc7   : > { %8093 = vmatmul.mubr.f32.gmra.mrb[52].mxu1 %v10296_v9  ;;  %9273 = vmatpush3.bf16.msra.mxu0 %v9270_v3  ;;  %v9334_v3 = vpack.c.bf16 %v6447_v0, %v6446_v63  ;;  %v10992_v63 = vld [vmem:[%s10128_s28 + $0x28] sm:$0xff]  ;;  %v9434_v0 = vpack.c.bf16 %v6545_v58, %v6544_v56  ;;  %v6608_v56 = vld [vmem:[%s13386_s1 + $0x7b0] sm:$0xff]  ;;  %v6609_v58 = vld [vmem:[%s13386_s1 + $0x7b8] sm:$0xff] }
  0xc8   : > { %9305 = vmatpush3.bf16.msra.mxu1 %v9302_v5  ;;  %8039 = vmatprep.mubr.f32.mxu0 %v10307_v12  ;;  %v6448_v5 = vld [vmem:[%s13386_s1 + $0x530] sm:$0xff] }
  0xc9   : > { %8095 = vmatprep.mubr.f32.mxu1 %v10307_v12  ;;  %9275 = vmatprep.subr.bf16.mxu0 %v9274_v11  ;;  %v9338_v8 = vpack.c.bf16 %v6449_v6, %v6448_v5  ;;  %v11009_v5 = vld [vmem:[%s10128_s28 + $0x30] sm:$0xff] }
  0xca   : > { %8040 = vmatmul.mubr.f32.gmra.mrb[54].mxu0 %v10318_v17  ;;  %9307 = vmatprep.subr.bf16.mxu1 %v9306_v13 }
  0xcb   : > { %8096 = vmatmul.mubr.f32.gmra.mrb[54].mxu1 %v10318_v17  ;;  %9277 = vmatpush3.bf16.msra.mxu0 %v9274_v11  ;;  %v6451_v11 = vld [vmem:[%s13386_s1 + $0x548] sm:$0xff] }
  0xcc   : > { %9309 = vmatpush3.bf16.msra.mxu1 %v9306_v13  ;;  %8042 = vmatprep.mubr.f32.mxu0 %v10329_v20  ;;  %v6483_v13 = vld [vmem:[%s13386_s1 + $0x5c8] sm:$0xff]  ;;  %v9342_v14 = vpack.c.bf16 %v6451_v11, %v6450_v10  ;;  %v6548_v10 = vld [vmem:[%s13386_s1 + $0x6d0] sm:$0xff]  ;;  %v6549_v11 = vld [vmem:[%s13386_s1 + $0x6d8] sm:$0xff] }
  0xcd   : > { %8098 = vmatprep.mubr.f32.mxu1 %v10329_v20  ;;  %9279 = vmatprep.subr.bf16.mxu0 %v9278_v19 }
  0xce   : > { %8043 = vmatmul.mubr.f32.gmra.mrb[56].mxu0 %v10340_v25  ;;  %9311 = vmatprep.subr.bf16.mxu1 %v9310_v21 }
  0xcf   : > { %8099 = vmatmul.mubr.f32.gmra.mrb[56].mxu1 %v10340_v25  ;;  %9281 = vmatpush3.bf16.msra.mxu0 %v9278_v19  ;;  %v9346_v19 = vpack.c.bf16 %v6453_v16, %v6452_v15  ;;  %v6518_v15 = vld [vmem:[%s13386_s1 + $0x660] sm:$0xff]  ;;  %v6519_v16 = vld [vmem:[%s13386_s1 + $0x668] sm:$0xff] }
  0xd0   : > { %9313 = vmatpush3.bf16.msra.mxu1 %v9310_v21  ;;  %8045 = vmatprep.mubr.f32.mxu0 %v10351_v29  ;;  %v6454_v21 = vld [vmem:[%s13386_s1 + $0x560] sm:$0xff] }
  0xd1   : > { %8101 = vmatprep.mubr.f32.mxu1 %v10351_v29  ;;  %9283 = vmatprep.subr.bf16.mxu0 %v9282_v28  ;;  %v9350_v24 = vpack.c.bf16 %v6455_v22, %v6454_v21  ;;  %v11058_v21 = vld [vmem:[%s10128_s28 + $0x58] sm:$0xff] }
  0xd2   : > { %8046 = vmatmul.mubr.f32.gmra.mrb[58].mxu0 %v10362_v34  ;;  %9315 = vmatprep.subr.bf16.mxu1 %v9314_v30 }
  0xd3   : > { %8102 = vmatmul.mubr.f32.gmra.mrb[58].mxu1 %v10362_v34  ;;  %9285 = vmatpush3.bf16.msra.mxu0 %v9282_v28  ;;  %v6457_v28 = vld [vmem:[%s13386_s1 + $0x578] sm:$0xff] }
  0xd4   : > { %9317 = vmatpush3.bf16.msra.mxu1 %v9314_v30  ;;  %8048 = vmatprep.mubr.f32.mxu0 %v10373_v37  ;;  %v6489_v30 = vld [vmem:[%s13386_s1 + $0x5f8] sm:$0xff]  ;;  %v9354_v31 = vpack.c.bf16 %v6457_v28, %v6456_v27  ;;  %v11075_v27 = vld [vmem:[%s10128_s28 + $0x60] sm:$0xff] }
  0xd5   : > { %8104 = vmatprep.mubr.f32.mxu1 %v10373_v37  ;;  %9287 = vmatprep.subr.bf16.mxu0 %v9286_v36 }
  0xd6   : > { %8049 = vmatmul.mubr.f32.gmra.mrb[60].mxu0 %v10384_v42  ;;  %9319 = vmatprep.subr.bf16.mxu1 %v9318_v38 }
  0xd7   : > { %8105 = vmatmul.mubr.f32.gmra.mrb[60].mxu1 %v10384_v42  ;;  %9289 = vmatpush3.bf16.msra.mxu0 %v9286_v36  ;;  %v9390_v36 = vpack.c.bf16 %v6507_v33, %v6506_v32  ;;  %v6602_v32 = vld [vmem:[%s13386_s1 + $0x780] sm:$0xff]  ;;  %v6603_v33 = vld [vmem:[%s13386_s1 + $0x788] sm:$0xff] }
  0xd8   : > { %9321 = vmatpush3.bf16.msra.mxu1 %v9318_v38  ;;  %8051 = vmatprep.mubr.f32.mxu0 %v10395_v45  ;;  %v6508_v38 = vld [vmem:[%s13386_s1 + $0x610] sm:$0xff] }
  0xd9   : > { %8107 = vmatprep.mubr.f32.mxu1 %v10395_v45  ;;  %9291 = vmatprep.subr.bf16.mxu0 %v9290_v44  ;;  %v9394_v41 = vpack.c.bf16 %v6509_v39, %v6508_v38  ;;  %v6572_v38 = vld [vmem:[%s13386_s1 + $0x710] sm:$0xff]  ;;  %v6573_v39 = vld [vmem:[%s13386_s1 + $0x718] sm:$0xff] }
  0xda   : > { %8052 = vmatmul.mubr.f32.gmra.mrb[62].mxu0 %v10406_v50  ;;  %9323 = vmatprep.subr.bf16.mxu1 %v9322_v46 }
  0xdb   : > { %8108 = vmatmul.mubr.f32.gmra.mrb[62].mxu1 %v10406_v50  ;;  %9293 = vmatpush3.bf16.msra.mxu0 %v9290_v44  ;;  %v6510_v44 = vld [vmem:[%s13386_s1 + $0x620] sm:$0xff] }
  0xdc   : > { %9325 = vmatpush3.bf16.msra.mxu1 %v9322_v46  ;;  %8142 = vmatprep.mubr.f32.mxu0 %v10815_v59  ;;  %v6511_v46 = vld [vmem:[%s13386_s1 + $0x628] sm:$0xff] }
  0xdd   : > { %8198 = vmatprep.mubr.f32.mxu1 %v10815_v59  ;;  %9327 = vmatprep.subr.bf16.mxu0 %v9326_v52  ;;  %v9398_v51 = vpack.c.bf16 %v6511_v46, %v6510_v44  ;;  %v6574_v44 = vld [vmem:[%s13386_s1 + $0x720] sm:$0xff]  ;;  %v6575_v46 = vld [vmem:[%s13386_s1 + $0x728] sm:$0xff] }
  0xde   : > { %8143 = vmatmul.mubr.f32.vlgmr.msra.gmra.mrb[64].mxu0 %v10254_v57  ;;  %9359 = vmatprep.subr.bf16.mxu1 %v9358_v53 }
  0xdf   : > { %8199 = vmatmul.mubr.f32.vlgmr.msra.gmra.mrb[64].mxu1 %v10254_v57  ;;  %9329 = vmatpush3.bf16.msra.mxu0 %v9326_v52  ;;  %v9366_v57 = vpack.c.bf16 %v6479_v2, %v6478_v26  ;;  %v10970_v52 = vld [vmem:[%s10128_s28 + $0x18] sm:$0xff]  ;;  %v6514_v26 = vld [vmem:[%s13386_s1 + $0x640] sm:$0xff]  ;;  %v6515_v2 = vld [vmem:[%s13386_s1 + $0x648] sm:$0xff] }
  0xe0   : > { %9361 = vmatpush3.bf16.msra.mxu1 %v9358_v53  ;;  %8145 = vmatprep.mubr.f32.mxu0 %v10263_v60  ;;  %v9430_v53 = vpack.c.bf16 %v6543_v48, %v6542_v47  ;;  %v9406_v6 = vpack.c.bf16 %v6515_v2, %v6514_v26  ;;  %v6606_v47 = vld [vmem:[%s13386_s1 + $0x7a0] sm:$0xff]  ;;  %v6607_v48 = vld [vmem:[%s13386_s1 + $0x7a8] sm:$0xff] }
  0xe1   : > { %8201 = vmatprep.mubr.f32.mxu1 %v10263_v60  ;;  %9331 = vmatprep.subr.bf16.mxu0 %v9330_v61  ;;  %v6480_v60 = vld [vmem:[%s13386_s1 + $0x5b0] sm:$0xff]  ;;  %v6578_v26 = vld [vmem:[%s13386_s1 + $0x740] sm:$0xff]  ;;  %v6579_v2 = vld [vmem:[%s13386_s1 + $0x748] sm:$0xff] }
  0xe2   : > { %8146 = vmatmul.mubr.f32.gmra.mrb[66].mxu0 %v10274_v1  ;;  %9363 = vmatprep.subr.bf16.mxu1 %v9362_v62 }
  0xe3   : > { %8202 = vmatmul.mubr.f32.gmra.mrb[66].mxu1 %v10274_v1  ;;  %9333 = vmatpush3.bf16.msra.mxu0 %v9330_v61  ;;  %v9370_v1 = vpack.c.bf16 %v6481_v7, %v6480_v60  ;;  %v10987_v61 = vld [vmem:[%s10128_s28 + $0x20] sm:$0xff]  ;;  %v11014_v60 = vld [vmem:[%s10128_s28 + $0x38] sm:$0xff] }
  0xe4   : > { %9365 = vmatpush3.bf16.msra.mxu1 %v9362_v62  ;;  %8148 = vmatprep.mubr.f32.mxu0 %v10285_v4  ;;  %v9402_v62 = vpack.c.bf16 %v6513_v55, %v6512_v54  ;;  %v6576_v54 = vld [vmem:[%s13386_s1 + $0x730] sm:$0xff]  ;;  %v6577_v55 = vld [vmem:[%s13386_s1 + $0x738] sm:$0xff] }
  0xe5   : > { %8204 = vmatprep.mubr.f32.mxu1 %v10285_v4  ;;  %9335 = vmatprep.subr.bf16.mxu0 %v9334_v3  ;;  %v6482_v4 = vld [vmem:[%s13386_s1 + $0x5c0] sm:$0xff] }
  0xe6   : > { %8149 = vmatmul.mubr.f32.gmra.mrb[68].mxu0 %v10296_v9  ;;  %9367 = vmatprep.subr.bf16.mxu1 %v9366_v57 }
  0xe7   : > { %8205 = vmatmul.mubr.f32.gmra.mrb[68].mxu1 %v10296_v9  ;;  %9337 = vmatpush3.bf16.msra.mxu0 %v9334_v3  ;;  %v9374_v9 = vpack.c.bf16 %v6483_v13, %v6482_v4  ;;  %v6546_v3 = vld [vmem:[%s13386_s1 + $0x6c0] sm:$0xff] }
  0xe8   : > { %9369 = vmatpush3.bf16.msra.mxu1 %v9366_v57  ;;  %8151 = vmatprep.mubr.f32.mxu0 %v10307_v12  ;;  %v6547_v57 = vld [vmem:[%s13386_s1 + $0x6c8] sm:$0xff]  ;;  %v11031_v4 = vld [vmem:[%s10128_s28 + $0x40] sm:$0xff] }
  0xe9   : > { %8207 = vmatprep.mubr.f32.mxu1 %v10307_v12  ;;  %9339 = vmatprep.subr.bf16.mxu0 %v9338_v8  ;;  %v6484_v12 = vld [vmem:[%s13386_s1 + $0x5d0] sm:$0xff]  ;;  %v9438_v7 = vpack.c.bf16 %v6547_v57, %v6546_v3  ;;  %v6610_v3 = vld [vmem:[%s13386_s1 + $0x7c0] sm:$0xff]  ;;  %v6611_v57 = vld [vmem:[%s13386_s1 + $0x7c8] sm:$0xff] }
  0xea   : > { %8152 = vmatmul.mubr.f32.gmra.mrb[70].mxu0 %v10318_v17  ;;  %9371 = vmatprep.subr.bf16.mxu1 %v9370_v1 }
  0xeb   : > { %8208 = vmatmul.mubr.f32.gmra.mrb[70].mxu1 %v10318_v17  ;;  %9341 = vmatpush3.bf16.msra.mxu0 %v9338_v8  ;;  %v9378_v17 = vpack.c.bf16 %v6485_v18, %v6484_v12  ;;  %v6516_v8 = vld [vmem:[%s13386_s1 + $0x650] sm:$0xff]  ;;  %v6550_v12 = vld [vmem:[%s13386_s1 + $0x6e0] sm:$0xff]  ;;  %v6551_v18 = vld [vmem:[%s13386_s1 + $0x6e8] sm:$0xff] }
  0xec   : > { %9373 = vmatpush3.bf16.msra.mxu1 %v9370_v1  ;;  %8154 = vmatprep.mubr.f32.mxu0 %v10329_v20  ;;  %v6517_v1 = vld [vmem:[%s13386_s1 + $0x658] sm:$0xff]  ;;  %v9446_v22 = vpack.c.bf16 %v6551_v18, %v6550_v12  ;;  %v6614_v12 = vld [vmem:[%s13386_s1 + $0x7e0] sm:$0xff]  ;;  %v6615_v18 = vld [vmem:[%s13386_s1 + $0x7e8] sm:$0xff] }
  0xed   : > { %8210 = vmatprep.mubr.f32.mxu1 %v10329_v20  ;;  %9343 = vmatprep.subr.bf16.mxu0 %v9342_v14  ;;  %v6486_v20 = vld [vmem:[%s13386_s1 + $0x5e0] sm:$0xff]  ;;  %v9410_v13 = vpack.c.bf16 %v6517_v1, %v6516_v8  ;;  %v6580_v8 = vld [vmem:[%s13386_s1 + $0x750] sm:$0xff]  ;;  %v6581_v1 = vld [vmem:[%s13386_s1 + $0x758] sm:$0xff] }
  0xee   : > { %8155 = vmatmul.mubr.f32.gmra.mrb[72].mxu0 %v10340_v25  ;;  %9375 = vmatprep.subr.bf16.mxu1 %v9374_v9 }
  0xef   : > { %8211 = vmatmul.mubr.f32.gmra.mrb[72].mxu1 %v10340_v25  ;;  %9345 = vmatpush3.bf16.msra.mxu0 %v9342_v14  ;;  %v9382_v25 = vpack.c.bf16 %v6487_v23, %v6486_v20  ;;  %v11036_v14 = vld [vmem:[%s10128_s28 + $0x48] sm:$0xff]  ;;  %v6520_v20 = vld [vmem:[%s13386_s1 + $0x670] sm:$0xff]  ;;  %v6521_v23 = vld [vmem:[%s13386_s1 + $0x678] sm:$0xff] }
  0xf0   : > { %9377 = vmatpush3.bf16.msra.mxu1 %v9374_v9  ;;  %8157 = vmatprep.mubr.f32.mxu0 %v10351_v29  ;;  %v9442_v9 = vpack.c.bf16 %v6549_v11, %v6548_v10  ;;  %v9418_v28 = vpack.c.bf16 %v6521_v23, %v6520_v20  ;;  %v6612_v10 = vld [vmem:[%s13386_s1 + $0x7d0] sm:$0xff]  ;;  %v6613_v11 = vld [vmem:[%s13386_s1 + $0x7d8] sm:$0xff] }
  0xf1   : > { %8213 = vmatprep.mubr.f32.mxu1 %v10351_v29  ;;  %9347 = vmatprep.subr.bf16.mxu0 %v9346_v19  ;;  %v6488_v29 = vld [vmem:[%s13386_s1 + $0x5f0] sm:$0xff] }
  0xf2   : > { %8158 = vmatmul.mubr.f32.gmra.mrb[74].mxu0 %v10362_v34  ;;  %9379 = vmatprep.subr.bf16.mxu1 %v9378_v17 }
  0xf3   : > { %8214 = vmatmul.mubr.f32.gmra.mrb[74].mxu1 %v10362_v34  ;;  %9349 = vmatpush3.bf16.msra.mxu0 %v9346_v19  ;;  %v9386_v34 = vpack.c.bf16 %v6489_v30, %v6488_v29  ;;  %v11053_v19 = vld [vmem:[%s10128_s28 + $0x50] sm:$0xff]  ;;  %v11080_v29 = vld [vmem:[%s10128_s28 + $0x68] sm:$0xff] }
  0xf4   : > { %9381 = vmatpush3.bf16.msra.mxu1 %v9378_v17  ;;  %8160 = vmatprep.mubr.f32.mxu0 %v10373_v37  ;;  %v9414_v17 = vpack.c.bf16 %v6519_v16, %v6518_v15  ;;  %v6582_v15 = vld [vmem:[%s13386_s1 + $0x760] sm:$0xff]  ;;  %v6583_v16 = vld [vmem:[%s13386_s1 + $0x768] sm:$0xff] }
  0xf5   : > { %8216 = vmatprep.mubr.f32.mxu1 %v10373_v37  ;;  %9351 = vmatprep.subr.bf16.mxu0 %v9350_v24  ;;  %v6538_v37 = vld [vmem:[%s13386_s1 + $0x680] sm:$0xff] }
  0xf6   : > { %8161 = vmatmul.mubr.f32.gmra.mrb[76].mxu0 %v10384_v42  ;;  %9383 = vmatprep.subr.bf16.mxu1 %v9382_v25 }
  0xf7   : > { %8217 = vmatmul.mubr.f32.gmra.mrb[76].mxu1 %v10384_v42  ;;  %9353 = vmatpush3.bf16.msra.mxu0 %v9350_v24  ;;  %v9422_v42 = vpack.c.bf16 %v6539_v35, %v6538_v37  ;;  %v6552_v24 = vld [vmem:[%s13386_s1 + $0x6f0] sm:$0xff] }
  0xf8   : > { %9385 = vmatpush3.bf16.msra.mxu1 %v9382_v25  ;;  %8163 = vmatprep.mubr.f32.mxu0 %v10395_v45  ;;  %v6553_v25 = vld [vmem:[%s13386_s1 + $0x6f8] sm:$0xff]  ;;  %v11097_v37 = vld [vmem:[%s10128_s28 + $0x70] sm:$0xff] }
  0xf9   : > { %8219 = vmatprep.mubr.f32.mxu1 %v10395_v45  ;;  %9355 = vmatprep.subr.bf16.mxu0 %v9354_v31  ;;  %v6540_v45 = vld [vmem:[%s13386_s1 + $0x690] sm:$0xff]  ;;  %v9450_v30 = vpack.c.bf16 %v6553_v25, %v6552_v24  ;;  %v9510_v24 = vpack.c.bf16 %v6615_v18, %v6614_v12 }
  0xfa   : > { %8164 = vmatmul.mubr.f32.gmra.mrb[78].mxu0 %v10406_v50  ;;  %9387 = vmatprep.subr.bf16.mxu1 %v9386_v34  ;;  %v6584_v25 = vld [vmem:[%s13386_s1 + $0x770] sm:$0xff] }
  0xfb   : > { %8220 = vmatmul.mubr.f32.gmra.mrb[78].mxu1 %v10406_v50  ;;  %9357 = vmatpush3.bf16.msra.mxu0 %v9354_v31  ;;  %v9426_v50 = vpack.c.bf16 %v6541_v40, %v6540_v45  ;;  %v6570_v31 = vld [vmem:[%s13386_s1 + $0x700] sm:$0xff]  ;;  %v6604_v45 = vld [vmem:[%s13386_s1 + $0x790] sm:$0xff]  ;;  %v6605_v40 = vld [vmem:[%s13386_s1 + $0x798] sm:$0xff] }
  0xfc   : > { %9389 = vmatpush3.bf16.msra.mxu1 %v9386_v34  ;;  %8254 = vmatprep.mubr.f32.mxu0 %v10815_v59  ;;  %v6571_v34 = vld [vmem:[%s13386_s1 + $0x708] sm:$0xff]  ;;  %v6672_v18 = vld [vmem:[%s13386_s1 + $0x8b0] sm:$0xff] }
  0xfd   : > { %8310 = vmatprep.mubr.f32.mxu1 %v10815_v59  ;;  %9391 = vmatprep.subr.bf16.mxu0 %v9390_v36  ;;  %v9454_v35 = vpack.c.bf16 %v6571_v34, %v6570_v31  ;;  %v6616_v31 = vld [vmem:[%s13386_s1 + $0x7f0] sm:$0xff]  ;;  %v6617_v34 = vld [vmem:[%s13386_s1 + $0x7f8] sm:$0xff] }
  0xfe   : > { %8255 = vmatmul.mubr.f32.vlgmr.msra.gmra.mrb[80].mxu0 %v10948_v43  ;;  %9423 = vmatprep.subr.bf16.mxu1 %v9422_v42 }
  0xff   : > { %8311 = vmatmul.mubr.f32.vlgmr.msra.gmra.mrb[80].mxu1 %v10948_v43  ;;  %9393 = vmatpush3.bf16.msra.mxu0 %v9390_v36  ;;  %v11102_v36 = vld [vmem:[%s10128_s28 + $0x78] sm:$0xff] }
 0x100   : > { %9425 = vmatpush3.bf16.msra.mxu1 %v9422_v42  ;;  %8257 = vmatprep.mubr.f32.mxu0 %v10965_v49  ;;  %v9486_v42 = vpack.c.bf16 %v6603_v33, %v6602_v32 }
 0x101   : > { %8313 = vmatprep.mubr.f32.mxu1 %v10965_v49  ;;  %9395 = vmatprep.subr.bf16.mxu0 %v9394_v41 }
 0x102   : > { %8258 = vmatmul.mubr.f32.gmra.mrb[82].mxu0 %v10970_v52  ;;  %9427 = vmatprep.subr.bf16.mxu1 %v9426_v50 }
 0x103   : > { %8314 = vmatmul.mubr.f32.gmra.mrb[82].mxu1 %v10970_v52  ;;  %9397 = vmatpush3.bf16.msra.mxu0 %v9394_v41  ;;  %v9458_v41 = vpack.c.bf16 %v6573_v39, %v6572_v38  ;;  %v9514_v38 = vpack.c.bf16 %v6617_v34, %v6616_v31  ;;  %v6634_v39 = vld [vmem:[%s13386_s1 + $0x800] sm:$0xff] }
 0x104   : > { %9429 = vmatpush3.bf16.msra.mxu1 %v9426_v50  ;;  %8260 = vmatprep.mubr.f32.mxu0 %v10987_v61  ;;  %v9490_v50 = vpack.c.bf16 %v6605_v40, %v6604_v45  ;;  %v6635_v45 = vld [vmem:[%s13386_s1 + $0x808] sm:$0xff]  ;;  %v6674_v34 = vld [vmem:[%s13386_s1 + $0x8c0] sm:$0xff] }
 0x105   : > { %8316 = vmatprep.mubr.f32.mxu1 %v10987_v61  ;;  %9399 = vmatprep.subr.bf16.mxu0 %v9398_v51 }
 0x106   : > { %8261 = vmatmul.mubr.f32.gmra.mrb[84].mxu0 %v10992_v63  ;;  %9431 = vmatprep.subr.bf16.mxu1 %v9430_v53 }
 0x107   : > { %8317 = vmatmul.mubr.f32.gmra.mrb[84].mxu1 %v10992_v63  ;;  %9401 = vmatpush3.bf16.msra.mxu0 %v9398_v51  ;;  %v9462_v51 = vpack.c.bf16 %v6575_v46, %v6574_v44  ;;  %v9518_v46 = vpack.c.bf16 %v6635_v45, %v6634_v39  ;;  %v6644_v45 = vld [vmem:[%s13386_s1 + $0x850] sm:$0xff] }
 0x108   : > { %9433 = vmatpush3.bf16.msra.mxu1 %v9430_v53  ;;  %8263 = vmatprep.mubr.f32.mxu0 %v11009_v5  ;;  %v9494_v53 = vpack.c.bf16 %v6607_v48, %v6606_v47 }
 0x109   : > { %8319 = vmatprep.mubr.f32.mxu1 %v11009_v5  ;;  %9403 = vmatprep.subr.bf16.mxu0 %v9402_v62 }
 0x10a   : > { %8264 = vmatmul.mubr.f32.gmra.mrb[86].mxu0 %v11014_v60  ;;  %9435 = vmatprep.subr.bf16.mxu1 %v9434_v0 }
 0x10b   : > { %8320 = vmatmul.mubr.f32.gmra.mrb[86].mxu1 %v11014_v60  ;;  %9405 = vmatpush3.bf16.msra.mxu0 %v9402_v62  ;;  %v9466_v62 = vpack.c.bf16 %v6577_v55, %v6576_v54  ;;  %v6637_v54 = vld [vmem:[%s13386_s1 + $0x818] sm:$0xff] }
 0x10c   : > { %9437 = vmatpush3.bf16.msra.mxu1 %v9434_v0  ;;  %8266 = vmatprep.mubr.f32.mxu0 %v11031_v4  ;;  %v9498_v0 = vpack.c.bf16 %v6609_v58, %v6608_v56  ;;  %v6668_v56 = vld [vmem:[%s13386_s1 + $0x890] sm:$0xff]  ;;  %v6669_v58 = vld [vmem:[%s13386_s1 + $0x898] sm:$0xff] }
 0x10d   : > { %8322 = vmatprep.mubr.f32.mxu1 %v11031_v4  ;;  %9407 = vmatprep.subr.bf16.mxu0 %v9406_v6 }
 0x10e   : > { %8267 = vmatmul.mubr.f32.gmra.mrb[88].mxu0 %v11036_v14  ;;  %9439 = vmatprep.subr.bf16.mxu1 %v9438_v7 }
 0x10f   : > { %8323 = vmatmul.mubr.f32.gmra.mrb[88].mxu1 %v11036_v14  ;;  %9409 = vmatpush3.bf16.msra.mxu0 %v9406_v6  ;;  %v9470_v6 = vpack.c.bf16 %v6579_v2, %v6578_v26 }
 0x110   : > { %9441 = vmatpush3.bf16.msra.mxu1 %v9438_v7  ;;  %8269 = vmatprep.mubr.f32.mxu0 %v11053_v19  ;;  %v9502_v7 = vpack.c.bf16 %v6611_v57, %v6610_v3  ;;  %v9554_v3 = vpack.c.bf16 %v6669_v58, %v6668_v56  ;;  %v6638_v57 = vld [vmem:[%s13386_s1 + $0x820] sm:$0xff] }
 0x111   : > { %8325 = vmatprep.mubr.f32.mxu1 %v11053_v19  ;;  %9411 = vmatprep.subr.bf16.mxu0 %v9410_v13  ;;  %v6678_v58 = vld [vmem:[%s13386_s1 + $0x8e0] sm:$0xff] }
 0x112   : > { %8270 = vmatmul.mubr.f32.gmra.mrb[90].mxu0 %v11058_v21  ;;  %9443 = vmatprep.subr.bf16.mxu1 %v9442_v9 }
 0x113   : > { %8326 = vmatmul.mubr.f32.gmra.mrb[90].mxu1 %v11058_v21  ;;  %9413 = vmatpush3.bf16.msra.mxu0 %v9410_v13  ;;  %v9474_v13 = vpack.c.bf16 %v6581_v1, %v6580_v8  ;;  %v6671_v8 = vld [vmem:[%s13386_s1 + $0x8a8] sm:$0xff] }
 0x114   : > { %9445 = vmatpush3.bf16.msra.mxu1 %v9442_v9  ;;  %8272 = vmatprep.mubr.f32.mxu0 %v11075_v27  ;;  %v9506_v9 = vpack.c.bf16 %v6613_v11, %v6612_v10 }
 0x115   : > { %8328 = vmatprep.mubr.f32.mxu1 %v11075_v27  ;;  %9415 = vmatprep.subr.bf16.mxu0 %v9414_v17 }
 0x116   : > { %8273 = vmatmul.mubr.f32.gmra.mrb[92].mxu0 %v11080_v29  ;;  %9447 = vmatprep.subr.bf16.mxu1 %v9446_v22 }
 0x117   : > { %8329 = vmatmul.mubr.f32.gmra.mrb[92].mxu1 %v11080_v29  ;;  %9417 = vmatpush3.bf16.msra.mxu0 %v9414_v17 }
 0x118   : > { %9449 = vmatpush3.bf16.msra.mxu1 %v9446_v22  ;;  %8275 = vmatprep.mubr.f32.mxu0 %v11097_v37  ;;  %v9478_v22 = vpack.c.bf16 %v6583_v16, %v6582_v15  ;;  %v6640_v15 = vld [vmem:[%s13386_s1 + $0x830] sm:$0xff]  ;;  %v6641_v16 = vld [vmem:[%s13386_s1 + $0x838] sm:$0xff] }
 0x119   : > { %8331 = vmatprep.mubr.f32.mxu1 %v11097_v37  ;;  %9419 = vmatprep.subr.bf16.mxu0 %v9418_v28 }
 0x11a   : > { %8276 = vmatmul.mubr.f32.gmra.mrb[94].mxu0 %v11102_v36  ;;  %9451 = vmatprep.subr.bf16.mxu1 %v9450_v30 }
 0x11b   : > { %8332 = vmatmul.mubr.f32.gmra.mrb[94].mxu1 %v11102_v36  ;;  %9421 = vmatpush3.bf16.msra.mxu0 %v9418_v28  ;;  %v6585_v28 = vld [vmem:[%s13386_s1 + $0x778] sm:$0xff] }
 0x11c   : > { %9453 = vmatpush3.bf16.msra.mxu1 %v9450_v30  ;;  %8366 = vmatprep.mubr.f32.mxu0 %v10815_v59  ;;  %v9482_v33 = vpack.c.bf16 %v6585_v28, %v6584_v25  ;;  %v6642_v28 = vld [vmem:[%s13386_s1 + $0x840] sm:$0xff] }
 0x11d   : > { %8422 = vmatprep.mubr.f32.mxu1 %v10815_v59  ;;  %9455 = vmatprep.subr.bf16.mxu0 %v9454_v35 }
 0x11e   : > { %8367 = vmatmul.mubr.f32.vlgmr.msra.gmra.mrb[96].mxu0 %v10948_v43  ;;  %9487 = vmatprep.subr.bf16.mxu1 %v9486_v42 }
 0x11f   : > { %8423 = vmatmul.mubr.f32.vlgmr.msra.gmra.mrb[96].mxu1 %v10948_v43  ;;  %9457 = vmatpush3.bf16.msra.mxu0 %v9454_v35 }
 0x120   : > { %9489 = vmatpush3.bf16.msra.mxu1 %v9486_v42  ;;  %8369 = vmatprep.mubr.f32.mxu0 %v10965_v49 }
 0x121   : > { %8425 = vmatprep.mubr.f32.mxu1 %v10965_v49  ;;  %9459 = vmatprep.subr.bf16.mxu0 %v9458_v41 }
 0x122   : > { %8370 = vmatmul.mubr.f32.gmra.mrb[98].mxu0 %v10970_v52  ;;  %9491 = vmatprep.subr.bf16.mxu1 %v9490_v50 }
 0x123   : > { %8426 = vmatmul.mubr.f32.gmra.mrb[98].mxu1 %v10970_v52  ;;  %9461 = vmatpush3.bf16.msra.mxu0 %v9458_v41  ;;  %v6666_v41 = vld [vmem:[%s13386_s1 + $0x880] sm:$0xff] }
 0x124   : > { %9493 = vmatpush3.bf16.msra.mxu1 %v9490_v50  ;;  %8372 = vmatprep.mubr.f32.mxu0 %v10987_v61  ;;  %v6667_v50 = vld [vmem:[%s13386_s1 + $0x888] sm:$0xff] }
 0x125   : > { %8428 = vmatprep.mubr.f32.mxu1 %v10987_v61  ;;  %9463 = vmatprep.subr.bf16.mxu0 %v9462_v51 }
 0x126   : > { %8373 = vmatmul.mubr.f32.gmra.mrb[100].mxu0 %v10992_v63  ;;  %9495 = vmatprep.subr.bf16.mxu1 %v9494_v53 }
 0x127   : > { %8429 = vmatmul.mubr.f32.gmra.mrb[100].mxu1 %v10992_v63  ;;  %9465 = vmatpush3.bf16.msra.mxu0 %v9462_v51  ;;  %v9550_v51 = vpack.c.bf16 %v6667_v50, %v6666_v41  ;;  %v6676_v50 = vld [vmem:[%s13386_s1 + $0x8d0] sm:$0xff] }
 0x128   : > { %9497 = vmatpush3.bf16.msra.mxu1 %v9494_v53  ;;  %8375 = vmatprep.mubr.f32.mxu0 %v11009_v5  ;;  %v6636_v53 = vld [vmem:[%s13386_s1 + $0x810] sm:$0xff] }
 0x129   : > { %8431 = vmatprep.mubr.f32.mxu1 %v11009_v5  ;;  %9467 = vmatprep.subr.bf16.mxu0 %v9466_v62 }
 0x12a   : > { %8376 = vmatmul.mubr.f32.gmra.mrb[102].mxu0 %v11014_v60  ;;  %9499 = vmatprep.subr.bf16.mxu1 %v9498_v0 }
 0x12b   : > { %8432 = vmatmul.mubr.f32.gmra.mrb[102].mxu1 %v11014_v60  ;;  %9469 = vmatpush3.bf16.msra.mxu0 %v9466_v62 }
 0x12c   : > { %9501 = vmatpush3.bf16.msra.mxu1 %v9498_v0  ;;  %8378 = vmatprep.mubr.f32.mxu0 %v11031_v4  ;;  %v9522_v0 = vpack.c.bf16 %v6637_v54, %v6636_v53  ;;  %v6646_v54 = vld [vmem:[%s13386_s1 + $0x860] sm:$0xff] }
 0x12d   : > { %8434 = vmatprep.mubr.f32.mxu1 %v11031_v4  ;;  %9471 = vmatprep.subr.bf16.mxu0 %v9470_v6 }
 0x12e   : > { %8379 = vmatmul.mubr.f32.gmra.mrb[104].mxu0 %v11036_v14  ;;  %9503 = vmatprep.subr.bf16.mxu1 %v9502_v7 }
 0x12f   : > { %8435 = vmatmul.mubr.f32.gmra.mrb[104].mxu1 %v11036_v14  ;;  %9473 = vmatpush3.bf16.msra.mxu0 %v9470_v6 }
 0x130   : > { %9505 = vmatpush3.bf16.msra.mxu1 %v9502_v7  ;;  %8381 = vmatprep.mubr.f32.mxu0 %v11053_v19  ;;  %v6670_v7 = vld [vmem:[%s13386_s1 + $0x8a0] sm:$0xff] }
 0x131   : > { %v7696_v17 = vpop.f32.mrb[0].mxu0  ;;  %8437 = vmatprep.mubr.f32.mxu1 %v11053_v19  ;;  %9475 = vmatprep.subr.bf16.mxu0 %v9474_v13 }
 0x132   : > { %357 = vst.msk [vmem:[%s11201_s23 + $0x8] sm:$0xff] %vm355_vm0, %v7696_v17  ;;  %v7752_v20 = vpop.f32.mrb[0].mxu1  ;;  %v276_v23 = vpop.f32.mrb[1].mxu0  ;;  %8382 = vmatmul.mubr.f32.gmra.mrb[106].mxu0 %v11058_v21  ;;  %9507 = vmatprep.subr.bf16.mxu1 %v9506_v9  ;;  %v6673_v17 = vld [vmem:[%s13386_s1 + $0x8b8] sm:$0xff] }
 0x133   : > { %6171 = vst.msk [vmem:[%s11201_s23 + $0x88] sm:$0xff] %vm355_vm0, %v7752_v20  ;;  %356 = vst.msk [vmem:[%s11201_s23] sm:$0xff] %vm355_vm0, %v276_v23  ;;  %v455_v30 = vpop.f32.mrb[1].mxu1  ;;  %8438 = vmatmul.mubr.f32.gmra.mrb[106].mxu1 %v11058_v21  ;;  %9477 = vmatpush3.bf16.msra.mxu0 %v9474_v13  ;;  %v9530_v20 = vpack.c.bf16 %v6641_v16, %v6640_v15  ;;  %v9562_v25 = vpack.c.bf16 %v6673_v17, %v6672_v18  ;;  %v6698_v16 = vld [vmem:[%s13386_s1 + $0x900] sm:$0xff] }
 0x134   : > { %6170 = vst.msk [vmem:[%s11201_s23 + $0x80] sm:$0xff] %vm355_vm0, %v455_v30  ;;  %9509 = vmatpush3.bf16.msra.mxu1 %v9506_v9  ;;  %8384 = vmatprep.mubr.f32.mxu0 %v11075_v27  ;;  %v9558_v9 = vpack.c.bf16 %v6671_v8, %v6670_v7  ;;  %v6643_v30 = vld [vmem:[%s13386_s1 + $0x848] sm:$0xff]  ;;  %v6680_v8 = vld [vmem:[%s13386_s1 + $0x8f0] sm:$0xff]  ;;  %v6730_v17 = vld [vmem:[%s13386_s1 + $0x980] sm:$0xff] }
 0x135   : > { %v7699_v32 = vpop.f32.mrb[2].mxu0  ;;  %8440 = vmatprep.mubr.f32.mxu1 %v11075_v27  ;;  %9479 = vmatprep.subr.bf16.mxu0 %v9478_v22 }
 0x136   : > { %359 = vst.msk [vmem:[%s11201_s23 + $0x18] sm:$0xff] %vm355_vm0, %v7699_v32  ;;  %v7755_v35 = vpop.f32.mrb[2].mxu1  ;;  %v286_v42 = vpop.f32.mrb[3].mxu0  ;;  %8385 = vmatmul.mubr.f32.gmra.mrb[108].mxu0 %v11080_v29  ;;  %9511 = vmatprep.subr.bf16.mxu1 %v9510_v24  ;;  %v6675_v32 = vld [vmem:[%s13386_s1 + $0x8c8] sm:$0xff] }
 0x137   : > { %6173 = vst.msk [vmem:[%s11201_s23 + $0x98] sm:$0xff] %vm355_vm0, %v7755_v35  ;;  %358 = vst.msk [vmem:[%s11201_s23 + $0x10] sm:$0xff] %vm355_vm0, %v286_v42  ;;  %v465_v40 = vpop.f32.mrb[3].mxu1  ;;  %8441 = vmatmul.mubr.f32.gmra.mrb[108].mxu1 %v11080_v29  ;;  %9481 = vmatpush3.bf16.msra.mxu0 %v9478_v22  ;;  %v9534_v35 = vpack.c.bf16 %v6643_v30, %v6642_v28  ;;  %v9566_v39 = vpack.c.bf16 %v6675_v32, %v6674_v34  ;;  %v6700_v30 = vld [vmem:[%s13386_s1 + $0x910] sm:$0xff] }
 0x138   : > { %6172 = vst.msk [vmem:[%s11201_s23 + $0x90] sm:$0xff] %vm355_vm0, %v465_v40  ;;  %9513 = vmatpush3.bf16.msra.mxu1 %v9510_v24  ;;  %8387 = vmatprep.mubr.f32.mxu0 %v11097_v37  ;;  %v6645_v40 = vld [vmem:[%s13386_s1 + $0x858] sm:$0xff]  ;;  %v6732_v32 = vld [vmem:[%s13386_s1 + $0x990] sm:$0xff] }
 0x139   : > { %v7702_v44 = vpop.f32.mrb[4].mxu0  ;;  %8443 = vmatprep.mubr.f32.mxu1 %v11097_v37  ;;  %9483 = vmatprep.subr.bf16.mxu0 %v9482_v33 }
 0x13a   : > { %361 = vst.msk [vmem:[%s11201_s23 + $0x28] sm:$0xff] %vm355_vm0, %v7702_v44  ;;  %v7758_v47 = vpop.f32.mrb[4].mxu1  ;;  %v296_v48 = vpop.f32.mrb[5].mxu0  ;;  %8388 = vmatmul.mubr.f32.gmra.mrb[110].mxu0 %v11102_v36  ;;  %9515 = vmatprep.subr.bf16.mxu1 %v9514_v38  ;;  %v6677_v44 = vld [vmem:[%s13386_s1 + $0x8d8] sm:$0xff] }
 0x13b   : > { %6175 = vst.msk [vmem:[%s11201_s23 + $0xa8] sm:$0xff] %vm355_vm0, %v7758_v47  ;;  %360 = vst.msk [vmem:[%s11201_s23 + $0x20] sm:$0xff] %vm355_vm0, %v296_v48  ;;  %v475_v55 = vpop.f32.mrb[5].mxu1  ;;  %8444 = vmatmul.mubr.f32.gmra.mrb[110].mxu1 %v11102_v36  ;;  %9485 = vmatpush3.bf16.msra.mxu0 %v9482_v33  ;;  %v9538_v47 = vpack.c.bf16 %v6645_v40, %v6644_v45  ;;  %v9570_v53 = vpack.c.bf16 %v6677_v44, %v6676_v50  ;;  %v6703_v50 = vld [vmem:[%s13386_s1 + $0x928] sm:$0xff] }
 0x13c   : > { %6174 = vst.msk [vmem:[%s11201_s23 + $0xa0] sm:$0xff] %vm355_vm0, %v475_v55  ;;  %9517 = vmatpush3.bf16.msra.mxu1 %v9514_v38  ;;  %8478 = vmatprep.mubr.f32.mxu0 %v10815_v59  ;;  %v6647_v55 = vld [vmem:[%s13386_s1 + $0x868] sm:$0xff] }
 0x13d   : > { %v7705_v62 = vpop.f32.mrb[6].mxu0  ;;  %8534 = vmatprep.mubr.f32.mxu1 %v10815_v59  ;;  %9519 = vmatprep.subr.bf16.mxu0 %v9518_v46  ;;  %v6639_v59 = vld [vmem:[%s13386_s1 + $0x828] sm:$0xff] }
 0x13e   : > { %363 = vst.msk [vmem:[%s11201_s23 + $0x38] sm:$0xff] %vm355_vm0, %v7705_v62  ;;  %v7761_v26 = vpop.f32.mrb[6].mxu1  ;;  %v306_v2 = vpop.f32.mrb[7].mxu0  ;;  %8479 = vmatmul.mubr.f32.vlgmr.msra.gmra.mrb[112].mxu0 %v10948_v43  ;;  %9551 = vmatprep.subr.bf16.mxu1 %v9550_v51  ;;  %v9526_v10 = vpack.c.bf16 %v6639_v59, %v6638_v57  ;;  %v6679_v62 = vld [vmem:[%s13386_s1 + $0x8e8] sm:$0xff]  ;;  %v6648_v59 = vld [vmem:[%s13386_s1 + $0x870] sm:$0xff] }
 0x13f   : > { %6177 = vst.msk [vmem:[%s11201_s23 + $0xb8] sm:$0xff] %vm355_vm0, %v7761_v26  ;;  %362 = vst.msk [vmem:[%s11201_s23 + $0x30] sm:$0xff] %vm355_vm0, %v306_v2  ;;  %v485_v6 = vpop.f32.mrb[7].mxu1  ;;  %8535 = vmatmul.mubr.f32.vlgmr.msra.gmra.mrb[112].mxu1 %v10948_v43  ;;  %9521 = vmatpush3.bf16.msra.mxu0 %v9518_v46  ;;  %v9542_v26 = vpack.c.bf16 %v6647_v55, %v6646_v54  ;;  %v9574_v57 = vpack.c.bf16 %v6679_v62, %v6678_v58  ;;  %v6704_v55 = vld [vmem:[%s13386_s1 + $0x930] sm:$0xff]  ;;  %v6737_v62 = vld [vmem:[%s13386_s1 + $0x9b8] sm:$0xff] }
 0x140   : > { %6176 = vst.msk [vmem:[%s11201_s23 + $0xb0] sm:$0xff] %vm355_vm0, %v485_v6  ;;  %9553 = vmatpush3.bf16.msra.mxu1 %v9550_v51  ;;  %8481 = vmatprep.mubr.f32.mxu0 %v10965_v49  ;;  %v6649_v6 = vld [vmem:[%s13386_s1 + $0x878] sm:$0xff]  ;;  %v6736_v58 = vld [vmem:[%s13386_s1 + $0x9b0] sm:$0xff] }
 0x141   : > { %v7708_v1 = vpop.f32.mrb[8].mxu0  ;;  %8537 = vmatprep.mubr.f32.mxu1 %v10965_v49  ;;  %9523 = vmatprep.subr.bf16.mxu0 %v9522_v0 }
 0x142   : > { %365 = vst.msk [vmem:[%s11201_s23 + $0x48] sm:$0xff] %vm355_vm0, %v7708_v1  ;;  %v7764_v11 = vpop.f32.mrb[8].mxu1  ;;  %v316_v13 = vpop.f32.mrb[9].mxu0  ;;  %8482 = vmatmul.mubr.f32.gmra.mrb[114].mxu0 %v10970_v52  ;;  %9555 = vmatprep.subr.bf16.mxu1 %v9554_v3  ;;  %v6681_v1 = vld [vmem:[%s13386_s1 + $0x8f8] sm:$0xff] }
 0x143   : > { %6179 = vst.msk [vmem:[%s11201_s23 + $0xc8] sm:$0xff] %vm355_vm0, %v7764_v11  ;;  %364 = vst.msk [vmem:[%s11201_s23 + $0x40] sm:$0xff] %vm355_vm0, %v316_v13  ;;  %v495_v12 = vpop.f32.mrb[9].mxu1  ;;  %8538 = vmatmul.mubr.f32.gmra.mrb[114].mxu1 %v10970_v52  ;;  %9525 = vmatpush3.bf16.msra.mxu0 %v9522_v0  ;;  %v9546_v11 = vpack.c.bf16 %v6649_v6, %v6648_v59  ;;  %v9578_v15 = vpack.c.bf16 %v6681_v1, %v6680_v8  ;;  %v6738_v6 = vld [vmem:[%s13386_s1 + $0x9c0] sm:$0xff] }
 0x144   : > { %6178 = vst.msk [vmem:[%s11201_s23 + $0xc0] sm:$0xff] %vm355_vm0, %v495_v12  ;;  %9557 = vmatpush3.bf16.msra.mxu1 %v9554_v3  ;;  %8484 = vmatprep.mubr.f32.mxu0 %v10987_v61  ;;  %v6699_v12 = vld [vmem:[%s13386_s1 + $0x908] sm:$0xff] }
 0x145   : > { %v7711_v22 = vpop.f32.mrb[10].mxu0  ;;  %8540 = vmatprep.mubr.f32.mxu1 %v10987_v61  ;;  %9527 = vmatprep.subr.bf16.mxu0 %v9526_v10 }
 0x146   : > { %367 = vst.msk [vmem:[%s11201_s23 + $0x58] sm:$0xff] %vm355_vm0, %v7711_v22  ;;  %v7767_v23 = vpop.f32.mrb[10].mxu1  ;;  %v326_v24 = vpop.f32.mrb[11].mxu0  ;;  %8485 = vmatmul.mubr.f32.gmra.mrb[116].mxu0 %v10992_v63  ;;  %9559 = vmatprep.subr.bf16.mxu1 %v9558_v9  ;;  %v6731_v22 = vld [vmem:[%s13386_s1 + $0x988] sm:$0xff] }
 0x147   : > { %6181 = vst.msk [vmem:[%s11201_s23 + $0xd8] sm:$0xff] %vm355_vm0, %v7767_v23  ;;  %366 = vst.msk [vmem:[%s11201_s23 + $0x50] sm:$0xff] %vm355_vm0, %v326_v24  ;;  %v505_v31 = vpop.f32.mrb[11].mxu1  ;;  %8541 = vmatmul.mubr.f32.gmra.mrb[116].mxu1 %v10992_v63  ;;  %9529 = vmatpush3.bf16.msra.mxu0 %v9526_v10  ;;  %v9582_v23 = vpack.c.bf16 %v6699_v12, %v6698_v16  ;;  %v9614_v28 = vpack.c.bf16 %v6731_v22, %v6730_v17  ;;  %v6741_v16 = vld [vmem:[%s13386_s1 + $0x9d8] sm:$0xff] }
 0x148   : > { %6180 = vst.msk [vmem:[%s11201_s23 + $0xd0] sm:$0xff] %vm355_vm0, %v505_v31  ;;  %9561 = vmatpush3.bf16.msra.mxu1 %v9558_v9  ;;  %8487 = vmatprep.mubr.f32.mxu0 %v11009_v5  ;;  %v6701_v31 = vld [vmem:[%s13386_s1 + $0x918] sm:$0xff] }
 0x149   : > { %v7714_v33 = vpop.f32.mrb[12].mxu0  ;;  %8543 = vmatprep.mubr.f32.mxu1 %v11009_v5  ;;  %9531 = vmatprep.subr.bf16.mxu0 %v9530_v20 }
 0x14a   : > { %369 = vst.msk [vmem:[%s11201_s23 + $0x68] sm:$0xff] %vm355_vm0, %v7714_v33  ;;  %v7770_v42 = vpop.f32.mrb[12].mxu1  ;;  %v336_v38 = vpop.f32.mrb[13].mxu0  ;;  %8488 = vmatmul.mubr.f32.gmra.mrb[118].mxu0 %v11014_v60  ;;  %9563 = vmatprep.subr.bf16.mxu1 %v9562_v25  ;;  %v6733_v33 = vld [vmem:[%s13386_s1 + $0x998] sm:$0xff] }
 0x14b   : > { %6183 = vst.msk [vmem:[%s11201_s23 + $0xe8] sm:$0xff] %vm355_vm0, %v7770_v42  ;;  %368 = vst.msk [vmem:[%s11201_s23 + $0x60] sm:$0xff] %vm355_vm0, %v336_v38  ;;  %v515_v41 = vpop.f32.mrb[13].mxu1  ;;  %8544 = vmatmul.mubr.f32.gmra.mrb[118].mxu1 %v11014_v60  ;;  %9533 = vmatpush3.bf16.msra.mxu0 %v9530_v20  ;;  %v9586_v38 = vpack.c.bf16 %v6701_v31, %v6700_v30  ;;  %v9618_v40 = vpack.c.bf16 %v6733_v33, %v6732_v32  ;;  %v6712_v32 = vld [vmem:[%s13386_s1 + $0x970] sm:$0xff] }
 0x14c   : > { %6182 = vst.msk [vmem:[%s11201_s23 + $0xe0] sm:$0xff] %vm355_vm0, %v515_v41  ;;  %9565 = vmatpush3.bf16.msra.mxu1 %v9562_v25  ;;  %8490 = vmatprep.mubr.f32.mxu0 %v11031_v4  ;;  %v6702_v41 = vld [vmem:[%s13386_s1 + $0x920] sm:$0xff] }
 0x14d   : > { %v7717_v46 = vpop.f32.mrb[14].mxu0  ;;  %8546 = vmatprep.mubr.f32.mxu1 %v11031_v4  ;;  %9535 = vmatprep.subr.bf16.mxu0 %v9534_v35 }
 0x14e   : > { %371 = vst.msk [vmem:[%s11201_s23 + $0x78] sm:$0xff] %vm355_vm0, %v7717_v46  ;;  %v7773_v48 = vpop.f32.mrb[14].mxu1  ;;  %v346_v51 = vpop.f32.mrb[15].mxu0  ;;  %8491 = vmatmul.mubr.f32.gmra.mrb[120].mxu0 %v11036_v14  ;;  %9567 = vmatprep.subr.bf16.mxu1 %v9566_v39  ;;  %v6734_v46 = vld [vmem:[%s13386_s1 + $0x9a0] sm:$0xff] }
 0x14f   : > { %6185 = vst.msk [vmem:[%s11201_s23 + $0xf8] sm:$0xff] %vm355_vm0, %v7773_v48  ;;  %370 = vst.msk [vmem:[%s11201_s23 + $0x70] sm:$0xff] %vm355_vm0, %v346_v51  ;;  %v525_v56 = vpop.f32.mrb[15].mxu1  ;;  %8547 = vmatmul.mubr.f32.gmra.mrb[120].mxu1 %v11036_v14  ;;  %9537 = vmatpush3.bf16.msra.mxu0 %v9534_v35  ;;  %v11466_v35 = vld [vmem:[%s10128_s28] sm:$0xff] }
 0x150   : > { %6184 = vst.msk [vmem:[%s11201_s23 + $0xf0] sm:$0xff] %vm355_vm0, %v525_v56  ;;  %9569 = vmatpush3.bf16.msra.mxu1 %v9566_v39  ;;  %8493 = vmatprep.mubr.f32.mxu0 %v11053_v19 }
 0x151   : > { %v7808_v0 = vpop.f32.mrb[16].mxu0  ;;  %8549 = vmatprep.mubr.f32.mxu1 %v11053_v19  ;;  %9539 = vmatprep.subr.bf16.mxu0 %v9538_v47 }
 0x152   : > { %6203 = vst.msk [vmem:[%s11201_s23 + $0x108] sm:$0xff] %vm355_vm0, %v7808_v0  ;;  %v7864_v2 = vpop.f32.mrb[16].mxu1  ;;  %v634_v3 = vpop.f32.mrb[17].mxu0  ;;  %8494 = vmatmul.mubr.f32.gmra.mrb[122].mxu0 %v11058_v21  ;;  %9571 = vmatprep.subr.bf16.mxu1 %v9570_v53 }
 0x153   : > { %6235 = vst.msk [vmem:[%s11201_s23 + $0x188] sm:$0xff] %vm355_vm0, %v7864_v2  ;;  %6202 = vst.msk [vmem:[%s11201_s23 + $0x100] sm:$0xff] %vm355_vm0, %v634_v3  ;;  %v813_v7 = vpop.f32.mrb[17].mxu1  ;;  %8550 = vmatmul.mubr.f32.gmra.mrb[122].mxu1 %v11058_v21  ;;  %9541 = vmatpush3.bf16.msra.mxu0 %v9538_v47  ;;  %v6735_v47 = vld [vmem:[%s13386_s1 + $0x9a8] sm:$0xff]  ;;  %v9626_v3 = vpack.c.bf16 %v6737_v62, %v6736_v58 }
 0x154   : > { %6234 = vst.msk [vmem:[%s11201_s23 + $0x180] sm:$0xff] %vm355_vm0, %v813_v7  ;;  %9573 = vmatpush3.bf16.msra.mxu1 %v9570_v53  ;;  %8496 = vmatprep.mubr.f32.mxu0 %v11075_v27  ;;  %v9622_v54 = vpack.c.bf16 %v6735_v47, %v6734_v46  ;;  %v6739_v7 = vld [vmem:[%s13386_s1 + $0x9c8] sm:$0xff]  ;;  %v6794_v46 = vld [vmem:[%s13386_s1 + $0xa80] sm:$0xff] }
 0x155   : > { %v7811_v10 = vpop.f32.mrb[18].mxu0  ;;  %8552 = vmatprep.mubr.f32.mxu1 %v11075_v27  ;;  %9543 = vmatprep.subr.bf16.mxu0 %v9542_v26  ;;  %v6795_v47 = vld [vmem:[%s13386_s1 + $0xa88] sm:$0xff] }
 0x156   : > { %6205 = vst.msk [vmem:[%s11201_s23 + $0x118] sm:$0xff] %vm355_vm0, %v7811_v10  ;;  %v7867_v13 = vpop.f32.mrb[18].mxu1  ;;  %v644_v9 = vpop.f32.mrb[19].mxu0  ;;  %8497 = vmatmul.mubr.f32.gmra.mrb[124].mxu0 %v11080_v29  ;;  %9575 = vmatprep.subr.bf16.mxu1 %v9574_v57 }
 0x157   : > { %6237 = vst.msk [vmem:[%s11201_s23 + $0x198] sm:$0xff] %vm355_vm0, %v7867_v13  ;;  %6204 = vst.msk [vmem:[%s11201_s23 + $0x110] sm:$0xff] %vm355_vm0, %v644_v9  ;;  %v823_v18 = vpop.f32.mrb[19].mxu1  ;;  %8553 = vmatmul.mubr.f32.gmra.mrb[124].mxu1 %v11080_v29  ;;  %9545 = vmatpush3.bf16.msra.mxu0 %v9542_v26  ;;  %v6708_v13 = vld [vmem:[%s13386_s1 + $0x950] sm:$0xff] }
 0x158   : > { %6236 = vst.msk [vmem:[%s11201_s23 + $0x190] sm:$0xff] %vm355_vm0, %v823_v18  ;;  %9577 = vmatpush3.bf16.msra.mxu1 %v9574_v57  ;;  %8499 = vmatprep.mubr.f32.mxu0 %v11097_v37  ;;  %v6706_v57 = vld [vmem:[%s13386_s1 + $0x940] sm:$0xff] }
 0x159   : > { %v7814_v20 = vpop.f32.mrb[20].mxu0  ;;  %8555 = vmatprep.mubr.f32.mxu1 %v11097_v37  ;;  %9547 = vmatprep.subr.bf16.mxu0 %v9546_v11 }
 0x15a   : > { %6207 = vst.msk [vmem:[%s11201_s23 + $0x128] sm:$0xff] %vm355_vm0, %v7814_v20  ;;  %v7870_v24 = vpop.f32.mrb[20].mxu1  ;;  %v654_v25 = vpop.f32.mrb[21].mxu0  ;;  %8500 = vmatmul.mubr.f32.gmra.mrb[126].mxu0 %v11102_v36  ;;  %9579 = vmatprep.subr.bf16.mxu1 %v9578_v15  ;;  %v6710_v20 = vld [vmem:[%s13386_s1 + $0x960] sm:$0xff] }
 0x15b   : > { %6239 = vst.msk [vmem:[%s11201_s23 + $0x1a8] sm:$0xff] %vm355_vm0, %v7870_v24  ;;  %6206 = vst.msk [vmem:[%s11201_s23 + $0x120] sm:$0xff] %vm355_vm0, %v654_v25  ;;  %v833_v34 = vpop.f32.mrb[21].mxu1  ;;  %8556 = vmatmul.mubr.f32.gmra.mrb[126].mxu1 %v11102_v36  ;;  %9549 = vmatpush3.bf16.msra.mxu0 %v9546_v11  ;;  %v9630_v11 = vpack.c.bf16 %v6739_v7, %v6738_v6  ;;  %v6742_v24 = vld [vmem:[%s13386_s1 + $0x9e0] sm:$0xff]  ;;  %v6743_v25 = vld [vmem:[%s13386_s1 + $0x9e8] sm:$0xff] }
 0x15c   : > { %6238 = vst.msk [vmem:[%s11201_s23 + $0x1a0] sm:$0xff] %vm355_vm0, %v833_v34  ;;  %9581 = vmatpush3.bf16.msra.mxu1 %v9578_v15  ;;  %8590 = vmatprep.mubr.f32.mxu0 %v11466_v35  ;;  %v6740_v15 = vld [vmem:[%s13386_s1 + $0x9d0] sm:$0xff]  ;;  %v9638_v34 = vpack.c.bf16 %v6743_v25, %v6742_v24  ;;  %v6771_v24 = vld [vmem:[%s13386_s1 + $0xa48] sm:$0xff] }
 0x15d   : > { %v7817_v42 = vpop.f32.mrb[22].mxu0  ;;  %8646 = vmatprep.mubr.f32.mxu1 %v11466_v35  ;;  %9583 = vmatprep.subr.bf16.mxu0 %v9582_v23  ;;  %v9634_v22 = vpack.c.bf16 %v6741_v16, %v6740_v15  ;;  %v11688_v6 = vld [vmem:[%s10128_s28 + $0x10] sm:$0xff]  ;;  %v6801_v16 = vld [vmem:[%s13386_s1 + $0xab8] sm:$0xff] }
 0x15e   : > { %6209 = vst.msk [vmem:[%s11201_s23 + $0x138] sm:$0xff] %vm355_vm0, %v7817_v42  ;;  %v7873_v39 = vpop.f32.mrb[22].mxu1  ;;  %v664_v45 = vpop.f32.mrb[23].mxu0  ;;  %8591 = vmatmul.mubr.f32.vlgmr.msra.gmra.mrb[128].mxu0 %v10948_v43  ;;  %9615 = vmatprep.subr.bf16.mxu1 %v9614_v28  ;;  %v6744_v42 = vld [vmem:[%s13386_s1 + $0x9f0] sm:$0xff] }
 0x15f   : > { %6241 = vst.msk [vmem:[%s11201_s23 + $0x1b8] sm:$0xff] %vm355_vm0, %v7873_v39  ;;  %6208 = vst.msk [vmem:[%s11201_s23 + $0x130] sm:$0xff] %vm355_vm0, %v664_v45  ;;  %v843_v44 = vpop.f32.mrb[23].mxu1  ;;  %8647 = vmatmul.mubr.f32.vlgmr.msra.gmra.mrb[128].mxu1 %v10948_v43  ;;  %9585 = vmatpush3.bf16.msra.mxu0 %v9582_v23  ;;  %v9590_v43 = vpack.c.bf16 %v6703_v50, %v6702_v41  ;;  %v6762_v50 = vld [vmem:[%s13386_s1 + $0xa00] sm:$0xff]  ;;  %v6800_v15 = vld [vmem:[%s13386_s1 + $0xab0] sm:$0xff] }
 0x160   : > { %6240 = vst.msk [vmem:[%s11201_s23 + $0x1b0] sm:$0xff] %vm355_vm0, %v843_v44  ;;  %9617 = vmatpush3.bf16.msra.mxu1 %v9614_v28  ;;  %8593 = vmatprep.mubr.f32.mxu0 %v10965_v49 }
 0x161   : > { %v7820_v48 = vpop.f32.mrb[24].mxu0  ;;  %8649 = vmatprep.mubr.f32.mxu1 %v10965_v49  ;;  %9587 = vmatprep.subr.bf16.mxu0 %v9586_v38  ;;  %v6705_v49 = vld [vmem:[%s13386_s1 + $0x938] sm:$0xff] }
 0x162   : > { %6211 = vst.msk [vmem:[%s11201_s23 + $0x148] sm:$0xff] %vm355_vm0, %v7820_v48  ;;  %v7876_v51 = vpop.f32.mrb[24].mxu1  ;;  %v674_v53 = vpop.f32.mrb[25].mxu0  ;;  %8594 = vmatmul.mubr.f32.gmra.mrb[130].mxu0 %v10970_v52  ;;  %9619 = vmatprep.subr.bf16.mxu1 %v9618_v40 }
 0x163   : > { %6243 = vst.msk [vmem:[%s11201_s23 + $0x1c8] sm:$0xff] %vm355_vm0, %v7876_v51  ;;  %6210 = vst.msk [vmem:[%s11201_s23 + $0x140] sm:$0xff] %vm355_vm0, %v674_v53  ;;  %v853_v56 = vpop.f32.mrb[25].mxu1  ;;  %8650 = vmatmul.mubr.f32.gmra.mrb[130].mxu1 %v10970_v52  ;;  %9589 = vmatpush3.bf16.msra.mxu0 %v9586_v38  ;;  %v9594_v52 = vpack.c.bf16 %v6705_v49, %v6704_v55  ;;  %v6745_v38 = vld [vmem:[%s13386_s1 + $0x9f8] sm:$0xff]  ;;  %v9678_v53 = vpack.c.bf16 %v6795_v47, %v6794_v46  ;;  %v6796_v49 = vld [vmem:[%s13386_s1 + $0xa90] sm:$0xff] }
 0x164   : > { %6242 = vst.msk [vmem:[%s11201_s23 + $0x1c0] sm:$0xff] %vm355_vm0, %v853_v56  ;;  %9621 = vmatpush3.bf16.msra.mxu1 %v9618_v40  ;;  %8596 = vmatprep.mubr.f32.mxu0 %v10987_v61  ;;  %v9642_v41 = vpack.c.bf16 %v6745_v38, %v6744_v42  ;;  %v6797_v56 = vld [vmem:[%s13386_s1 + $0xa98] sm:$0xff]  ;;  %v6772_v38 = vld [vmem:[%s13386_s1 + $0xa50] sm:$0xff]  ;;  %v11785_v47 = vld [vmem:[%s10128_s28 + $0x48] sm:$0xff] }
 0x165   : > { %v7823_v0 = vpop.f32.mrb[26].mxu0  ;;  %8652 = vmatprep.mubr.f32.mxu1 %v10987_v61  ;;  %9591 = vmatprep.subr.bf16.mxu0 %v9590_v43  ;;  %v6707_v61 = vld [vmem:[%s13386_s1 + $0x948] sm:$0xff] }
 0x166   : > { %6213 = vst.msk [vmem:[%s11201_s23 + $0x158] sm:$0xff] %vm355_vm0, %v7823_v0  ;;  %v7879_v26 = vpop.f32.mrb[26].mxu1  ;;  %v684_v2 = vpop.f32.mrb[27].mxu0  ;;  %8597 = vmatmul.mubr.f32.gmra.mrb[132].mxu0 %v10992_v63  ;;  %9623 = vmatprep.subr.bf16.mxu1 %v9622_v54 }
 0x167   : > { %6245 = vst.msk [vmem:[%s11201_s23 + $0x1d8] sm:$0xff] %vm355_vm0, %v7879_v26  ;;  %6212 = vst.msk [vmem:[%s11201_s23 + $0x150] sm:$0xff] %vm355_vm0, %v684_v2  ;;  %v863_v59 = vpop.f32.mrb[27].mxu1  ;;  %8653 = vmatmul.mubr.f32.gmra.mrb[132].mxu1 %v10992_v63  ;;  %9593 = vmatpush3.bf16.msra.mxu0 %v9590_v43  ;;  %v9598_v63 = vpack.c.bf16 %v6707_v61, %v6706_v57  ;;  %v9682_v26 = vpack.c.bf16 %v6797_v56, %v6796_v49  ;;  %v6766_v2 = vld [vmem:[%s13386_s1 + $0xa20] sm:$0xff] }
 0x168   : > { %6244 = vst.msk [vmem:[%s11201_s23 + $0x1d0] sm:$0xff] %vm355_vm0, %v863_v59  ;;  %9625 = vmatpush3.bf16.msra.mxu1 %v9622_v54  ;;  %8599 = vmatprep.mubr.f32.mxu0 %v11009_v5  ;;  %v6764_v54 = vld [vmem:[%s13386_s1 + $0xa10] sm:$0xff]  ;;  %v6798_v61 = vld [vmem:[%s13386_s1 + $0xaa0] sm:$0xff]  ;;  %v6799_v59 = vld [vmem:[%s13386_s1 + $0xaa8] sm:$0xff] }
 0x169   : > { %v7826_v8 = vpop.f32.mrb[28].mxu0  ;;  %8655 = vmatprep.mubr.f32.mxu1 %v11009_v5  ;;  %9595 = vmatprep.subr.bf16.mxu0 %v9594_v52  ;;  %v6709_v5 = vld [vmem:[%s13386_s1 + $0x958] sm:$0xff] }
 0x16a   : > { %6215 = vst.msk [vmem:[%s11201_s23 + $0x168] sm:$0xff] %vm355_vm0, %v7826_v8  ;;  %v7882_v1 = vpop.f32.mrb[28].mxu1  ;;  %v694_v10 = vpop.f32.mrb[29].mxu0  ;;  %8600 = vmatmul.mubr.f32.gmra.mrb[134].mxu0 %v11014_v60  ;;  %9627 = vmatprep.subr.bf16.mxu1 %v9626_v3 }
 0x16b   : > { %6247 = vst.msk [vmem:[%s11201_s23 + $0x1e8] sm:$0xff] %vm355_vm0, %v7882_v1  ;;  %6214 = vst.msk [vmem:[%s11201_s23 + $0x160] sm:$0xff] %vm355_vm0, %v694_v10  ;;  %v873_v9 = vpop.f32.mrb[29].mxu1  ;;  %8656 = vmatmul.mubr.f32.gmra.mrb[134].mxu1 %v11014_v60  ;;  %9597 = vmatpush3.bf16.msra.mxu0 %v9594_v52  ;;  %v9602_v60 = vpack.c.bf16 %v6709_v5, %v6708_v13  ;;  %v11665_v52 = vld [vmem:[%s10128_s28 + $0x8] sm:$0xff]  ;;  %v11695_v10 = vld [vmem:[%s10128_s28 + $0x18] sm:$0xff] }
 0x16c   : > { %6246 = vst.msk [vmem:[%s11201_s23 + $0x1e0] sm:$0xff] %vm355_vm0, %v873_v9  ;;  %9629 = vmatpush3.bf16.msra.mxu1 %v9626_v3  ;;  %8602 = vmatprep.mubr.f32.mxu0 %v11031_v4  ;;  %v6767_v3 = vld [vmem:[%s13386_s1 + $0xa28] sm:$0xff]  ;;  %v6768_v13 = vld [vmem:[%s13386_s1 + $0xa30] sm:$0xff]  ;;  %v6769_v5 = vld [vmem:[%s13386_s1 + $0xa38] sm:$0xff] }
 0x16d   : > { %v7829_v12 = vpop.f32.mrb[30].mxu0  ;;  %8658 = vmatprep.mubr.f32.mxu1 %v11031_v4  ;;  %9599 = vmatprep.subr.bf16.mxu0 %v9598_v63  ;;  %v6711_v4 = vld [vmem:[%s13386_s1 + $0x968] sm:$0xff]  ;;  %v9654_v8 = vpack.c.bf16 %v6767_v3, %v6766_v2  ;;  %v6808_v3 = vld [vmem:[%s13386_s1 + $0xaf0] sm:$0xff] }
 0x16e   : > { %6217 = vst.msk [vmem:[%s11201_s23 + $0x178] sm:$0xff] %vm355_vm0, %v7829_v12  ;;  %v7885_v18 = vpop.f32.mrb[30].mxu1  ;;  %v704_v17 = vpop.f32.mrb[31].mxu0  ;;  %8603 = vmatmul.mubr.f32.gmra.mrb[136].mxu0 %v11036_v14  ;;  %9631 = vmatprep.subr.bf16.mxu1 %v9630_v11  ;;  %v11718_v12 = vld [vmem:[%s10128_s28 + $0x20] sm:$0xff] }
 0x16f   : > { %6249 = vst.msk [vmem:[%s11201_s23 + $0x1f8] sm:$0xff] %vm355_vm0, %v7885_v18  ;;  %6216 = vst.msk [vmem:[%s11201_s23 + $0x170] sm:$0xff] %vm355_vm0, %v704_v17  ;;  %v883_v23 = vpop.f32.mrb[31].mxu1  ;;  %8659 = vmatmul.mubr.f32.gmra.mrb[136].mxu1 %v11036_v14  ;;  %9601 = vmatpush3.bf16.msra.mxu0 %v9598_v63  ;;  %v9606_v14 = vpack.c.bf16 %v6711_v4, %v6710_v20  ;;  %v9658_v18 = vpack.c.bf16 %v6769_v5, %v6768_v13  ;;  %v11725_v20 = vld [vmem:[%s10128_s28 + $0x28] sm:$0xff]  ;;  %v6826_v13 = vld [vmem:[%s13386_s1 + $0xb00] sm:$0xff] }
 0x170   : > { %6248 = vst.msk [vmem:[%s11201_s23 + $0x1f0] sm:$0xff] %vm355_vm0, %v883_v23  ;;  %9633 = vmatpush3.bf16.msra.mxu1 %v9630_v11  ;;  %8605 = vmatprep.mubr.f32.mxu0 %v11053_v19  ;;  %v9686_v11 = vpack.c.bf16 %v6799_v59, %v6798_v61  ;;  %v9690_v4 = vpack.c.bf16 %v6801_v16, %v6800_v15  ;;  %v6770_v23 = vld [vmem:[%s13386_s1 + $0xa40] sm:$0xff]  ;;  %v6827_v5 = vld [vmem:[%s13386_s1 + $0xb08] sm:$0xff] }
 0x171   : > { %v7920_v28 = vpop.f32.mrb[32].mxu0  ;;  %8661 = vmatprep.mubr.f32.mxu1 %v11053_v19  ;;  %9603 = vmatprep.subr.bf16.mxu0 %v9602_v60  ;;  %v6713_v19 = vld [vmem:[%s13386_s1 + $0x978] sm:$0xff]  ;;  %v11838_v61 = vld [vmem:[%s10128_s28 + $0x60] sm:$0xff]  ;;  %v6859_v16 = vld [vmem:[%s13386_s1 + $0xb88] sm:$0xff] }
 0x172   : > { %6267 = vst.msk [vmem:[%s11201_s23 + $0x208] sm:$0xff] %vm355_vm0, %v7920_v28  ;;  %v7976_v30 = vpop.f32.mrb[32].mxu1  ;;  %v992_v31 = vpop.f32.mrb[33].mxu0  ;;  %8606 = vmatmul.mubr.f32.gmra.mrb[138].mxu0 %v11058_v21  ;;  %9635 = vmatprep.subr.bf16.mxu1 %v9634_v22  ;;  %v6802_v28 = vld [vmem:[%s13386_s1 + $0xac0] sm:$0xff] }
 0x173   : > { %6299 = vst.msk [vmem:[%s11201_s23 + $0x288] sm:$0xff] %vm355_vm0, %v7976_v30  ;;  %6266 = vst.msk [vmem:[%s11201_s23 + $0x200] sm:$0xff] %vm355_vm0, %v992_v31  ;;  %v1171_v33 = vpop.f32.mrb[33].mxu1  ;;  %8662 = vmatmul.mubr.f32.gmra.mrb[138].mxu1 %v11058_v21  ;;  %9605 = vmatpush3.bf16.msra.mxu0 %v9602_v60  ;;  %v9610_v21 = vpack.c.bf16 %v6713_v19, %v6712_v32  ;;  %v11748_v30 = vld [vmem:[%s10128_s28 + $0x30] sm:$0xff]  ;;  %v6858_v15 = vld [vmem:[%s13386_s1 + $0xb80] sm:$0xff] }
 0x174   : > { %6298 = vst.msk [vmem:[%s11201_s23 + $0x280] sm:$0xff] %vm355_vm0, %v1171_v33  ;;  %9637 = vmatpush3.bf16.msra.mxu1 %v9634_v22  ;;  %8608 = vmatprep.mubr.f32.mxu0 %v11075_v27  ;;  %v11755_v33 = vld [vmem:[%s10128_s28 + $0x38] sm:$0xff] }
 0x175   : > { %v7923_v39 = vpop.f32.mrb[34].mxu0  ;;  %8664 = vmatprep.mubr.f32.mxu1 %v11075_v27  ;;  %9607 = vmatprep.subr.bf16.mxu0 %v9606_v14  ;;  %v6763_v27 = vld [vmem:[%s13386_s1 + $0xa08] sm:$0xff] }
 0x176   : > { %6269 = vst.msk [vmem:[%s11201_s23 + $0x218] sm:$0xff] %vm355_vm0, %v7923_v39  ;;  %v7979_v45 = vpop.f32.mrb[34].mxu1  ;;  %v1002_v40 = vpop.f32.mrb[35].mxu0  ;;  %8609 = vmatmul.mubr.f32.gmra.mrb[140].mxu0 %v11080_v29  ;;  %9639 = vmatprep.subr.bf16.mxu1 %v9638_v34  ;;  %v6773_v39 = vld [vmem:[%s13386_s1 + $0xa58] sm:$0xff] }
 0x177   : > { %6301 = vst.msk [vmem:[%s11201_s23 + $0x298] sm:$0xff] %vm355_vm0, %v7979_v45  ;;  %6268 = vst.msk [vmem:[%s11201_s23 + $0x210] sm:$0xff] %vm355_vm0, %v1002_v40  ;;  %v1181_v44 = vpop.f32.mrb[35].mxu1  ;;  %8665 = vmatmul.mubr.f32.gmra.mrb[140].mxu1 %v11080_v29  ;;  %9609 = vmatpush3.bf16.msra.mxu0 %v9606_v14  ;;  %v9646_v29 = vpack.c.bf16 %v6763_v27, %v6762_v50  ;;  %v6803_v14 = vld [vmem:[%s13386_s1 + $0xac8] sm:$0xff]  ;;  %v6804_v45 = vld [vmem:[%s13386_s1 + $0xad0] sm:$0xff]  ;;  %v9666_v27 = vpack.c.bf16 %v6773_v39, %v6772_v38 }
 0x178   : > { %6300 = vst.msk [vmem:[%s11201_s23 + $0x290] sm:$0xff] %vm355_vm0, %v1181_v44  ;;  %9641 = vmatpush3.bf16.msra.mxu1 %v9638_v34  ;;  %8611 = vmatprep.mubr.f32.mxu0 %v11097_v37  ;;  %v9662_v34 = vpack.c.bf16 %v6771_v24, %v6770_v23  ;;  %v9694_v42 = vpack.c.bf16 %v6803_v14, %v6802_v28  ;;  %v6805_v40 = vld [vmem:[%s13386_s1 + $0xad8] sm:$0xff] }
 0x179   : > { %v7926_v48 = vpop.f32.mrb[36].mxu0  ;;  %8667 = vmatprep.mubr.f32.mxu1 %v11097_v37  ;;  %9611 = vmatprep.subr.bf16.mxu0 %v9610_v21  ;;  %v6765_v37 = vld [vmem:[%s13386_s1 + $0xa18] sm:$0xff]  ;;  %v9742_v24 = vpack.c.bf16 %v6859_v16, %v6858_v15  ;;  %v6868_v16 = vld [vmem:[%s13386_s1 + $0xbd0] sm:$0xff] }
 0x17a   : > { %6271 = vst.msk [vmem:[%s11201_s23 + $0x228] sm:$0xff] %vm355_vm0, %v7926_v48  ;;  %v7982_v43 = vpop.f32.mrb[36].mxu1  ;;  %v1012_v51 = vpop.f32.mrb[37].mxu0  ;;  %8612 = vmatmul.mubr.f32.gmra.mrb[142].mxu0 %v11102_v36  ;;  %9643 = vmatprep.subr.bf16.mxu1 %v9642_v41  ;;  %v9698_v48 = vpack.c.bf16 %v6805_v40, %v6804_v45  ;;  %v11875_v23 = vld [vmem:[%s10128_s28 + $0x78] sm:$0xff]  ;;  %v6862_v40 = vld [vmem:[%s13386_s1 + $0xba0] sm:$0xff] }
 0x17b   : > { %6303 = vst.msk [vmem:[%s11201_s23 + $0x2a8] sm:$0xff] %vm355_vm0, %v7982_v43  ;;  %6270 = vst.msk [vmem:[%s11201_s23 + $0x220] sm:$0xff] %vm355_vm0, %v1012_v51  ;;  %v1191_v55 = vpop.f32.mrb[37].mxu1  ;;  %8668 = vmatmul.mubr.f32.gmra.mrb[142].mxu1 %v11102_v36  ;;  %9613 = vmatpush3.bf16.msra.mxu0 %v9610_v21  ;;  %v9650_v36 = vpack.c.bf16 %v6765_v37, %v6764_v54  ;;  %v6775_v43 = vld [vmem:[%s13386_s1 + $0xa68] sm:$0xff]  ;;  %v11808_v37 = vld [vmem:[%s10128_s28 + $0x50] sm:$0xff] }
 0x17c   : > { %6302 = vst.msk [vmem:[%s11201_s23 + $0x2a0] sm:$0xff] %vm355_vm0, %v1191_v55  ;;  %9645 = vmatpush3.bf16.msra.mxu1 %v9642_v41  ;;  %8702 = vmatprep.mubr.f32.mxu0 %v11466_v35  ;;  %v11778_v41 = vld [vmem:[%s10128_s28 + $0x40] sm:$0xff]  ;;  %v6807_v54 = vld [vmem:[%s13386_s1 + $0xae8] sm:$0xff]  ;;  %v6829_v28 = vld [vmem:[%s13386_s1 + $0xb18] sm:$0xff] }
 0x17d   : > { %v7929_v58 = vpop.f32.mrb[38].mxu0  ;;  %8758 = vmatprep.mubr.f32.mxu1 %v11466_v35  ;;  %9647 = vmatprep.subr.bf16.mxu0 %v9646_v29 }
 0x17e   : > { %6273 = vst.msk [vmem:[%s11201_s23 + $0x238] sm:$0xff] %vm355_vm0, %v7929_v58  ;;  %v7985_v62 = vpop.f32.mrb[38].mxu1  ;;  %v1022_v0 = vpop.f32.mrb[39].mxu0  ;;  %8703 = vmatmul.mubr.f32.vlgmr.msra.gmra.mrb[144].mxu0 %v11665_v52  ;;  %9679 = vmatprep.subr.bf16.mxu1 %v9678_v53 }
 0x17f   : > { %6305 = vst.msk [vmem:[%s11201_s23 + $0x2b8] sm:$0xff] %vm355_vm0, %v7985_v62  ;;  %6272 = vst.msk [vmem:[%s11201_s23 + $0x230] sm:$0xff] %vm355_vm0, %v1022_v0  ;;  %v1201_v57 = vpop.f32.mrb[39].mxu1  ;;  %8759 = vmatmul.mubr.f32.vlgmr.msra.gmra.mrb[144].mxu1 %v11665_v52  ;;  %9649 = vmatpush3.bf16.msra.mxu0 %v9646_v29  ;;  %v6774_v29 = vld [vmem:[%s13386_s1 + $0xa60] sm:$0xff]  ;;  %v6776_v0 = vld [vmem:[%s13386_s1 + $0xa70] sm:$0xff] }
 0x180   : > { %6304 = vst.msk [vmem:[%s11201_s23 + $0x2b0] sm:$0xff] %vm355_vm0, %v1201_v57  ;;  %9681 = vmatpush3.bf16.msra.mxu1 %v9678_v53  ;;  %8705 = vmatprep.mubr.f32.mxu0 %v11688_v6  ;;  %v6806_v53 = vld [vmem:[%s13386_s1 + $0xae0] sm:$0xff]  ;;  %v9670_v49 = vpack.c.bf16 %v6775_v43, %v6774_v29  ;;  %v6809_v57 = vld [vmem:[%s13386_s1 + $0xaf8] sm:$0xff]  ;;  %v6832_v43 = vld [vmem:[%s13386_s1 + $0xb30] sm:$0xff] }
 0x181   : > { %v7932_v7 = vpop.f32.mrb[40].mxu0  ;;  %8761 = vmatprep.mubr.f32.mxu1 %v11688_v6  ;;  %9651 = vmatprep.subr.bf16.mxu0 %v9650_v36  ;;  %v9702_v62 = vpack.c.bf16 %v6807_v54, %v6806_v53  ;;  %v6864_v54 = vld [vmem:[%s13386_s1 + $0xbb0] sm:$0xff] }
 0x182   : > { %6275 = vst.msk [vmem:[%s11201_s23 + $0x248] sm:$0xff] %vm355_vm0, %v7932_v7  ;;  %v7988_v63 = vpop.f32.mrb[40].mxu1  ;;  %v1032_v1 = vpop.f32.mrb[41].mxu0  ;;  %8706 = vmatmul.mubr.f32.gmra.mrb[146].mxu0 %v11695_v10  ;;  %9683 = vmatprep.subr.bf16.mxu1 %v9682_v26 }
 0x183   : > { %6307 = vst.msk [vmem:[%s11201_s23 + $0x2c8] sm:$0xff] %vm355_vm0, %v7988_v63  ;;  %6274 = vst.msk [vmem:[%s11201_s23 + $0x240] sm:$0xff] %vm355_vm0, %v1032_v1  ;;  %v1211_v9 = vpop.f32.mrb[41].mxu1  ;;  %8762 = vmatmul.mubr.f32.gmra.mrb[146].mxu1 %v11695_v10  ;;  %9653 = vmatpush3.bf16.msra.mxu0 %v9650_v36  ;;  %v11815_v36 = vld [vmem:[%s10128_s28 + $0x58] sm:$0xff]  ;;  %v11845_v1 = vld [vmem:[%s10128_s28 + $0x68] sm:$0xff] }
 0x184   : > { %6306 = vst.msk [vmem:[%s11201_s23 + $0x2c0] sm:$0xff] %vm355_vm0, %v1211_v9  ;;  %9685 = vmatpush3.bf16.msra.mxu1 %v9682_v26  ;;  %8708 = vmatprep.mubr.f32.mxu0 %v11718_v12  ;;  %v6777_v26 = vld [vmem:[%s13386_s1 + $0xa78] sm:$0xff] }
 0x185   : > { %v7935_v60 = vpop.f32.mrb[42].mxu0  ;;  %8764 = vmatprep.mubr.f32.mxu1 %v11718_v12  ;;  %9655 = vmatprep.subr.bf16.mxu0 %v9654_v8  ;;  %v9674_v7 = vpack.c.bf16 %v6777_v26, %v6776_v0  ;;  %v6834_v26 = vld [vmem:[%s13386_s1 + $0xb40] sm:$0xff] }
 0x186   : > { %6277 = vst.msk [vmem:[%s11201_s23 + $0x258] sm:$0xff] %vm355_vm0, %v7935_v60  ;;  %v7991_v17 = vpop.f32.mrb[42].mxu1  ;;  %v1042_v22 = vpop.f32.mrb[43].mxu0  ;;  %8709 = vmatmul.mubr.f32.gmra.mrb[148].mxu0 %v11725_v20  ;;  %9687 = vmatprep.subr.bf16.mxu1 %v9686_v11  ;;  %v11868_v60 = vld [vmem:[%s10128_s28 + $0x70] sm:$0xff] }
 0x187   : > { %6309 = vst.msk [vmem:[%s11201_s23 + $0x2d8] sm:$0xff] %vm355_vm0, %v7991_v17  ;;  %6276 = vst.msk [vmem:[%s11201_s23 + $0x250] sm:$0xff] %vm355_vm0, %v1042_v22  ;;  %v1221_v25 = vpop.f32.mrb[43].mxu1  ;;  %8765 = vmatmul.mubr.f32.gmra.mrb[148].mxu1 %v11725_v20  ;;  %9657 = vmatpush3.bf16.msra.mxu0 %v9654_v8  ;;  %v9710_v17 = vpack.c.bf16 %v6827_v5, %v6826_v13  ;;  %v6836_v5 = vld [vmem:[%s13386_s1 + $0xb50] sm:$0xff] }
 0x188   : > { %6308 = vst.msk [vmem:[%s11201_s23 + $0x2d0] sm:$0xff] %vm355_vm0, %v1221_v25  ;;  %9689 = vmatpush3.bf16.msra.mxu1 %v9686_v11  ;;  %8711 = vmatprep.mubr.f32.mxu0 %v11748_v30  ;;  %v9706_v11 = vpack.c.bf16 %v6809_v57, %v6808_v3  ;;  %v6828_v25 = vld [vmem:[%s13386_s1 + $0xb10] sm:$0xff]  ;;  %v6866_v57 = vld [vmem:[%s13386_s1 + $0xbc0] sm:$0xff] }
 0x189   : > { %v7938_v31 = vpop.f32.mrb[44].mxu0  ;;  %8767 = vmatprep.mubr.f32.mxu1 %v11748_v30  ;;  %9659 = vmatprep.subr.bf16.mxu0 %v9658_v18 }
 0x18a   : > { %6279 = vst.msk [vmem:[%s11201_s23 + $0x268] sm:$0xff] %vm355_vm0, %v7938_v31  ;;  %v7994_v32 = vpop.f32.mrb[44].mxu1  ;;  %v1052_v19 = vpop.f32.mrb[45].mxu0  ;;  %8712 = vmatmul.mubr.f32.gmra.mrb[150].mxu0 %v11755_v33  ;;  %9691 = vmatprep.subr.bf16.mxu1 %v9690_v4  ;;  %v6860_v31 = vld [vmem:[%s13386_s1 + $0xb90] sm:$0xff] }
 0x18b   : > { %6311 = vst.msk [vmem:[%s11201_s23 + $0x2e8] sm:$0xff] %vm355_vm0, %v7994_v32  ;;  %6278 = vst.msk [vmem:[%s11201_s23 + $0x260] sm:$0xff] %vm355_vm0, %v1052_v19  ;;  %v1231_v21 = vpop.f32.mrb[45].mxu1  ;;  %8768 = vmatmul.mubr.f32.gmra.mrb[150].mxu1 %v11755_v33  ;;  %9661 = vmatpush3.bf16.msra.mxu0 %v9658_v18  ;;  %v9714_v19 = vpack.c.bf16 %v6829_v28, %v6828_v25  ;;  %v6838_v28 = vld [vmem:[%s13386_s1 + $0xb60] sm:$0xff] }
 0x18c   : > { %6310 = vst.msk [vmem:[%s11201_s23 + $0x2e0] sm:$0xff] %vm355_vm0, %v1231_v21  ;;  %9693 = vmatpush3.bf16.msra.mxu1 %v9690_v4  ;;  %8714 = vmatprep.mubr.f32.mxu0 %v11778_v41  ;;  %v6830_v21 = vld [vmem:[%s13386_s1 + $0xb20] sm:$0xff] }
 0x18d   : > { %v7941_v50 = vpop.f32.mrb[46].mxu0  ;;  %8770 = vmatprep.mubr.f32.mxu1 %v11778_v41  ;;  %9663 = vmatprep.subr.bf16.mxu0 %v9662_v34 }
 0x18e   : > { %6281 = vst.msk [vmem:[%s11201_s23 + $0x278] sm:$0xff] %vm355_vm0, %v7941_v50  ;;  %v7997_v44 = vpop.f32.mrb[46].mxu1  ;;  %v1062_v46 = vpop.f32.mrb[47].mxu0  ;;  %8715 = vmatmul.mubr.f32.gmra.mrb[152].mxu0 %v11785_v47  ;;  %9695 = vmatprep.subr.bf16.mxu1 %v9694_v42  ;;  %v6863_v50 = vld [vmem:[%s13386_s1 + $0xba8] sm:$0xff] }
 0x18f   : > { %6313 = vst.msk [vmem:[%s11201_s23 + $0x2f8] sm:$0xff] %vm355_vm0, %v7997_v44  ;;  %6280 = vst.msk [vmem:[%s11201_s23 + $0x270] sm:$0xff] %vm355_vm0, %v1062_v46  ;;  %v1241_v51 = vpop.f32.mrb[47].mxu1  ;;  %8771 = vmatmul.mubr.f32.gmra.mrb[152].mxu1 %v11785_v47  ;;  %9665 = vmatpush3.bf16.msra.mxu0 %v9662_v34  ;;  %v6861_v34 = vld [vmem:[%s13386_s1 + $0xb98] sm:$0xff]  ;;  %v9750_v29 = vpack.c.bf16 %v6863_v50, %v6862_v40  ;;  %v6872_v50 = vld [vmem:[%s13386_s1 + $0xbf0] sm:$0xff] }
 0x190   : > { %6312 = vst.msk [vmem:[%s11201_s23 + $0x2f0] sm:$0xff] %vm355_vm0, %v1241_v51  ;;  %9697 = vmatpush3.bf16.msra.mxu1 %v9694_v42  ;;  %8717 = vmatprep.mubr.f32.mxu0 %v11808_v37  ;;  %v9746_v39 = vpack.c.bf16 %v6861_v34, %v6860_v31  ;;  %v6833_v51 = vld [vmem:[%s13386_s1 + $0xb38] sm:$0xff]  ;;  %v6870_v34 = vld [vmem:[%s13386_s1 + $0xbe0] sm:$0xff] }
 0x191   : > { %v8032_v55 = vpop.f32.mrb[48].mxu0  ;;  %8773 = vmatprep.mubr.f32.mxu1 %v11808_v37  ;;  %9667 = vmatprep.subr.bf16.mxu0 %v9666_v27 }
 0x192   : > { %6331 = vst.msk [vmem:[%s11201_s23 + $0x308] sm:$0xff] %vm355_vm0, %v8032_v55  ;;  %v8088_v56 = vpop.f32.mrb[48].mxu1  ;;  %v1350_v58 = vpop.f32.mrb[49].mxu0  ;;  %8718 = vmatmul.mubr.f32.gmra.mrb[154].mxu0 %v11815_v36  ;;  %9699 = vmatprep.subr.bf16.mxu1 %v9698_v48  ;;  %v6865_v55 = vld [vmem:[%s13386_s1 + $0xbb8] sm:$0xff] }
 0x193   : > { %6363 = vst.msk [vmem:[%s11201_s23 + $0x388] sm:$0xff] %vm355_vm0, %v8088_v56  ;;  %6330 = vst.msk [vmem:[%s11201_s23 + $0x300] sm:$0xff] %vm355_vm0, %v1350_v58  ;;  %v1529_v2 = vpop.f32.mrb[49].mxu1  ;;  %8774 = vmatmul.mubr.f32.gmra.mrb[154].mxu1 %v11815_v36  ;;  %9669 = vmatpush3.bf16.msra.mxu0 %v9666_v27  ;;  %v9722_v56 = vpack.c.bf16 %v6833_v51, %v6832_v43  ;;  %v9754_v0 = vpack.c.bf16 %v6865_v55, %v6864_v54 }
 0x194   : > { %6362 = vst.msk [vmem:[%s11201_s23 + $0x380] sm:$0xff] %vm355_vm0, %v1529_v2  ;;  %9701 = vmatpush3.bf16.msra.mxu1 %v9698_v48  ;;  %8720 = vmatprep.mubr.f32.mxu0 %v11838_v61  ;;  %v6835_v2 = vld [vmem:[%s13386_s1 + $0xb48] sm:$0xff] }
 0x195   : > { %v8035_v59 = vpop.f32.mrb[50].mxu0  ;;  %8776 = vmatprep.mubr.f32.mxu1 %v11838_v61  ;;  %9671 = vmatprep.subr.bf16.mxu0 %v9670_v49 }
 0x196   : > { %6333 = vst.msk [vmem:[%s11201_s23 + $0x318] sm:$0xff] %vm355_vm0, %v8035_v59  ;;  %v8091_v8 = vpop.f32.mrb[50].mxu1  ;;  %v1360_v63 = vpop.f32.mrb[51].mxu0  ;;  %8721 = vmatmul.mubr.f32.gmra.mrb[156].mxu0 %v11845_v1  ;;  %9703 = vmatprep.subr.bf16.mxu1 %v9702_v62  ;;  %v6867_v59 = vld [vmem:[%s13386_s1 + $0xbc8] sm:$0xff] }
 0x197   : > { %6365 = vst.msk [vmem:[%s11201_s23 + $0x398] sm:$0xff] %vm355_vm0, %v8091_v8  ;;  %6332 = vst.msk [vmem:[%s11201_s23 + $0x310] sm:$0xff] %vm355_vm0, %v1360_v63  ;;  %v1539_v9 = vpop.f32.mrb[51].mxu1  ;;  %8777 = vmatmul.mubr.f32.gmra.mrb[156].mxu1 %v11845_v1  ;;  %9673 = vmatpush3.bf16.msra.mxu0 %v9670_v49  ;;  %v9726_v8 = vpack.c.bf16 %v6835_v2, %v6834_v26  ;;  %v9758_v13 = vpack.c.bf16 %v6867_v59, %v6866_v57 }
 0x198   : > { %6364 = vst.msk [vmem:[%s11201_s23 + $0x390] sm:$0xff] %vm355_vm0, %v1539_v9  ;;  %9705 = vmatpush3.bf16.msra.mxu1 %v9702_v62  ;;  %8723 = vmatprep.mubr.f32.mxu0 %v11868_v60  ;;  %v6837_v9 = vld [vmem:[%s13386_s1 + $0xb58] sm:$0xff] }
 0x199   : > { %v8038_v18 = vpop.f32.mrb[52].mxu0  ;;  %8779 = vmatprep.mubr.f32.mxu1 %v11868_v60  ;;  %9675 = vmatprep.subr.bf16.mxu0 %v9674_v7 }
 0x19a   : > { %6335 = vst.msk [vmem:[%s11201_s23 + $0x328] sm:$0xff] %vm355_vm0, %v8038_v18  ;;  %v8094_v22 = vpop.f32.mrb[52].mxu1  ;;  %v1370_v4 = vpop.f32.mrb[53].mxu0  ;;  %8724 = vmatmul.mubr.f32.gmra.mrb[158].mxu0 %v11875_v23  ;;  %9707 = vmatprep.subr.bf16.mxu1 %v9706_v11  ;;  %v6869_v18 = vld [vmem:[%s13386_s1 + $0xbd8] sm:$0xff] }
 0x19b   : > { %6367 = vst.msk [vmem:[%s11201_s23 + $0x3a8] sm:$0xff] %vm355_vm0, %v8094_v22  ;;  %6334 = vst.msk [vmem:[%s11201_s23 + $0x320] sm:$0xff] %vm355_vm0, %v1370_v4  ;;  %v1549_v14 = vpop.f32.mrb[53].mxu1  ;;  %8780 = vmatmul.mubr.f32.gmra.mrb[158].mxu1 %v11875_v23  ;;  %9677 = vmatpush3.bf16.msra.mxu0 %v9674_v7  ;;  %v9730_v22 = vpack.c.bf16 %v6837_v9, %v6836_v5  ;;  %v9762_v25 = vpack.c.bf16 %v6869_v18, %v6868_v16 }
 0x19c   : > { %6366 = vst.msk [vmem:[%s11201_s23 + $0x3a0] sm:$0xff] %vm355_vm0, %v1549_v14  ;;  %9709 = vmatpush3.bf16.msra.mxu1 %v9706_v11  ;;  %8814 = vmatprep.mubr.f32.mxu0 %v11466_v35  ;;  %v6839_v14 = vld [vmem:[%s13386_s1 + $0xb68] sm:$0xff] }
 0x19d   : > { %v8041_v32 = vpop.f32.mrb[54].mxu0  ;;  %8870 = vmatprep.mubr.f32.mxu1 %v11466_v35  ;;  %9711 = vmatprep.subr.bf16.mxu0 %v9710_v17  ;;  %v6831_v35 = vld [vmem:[%s13386_s1 + $0xb28] sm:$0xff] }
 0x19e   : > { %6337 = vst.msk [vmem:[%s11201_s23 + $0x338] sm:$0xff] %vm355_vm0, %v8041_v32  ;;  %v8097_v42 = vpop.f32.mrb[54].mxu1  ;;  %v1380_v38 = vpop.f32.mrb[55].mxu0  ;;  %8815 = vmatmul.mubr.f32.vlgmr.msra.gmra.mrb[160].mxu0 %v11665_v52  ;;  %9743 = vmatprep.subr.bf16.mxu1 %v9742_v24  ;;  %v9718_v44 = vpack.c.bf16 %v6831_v35, %v6830_v21  ;;  %v6871_v32 = vld [vmem:[%s13386_s1 + $0xbe8] sm:$0xff]  ;;  %v6840_v35 = vld [vmem:[%s13386_s1 + $0xb70] sm:$0xff] }
 0x19f   : > { %6369 = vst.msk [vmem:[%s11201_s23 + $0x3b8] sm:$0xff] %vm355_vm0, %v8097_v42  ;;  %6336 = vst.msk [vmem:[%s11201_s23 + $0x330] sm:$0xff] %vm355_vm0, %v1380_v38  ;;  %v1559_v45 = vpop.f32.mrb[55].mxu1  ;;  %8871 = vmatmul.mubr.f32.vlgmr.msra.gmra.mrb[160].mxu1 %v11665_v52  ;;  %9713 = vmatpush3.bf16.msra.mxu0 %v9710_v17  ;;  %v9734_v42 = vpack.c.bf16 %v6839_v14, %v6838_v28  ;;  %v9766_v21 = vpack.c.bf16 %v6871_v32, %v6870_v34 }
 0x1a0   : > { %6368 = vst.msk [vmem:[%s11201_s23 + $0x3b0] sm:$0xff] %vm355_vm0, %v1559_v45  ;;  %9745 = vmatpush3.bf16.msra.mxu1 %v9742_v24  ;;  %8817 = vmatprep.mubr.f32.mxu0 %v11688_v6  ;;  %v6841_v45 = vld [vmem:[%s13386_s1 + $0xb78] sm:$0xff] }
 0x1a1   : > { %v8044_v27 = vpop.f32.mrb[56].mxu0  ;;  %8873 = vmatprep.mubr.f32.mxu1 %v11688_v6  ;;  %9715 = vmatprep.subr.bf16.mxu0 %v9714_v19 }
 0x1a2   : > { %6339 = vst.msk [vmem:[%s11201_s23 + $0x348] sm:$0xff] %vm355_vm0, %v8044_v27  ;;  %v8100_v46 = vpop.f32.mrb[56].mxu1  ;;  %v1390_v48 = vpop.f32.mrb[57].mxu0  ;;  %8818 = vmatmul.mubr.f32.gmra.mrb[162].mxu0 %v11695_v10  ;;  %9747 = vmatprep.subr.bf16.mxu1 %v9746_v39  ;;  %v6873_v27 = vld [vmem:[%s13386_s1 + $0xbf8] sm:$0xff] }
 0x1a3   : > { %6371 = vst.msk [vmem:[%s11201_s23 + $0x3c8] sm:$0xff] %vm355_vm0, %v8100_v46  ;;  %6338 = vst.msk [vmem:[%s11201_s23 + $0x340] sm:$0xff] %vm355_vm0, %v1390_v48  ;;  %v1569_v53 = vpop.f32.mrb[57].mxu1  ;;  %8874 = vmatmul.mubr.f32.gmra.mrb[162].mxu1 %v11695_v10  ;;  %9717 = vmatpush3.bf16.msra.mxu0 %v9714_v19  ;;  %v9738_v46 = vpack.c.bf16 %v6841_v45, %v6840_v35  ;;  %v9770_v43 = vpack.c.bf16 %v6873_v27, %v6872_v50 }
 0x1a4   : > { %6370 = vst.msk [vmem:[%s11201_s23 + $0x3c0] sm:$0xff] %vm355_vm0, %v1569_v53  ;;  %9749 = vmatpush3.bf16.msra.mxu1 %v9746_v39  ;;  %8820 = vmatprep.mubr.f32.mxu0 %v11718_v12 }
 0x1a5   : > { %v8047_v49 = vpop.f32.mrb[58].mxu0  ;;  %8876 = vmatprep.mubr.f32.mxu1 %v11718_v12  ;;  %9719 = vmatprep.subr.bf16.mxu0 %v9718_v44 }
 0x1a6   : > { %6341 = vst.msk [vmem:[%s11201_s23 + $0x358] sm:$0xff] %vm355_vm0, %v8047_v49  ;;  %v8103_v58 = vpop.f32.mrb[58].mxu1  ;;  %v1400_v62 = vpop.f32.mrb[59].mxu0  ;;  %8821 = vmatmul.mubr.f32.gmra.mrb[164].mxu0 %v11725_v20  ;;  %9751 = vmatprep.subr.bf16.mxu1 %v9750_v29 }
 0x1a7   : > { %6373 = vst.msk [vmem:[%s11201_s23 + $0x3d8] sm:$0xff] %vm355_vm0, %v8103_v58  ;;  %6340 = vst.msk [vmem:[%s11201_s23 + $0x350] sm:$0xff] %vm355_vm0, %v1400_v62  ;;  %v1579_v3 = vpop.f32.mrb[59].mxu1  ;;  %8877 = vmatmul.mubr.f32.gmra.mrb[164].mxu1 %v11725_v20  ;;  %9721 = vmatpush3.bf16.msra.mxu0 %v9718_v44 }
 0x1a8   : > { %6372 = vst.msk [vmem:[%s11201_s23 + $0x3d0] sm:$0xff] %vm355_vm0, %v1579_v3  ;;  %9753 = vmatpush3.bf16.msra.mxu1 %v9750_v29  ;;  %8823 = vmatprep.mubr.f32.mxu0 %v11748_v30 }
 0x1a9   : > { %v8050_v7 = vpop.f32.mrb[60].mxu0  ;;  %8879 = vmatprep.mubr.f32.mxu1 %v11748_v30  ;;  %9723 = vmatprep.subr.bf16.mxu0 %v9722_v56 }
 0x1aa   : > { %6343 = vst.msk [vmem:[%s11201_s23 + $0x368] sm:$0xff] %vm355_vm0, %v8050_v7  ;;  %v8106_v63 = vpop.f32.mrb[60].mxu1  ;;  %v1410_v11 = vpop.f32.mrb[61].mxu0  ;;  %8824 = vmatmul.mubr.f32.gmra.mrb[166].mxu0 %v11755_v33  ;;  %9755 = vmatprep.subr.bf16.mxu1 %v9754_v0 }
 0x1ab   : > { %6375 = vst.msk [vmem:[%s11201_s23 + $0x3e8] sm:$0xff] %vm355_vm0, %v8106_v63  ;;  %6342 = vst.msk [vmem:[%s11201_s23 + $0x360] sm:$0xff] %vm355_vm0, %v1410_v11  ;;  %v1589_v15 = vpop.f32.mrb[61].mxu1  ;;  %8880 = vmatmul.mubr.f32.gmra.mrb[166].mxu1 %v11755_v33  ;;  %9725 = vmatpush3.bf16.msra.mxu0 %v9722_v56  ;;  %v9881_v56 = vld [vmem:[%s10128_s28] sm:$0xff]  ;;  %s6890_s28 = sshll.u32 (%p13393_p7), %s9962_s12, 4 }
 0x1ac   : > { %6374 = vst.msk [vmem:[%s11201_s23 + $0x3e0] sm:$0xff] %vm355_vm0, %v1589_v15  ;;  %9757 = vmatpush3.bf16.msra.mxu1 %v9754_v0  ;;  %8826 = vmatprep.mubr.f32.mxu0 %v11778_v41  ;;  %s4498_s26 = sadd.s32 (%p13393_p7), %s9775_s21, %s6890_s28 }
 0x1ad   : > { %v8053_v17 = vpop.f32.mrb[62].mxu0  ;;  %8882 = vmatprep.mubr.f32.mxu1 %v11778_v41  ;;  %9727 = vmatprep.subr.bf16.mxu0 %v9726_v8  ;;  %s6891_s30 = sshll.u32 (%p13393_p7), %s4498_s26, 3 }
 0x1ae   : > { %6345 = vst.msk [vmem:[%s11201_s23 + $0x378] sm:$0xff] %vm355_vm0, %v8053_v17  ;;  %v8109_v4 = vpop.f32.mrb[62].mxu1  ;;  %v1420_v24 = vpop.f32.mrb[63].mxu0  ;;  %8827 = vmatmul.mubr.f32.gmra.mrb[168].mxu0 %v11785_v47  ;;  %9759 = vmatprep.subr.bf16.mxu1 %v9758_v13  ;;  %s12603_s13 = scalar_lea.vmem (%p13393_p7), %s13387_s2, %s6891_s30 }
 0x1af   : > { %6377 = vst.msk [vmem:[%s11201_s23 + $0x3f8] sm:$0xff] %vm355_vm0, %v8109_v4  ;;  %6344 = vst.msk [vmem:[%s11201_s23 + $0x370] sm:$0xff] %vm355_vm0, %v1420_v24  ;;  %v1599_v31 = vpop.f32.mrb[63].mxu1  ;;  %8883 = vmatmul.mubr.f32.gmra.mrb[168].mxu1 %v11785_v47  ;;  %9729 = vmatpush3.bf16.msra.mxu0 %v9726_v8 }
 0x1b0   : > { %6376 = vst.msk [vmem:[%s11201_s23 + $0x3f0] sm:$0xff] %vm355_vm0, %v1599_v31  ;;  %9761 = vmatpush3.bf16.msra.mxu1 %v9758_v13  ;;  %8829 = vmatprep.mubr.f32.mxu0 %v11808_v37 }
 0x1b1   : > { %v8144_v19 = vpop.f32.mrb[64].mxu0  ;;  %8885 = vmatprep.mubr.f32.mxu1 %v11808_v37  ;;  %9731 = vmatprep.subr.bf16.mxu0 %v9730_v22 }
 0x1b2   : > { %6395 = vst.msk [vmem:[%s11201_s23 + $0x408] sm:$0xff] %vm355_vm0, %v8144_v19  ;;  %v8200_v38 = vpop.f32.mrb[64].mxu1  ;;  %v1708_v39 = vpop.f32.mrb[65].mxu0  ;;  %8830 = vmatmul.mubr.f32.gmra.mrb[170].mxu0 %v11815_v36  ;;  %9763 = vmatprep.subr.bf16.mxu1 %v9762_v25 }
 0x1b3   : > { %6427 = vst.msk [vmem:[%s11201_s23 + $0x488] sm:$0xff] %vm355_vm0, %v8200_v38  ;;  %6394 = vst.msk [vmem:[%s11201_s23 + $0x400] sm:$0xff] %vm355_vm0, %v1708_v39  ;;  %v1887_v40 = vpop.f32.mrb[65].mxu1  ;;  %8886 = vmatmul.mubr.f32.gmra.mrb[170].mxu1 %v11815_v36  ;;  %9733 = vmatpush3.bf16.msra.mxu0 %v9730_v22 }
 0x1b4   : > { %6426 = vst.msk [vmem:[%s11201_s23 + $0x480] sm:$0xff] %vm355_vm0, %v1887_v40  ;;  %9765 = vmatpush3.bf16.msra.mxu1 %v9762_v25  ;;  %8832 = vmatprep.mubr.f32.mxu0 %v11838_v61 }
 0x1b5   : > { %v8147_v44 = vpop.f32.mrb[66].mxu0  ;;  %8888 = vmatprep.mubr.f32.mxu1 %v11838_v61  ;;  %9735 = vmatprep.subr.bf16.mxu0 %v9734_v42 }
 0x1b6   : > { %6397 = vst.msk [vmem:[%s11201_s23 + $0x418] sm:$0xff] %vm355_vm0, %v8147_v44  ;;  %v8203_v48 = vpop.f32.mrb[66].mxu1  ;;  %v1718_v29 = vpop.f32.mrb[67].mxu0  ;;  %8833 = vmatmul.mubr.f32.gmra.mrb[172].mxu0 %v11845_v1  ;;  %9767 = vmatprep.subr.bf16.mxu1 %v9766_v21 }
 0x1b7   : > { %6429 = vst.msk [vmem:[%s11201_s23 + $0x498] sm:$0xff] %vm355_vm0, %v8203_v48  ;;  %6396 = vst.msk [vmem:[%s11201_s23 + $0x410] sm:$0xff] %vm355_vm0, %v1718_v29  ;;  %v1897_v51 = vpop.f32.mrb[67].mxu1  ;;  %8889 = vmatmul.mubr.f32.gmra.mrb[172].mxu1 %v11845_v1  ;;  %9737 = vmatpush3.bf16.msra.mxu0 %v9734_v42 }
 0x1b8   : > { %6428 = vst.msk [vmem:[%s11201_s23 + $0x490] sm:$0xff] %vm355_vm0, %v1897_v51  ;;  %9769 = vmatpush3.bf16.msra.mxu1 %v9766_v21  ;;  %8835 = vmatprep.mubr.f32.mxu0 %v11868_v60 }
 0x1b9   : > { %v8150_v53 = vpop.f32.mrb[68].mxu0  ;;  %8891 = vmatprep.mubr.f32.mxu1 %v11868_v60  ;;  %9739 = vmatprep.subr.bf16.mxu0 %v9738_v46 }
 0x1ba   : > { %6399 = vst.msk [vmem:[%s11201_s23 + $0x428] sm:$0xff] %vm355_vm0, %v8150_v53  ;;  %v8206_v54 = vpop.f32.mrb[68].mxu1  ;;  %v1728_v55 = vpop.f32.mrb[69].mxu0  ;;  %8836 = vmatmul.mubr.f32.gmra.mrb[174].mxu0 %v11875_v23  ;;  %9771 = vmatprep.subr.bf16.mxu1 %v9770_v43 }
 0x1bb   : > { %6431 = vst.msk [vmem:[%s11201_s23 + $0x4a8] sm:$0xff] %vm355_vm0, %v8206_v54  ;;  %6398 = vst.msk [vmem:[%s11201_s23 + $0x420] sm:$0xff] %vm355_vm0, %v1728_v55  ;;  %v1907_v49 = vpop.f32.mrb[69].mxu1  ;;  %8892 = vmatmul.mubr.f32.gmra.mrb[174].mxu1 %v11875_v23  ;;  %9741 = vmatpush3.bf16.msra.mxu0 %v9738_v46 }
 0x1bc   : > { %6430 = vst.msk [vmem:[%s11201_s23 + $0x4a0] sm:$0xff] %vm355_vm0, %v1907_v49  ;;  %9773 = vmatpush3.bf16.msra.mxu1 %v9770_v43  ;;  %8926 = vmatprep.mubr.f32.mxu0 %v9881_v56 }
 0x1bd   : > { %v8153_v58 = vpop.f32.mrb[70].mxu0  ;;  %8982 = vmatprep.mubr.f32.mxu1 %v9881_v56 }
 0x1be   : > { %6401 = vst.msk [vmem:[%s11201_s23 + $0x438] sm:$0xff] %vm355_vm0, %v8153_v58  ;;  %v8209_v62 = vpop.f32.mrb[70].mxu1  ;;  %v1738_v0 = vpop.f32.mrb[71].mxu0  ;;  %8927 = vmatmul.mubr.f32.vlgmr.msra.gmra.mrb[176].mxu0 %v11665_v52 }
 0x1bf   : > { %6433 = vst.msk [vmem:[%s11201_s23 + $0x4b8] sm:$0xff] %vm355_vm0, %v8209_v62  ;;  %6400 = vst.msk [vmem:[%s11201_s23 + $0x430] sm:$0xff] %vm355_vm0, %v1738_v0  ;;  %v1917_v26 = vpop.f32.mrb[71].mxu1  ;;  %8983 = vmatmul.mubr.f32.vlgmr.msra.gmra.mrb[176].mxu1 %v11665_v52  ;;  %8929 = vmatprep.mubr.f32.mxu0 %v11688_v6 }
 0x1c0   : > { %6432 = vst.msk [vmem:[%s11201_s23 + $0x4b0] sm:$0xff] %vm355_vm0, %v1917_v26  ;;  %8985 = vmatprep.mubr.f32.mxu1 %v11688_v6 }
 0x1c1   : > { %v8156_v2 = vpop.f32.mrb[72].mxu0 }
 0x1c2   : > { %6403 = vst.msk [vmem:[%s11201_s23 + $0x448] sm:$0xff] %vm355_vm0, %v8156_v2  ;;  %v8212_v3 = vpop.f32.mrb[72].mxu1  ;;  %v1748_v57 = vpop.f32.mrb[73].mxu0  ;;  %8930 = vmatmul.mubr.f32.gmra.mrb[178].mxu0 %v11695_v10 }
 0x1c3   : > { %6435 = vst.msk [vmem:[%s11201_s23 + $0x4c8] sm:$0xff] %vm355_vm0, %v8212_v3  ;;  %6402 = vst.msk [vmem:[%s11201_s23 + $0x440] sm:$0xff] %vm355_vm0, %v1748_v57  ;;  %v1927_v52 = vpop.f32.mrb[73].mxu1  ;;  %8986 = vmatmul.mubr.f32.gmra.mrb[178].mxu1 %v11695_v10  ;;  %8932 = vmatprep.mubr.f32.mxu0 %v11718_v12 }
 0x1c4   : > { %6434 = vst.msk [vmem:[%s11201_s23 + $0x4c0] sm:$0xff] %vm355_vm0, %v1927_v52  ;;  %8988 = vmatprep.mubr.f32.mxu1 %v11718_v12 }
 0x1c5   : > { %v8159_v6 = vpop.f32.mrb[74].mxu0 }
 0x1c6   : > { %6405 = vst.msk [vmem:[%s11201_s23 + $0x458] sm:$0xff] %vm355_vm0, %v8159_v6  ;;  %v8215_v59 = vpop.f32.mrb[74].mxu1  ;;  %v1758_v7 = vpop.f32.mrb[75].mxu0  ;;  %8933 = vmatmul.mubr.f32.gmra.mrb[180].mxu0 %v11725_v20 }
 0x1c7   : > { %6437 = vst.msk [vmem:[%s11201_s23 + $0x4d8] sm:$0xff] %vm355_vm0, %v8215_v59  ;;  %6404 = vst.msk [vmem:[%s11201_s23 + $0x450] sm:$0xff] %vm355_vm0, %v1758_v7  ;;  %v1937_v10 = vpop.f32.mrb[75].mxu1  ;;  %8989 = vmatmul.mubr.f32.gmra.mrb[180].mxu1 %v11725_v20  ;;  %8935 = vmatprep.mubr.f32.mxu0 %v11748_v30 }
 0x1c8   : > { %6436 = vst.msk [vmem:[%s11201_s23 + $0x4d0] sm:$0xff] %vm355_vm0, %v1937_v10  ;;  %8991 = vmatprep.mubr.f32.mxu1 %v11748_v30 }
 0x1c9   : > { %v8162_v12 = vpop.f32.mrb[76].mxu0 }
 0x1ca   : > { %6407 = vst.msk [vmem:[%s11201_s23 + $0x468] sm:$0xff] %vm355_vm0, %v8162_v12  ;;  %v8218_v8 = vpop.f32.mrb[76].mxu1  ;;  %v1768_v63 = vpop.f32.mrb[77].mxu0  ;;  %8936 = vmatmul.mubr.f32.gmra.mrb[182].mxu0 %v11755_v33 }
 0x1cb   : > { %6439 = vst.msk [vmem:[%s11201_s23 + $0x4e8] sm:$0xff] %vm355_vm0, %v8218_v8  ;;  %6406 = vst.msk [vmem:[%s11201_s23 + $0x460] sm:$0xff] %vm355_vm0, %v1768_v63  ;;  %v1947_v20 = vpop.f32.mrb[77].mxu1  ;;  %8992 = vmatmul.mubr.f32.gmra.mrb[182].mxu1 %v11755_v33  ;;  %8938 = vmatprep.mubr.f32.mxu0 %v11778_v41 }
 0x1cc   : > { %6438 = vst.msk [vmem:[%s11201_s23 + $0x4e0] sm:$0xff] %vm355_vm0, %v1947_v20  ;;  %8994 = vmatprep.mubr.f32.mxu1 %v11778_v41 }
 0x1cd   : > { %v8165_v30 = vpop.f32.mrb[78].mxu0 }
 0x1ce   : > { %6409 = vst.msk [vmem:[%s11201_s23 + $0x478] sm:$0xff] %vm355_vm0, %v8165_v30  ;;  %v8221_v11 = vpop.f32.mrb[78].mxu1  ;;  %v1778_v13 = vpop.f32.mrb[79].mxu0  ;;  %8939 = vmatmul.mubr.f32.gmra.mrb[184].mxu0 %v11785_v47 }
 0x1cf   : > { %6441 = vst.msk [vmem:[%s11201_s23 + $0x4f8] sm:$0xff] %vm355_vm0, %v8221_v11  ;;  %6408 = vst.msk [vmem:[%s11201_s23 + $0x470] sm:$0xff] %vm355_vm0, %v1778_v13  ;;  %v1957_v33 = vpop.f32.mrb[79].mxu1  ;;  %8995 = vmatmul.mubr.f32.gmra.mrb[184].mxu1 %v11785_v47  ;;  %8941 = vmatprep.mubr.f32.mxu0 %v11808_v37 }
 0x1d0   : > { %6440 = vst.msk [vmem:[%s11201_s23 + $0x4f0] sm:$0xff] %vm355_vm0, %v1957_v33  ;;  %8997 = vmatprep.mubr.f32.mxu1 %v11808_v37 }
 0x1d1   : > { %v8256_v41 = vpop.f32.mrb[80].mxu0 }
 0x1d2   : > { %6459 = vst.msk [vmem:[%s11201_s23 + $0x508] sm:$0xff] %vm355_vm0, %v8256_v41  ;;  %v8312_v5 = vpop.f32.mrb[80].mxu1  ;;  %v2066_v9 = vpop.f32.mrb[81].mxu0  ;;  %8942 = vmatmul.mubr.f32.gmra.mrb[186].mxu0 %v11815_v36 }
 0x1d3   : > { %6491 = vst.msk [vmem:[%s11201_s23 + $0x588] sm:$0xff] %vm355_vm0, %v8312_v5  ;;  %6458 = vst.msk [vmem:[%s11201_s23 + $0x500] sm:$0xff] %vm355_vm0, %v2066_v9  ;;  %v2245_v47 = vpop.f32.mrb[81].mxu1  ;;  %8998 = vmatmul.mubr.f32.gmra.mrb[186].mxu1 %v11815_v36  ;;  %8944 = vmatprep.mubr.f32.mxu0 %v11838_v61 }
 0x1d4   : > { %6490 = vst.msk [vmem:[%s11201_s23 + $0x580] sm:$0xff] %vm355_vm0, %v2245_v47  ;;  %9000 = vmatprep.mubr.f32.mxu1 %v11838_v61 }
 0x1d5   : > { %v8259_v37 = vpop.f32.mrb[82].mxu0 }
 0x1d6   : > { %6461 = vst.msk [vmem:[%s11201_s23 + $0x518] sm:$0xff] %vm355_vm0, %v8259_v37  ;;  %v8315_v15 = vpop.f32.mrb[82].mxu1  ;;  %v2076_v16 = vpop.f32.mrb[83].mxu0  ;;  %8945 = vmatmul.mubr.f32.gmra.mrb[188].mxu0 %v11845_v1 }
 0x1d7   : > { %6493 = vst.msk [vmem:[%s11201_s23 + $0x598] sm:$0xff] %vm355_vm0, %v8315_v15  ;;  %6460 = vst.msk [vmem:[%s11201_s23 + $0x510] sm:$0xff] %vm355_vm0, %v2076_v16  ;;  %v2255_v36 = vpop.f32.mrb[83].mxu1  ;;  %9001 = vmatmul.mubr.f32.gmra.mrb[188].mxu1 %v11845_v1  ;;  %8947 = vmatprep.mubr.f32.mxu0 %v11868_v60 }
 0x1d8   : > { %6492 = vst.msk [vmem:[%s11201_s23 + $0x590] sm:$0xff] %vm355_vm0, %v2255_v36  ;;  %9003 = vmatprep.mubr.f32.mxu1 %v11868_v60 }
 0x1d9   : > { %v8262_v61 = vpop.f32.mrb[84].mxu0 }
 0x1da   : > { %6463 = vst.msk [vmem:[%s11201_s23 + $0x528] sm:$0xff] %vm355_vm0, %v8262_v61  ;;  %v8318_v18 = vpop.f32.mrb[84].mxu1  ;;  %v2086_v17 = vpop.f32.mrb[85].mxu0  ;;  %8948 = vmatmul.mubr.f32.gmra.mrb[190].mxu0 %v11875_v23 }
 0x1db   : > { %6495 = vst.msk [vmem:[%s11201_s23 + $0x5a8] sm:$0xff] %vm355_vm0, %v8318_v18  ;;  %6462 = vst.msk [vmem:[%s11201_s23 + $0x520] sm:$0xff] %vm355_vm0, %v2086_v17  ;;  %v2265_v1 = vpop.f32.mrb[85].mxu1  ;;  %9004 = vmatmul.mubr.f32.gmra.mrb[190].mxu1 %v11875_v23 }
 0x1dc   : > { %6494 = vst.msk [vmem:[%s11201_s23 + $0x5a0] sm:$0xff] %vm355_vm0, %v2265_v1 }
 0x1dd   : > { %v8265_v60 = vpop.f32.mrb[86].mxu0 }
 0x1de   : > { %6465 = vst.msk [vmem:[%s11201_s23 + $0x538] sm:$0xff] %vm355_vm0, %v8265_v60  ;;  %v8321_v22 = vpop.f32.mrb[86].mxu1  ;;  %v2096_v4 = vpop.f32.mrb[87].mxu0 }
 0x1df   : > { %6497 = vst.msk [vmem:[%s11201_s23 + $0x5b8] sm:$0xff] %vm355_vm0, %v8321_v22  ;;  %6464 = vst.msk [vmem:[%s11201_s23 + $0x530] sm:$0xff] %vm355_vm0, %v2096_v4  ;;  %v2275_v24 = vpop.f32.mrb[87].mxu1 }
 0x1e0   : > { %6496 = vst.msk [vmem:[%s11201_s23 + $0x5b0] sm:$0xff] %vm355_vm0, %v2275_v24 }
 0x1e1   : > { %v8268_v23 = vpop.f32.mrb[88].mxu0 }
 0x1e2   : > { %6467 = vst.msk [vmem:[%s11201_s23 + $0x548] sm:$0xff] %vm355_vm0, %v8268_v23  ;;  %v8324_v25 = vpop.f32.mrb[88].mxu1  ;;  %v2106_v28 = vpop.f32.mrb[89].mxu0 }
 0x1e3   : > { %6499 = vst.msk [vmem:[%s11201_s23 + $0x5c8] sm:$0xff] %vm355_vm0, %v8324_v25  ;;  %6466 = vst.msk [vmem:[%s11201_s23 + $0x540] sm:$0xff] %vm355_vm0, %v2106_v28  ;;  %v2285_v14 = vpop.f32.mrb[89].mxu1 }
 0x1e4   : > { %6498 = vst.msk [vmem:[%s11201_s23 + $0x5c0] sm:$0xff] %vm355_vm0, %v2285_v14 }
 0x1e5   : > { %v8271_v31 = vpop.f32.mrb[90].mxu0 }
 0x1e6   : > { %6469 = vst.msk [vmem:[%s11201_s23 + $0x558] sm:$0xff] %vm355_vm0, %v8271_v31  ;;  %v8327_v34 = vpop.f32.mrb[90].mxu1  ;;  %v2116_v32 = vpop.f32.mrb[91].mxu0 }
 0x1e7   : > { %6501 = vst.msk [vmem:[%s11201_s23 + $0x5d8] sm:$0xff] %vm355_vm0, %v8327_v34  ;;  %6468 = vst.msk [vmem:[%s11201_s23 + $0x550] sm:$0xff] %vm355_vm0, %v2116_v32  ;;  %v2295_v19 = vpop.f32.mrb[91].mxu1 }
 0x1e8   : > { %6500 = vst.msk [vmem:[%s11201_s23 + $0x5d0] sm:$0xff] %vm355_vm0, %v2295_v19 }
 0x1e9   : > { %v8274_v42 = vpop.f32.mrb[92].mxu0 }
 0x1ea   : > { %6471 = vst.msk [vmem:[%s11201_s23 + $0x568] sm:$0xff] %vm355_vm0, %v8274_v42  ;;  %v8330_v38 = vpop.f32.mrb[92].mxu1  ;;  %v2126_v39 = vpop.f32.mrb[93].mxu0 }
 0x1eb   : > { %6503 = vst.msk [vmem:[%s11201_s23 + $0x5e8] sm:$0xff] %vm355_vm0, %v8330_v38  ;;  %6470 = vst.msk [vmem:[%s11201_s23 + $0x560] sm:$0xff] %vm355_vm0, %v2126_v39  ;;  %v2305_v21 = vpop.f32.mrb[93].mxu1 }
 0x1ec   : > { %6502 = vst.msk [vmem:[%s11201_s23 + $0x5e0] sm:$0xff] %vm355_vm0, %v2305_v21 }
 0x1ed   : > { %v8277_v35 = vpop.f32.mrb[94].mxu0 }
 0x1ee   : > { %6473 = vst.msk [vmem:[%s11201_s23 + $0x578] sm:$0xff] %vm355_vm0, %v8277_v35  ;;  %v8333_v45 = vpop.f32.mrb[94].mxu1  ;;  %v2136_v40 = vpop.f32.mrb[95].mxu0 }
 0x1ef   : > { %6505 = vst.msk [vmem:[%s11201_s23 + $0x5f8] sm:$0xff] %vm355_vm0, %v8333_v45  ;;  %6472 = vst.msk [vmem:[%s11201_s23 + $0x570] sm:$0xff] %vm355_vm0, %v2136_v40  ;;  %v2315_v50 = vpop.f32.mrb[95].mxu1 }
 0x1f0   : > { %6504 = vst.msk [vmem:[%s11201_s23 + $0x5f0] sm:$0xff] %vm355_vm0, %v2315_v50 }
 0x1f1   : > { %v8368_v27 = vpop.f32.mrb[96].mxu0 }
 0x1f2   : > { %6523 = vst.msk [vmem:[%s11201_s23 + $0x608] sm:$0xff] %vm355_vm0, %v8368_v27  ;;  %v8424_v44 = vpop.f32.mrb[96].mxu1  ;;  %v2424_v46 = vpop.f32.mrb[97].mxu0 }
 0x1f3   : > { %6555 = vst.msk [vmem:[%s11201_s23 + $0x688] sm:$0xff] %vm355_vm0, %v8424_v44  ;;  %6522 = vst.msk [vmem:[%s11201_s23 + $0x600] sm:$0xff] %vm355_vm0, %v2424_v46  ;;  %v2603_v48 = vpop.f32.mrb[97].mxu1 }
 0x1f4   : > { %6554 = vst.msk [vmem:[%s11201_s23 + $0x680] sm:$0xff] %vm355_vm0, %v2603_v48 }
 0x1f5   : > { %v8371_v29 = vpop.f32.mrb[98].mxu0 }
 0x1f6   : > { %6525 = vst.msk [vmem:[%s11201_s23 + $0x618] sm:$0xff] %vm355_vm0, %v8371_v29  ;;  %v8427_v43 = vpop.f32.mrb[98].mxu1  ;;  %v2434_v51 = vpop.f32.mrb[99].mxu0 }
 0x1f7   : > { %6557 = vst.msk [vmem:[%s11201_s23 + $0x698] sm:$0xff] %vm355_vm0, %v8427_v43  ;;  %6524 = vst.msk [vmem:[%s11201_s23 + $0x610] sm:$0xff] %vm355_vm0, %v2434_v51  ;;  %v2613_v53 = vpop.f32.mrb[99].mxu1 }
 0x1f8   : > { %6556 = vst.msk [vmem:[%s11201_s23 + $0x690] sm:$0xff] %vm355_vm0, %v2613_v53 }
 0x1f9   : > { %v8374_v54 = vpop.f32.mrb[100].mxu0 }
 0x1fa   : > { %6527 = vst.msk [vmem:[%s11201_s23 + $0x628] sm:$0xff] %vm355_vm0, %v8374_v54  ;;  %v8430_v55 = vpop.f32.mrb[100].mxu1  ;;  %v2444_v49 = vpop.f32.mrb[101].mxu0 }
 0x1fb   : > { %6559 = vst.msk [vmem:[%s11201_s23 + $0x6a8] sm:$0xff] %vm355_vm0, %v8430_v55  ;;  %6526 = vst.msk [vmem:[%s11201_s23 + $0x620] sm:$0xff] %vm355_vm0, %v2444_v49  ;;  %v2623_v56 = vpop.f32.mrb[101].mxu1 }
 0x1fc   : > { %6558 = vst.msk [vmem:[%s11201_s23 + $0x6a0] sm:$0xff] %vm355_vm0, %v2623_v56 }
 0x1fd   : > { %v8377_v58 = vpop.f32.mrb[102].mxu0 }
 0x1fe   : > { %6529 = vst.msk [vmem:[%s11201_s23 + $0x638] sm:$0xff] %vm355_vm0, %v8377_v58  ;;  %v8433_v62 = vpop.f32.mrb[102].mxu1  ;;  %v2454_v0 = vpop.f32.mrb[103].mxu0 }
 0x1ff   : > { %6561 = vst.msk [vmem:[%s11201_s23 + $0x6b8] sm:$0xff] %vm355_vm0, %v8433_v62  ;;  %6528 = vst.msk [vmem:[%s11201_s23 + $0x630] sm:$0xff] %vm355_vm0, %v2454_v0  ;;  %v2633_v26 = vpop.f32.mrb[103].mxu1 }
 0x200   : > { %6560 = vst.msk [vmem:[%s11201_s23 + $0x6b0] sm:$0xff] %vm355_vm0, %v2633_v26 }
 0x201   : > { %v8380_v2 = vpop.f32.mrb[104].mxu0 }
 0x202   : > { %6531 = vst.msk [vmem:[%s11201_s23 + $0x648] sm:$0xff] %vm355_vm0, %v8380_v2  ;;  %v8436_v3 = vpop.f32.mrb[104].mxu1  ;;  %v2464_v57 = vpop.f32.mrb[105].mxu0 }
 0x203   : > { %6563 = vst.msk [vmem:[%s11201_s23 + $0x6c8] sm:$0xff] %vm355_vm0, %v8436_v3  ;;  %6530 = vst.msk [vmem:[%s11201_s23 + $0x640] sm:$0xff] %vm355_vm0, %v2464_v57  ;;  %v2643_v52 = vpop.f32.mrb[105].mxu1 }
 0x204   : > { %6562 = vst.msk [vmem:[%s11201_s23 + $0x6c0] sm:$0xff] %vm355_vm0, %v2643_v52 }
 0x205   : > { %v8383_v6 = vpop.f32.mrb[106].mxu0 }
 0x206   : > { %6533 = vst.msk [vmem:[%s11201_s23 + $0x658] sm:$0xff] %vm355_vm0, %v8383_v6  ;;  %v8439_v59 = vpop.f32.mrb[106].mxu1  ;;  %v2474_v7 = vpop.f32.mrb[107].mxu0 }
 0x207   : > { %6565 = vst.msk [vmem:[%s11201_s23 + $0x6d8] sm:$0xff] %vm355_vm0, %v8439_v59  ;;  %6532 = vst.msk [vmem:[%s11201_s23 + $0x650] sm:$0xff] %vm355_vm0, %v2474_v7  ;;  %v2653_v10 = vpop.f32.mrb[107].mxu1 }
 0x208   : > { %6564 = vst.msk [vmem:[%s11201_s23 + $0x6d0] sm:$0xff] %vm355_vm0, %v2653_v10 }
 0x209   : > { %v8386_v12 = vpop.f32.mrb[108].mxu0 }
 0x20a   : > { %6535 = vst.msk [vmem:[%s11201_s23 + $0x668] sm:$0xff] %vm355_vm0, %v8386_v12  ;;  %v8442_v8 = vpop.f32.mrb[108].mxu1  ;;  %v2484_v63 = vpop.f32.mrb[109].mxu0 }
 0x20b   : > { %6567 = vst.msk [vmem:[%s11201_s23 + $0x6e8] sm:$0xff] %vm355_vm0, %v8442_v8  ;;  %6534 = vst.msk [vmem:[%s11201_s23 + $0x660] sm:$0xff] %vm355_vm0, %v2484_v63  ;;  %v2663_v20 = vpop.f32.mrb[109].mxu1 }
 0x20c   : > { %6566 = vst.msk [vmem:[%s11201_s23 + $0x6e0] sm:$0xff] %vm355_vm0, %v2663_v20 }
 0x20d   : > { %v8389_v30 = vpop.f32.mrb[110].mxu0 }
 0x20e   : > { %6537 = vst.msk [vmem:[%s11201_s23 + $0x678] sm:$0xff] %vm355_vm0, %v8389_v30  ;;  %v8445_v11 = vpop.f32.mrb[110].mxu1  ;;  %v2494_v13 = vpop.f32.mrb[111].mxu0 }
 0x20f   : > { %6569 = vst.msk [vmem:[%s11201_s23 + $0x6f8] sm:$0xff] %vm355_vm0, %v8445_v11  ;;  %6536 = vst.msk [vmem:[%s11201_s23 + $0x670] sm:$0xff] %vm355_vm0, %v2494_v13  ;;  %v2673_v33 = vpop.f32.mrb[111].mxu1 }
 0x210   : > { %6568 = vst.msk [vmem:[%s11201_s23 + $0x6f0] sm:$0xff] %vm355_vm0, %v2673_v33 }
 0x211   : > { %v8480_v41 = vpop.f32.mrb[112].mxu0 }
 0x212   : > { %6587 = vst.msk [vmem:[%s11201_s23 + $0x708] sm:$0xff] %vm355_vm0, %v8480_v41  ;;  %v8536_v5 = vpop.f32.mrb[112].mxu1  ;;  %v2782_v9 = vpop.f32.mrb[113].mxu0 }
 0x213   : > { %6619 = vst.msk [vmem:[%s11201_s23 + $0x788] sm:$0xff] %vm355_vm0, %v8536_v5  ;;  %6586 = vst.msk [vmem:[%s11201_s23 + $0x700] sm:$0xff] %vm355_vm0, %v2782_v9  ;;  %v2961_v47 = vpop.f32.mrb[113].mxu1 }
 0x214   : > { %6618 = vst.msk [vmem:[%s11201_s23 + $0x780] sm:$0xff] %vm355_vm0, %v2961_v47 }
 0x215   : > { %v8483_v37 = vpop.f32.mrb[114].mxu0 }
 0x216   : > { %6589 = vst.msk [vmem:[%s11201_s23 + $0x718] sm:$0xff] %vm355_vm0, %v8483_v37  ;;  %v8539_v15 = vpop.f32.mrb[114].mxu1  ;;  %v2792_v16 = vpop.f32.mrb[115].mxu0 }
 0x217   : > { %6621 = vst.msk [vmem:[%s11201_s23 + $0x798] sm:$0xff] %vm355_vm0, %v8539_v15  ;;  %6588 = vst.msk [vmem:[%s11201_s23 + $0x710] sm:$0xff] %vm355_vm0, %v2792_v16  ;;  %v2971_v36 = vpop.f32.mrb[115].mxu1 }
 0x218   : > { %6620 = vst.msk [vmem:[%s11201_s23 + $0x790] sm:$0xff] %vm355_vm0, %v2971_v36 }
 0x219   : > { %v8486_v61 = vpop.f32.mrb[116].mxu0 }
 0x21a   : > { %6591 = vst.msk [vmem:[%s11201_s23 + $0x728] sm:$0xff] %vm355_vm0, %v8486_v61  ;;  %v8542_v18 = vpop.f32.mrb[116].mxu1  ;;  %v2802_v17 = vpop.f32.mrb[117].mxu0 }
 0x21b   : > { %6623 = vst.msk [vmem:[%s11201_s23 + $0x7a8] sm:$0xff] %vm355_vm0, %v8542_v18  ;;  %6590 = vst.msk [vmem:[%s11201_s23 + $0x720] sm:$0xff] %vm355_vm0, %v2802_v17  ;;  %v2981_v1 = vpop.f32.mrb[117].mxu1 }
 0x21c   : > { %6622 = vst.msk [vmem:[%s11201_s23 + $0x7a0] sm:$0xff] %vm355_vm0, %v2981_v1 }
 0x21d   : > { %v8489_v60 = vpop.f32.mrb[118].mxu0 }
 0x21e   : > { %6593 = vst.msk [vmem:[%s11201_s23 + $0x738] sm:$0xff] %vm355_vm0, %v8489_v60  ;;  %v8545_v22 = vpop.f32.mrb[118].mxu1  ;;  %v2812_v4 = vpop.f32.mrb[119].mxu0 }
 0x21f   : > { %6625 = vst.msk [vmem:[%s11201_s23 + $0x7b8] sm:$0xff] %vm355_vm0, %v8545_v22  ;;  %6592 = vst.msk [vmem:[%s11201_s23 + $0x730] sm:$0xff] %vm355_vm0, %v2812_v4  ;;  %v2991_v24 = vpop.f32.mrb[119].mxu1 }
 0x220   : > { %6624 = vst.msk [vmem:[%s11201_s23 + $0x7b0] sm:$0xff] %vm355_vm0, %v2991_v24 }
 0x221   : > { %v8492_v23 = vpop.f32.mrb[120].mxu0 }
 0x222   : > { %6595 = vst.msk [vmem:[%s11201_s23 + $0x748] sm:$0xff] %vm355_vm0, %v8492_v23  ;;  %v8548_v25 = vpop.f32.mrb[120].mxu1  ;;  %v2822_v28 = vpop.f32.mrb[121].mxu0 }
 0x223   : > { %6627 = vst.msk [vmem:[%s11201_s23 + $0x7c8] sm:$0xff] %vm355_vm0, %v8548_v25  ;;  %6594 = vst.msk [vmem:[%s11201_s23 + $0x740] sm:$0xff] %vm355_vm0, %v2822_v28  ;;  %v3001_v14 = vpop.f32.mrb[121].mxu1 }
 0x224   : > { %6626 = vst.msk [vmem:[%s11201_s23 + $0x7c0] sm:$0xff] %vm355_vm0, %v3001_v14 }
 0x225   : > { %v8495_v31 = vpop.f32.mrb[122].mxu0 }
 0x226   : > { %6597 = vst.msk [vmem:[%s11201_s23 + $0x758] sm:$0xff] %vm355_vm0, %v8495_v31  ;;  %v8551_v34 = vpop.f32.mrb[122].mxu1  ;;  %v2832_v32 = vpop.f32.mrb[123].mxu0 }
 0x227   : > { %6629 = vst.msk [vmem:[%s11201_s23 + $0x7d8] sm:$0xff] %vm355_vm0, %v8551_v34  ;;  %6596 = vst.msk [vmem:[%s11201_s23 + $0x750] sm:$0xff] %vm355_vm0, %v2832_v32  ;;  %v3011_v19 = vpop.f32.mrb[123].mxu1 }
 0x228   : > { %6628 = vst.msk [vmem:[%s11201_s23 + $0x7d0] sm:$0xff] %vm355_vm0, %v3011_v19 }
 0x229   : > { %v8498_v42 = vpop.f32.mrb[124].mxu0 }
 0x22a   : > { %6599 = vst.msk [vmem:[%s11201_s23 + $0x768] sm:$0xff] %vm355_vm0, %v8498_v42  ;;  %v8554_v38 = vpop.f32.mrb[124].mxu1  ;;  %v2842_v39 = vpop.f32.mrb[125].mxu0 }
 0x22b   : > { %6631 = vst.msk [vmem:[%s11201_s23 + $0x7e8] sm:$0xff] %vm355_vm0, %v8554_v38  ;;  %6598 = vst.msk [vmem:[%s11201_s23 + $0x760] sm:$0xff] %vm355_vm0, %v2842_v39  ;;  %v3021_v21 = vpop.f32.mrb[125].mxu1 }
 0x22c   : > { %6630 = vst.msk [vmem:[%s11201_s23 + $0x7e0] sm:$0xff] %vm355_vm0, %v3021_v21 }
 0x22d   : > { %v8501_v35 = vpop.f32.mrb[126].mxu0 }
 0x22e   : > { %6601 = vst.msk [vmem:[%s11201_s23 + $0x778] sm:$0xff] %vm355_vm0, %v8501_v35  ;;  %v8557_v45 = vpop.f32.mrb[126].mxu1  ;;  %v2852_v40 = vpop.f32.mrb[127].mxu0 }
 0x22f   : > { %6633 = vst.msk [vmem:[%s11201_s23 + $0x7f8] sm:$0xff] %vm355_vm0, %v8557_v45  ;;  %6600 = vst.msk [vmem:[%s11201_s23 + $0x770] sm:$0xff] %vm355_vm0, %v2852_v40  ;;  %v3031_v50 = vpop.f32.mrb[127].mxu1 }
 0x230   : > { %6632 = vst.msk [vmem:[%s11201_s23 + $0x7f0] sm:$0xff] %vm355_vm0, %v3031_v50 }
 0x231   : > { %v8592_v27 = vpop.f32.mrb[128].mxu0 }
 0x232   : > { %6651 = vst.msk [vmem:[%s11201_s23 + $0x808] sm:$0xff] %vm355_vm0, %v8592_v27  ;;  %v8648_v44 = vpop.f32.mrb[128].mxu1  ;;  %v3140_v46 = vpop.f32.mrb[129].mxu0 }
 0x233   : > { %6683 = vst.msk [vmem:[%s11201_s23 + $0x888] sm:$0xff] %vm355_vm0, %v8648_v44  ;;  %6650 = vst.msk [vmem:[%s11201_s23 + $0x800] sm:$0xff] %vm355_vm0, %v3140_v46  ;;  %v3319_v48 = vpop.f32.mrb[129].mxu1 }
 0x234   : > { %6682 = vst.msk [vmem:[%s11201_s23 + $0x880] sm:$0xff] %vm355_vm0, %v3319_v48 }
 0x235   : > { %v8595_v29 = vpop.f32.mrb[130].mxu0 }
 0x236   : > { %6653 = vst.msk [vmem:[%s11201_s23 + $0x818] sm:$0xff] %vm355_vm0, %v8595_v29  ;;  %v8651_v43 = vpop.f32.mrb[130].mxu1  ;;  %v3150_v51 = vpop.f32.mrb[131].mxu0 }
 0x237   : > { %6685 = vst.msk [vmem:[%s11201_s23 + $0x898] sm:$0xff] %vm355_vm0, %v8651_v43  ;;  %6652 = vst.msk [vmem:[%s11201_s23 + $0x810] sm:$0xff] %vm355_vm0, %v3150_v51  ;;  %v3329_v53 = vpop.f32.mrb[131].mxu1 }
 0x238   : > { %6684 = vst.msk [vmem:[%s11201_s23 + $0x890] sm:$0xff] %vm355_vm0, %v3329_v53 }
 0x239   : > { %v8598_v54 = vpop.f32.mrb[132].mxu0 }
 0x23a   : > { %6655 = vst.msk [vmem:[%s11201_s23 + $0x828] sm:$0xff] %vm355_vm0, %v8598_v54  ;;  %v8654_v55 = vpop.f32.mrb[132].mxu1  ;;  %v3160_v49 = vpop.f32.mrb[133].mxu0 }
 0x23b   : > { %6687 = vst.msk [vmem:[%s11201_s23 + $0x8a8] sm:$0xff] %vm355_vm0, %v8654_v55  ;;  %6654 = vst.msk [vmem:[%s11201_s23 + $0x820] sm:$0xff] %vm355_vm0, %v3160_v49  ;;  %v3339_v56 = vpop.f32.mrb[133].mxu1 }
 0x23c   : > { %6686 = vst.msk [vmem:[%s11201_s23 + $0x8a0] sm:$0xff] %vm355_vm0, %v3339_v56 }
 0x23d   : > { %v8601_v58 = vpop.f32.mrb[134].mxu0 }
 0x23e   : > { %6657 = vst.msk [vmem:[%s11201_s23 + $0x838] sm:$0xff] %vm355_vm0, %v8601_v58  ;;  %v8657_v62 = vpop.f32.mrb[134].mxu1  ;;  %v3170_v0 = vpop.f32.mrb[135].mxu0 }
 0x23f   : > { %6689 = vst.msk [vmem:[%s11201_s23 + $0x8b8] sm:$0xff] %vm355_vm0, %v8657_v62  ;;  %6656 = vst.msk [vmem:[%s11201_s23 + $0x830] sm:$0xff] %vm355_vm0, %v3170_v0  ;;  %v3349_v26 = vpop.f32.mrb[135].mxu1 }
 0x240   : > { %6688 = vst.msk [vmem:[%s11201_s23 + $0x8b0] sm:$0xff] %vm355_vm0, %v3349_v26 }
 0x241   : > { %v8604_v2 = vpop.f32.mrb[136].mxu0 }
 0x242   : > { %6659 = vst.msk [vmem:[%s11201_s23 + $0x848] sm:$0xff] %vm355_vm0, %v8604_v2  ;;  %v8660_v3 = vpop.f32.mrb[136].mxu1  ;;  %v3180_v57 = vpop.f32.mrb[137].mxu0 }
 0x243   : > { %6691 = vst.msk [vmem:[%s11201_s23 + $0x8c8] sm:$0xff] %vm355_vm0, %v8660_v3  ;;  %6658 = vst.msk [vmem:[%s11201_s23 + $0x840] sm:$0xff] %vm355_vm0, %v3180_v57  ;;  %v3359_v52 = vpop.f32.mrb[137].mxu1 }
 0x244   : > { %6690 = vst.msk [vmem:[%s11201_s23 + $0x8c0] sm:$0xff] %vm355_vm0, %v3359_v52 }
 0x245   : > { %v8607_v6 = vpop.f32.mrb[138].mxu0 }
 0x246   : > { %6661 = vst.msk [vmem:[%s11201_s23 + $0x858] sm:$0xff] %vm355_vm0, %v8607_v6  ;;  %v8663_v59 = vpop.f32.mrb[138].mxu1  ;;  %v3190_v7 = vpop.f32.mrb[139].mxu0 }
 0x247   : > { %6693 = vst.msk [vmem:[%s11201_s23 + $0x8d8] sm:$0xff] %vm355_vm0, %v8663_v59  ;;  %6660 = vst.msk [vmem:[%s11201_s23 + $0x850] sm:$0xff] %vm355_vm0, %v3190_v7  ;;  %v3369_v10 = vpop.f32.mrb[139].mxu1 }
 0x248   : > { %6692 = vst.msk [vmem:[%s11201_s23 + $0x8d0] sm:$0xff] %vm355_vm0, %v3369_v10 }
 0x249   : > { %v8610_v12 = vpop.f32.mrb[140].mxu0 }
 0x24a   : > { %6663 = vst.msk [vmem:[%s11201_s23 + $0x868] sm:$0xff] %vm355_vm0, %v8610_v12  ;;  %v8666_v8 = vpop.f32.mrb[140].mxu1  ;;  %v3200_v63 = vpop.f32.mrb[141].mxu0 }
 0x24b   : > { %6695 = vst.msk [vmem:[%s11201_s23 + $0x8e8] sm:$0xff] %vm355_vm0, %v8666_v8  ;;  %6662 = vst.msk [vmem:[%s11201_s23 + $0x860] sm:$0xff] %vm355_vm0, %v3200_v63  ;;  %v3379_v20 = vpop.f32.mrb[141].mxu1 }
 0x24c   : > { %6694 = vst.msk [vmem:[%s11201_s23 + $0x8e0] sm:$0xff] %vm355_vm0, %v3379_v20 }
 0x24d   : > { %v8613_v30 = vpop.f32.mrb[142].mxu0 }
 0x24e   : > { %6665 = vst.msk [vmem:[%s11201_s23 + $0x878] sm:$0xff] %vm355_vm0, %v8613_v30  ;;  %v8669_v11 = vpop.f32.mrb[142].mxu1  ;;  %v3210_v13 = vpop.f32.mrb[143].mxu0 }
 0x24f   : > { %6697 = vst.msk [vmem:[%s11201_s23 + $0x8f8] sm:$0xff] %vm355_vm0, %v8669_v11  ;;  %6664 = vst.msk [vmem:[%s11201_s23 + $0x870] sm:$0xff] %vm355_vm0, %v3210_v13  ;;  %v3389_v33 = vpop.f32.mrb[143].mxu1 }
 0x250   : > { %6696 = vst.msk [vmem:[%s11201_s23 + $0x8f0] sm:$0xff] %vm355_vm0, %v3389_v33 }
 0x251   : > { %v8704_v41 = vpop.f32.mrb[144].mxu0 }
 0x252   : > { %6715 = vst.msk [vmem:[%s11201_s23 + $0x908] sm:$0xff] %vm355_vm0, %v8704_v41  ;;  %v8760_v5 = vpop.f32.mrb[144].mxu1  ;;  %v3498_v9 = vpop.f32.mrb[145].mxu0 }
 0x253   : > { %6747 = vst.msk [vmem:[%s11201_s23 + $0x988] sm:$0xff] %vm355_vm0, %v8760_v5  ;;  %6714 = vst.msk [vmem:[%s11201_s23 + $0x900] sm:$0xff] %vm355_vm0, %v3498_v9  ;;  %v3677_v47 = vpop.f32.mrb[145].mxu1 }
 0x254   : > { %6746 = vst.msk [vmem:[%s11201_s23 + $0x980] sm:$0xff] %vm355_vm0, %v3677_v47 }
 0x255   : > { %v8707_v37 = vpop.f32.mrb[146].mxu0 }
 0x256   : > { %6717 = vst.msk [vmem:[%s11201_s23 + $0x918] sm:$0xff] %vm355_vm0, %v8707_v37  ;;  %v8763_v15 = vpop.f32.mrb[146].mxu1  ;;  %v3508_v16 = vpop.f32.mrb[147].mxu0 }
 0x257   : > { %6749 = vst.msk [vmem:[%s11201_s23 + $0x998] sm:$0xff] %vm355_vm0, %v8763_v15  ;;  %6716 = vst.msk [vmem:[%s11201_s23 + $0x910] sm:$0xff] %vm355_vm0, %v3508_v16  ;;  %v3687_v36 = vpop.f32.mrb[147].mxu1 }
 0x258   : > { %6748 = vst.msk [vmem:[%s11201_s23 + $0x990] sm:$0xff] %vm355_vm0, %v3687_v36 }
 0x259   : > { %v8710_v61 = vpop.f32.mrb[148].mxu0 }
 0x25a   : > { %6719 = vst.msk [vmem:[%s11201_s23 + $0x928] sm:$0xff] %vm355_vm0, %v8710_v61  ;;  %v8766_v18 = vpop.f32.mrb[148].mxu1  ;;  %v3518_v17 = vpop.f32.mrb[149].mxu0 }
 0x25b   : > { %6751 = vst.msk [vmem:[%s11201_s23 + $0x9a8] sm:$0xff] %vm355_vm0, %v8766_v18  ;;  %6718 = vst.msk [vmem:[%s11201_s23 + $0x920] sm:$0xff] %vm355_vm0, %v3518_v17  ;;  %v3697_v1 = vpop.f32.mrb[149].mxu1 }
 0x25c   : > { %6750 = vst.msk [vmem:[%s11201_s23 + $0x9a0] sm:$0xff] %vm355_vm0, %v3697_v1 }
 0x25d   : > { %v8713_v60 = vpop.f32.mrb[150].mxu0 }
 0x25e   : > { %6721 = vst.msk [vmem:[%s11201_s23 + $0x938] sm:$0xff] %vm355_vm0, %v8713_v60  ;;  %v8769_v22 = vpop.f32.mrb[150].mxu1  ;;  %v3528_v4 = vpop.f32.mrb[151].mxu0 }
 0x25f   : > { %6753 = vst.msk [vmem:[%s11201_s23 + $0x9b8] sm:$0xff] %vm355_vm0, %v8769_v22  ;;  %6720 = vst.msk [vmem:[%s11201_s23 + $0x930] sm:$0xff] %vm355_vm0, %v3528_v4  ;;  %v3707_v24 = vpop.f32.mrb[151].mxu1 }
 0x260   : > { %6752 = vst.msk [vmem:[%s11201_s23 + $0x9b0] sm:$0xff] %vm355_vm0, %v3707_v24 }
 0x261   : > { %v8716_v23 = vpop.f32.mrb[152].mxu0 }
 0x262   : > { %6723 = vst.msk [vmem:[%s11201_s23 + $0x948] sm:$0xff] %vm355_vm0, %v8716_v23  ;;  %v8772_v25 = vpop.f32.mrb[152].mxu1  ;;  %v3538_v28 = vpop.f32.mrb[153].mxu0 }
 0x263   : > { %6755 = vst.msk [vmem:[%s11201_s23 + $0x9c8] sm:$0xff] %vm355_vm0, %v8772_v25  ;;  %6722 = vst.msk [vmem:[%s11201_s23 + $0x940] sm:$0xff] %vm355_vm0, %v3538_v28  ;;  %v3717_v14 = vpop.f32.mrb[153].mxu1 }
 0x264   : > { %6754 = vst.msk [vmem:[%s11201_s23 + $0x9c0] sm:$0xff] %vm355_vm0, %v3717_v14 }
 0x265   : > { %v8719_v31 = vpop.f32.mrb[154].mxu0 }
 0x266   : > { %6725 = vst.msk [vmem:[%s11201_s23 + $0x958] sm:$0xff] %vm355_vm0, %v8719_v31  ;;  %v8775_v34 = vpop.f32.mrb[154].mxu1  ;;  %v3548_v32 = vpop.f32.mrb[155].mxu0 }
 0x267   : > { %6757 = vst.msk [vmem:[%s11201_s23 + $0x9d8] sm:$0xff] %vm355_vm0, %v8775_v34  ;;  %6724 = vst.msk [vmem:[%s11201_s23 + $0x950] sm:$0xff] %vm355_vm0, %v3548_v32  ;;  %v3727_v19 = vpop.f32.mrb[155].mxu1 }
 0x268   : > { %6756 = vst.msk [vmem:[%s11201_s23 + $0x9d0] sm:$0xff] %vm355_vm0, %v3727_v19 }
 0x269   : > { %v8722_v42 = vpop.f32.mrb[156].mxu0 }
 0x26a   : > { %6727 = vst.msk [vmem:[%s11201_s23 + $0x968] sm:$0xff] %vm355_vm0, %v8722_v42  ;;  %v8778_v38 = vpop.f32.mrb[156].mxu1  ;;  %v3558_v39 = vpop.f32.mrb[157].mxu0 }
 0x26b   : > { %6759 = vst.msk [vmem:[%s11201_s23 + $0x9e8] sm:$0xff] %vm355_vm0, %v8778_v38  ;;  %6726 = vst.msk [vmem:[%s11201_s23 + $0x960] sm:$0xff] %vm355_vm0, %v3558_v39  ;;  %v3737_v21 = vpop.f32.mrb[157].mxu1 }
 0x26c   : > { %6758 = vst.msk [vmem:[%s11201_s23 + $0x9e0] sm:$0xff] %vm355_vm0, %v3737_v21 }
 0x26d   : > { %v8725_v35 = vpop.f32.mrb[158].mxu0 }
 0x26e   : > { %6729 = vst.msk [vmem:[%s11201_s23 + $0x978] sm:$0xff] %vm355_vm0, %v8725_v35  ;;  %v8781_v45 = vpop.f32.mrb[158].mxu1  ;;  %v3568_v40 = vpop.f32.mrb[159].mxu0 }
 0x26f   : > { %6761 = vst.msk [vmem:[%s11201_s23 + $0x9f8] sm:$0xff] %vm355_vm0, %v8781_v45  ;;  %6728 = vst.msk [vmem:[%s11201_s23 + $0x970] sm:$0xff] %vm355_vm0, %v3568_v40  ;;  %v3747_v50 = vpop.f32.mrb[159].mxu1 }
 0x270   : > { %6760 = vst.msk [vmem:[%s11201_s23 + $0x9f0] sm:$0xff] %vm355_vm0, %v3747_v50 }
 0x271   : > { %v8816_v27 = vpop.f32.mrb[160].mxu0 }
 0x272   : > { %6779 = vst.msk [vmem:[%s11201_s23 + $0xa08] sm:$0xff] %vm355_vm0, %v8816_v27  ;;  %v8872_v44 = vpop.f32.mrb[160].mxu1  ;;  %v3856_v46 = vpop.f32.mrb[161].mxu0  ;;  %v5294_v27 = vld [vmem:[%s11201_s23] sm:$0xff] (%p13393_p7) }
 0x273   : > { %6811 = vst.msk [vmem:[%s11201_s23 + $0xa88] sm:$0xff] %vm355_vm0, %v8872_v44  ;;  %6778 = vst.msk [vmem:[%s11201_s23 + $0xa00] sm:$0xff] %vm355_vm0, %v3856_v46  ;;  %v4035_v48 = vpop.f32.mrb[161].mxu1  ;;  %v5296_v44 = vld [vmem:[%s11201_s23 + $0x8] sm:$0xff] (%p13393_p7)  ;;  %v5298_v46 = vld [vmem:[%s11201_s23 + $0x10] sm:$0xff] (%p13393_p7) }
 0x274   : > { %6810 = vst.msk [vmem:[%s11201_s23 + $0xa80] sm:$0xff] %vm355_vm0, %v4035_v48  ;;  %v5300_v48 = vld [vmem:[%s11201_s23 + $0x18] sm:$0xff] (%p13393_p7)  ;;  %5295 = vst [vmem:[%s12603_s13] sm:$0xff] (%p13393_p7), %v5294_v27  ;;  %v5422_v27 = vld [vmem:[%s11201_s23 + $0x200] sm:$0xff] (%p13393_p7) }
 0x275   : > { %v8819_v29 = vpop.f32.mrb[162].mxu0  ;;  %5297 = vst [vmem:[%s12603_s13 + $0x8] sm:$0xff] (%p13393_p7), %v5296_v44  ;;  %5299 = vst [vmem:[%s12603_s13 + $0x10] sm:$0xff] (%p13393_p7), %v5298_v46  ;;  %v5424_v44 = vld [vmem:[%s11201_s23 + $0x208] sm:$0xff] (%p13393_p7)  ;;  %v5426_v46 = vld [vmem:[%s11201_s23 + $0x210] sm:$0xff] (%p13393_p7) }
 0x276   : > { %6781 = vst.msk [vmem:[%s11201_s23 + $0xa18] sm:$0xff] %vm355_vm0, %v8819_v29  ;;  %v8875_v43 = vpop.f32.mrb[162].mxu1  ;;  %v3866_v51 = vpop.f32.mrb[163].mxu0  ;;  %v5302_v29 = vld [vmem:[%s11201_s23 + $0x20] sm:$0xff] (%p13393_p7)  ;;  %5301 = vst [vmem:[%s12603_s13 + $0x18] sm:$0xff] (%p13393_p7), %v5300_v48  ;;  %v5428_v48 = vld [vmem:[%s11201_s23 + $0x218] sm:$0xff] (%p13393_p7) }
 0x277   : > { %6813 = vst.msk [vmem:[%s11201_s23 + $0xa98] sm:$0xff] %vm355_vm0, %v8875_v43  ;;  %6780 = vst.msk [vmem:[%s11201_s23 + $0xa10] sm:$0xff] %vm355_vm0, %v3866_v51  ;;  %v4045_v53 = vpop.f32.mrb[163].mxu1  ;;  %v5304_v43 = vld [vmem:[%s11201_s23 + $0x28] sm:$0xff] (%p13393_p7)  ;;  %v5306_v51 = vld [vmem:[%s11201_s23 + $0x30] sm:$0xff] (%p13393_p7) }
 0x278   : > { %6812 = vst.msk [vmem:[%s11201_s23 + $0xa90] sm:$0xff] %vm355_vm0, %v4045_v53  ;;  %v5308_v53 = vld [vmem:[%s11201_s23 + $0x38] sm:$0xff] (%p13393_p7)  ;;  %5303 = vst [vmem:[%s12603_s13 + $0x20] sm:$0xff] (%p13393_p7), %v5302_v29  ;;  %v5430_v29 = vld [vmem:[%s11201_s23 + $0x220] sm:$0xff] (%p13393_p7) }
 0x279   : > { %v8822_v54 = vpop.f32.mrb[164].mxu0  ;;  %5305 = vst [vmem:[%s12603_s13 + $0x28] sm:$0xff] (%p13393_p7), %v5304_v43  ;;  %5307 = vst [vmem:[%s12603_s13 + $0x30] sm:$0xff] (%p13393_p7), %v5306_v51  ;;  %v5432_v43 = vld [vmem:[%s11201_s23 + $0x228] sm:$0xff] (%p13393_p7)  ;;  %v5434_v51 = vld [vmem:[%s11201_s23 + $0x230] sm:$0xff] (%p13393_p7) }
 0x27a   : > { %6783 = vst.msk [vmem:[%s11201_s23 + $0xa28] sm:$0xff] %vm355_vm0, %v8822_v54  ;;  %v8878_v55 = vpop.f32.mrb[164].mxu1  ;;  %v3876_v49 = vpop.f32.mrb[165].mxu0  ;;  %v5310_v54 = vld [vmem:[%s11201_s23 + $0x40] sm:$0xff] (%p13393_p7)  ;;  %5309 = vst [vmem:[%s12603_s13 + $0x38] sm:$0xff] (%p13393_p7), %v5308_v53  ;;  %v5436_v53 = vld [vmem:[%s11201_s23 + $0x238] sm:$0xff] (%p13393_p7) }
 0x27b   : > { %6815 = vst.msk [vmem:[%s11201_s23 + $0xaa8] sm:$0xff] %vm355_vm0, %v8878_v55  ;;  %6782 = vst.msk [vmem:[%s11201_s23 + $0xa20] sm:$0xff] %vm355_vm0, %v3876_v49  ;;  %v4055_v56 = vpop.f32.mrb[165].mxu1  ;;  %v5312_v55 = vld [vmem:[%s11201_s23 + $0x48] sm:$0xff] (%p13393_p7)  ;;  %v5314_v49 = vld [vmem:[%s11201_s23 + $0x50] sm:$0xff] (%p13393_p7) }
 0x27c   : > { %6814 = vst.msk [vmem:[%s11201_s23 + $0xaa0] sm:$0xff] %vm355_vm0, %v4055_v56  ;;  %v5316_v56 = vld [vmem:[%s11201_s23 + $0x58] sm:$0xff] (%p13393_p7)  ;;  %5311 = vst [vmem:[%s12603_s13 + $0x40] sm:$0xff] (%p13393_p7), %v5310_v54  ;;  %v5438_v54 = vld [vmem:[%s11201_s23 + $0x240] sm:$0xff] (%p13393_p7) }
 0x27d   : > { %v8825_v58 = vpop.f32.mrb[166].mxu0  ;;  %5313 = vst [vmem:[%s12603_s13 + $0x48] sm:$0xff] (%p13393_p7), %v5312_v55  ;;  %5315 = vst [vmem:[%s12603_s13 + $0x50] sm:$0xff] (%p13393_p7), %v5314_v49  ;;  %v5440_v55 = vld [vmem:[%s11201_s23 + $0x248] sm:$0xff] (%p13393_p7)  ;;  %v5442_v49 = vld [vmem:[%s11201_s23 + $0x250] sm:$0xff] (%p13393_p7) }
 0x27e   : > { %6785 = vst.msk [vmem:[%s11201_s23 + $0xa38] sm:$0xff] %vm355_vm0, %v8825_v58  ;;  %v8881_v62 = vpop.f32.mrb[166].mxu1  ;;  %v3886_v0 = vpop.f32.mrb[167].mxu0  ;;  %v5318_v58 = vld [vmem:[%s11201_s23 + $0x60] sm:$0xff] (%p13393_p7)  ;;  %5317 = vst [vmem:[%s12603_s13 + $0x58] sm:$0xff] (%p13393_p7), %v5316_v56  ;;  %v5444_v56 = vld [vmem:[%s11201_s23 + $0x258] sm:$0xff] (%p13393_p7) }
 0x27f   : > { %6817 = vst.msk [vmem:[%s11201_s23 + $0xab8] sm:$0xff] %vm355_vm0, %v8881_v62  ;;  %6784 = vst.msk [vmem:[%s11201_s23 + $0xa30] sm:$0xff] %vm355_vm0, %v3886_v0  ;;  %v4065_v26 = vpop.f32.mrb[167].mxu1  ;;  %v5320_v62 = vld [vmem:[%s11201_s23 + $0x68] sm:$0xff] (%p13393_p7)  ;;  %v5322_v0 = vld [vmem:[%s11201_s23 + $0x70] sm:$0xff] (%p13393_p7) }
 0x280   : > { %6816 = vst.msk [vmem:[%s11201_s23 + $0xab0] sm:$0xff] %vm355_vm0, %v4065_v26  ;;  %5319 = vst [vmem:[%s12603_s13 + $0x60] sm:$0xff] (%p13393_p7), %v5318_v58  ;;  %v5324_v26 = vld [vmem:[%s11201_s23 + $0x78] sm:$0xff] (%p13393_p7)  ;;  %v5446_v58 = vld [vmem:[%s11201_s23 + $0x260] sm:$0xff] (%p13393_p7) }
 0x281   : > { %v8828_v2 = vpop.f32.mrb[168].mxu0  ;;  %5321 = vst [vmem:[%s12603_s13 + $0x68] sm:$0xff] (%p13393_p7), %v5320_v62  ;;  %5323 = vst [vmem:[%s12603_s13 + $0x70] sm:$0xff] (%p13393_p7), %v5322_v0  ;;  %v5448_v62 = vld [vmem:[%s11201_s23 + $0x268] sm:$0xff] (%p13393_p7)  ;;  %v5450_v0 = vld [vmem:[%s11201_s23 + $0x270] sm:$0xff] (%p13393_p7) }
 0x282   : > { %6787 = vst.msk [vmem:[%s11201_s23 + $0xa48] sm:$0xff] %vm355_vm0, %v8828_v2  ;;  %v8884_v3 = vpop.f32.mrb[168].mxu1  ;;  %v3896_v57 = vpop.f32.mrb[169].mxu0  ;;  %v5326_v2 = vld [vmem:[%s11201_s23 + $0x80] sm:$0xff] (%p13393_p7)  ;;  %5325 = vst [vmem:[%s12603_s13 + $0x78] sm:$0xff] (%p13393_p7), %v5324_v26  ;;  %v5452_v26 = vld [vmem:[%s11201_s23 + $0x278] sm:$0xff] (%p13393_p7) }
 0x283   : > { %6819 = vst.msk [vmem:[%s11201_s23 + $0xac8] sm:$0xff] %vm355_vm0, %v8884_v3  ;;  %6786 = vst.msk [vmem:[%s11201_s23 + $0xa40] sm:$0xff] %vm355_vm0, %v3896_v57  ;;  %v4075_v52 = vpop.f32.mrb[169].mxu1  ;;  %v5328_v3 = vld [vmem:[%s11201_s23 + $0x88] sm:$0xff] (%p13393_p7)  ;;  %v5330_v57 = vld [vmem:[%s11201_s23 + $0x90] sm:$0xff] (%p13393_p7) }
 0x284   : > { %6818 = vst.msk [vmem:[%s11201_s23 + $0xac0] sm:$0xff] %vm355_vm0, %v4075_v52  ;;  %5327 = vst [vmem:[%s12603_s13 + $0x100] sm:$0xff] (%p13393_p7), %v5326_v2  ;;  %v5332_v52 = vld [vmem:[%s11201_s23 + $0x98] sm:$0xff] (%p13393_p7)  ;;  %v5454_v2 = vld [vmem:[%s11201_s23 + $0x280] sm:$0xff] (%p13393_p7) }
 0x285   : > { %v8831_v6 = vpop.f32.mrb[170].mxu0  ;;  %5329 = vst [vmem:[%s12603_s13 + $0x108] sm:$0xff] (%p13393_p7), %v5328_v3  ;;  %5331 = vst [vmem:[%s12603_s13 + $0x110] sm:$0xff] (%p13393_p7), %v5330_v57  ;;  %v5456_v3 = vld [vmem:[%s11201_s23 + $0x288] sm:$0xff] (%p13393_p7)  ;;  %v5458_v57 = vld [vmem:[%s11201_s23 + $0x290] sm:$0xff] (%p13393_p7) }
 0x286   : > { %6789 = vst.msk [vmem:[%s11201_s23 + $0xa58] sm:$0xff] %vm355_vm0, %v8831_v6  ;;  %v8887_v59 = vpop.f32.mrb[170].mxu1  ;;  %v3906_v7 = vpop.f32.mrb[171].mxu0  ;;  %v5334_v6 = vld [vmem:[%s11201_s23 + $0xa0] sm:$0xff] (%p13393_p7)  ;;  %5333 = vst [vmem:[%s12603_s13 + $0x118] sm:$0xff] (%p13393_p7), %v5332_v52  ;;  %v5460_v52 = vld [vmem:[%s11201_s23 + $0x298] sm:$0xff] (%p13393_p7) }
 0x287   : > { %6821 = vst.msk [vmem:[%s11201_s23 + $0xad8] sm:$0xff] %vm355_vm0, %v8887_v59  ;;  %6788 = vst.msk [vmem:[%s11201_s23 + $0xa50] sm:$0xff] %vm355_vm0, %v3906_v7  ;;  %v4085_v10 = vpop.f32.mrb[171].mxu1  ;;  %v5336_v59 = vld [vmem:[%s11201_s23 + $0xa8] sm:$0xff] (%p13393_p7)  ;;  %v5338_v7 = vld [vmem:[%s11201_s23 + $0xb0] sm:$0xff] (%p13393_p7) }
 0x288   : > { %6820 = vst.msk [vmem:[%s11201_s23 + $0xad0] sm:$0xff] %vm355_vm0, %v4085_v10  ;;  %5335 = vst [vmem:[%s12603_s13 + $0x120] sm:$0xff] (%p13393_p7), %v5334_v6  ;;  %v5340_v10 = vld [vmem:[%s11201_s23 + $0xb8] sm:$0xff] (%p13393_p7)  ;;  %v5462_v6 = vld [vmem:[%s11201_s23 + $0x2a0] sm:$0xff] (%p13393_p7) }
 0x289   : > { %v8834_v12 = vpop.f32.mrb[172].mxu0  ;;  %5337 = vst [vmem:[%s12603_s13 + $0x128] sm:$0xff] (%p13393_p7), %v5336_v59  ;;  %5339 = vst [vmem:[%s12603_s13 + $0x130] sm:$0xff] (%p13393_p7), %v5338_v7  ;;  %v5464_v59 = vld [vmem:[%s11201_s23 + $0x2a8] sm:$0xff] (%p13393_p7)  ;;  %v5466_v7 = vld [vmem:[%s11201_s23 + $0x2b0] sm:$0xff] (%p13393_p7) }
 0x28a   : > { %6791 = vst.msk [vmem:[%s11201_s23 + $0xa68] sm:$0xff] %vm355_vm0, %v8834_v12  ;;  %v8890_v8 = vpop.f32.mrb[172].mxu1  ;;  %v3916_v63 = vpop.f32.mrb[173].mxu0  ;;  %5341 = vst [vmem:[%s12603_s13 + $0x138] sm:$0xff] (%p13393_p7), %v5340_v10  ;;  %v5342_v12 = vld [vmem:[%s11201_s23 + $0xc0] sm:$0xff] (%p13393_p7)  ;;  %v5468_v10 = vld [vmem:[%s11201_s23 + $0x2b8] sm:$0xff] (%p13393_p7) }
 0x28b   : > { %6823 = vst.msk [vmem:[%s11201_s23 + $0xae8] sm:$0xff] %vm355_vm0, %v8890_v8  ;;  %6790 = vst.msk [vmem:[%s11201_s23 + $0xa60] sm:$0xff] %vm355_vm0, %v3916_v63  ;;  %v4095_v20 = vpop.f32.mrb[173].mxu1  ;;  %v5344_v8 = vld [vmem:[%s11201_s23 + $0xc8] sm:$0xff] (%p13393_p7)  ;;  %v5346_v63 = vld [vmem:[%s11201_s23 + $0xd0] sm:$0xff] (%p13393_p7) }
 0x28c   : > { %6822 = vst.msk [vmem:[%s11201_s23 + $0xae0] sm:$0xff] %vm355_vm0, %v4095_v20  ;;  %5343 = vst [vmem:[%s12603_s13 + $0x140] sm:$0xff] (%p13393_p7), %v5342_v12  ;;  %v5348_v20 = vld [vmem:[%s11201_s23 + $0xd8] sm:$0xff] (%p13393_p7)  ;;  %v5470_v12 = vld [vmem:[%s11201_s23 + $0x2c0] sm:$0xff] (%p13393_p7) }
 0x28d   : > { %v8837_v30 = vpop.f32.mrb[174].mxu0  ;;  %5345 = vst [vmem:[%s12603_s13 + $0x148] sm:$0xff] (%p13393_p7), %v5344_v8  ;;  %5347 = vst [vmem:[%s12603_s13 + $0x150] sm:$0xff] (%p13393_p7), %v5346_v63  ;;  %v5472_v8 = vld [vmem:[%s11201_s23 + $0x2c8] sm:$0xff] (%p13393_p7)  ;;  %v5474_v63 = vld [vmem:[%s11201_s23 + $0x2d0] sm:$0xff] (%p13393_p7) }
 0x28e   : > { %6793 = vst.msk [vmem:[%s11201_s23 + $0xa78] sm:$0xff] %vm355_vm0, %v8837_v30  ;;  %v8893_v11 = vpop.f32.mrb[174].mxu1  ;;  %v3926_v13 = vpop.f32.mrb[175].mxu0  ;;  %v5350_v30 = vld [vmem:[%s11201_s23 + $0xe0] sm:$0xff] (%p13393_p7)  ;;  %5349 = vst [vmem:[%s12603_s13 + $0x158] sm:$0xff] (%p13393_p7), %v5348_v20  ;;  %v5476_v20 = vld [vmem:[%s11201_s23 + $0x2d8] sm:$0xff] (%p13393_p7) }
 0x28f   : > { %6825 = vst.msk [vmem:[%s11201_s23 + $0xaf8] sm:$0xff] %vm355_vm0, %v8893_v11  ;;  %6792 = vst.msk [vmem:[%s11201_s23 + $0xa70] sm:$0xff] %vm355_vm0, %v3926_v13  ;;  %v4105_v33 = vpop.f32.mrb[175].mxu1  ;;  %v5352_v11 = vld [vmem:[%s11201_s23 + $0xe8] sm:$0xff] (%p13393_p7)  ;;  %v5354_v13 = vld [vmem:[%s11201_s23 + $0xf0] sm:$0xff] (%p13393_p7) }
 0x290   : > { %6824 = vst.msk [vmem:[%s11201_s23 + $0xaf0] sm:$0xff] %vm355_vm0, %v4105_v33  ;;  %5351 = vst [vmem:[%s12603_s13 + $0x160] sm:$0xff] (%p13393_p7), %v5350_v30  ;;  %v5356_v33 = vld [vmem:[%s11201_s23 + $0xf8] sm:$0xff] (%p13393_p7)  ;;  %v5478_v30 = vld [vmem:[%s11201_s23 + $0x2e0] sm:$0xff] (%p13393_p7) }
 0x291   : > { %v8928_v41 = vpop.f32.mrb[176].mxu0  ;;  %5353 = vst [vmem:[%s12603_s13 + $0x168] sm:$0xff] (%p13393_p7), %v5352_v11  ;;  %5355 = vst [vmem:[%s12603_s13 + $0x170] sm:$0xff] (%p13393_p7), %v5354_v13  ;;  %v5480_v11 = vld [vmem:[%s11201_s23 + $0x2e8] sm:$0xff] (%p13393_p7)  ;;  %v5482_v13 = vld [vmem:[%s11201_s23 + $0x2f0] sm:$0xff] (%p13393_p7) }
 0x292   : > { %6843 = vst.msk [vmem:[%s11201_s23 + $0xb08] sm:$0xff] %vm355_vm0, %v8928_v41  ;;  %v8984_v5 = vpop.f32.mrb[176].mxu1  ;;  %v4214_v9 = vpop.f32.mrb[177].mxu0  ;;  %v5358_v41 = vld [vmem:[%s11201_s23 + $0x100] sm:$0xff] (%p13393_p7)  ;;  %5357 = vst [vmem:[%s12603_s13 + $0x178] sm:$0xff] (%p13393_p7), %v5356_v33  ;;  %v5484_v33 = vld [vmem:[%s11201_s23 + $0x2f8] sm:$0xff] (%p13393_p7) }
 0x293   : > { %6875 = vst.msk [vmem:[%s11201_s23 + $0xb88] sm:$0xff] %vm355_vm0, %v8984_v5  ;;  %6842 = vst.msk [vmem:[%s11201_s23 + $0xb00] sm:$0xff] %vm355_vm0, %v4214_v9  ;;  %v4393_v47 = vpop.f32.mrb[177].mxu1  ;;  %v5360_v5 = vld [vmem:[%s11201_s23 + $0x108] sm:$0xff] (%p13393_p7)  ;;  %v5362_v9 = vld [vmem:[%s11201_s23 + $0x110] sm:$0xff] (%p13393_p7) }
 0x294   : > { %6874 = vst.msk [vmem:[%s11201_s23 + $0xb80] sm:$0xff] %vm355_vm0, %v4393_v47  ;;  %5359 = vst [vmem:[%s12603_s13 + $0x200] sm:$0xff] (%p13393_p7), %v5358_v41  ;;  %v5364_v47 = vld [vmem:[%s11201_s23 + $0x118] sm:$0xff] (%p13393_p7)  ;;  %v5486_v41 = vld [vmem:[%s11201_s23 + $0x300] sm:$0xff] (%p13393_p7) }
 0x295   : > { %v8931_v37 = vpop.f32.mrb[178].mxu0  ;;  %5361 = vst [vmem:[%s12603_s13 + $0x208] sm:$0xff] (%p13393_p7), %v5360_v5  ;;  %5363 = vst [vmem:[%s12603_s13 + $0x210] sm:$0xff] (%p13393_p7), %v5362_v9  ;;  %v5488_v5 = vld [vmem:[%s11201_s23 + $0x308] sm:$0xff] (%p13393_p7)  ;;  %v5490_v9 = vld [vmem:[%s11201_s23 + $0x310] sm:$0xff] (%p13393_p7) }
 0x296   : > { %6845 = vst.msk [vmem:[%s11201_s23 + $0xb18] sm:$0xff] %vm355_vm0, %v8931_v37  ;;  %v8987_v15 = vpop.f32.mrb[178].mxu1  ;;  %v4224_v16 = vpop.f32.mrb[179].mxu0  ;;  %5365 = vst [vmem:[%s12603_s13 + $0x218] sm:$0xff] (%p13393_p7), %v5364_v47  ;;  %v5366_v37 = vld [vmem:[%s11201_s23 + $0x120] sm:$0xff] (%p13393_p7)  ;;  %v5492_v47 = vld [vmem:[%s11201_s23 + $0x318] sm:$0xff] (%p13393_p7) }
 0x297   : > { %6877 = vst.msk [vmem:[%s11201_s23 + $0xb98] sm:$0xff] %vm355_vm0, %v8987_v15  ;;  %6844 = vst.msk [vmem:[%s11201_s23 + $0xb10] sm:$0xff] %vm355_vm0, %v4224_v16  ;;  %v4403_v36 = vpop.f32.mrb[179].mxu1  ;;  %v5368_v15 = vld [vmem:[%s11201_s23 + $0x128] sm:$0xff] (%p13393_p7)  ;;  %v5370_v16 = vld [vmem:[%s11201_s23 + $0x130] sm:$0xff] (%p13393_p7) }
 0x298   : > { %6876 = vst.msk [vmem:[%s11201_s23 + $0xb90] sm:$0xff] %vm355_vm0, %v4403_v36  ;;  %5367 = vst [vmem:[%s12603_s13 + $0x220] sm:$0xff] (%p13393_p7), %v5366_v37  ;;  %v5372_v36 = vld [vmem:[%s11201_s23 + $0x138] sm:$0xff] (%p13393_p7)  ;;  %v5494_v37 = vld [vmem:[%s11201_s23 + $0x320] sm:$0xff] (%p13393_p7) }
 0x299   : > { %v8934_v61 = vpop.f32.mrb[180].mxu0  ;;  %5369 = vst [vmem:[%s12603_s13 + $0x228] sm:$0xff] (%p13393_p7), %v5368_v15  ;;  %5371 = vst [vmem:[%s12603_s13 + $0x230] sm:$0xff] (%p13393_p7), %v5370_v16  ;;  %v5496_v15 = vld [vmem:[%s11201_s23 + $0x328] sm:$0xff] (%p13393_p7)  ;;  %v5498_v16 = vld [vmem:[%s11201_s23 + $0x330] sm:$0xff] (%p13393_p7) }
 0x29a   : > { %6847 = vst.msk [vmem:[%s11201_s23 + $0xb28] sm:$0xff] %vm355_vm0, %v8934_v61  ;;  %v8990_v18 = vpop.f32.mrb[180].mxu1  ;;  %v4234_v17 = vpop.f32.mrb[181].mxu0  ;;  %v5374_v61 = vld [vmem:[%s11201_s23 + $0x140] sm:$0xff] (%p13393_p7)  ;;  %5373 = vst [vmem:[%s12603_s13 + $0x238] sm:$0xff] (%p13393_p7), %v5372_v36  ;;  %v5500_v36 = vld [vmem:[%s11201_s23 + $0x338] sm:$0xff] (%p13393_p7) }
 0x29b   : > { %6879 = vst.msk [vmem:[%s11201_s23 + $0xba8] sm:$0xff] %vm355_vm0, %v8990_v18  ;;  %6846 = vst.msk [vmem:[%s11201_s23 + $0xb20] sm:$0xff] %vm355_vm0, %v4234_v17  ;;  %v4413_v1 = vpop.f32.mrb[181].mxu1  ;;  %v5376_v18 = vld [vmem:[%s11201_s23 + $0x148] sm:$0xff] (%p13393_p7)  ;;  %v5378_v17 = vld [vmem:[%s11201_s23 + $0x150] sm:$0xff] (%p13393_p7) }
 0x29c   : > { %6878 = vst.msk [vmem:[%s11201_s23 + $0xba0] sm:$0xff] %vm355_vm0, %v4413_v1  ;;  %5375 = vst [vmem:[%s12603_s13 + $0x240] sm:$0xff] (%p13393_p7), %v5374_v61  ;;  %v5380_v1 = vld [vmem:[%s11201_s23 + $0x158] sm:$0xff] (%p13393_p7)  ;;  %v5502_v61 = vld [vmem:[%s11201_s23 + $0x340] sm:$0xff] (%p13393_p7) }
 0x29d   : > { %v8937_v60 = vpop.f32.mrb[182].mxu0  ;;  %5377 = vst [vmem:[%s12603_s13 + $0x248] sm:$0xff] (%p13393_p7), %v5376_v18  ;;  %5379 = vst [vmem:[%s12603_s13 + $0x250] sm:$0xff] (%p13393_p7), %v5378_v17  ;;  %v5504_v18 = vld [vmem:[%s11201_s23 + $0x348] sm:$0xff] (%p13393_p7)  ;;  %v5506_v17 = vld [vmem:[%s11201_s23 + $0x350] sm:$0xff] (%p13393_p7) }
 0x29e   : > { %6849 = vst.msk [vmem:[%s11201_s23 + $0xb38] sm:$0xff] %vm355_vm0, %v8937_v60  ;;  %v8993_v22 = vpop.f32.mrb[182].mxu1  ;;  %v4244_v4 = vpop.f32.mrb[183].mxu0  ;;  %v5382_v60 = vld [vmem:[%s11201_s23 + $0x160] sm:$0xff] (%p13393_p7)  ;;  %5381 = vst [vmem:[%s12603_s13 + $0x258] sm:$0xff] (%p13393_p7), %v5380_v1  ;;  %v5508_v1 = vld [vmem:[%s11201_s23 + $0x358] sm:$0xff] (%p13393_p7) }
 0x29f   : > { %6881 = vst.msk [vmem:[%s11201_s23 + $0xbb8] sm:$0xff] %vm355_vm0, %v8993_v22  ;;  %6848 = vst.msk [vmem:[%s11201_s23 + $0xb30] sm:$0xff] %vm355_vm0, %v4244_v4  ;;  %v4423_v24 = vpop.f32.mrb[183].mxu1  ;;  %v5384_v22 = vld [vmem:[%s11201_s23 + $0x168] sm:$0xff] (%p13393_p7)  ;;  %v5386_v4 = vld [vmem:[%s11201_s23 + $0x170] sm:$0xff] (%p13393_p7) }
 0x2a0   : > { %6880 = vst.msk [vmem:[%s11201_s23 + $0xbb0] sm:$0xff] %vm355_vm0, %v4423_v24  ;;  %5383 = vst [vmem:[%s12603_s13 + $0x260] sm:$0xff] (%p13393_p7), %v5382_v60  ;;  %v5388_v24 = vld [vmem:[%s11201_s23 + $0x178] sm:$0xff] (%p13393_p7)  ;;  %v5510_v60 = vld [vmem:[%s11201_s23 + $0x360] sm:$0xff] (%p13393_p7) }
 0x2a1   : > { %v8940_v23 = vpop.f32.mrb[184].mxu0  ;;  %5385 = vst [vmem:[%s12603_s13 + $0x268] sm:$0xff] (%p13393_p7), %v5384_v22  ;;  %5387 = vst [vmem:[%s12603_s13 + $0x270] sm:$0xff] (%p13393_p7), %v5386_v4  ;;  %v5512_v22 = vld [vmem:[%s11201_s23 + $0x368] sm:$0xff] (%p13393_p7)  ;;  %v5514_v4 = vld [vmem:[%s11201_s23 + $0x370] sm:$0xff] (%p13393_p7) }
 0x2a2   : > { %6851 = vst.msk [vmem:[%s11201_s23 + $0xb48] sm:$0xff] %vm355_vm0, %v8940_v23  ;;  %v8996_v25 = vpop.f32.mrb[184].mxu1  ;;  %v4254_v28 = vpop.f32.mrb[185].mxu0  ;;  %5389 = vst [vmem:[%s12603_s13 + $0x278] sm:$0xff] (%p13393_p7), %v5388_v24  ;;  %v5390_v23 = vld [vmem:[%s11201_s23 + $0x180] sm:$0xff] (%p13393_p7)  ;;  %v5516_v24 = vld [vmem:[%s11201_s23 + $0x378] sm:$0xff] (%p13393_p7) }
 0x2a3   : > { %6883 = vst.msk [vmem:[%s11201_s23 + $0xbc8] sm:$0xff] %vm355_vm0, %v8996_v25  ;;  %6850 = vst.msk [vmem:[%s11201_s23 + $0xb40] sm:$0xff] %vm355_vm0, %v4254_v28  ;;  %v4433_v14 = vpop.f32.mrb[185].mxu1  ;;  %v5392_v25 = vld [vmem:[%s11201_s23 + $0x188] sm:$0xff] (%p13393_p7)  ;;  %v5394_v28 = vld [vmem:[%s11201_s23 + $0x190] sm:$0xff] (%p13393_p7) }
 0x2a4   : > { %6882 = vst.msk [vmem:[%s11201_s23 + $0xbc0] sm:$0xff] %vm355_vm0, %v4433_v14  ;;  %5391 = vst [vmem:[%s12603_s13 + $0x300] sm:$0xff] (%p13393_p7), %v5390_v23  ;;  %v5396_v14 = vld [vmem:[%s11201_s23 + $0x198] sm:$0xff] (%p13393_p7)  ;;  %v5518_v23 = vld [vmem:[%s11201_s23 + $0x380] sm:$0xff] (%p13393_p7) }
 0x2a5   : > { %v8943_v31 = vpop.f32.mrb[186].mxu0  ;;  %5393 = vst [vmem:[%s12603_s13 + $0x308] sm:$0xff] (%p13393_p7), %v5392_v25  ;;  %5395 = vst [vmem:[%s12603_s13 + $0x310] sm:$0xff] (%p13393_p7), %v5394_v28  ;;  %v5520_v25 = vld [vmem:[%s11201_s23 + $0x388] sm:$0xff] (%p13393_p7)  ;;  %v5522_v28 = vld [vmem:[%s11201_s23 + $0x390] sm:$0xff] (%p13393_p7) }
 0x2a6   : > { %6853 = vst.msk [vmem:[%s11201_s23 + $0xb58] sm:$0xff] %vm355_vm0, %v8943_v31  ;;  %v8999_v34 = vpop.f32.mrb[186].mxu1  ;;  %v4264_v32 = vpop.f32.mrb[187].mxu0  ;;  %v5398_v31 = vld [vmem:[%s11201_s23 + $0x1a0] sm:$0xff] (%p13393_p7)  ;;  %5397 = vst [vmem:[%s12603_s13 + $0x318] sm:$0xff] (%p13393_p7), %v5396_v14  ;;  %v5524_v14 = vld [vmem:[%s11201_s23 + $0x398] sm:$0xff] (%p13393_p7) }
 0x2a7   : > { %6885 = vst.msk [vmem:[%s11201_s23 + $0xbd8] sm:$0xff] %vm355_vm0, %v8999_v34  ;;  %6852 = vst.msk [vmem:[%s11201_s23 + $0xb50] sm:$0xff] %vm355_vm0, %v4264_v32  ;;  %v4443_v19 = vpop.f32.mrb[187].mxu1  ;;  %v5400_v34 = vld [vmem:[%s11201_s23 + $0x1a8] sm:$0xff] (%p13393_p7)  ;;  %v5402_v32 = vld [vmem:[%s11201_s23 + $0x1b0] sm:$0xff] (%p13393_p7) }
 0x2a8   : > { %6884 = vst.msk [vmem:[%s11201_s23 + $0xbd0] sm:$0xff] %vm355_vm0, %v4443_v19  ;;  %5399 = vst [vmem:[%s12603_s13 + $0x320] sm:$0xff] (%p13393_p7), %v5398_v31  ;;  %v5404_v19 = vld [vmem:[%s11201_s23 + $0x1b8] sm:$0xff] (%p13393_p7)  ;;  %v5526_v31 = vld [vmem:[%s11201_s23 + $0x3a0] sm:$0xff] (%p13393_p7) }
 0x2a9   : > { %v8946_v42 = vpop.f32.mrb[188].mxu0  ;;  %5401 = vst [vmem:[%s12603_s13 + $0x328] sm:$0xff] (%p13393_p7), %v5400_v34  ;;  %5403 = vst [vmem:[%s12603_s13 + $0x330] sm:$0xff] (%p13393_p7), %v5402_v32  ;;  %v5528_v34 = vld [vmem:[%s11201_s23 + $0x3a8] sm:$0xff] (%p13393_p7)  ;;  %v5530_v32 = vld [vmem:[%s11201_s23 + $0x3b0] sm:$0xff] (%p13393_p7) }
 0x2aa   : > { %6855 = vst.msk [vmem:[%s11201_s23 + $0xb68] sm:$0xff] %vm355_vm0, %v8946_v42  ;;  %v9002_v38 = vpop.f32.mrb[188].mxu1  ;;  %v4274_v39 = vpop.f32.mrb[189].mxu0  ;;  %4495 = sbr.rel (!%p13393_p7) target bundleno = 851 (0x353), region = 36  ;;  %v5406_v42 = vld [vmem:[%s11201_s23 + $0x1c0] sm:$0xff] (%p13393_p7)  ;;  %5405 = vst [vmem:[%s12603_s13 + $0x338] sm:$0xff] (%p13393_p7), %v5404_v19 }
 0x2ab   : > { %6887 = vst.msk [vmem:[%s11201_s23 + $0xbe8] sm:$0xff] %vm355_vm0, %v9002_v38  ;;  %6854 = vst.msk [vmem:[%s11201_s23 + $0xb60] sm:$0xff] %vm355_vm0, %v4274_v39  ;;  %v4453_v21 = vpop.f32.mrb[189].mxu1  ;;  %v5408_v38 = vld [vmem:[%s11201_s23 + $0x1c8] sm:$0xff] (%p13393_p7)  ;;  %v5410_v39 = vld [vmem:[%s11201_s23 + $0x1d0] sm:$0xff] (%p13393_p7) }
 0x2ac   : > { %6886 = vst.msk [vmem:[%s11201_s23 + $0xbe0] sm:$0xff] %vm355_vm0, %v4453_v21  ;;  %5407 = vst [vmem:[%s12603_s13 + $0x340] sm:$0xff] (%p13393_p7), %v5406_v42  ;;  %v5412_v21 = vld [vmem:[%s11201_s23 + $0x1d8] sm:$0xff] (%p13393_p7)  ;;  %v5534_v42 = vld [vmem:[%s11201_s23 + $0x3c0] sm:$0xff] (%p13393_p7) }
 0x2ad   : > { %v8949_v35 = vpop.f32.mrb[190].mxu0  ;;  %5409 = vst [vmem:[%s12603_s13 + $0x348] sm:$0xff] (%p13393_p7), %v5408_v38  ;;  %5411 = vst [vmem:[%s12603_s13 + $0x350] sm:$0xff] (%p13393_p7), %v5410_v39  ;;  %v5532_v19 = vld [vmem:[%s11201_s23 + $0x3b8] sm:$0xff] (%p13393_p7)  ;;  %v5536_v38 = vld [vmem:[%s11201_s23 + $0x3c8] sm:$0xff] (%p13393_p7) }
 0x2ae   : > { %6857 = vst.msk [vmem:[%s11201_s23 + $0xb78] sm:$0xff] %vm355_vm0, %v8949_v35  ;;  %v9005_v45 = vpop.f32.mrb[190].mxu1  ;;  %v4284_v40 = vpop.f32.mrb[191].mxu0  ;;  %5413 = vst [vmem:[%s12603_s13 + $0x358] sm:$0xff] (%p13393_p7), %v5412_v21  ;;  %v5414_v35 = vld [vmem:[%s11201_s23 + $0x1e0] sm:$0xff] (%p13393_p7)  ;;  %v5538_v39 = vld [vmem:[%s11201_s23 + $0x3d0] sm:$0xff] (%p13393_p7) }
 0x2af   : > { %6889 = vst.msk [vmem:[%s11201_s23 + $0xbf8] sm:$0xff] %vm355_vm0, %v9005_v45  ;;  %6856 = vst.msk [vmem:[%s11201_s23 + $0xb70] sm:$0xff] %vm355_vm0, %v4284_v40  ;;  %v4463_v50 = vpop.f32.mrb[191].mxu1  ;;  %v5416_v45 = vld [vmem:[%s11201_s23 + $0x1e8] sm:$0xff] (%p13393_p7)  ;;  %v5418_v40 = vld [vmem:[%s11201_s23 + $0x1f0] sm:$0xff] (%p13393_p7) }
 0x2b0   : > { %6888 = vst.msk [vmem:[%s11201_s23 + $0xbf0] sm:$0xff] %vm355_vm0, %v4463_v50  ;;  %5415 = vst [vmem:[%s12603_s13 + $0x360] sm:$0xff] (%p13393_p7), %v5414_v35  ;;  %v5420_v50 = vld [vmem:[%s11201_s23 + $0x1f8] sm:$0xff] (%p13393_p7)  ;;  %v5542_v35 = vld [vmem:[%s11201_s23 + $0x3e0] sm:$0xff] (%p13393_p7) }
 0x2b1   : > { %5417 = vst [vmem:[%s12603_s13 + $0x368] sm:$0xff] %v5416_v45  ;;  %5419 = vst [vmem:[%s12603_s13 + $0x370] sm:$0xff] %v5418_v40  ;;  %v5540_v21 = vld [vmem:[%s11201_s23 + $0x3d8] sm:$0xff]  ;;  %v5544_v45 = vld [vmem:[%s11201_s23 + $0x3e8] sm:$0xff] }
 0x2b2   : > { %5421 = vst [vmem:[%s12603_s13 + $0x378] sm:$0xff] %v5420_v50  ;;  %5423 = vst [vmem:[%s12603_s13 + $0x400] sm:$0xff] %v5422_v27  ;;  %v5546_v40 = vld [vmem:[%s11201_s23 + $0x3f0] sm:$0xff]  ;;  %v5548_v50 = vld [vmem:[%s11201_s23 + $0x3f8] sm:$0xff] }
 0x2b3   : > { %5425 = vst [vmem:[%s12603_s13 + $0x408] sm:$0xff] %v5424_v44  ;;  %5427 = vst [vmem:[%s12603_s13 + $0x410] sm:$0xff] %v5426_v46  ;;  %v5550_v27 = vld [vmem:[%s11201_s23 + $0x400] sm:$0xff]  ;;  %v5552_v44 = vld [vmem:[%s11201_s23 + $0x408] sm:$0xff] }
 0x2b4   : > { %5429 = vst [vmem:[%s12603_s13 + $0x418] sm:$0xff] %v5428_v48  ;;  %5431 = vst [vmem:[%s12603_s13 + $0x420] sm:$0xff] %v5430_v29  ;;  %v5554_v46 = vld [vmem:[%s11201_s23 + $0x410] sm:$0xff]  ;;  %v5556_v48 = vld [vmem:[%s11201_s23 + $0x418] sm:$0xff] }
 0x2b5   : > { %5433 = vst [vmem:[%s12603_s13 + $0x428] sm:$0xff] %v5432_v43  ;;  %5435 = vst [vmem:[%s12603_s13 + $0x430] sm:$0xff] %v5434_v51  ;;  %v5558_v29 = vld [vmem:[%s11201_s23 + $0x420] sm:$0xff]  ;;  %v5560_v43 = vld [vmem:[%s11201_s23 + $0x428] sm:$0xff] }
 0x2b6   : > { %5437 = vst [vmem:[%s12603_s13 + $0x438] sm:$0xff] %v5436_v53  ;;  %5439 = vst [vmem:[%s12603_s13 + $0x440] sm:$0xff] %v5438_v54  ;;  %v5562_v51 = vld [vmem:[%s11201_s23 + $0x430] sm:$0xff]  ;;  %v5564_v53 = vld [vmem:[%s11201_s23 + $0x438] sm:$0xff] }
 0x2b7   : > { %5441 = vst [vmem:[%s12603_s13 + $0x448] sm:$0xff] %v5440_v55  ;;  %5443 = vst [vmem:[%s12603_s13 + $0x450] sm:$0xff] %v5442_v49  ;;  %v5566_v54 = vld [vmem:[%s11201_s23 + $0x440] sm:$0xff]  ;;  %v5568_v55 = vld [vmem:[%s11201_s23 + $0x448] sm:$0xff] }
 0x2b8   : > { %5445 = vst [vmem:[%s12603_s13 + $0x458] sm:$0xff] %v5444_v56  ;;  %5447 = vst [vmem:[%s12603_s13 + $0x460] sm:$0xff] %v5446_v58  ;;  %v5570_v49 = vld [vmem:[%s11201_s23 + $0x450] sm:$0xff]  ;;  %v5572_v56 = vld [vmem:[%s11201_s23 + $0x458] sm:$0xff] }
 0x2b9   : > { %5449 = vst [vmem:[%s12603_s13 + $0x468] sm:$0xff] %v5448_v62  ;;  %5451 = vst [vmem:[%s12603_s13 + $0x470] sm:$0xff] %v5450_v0  ;;  %v5574_v58 = vld [vmem:[%s11201_s23 + $0x460] sm:$0xff]  ;;  %v5576_v62 = vld [vmem:[%s11201_s23 + $0x468] sm:$0xff] }
 0x2ba   : > { %5453 = vst [vmem:[%s12603_s13 + $0x478] sm:$0xff] %v5452_v26  ;;  %5455 = vst [vmem:[%s12603_s13 + $0x500] sm:$0xff] %v5454_v2  ;;  %v5578_v0 = vld [vmem:[%s11201_s23 + $0x470] sm:$0xff]  ;;  %v5580_v26 = vld [vmem:[%s11201_s23 + $0x478] sm:$0xff] }
 0x2bb   : > { %5457 = vst [vmem:[%s12603_s13 + $0x508] sm:$0xff] %v5456_v3  ;;  %5459 = vst [vmem:[%s12603_s13 + $0x510] sm:$0xff] %v5458_v57  ;;  %v5582_v2 = vld [vmem:[%s11201_s23 + $0x480] sm:$0xff]  ;;  %v5584_v3 = vld [vmem:[%s11201_s23 + $0x488] sm:$0xff] }
 0x2bc   : > { %5461 = vst [vmem:[%s12603_s13 + $0x518] sm:$0xff] %v5460_v52  ;;  %5463 = vst [vmem:[%s12603_s13 + $0x520] sm:$0xff] %v5462_v6  ;;  %v5586_v57 = vld [vmem:[%s11201_s23 + $0x490] sm:$0xff]  ;;  %v5588_v52 = vld [vmem:[%s11201_s23 + $0x498] sm:$0xff] }
 0x2bd   : > { %5465 = vst [vmem:[%s12603_s13 + $0x528] sm:$0xff] %v5464_v59  ;;  %5467 = vst [vmem:[%s12603_s13 + $0x530] sm:$0xff] %v5466_v7  ;;  %v5590_v6 = vld [vmem:[%s11201_s23 + $0x4a0] sm:$0xff]  ;;  %v5592_v59 = vld [vmem:[%s11201_s23 + $0x4a8] sm:$0xff] }
 0x2be   : > { %5469 = vst [vmem:[%s12603_s13 + $0x538] sm:$0xff] %v5468_v10  ;;  %5471 = vst [vmem:[%s12603_s13 + $0x540] sm:$0xff] %v5470_v12  ;;  %v5594_v7 = vld [vmem:[%s11201_s23 + $0x4b0] sm:$0xff]  ;;  %v5596_v10 = vld [vmem:[%s11201_s23 + $0x4b8] sm:$0xff] }
 0x2bf   : > { %5473 = vst [vmem:[%s12603_s13 + $0x548] sm:$0xff] %v5472_v8  ;;  %5475 = vst [vmem:[%s12603_s13 + $0x550] sm:$0xff] %v5474_v63  ;;  %v5598_v12 = vld [vmem:[%s11201_s23 + $0x4c0] sm:$0xff]  ;;  %v5600_v8 = vld [vmem:[%s11201_s23 + $0x4c8] sm:$0xff] }
 0x2c0   : > { %5477 = vst [vmem:[%s12603_s13 + $0x558] sm:$0xff] %v5476_v20  ;;  %5479 = vst [vmem:[%s12603_s13 + $0x560] sm:$0xff] %v5478_v30  ;;  %v5602_v63 = vld [vmem:[%s11201_s23 + $0x4d0] sm:$0xff]  ;;  %v5604_v20 = vld [vmem:[%s11201_s23 + $0x4d8] sm:$0xff] }
 0x2c1   : > { %5481 = vst [vmem:[%s12603_s13 + $0x568] sm:$0xff] %v5480_v11  ;;  %5483 = vst [vmem:[%s12603_s13 + $0x570] sm:$0xff] %v5482_v13  ;;  %v5606_v30 = vld [vmem:[%s11201_s23 + $0x4e0] sm:$0xff]  ;;  %v5608_v11 = vld [vmem:[%s11201_s23 + $0x4e8] sm:$0xff] }
 0x2c2   : > { %5485 = vst [vmem:[%s12603_s13 + $0x578] sm:$0xff] %v5484_v33  ;;  %5487 = vst [vmem:[%s12603_s13 + $0x600] sm:$0xff] %v5486_v41  ;;  %v5610_v13 = vld [vmem:[%s11201_s23 + $0x4f0] sm:$0xff]  ;;  %v5612_v33 = vld [vmem:[%s11201_s23 + $0x4f8] sm:$0xff] }
 0x2c3   : > { %5489 = vst [vmem:[%s12603_s13 + $0x608] sm:$0xff] %v5488_v5  ;;  %5491 = vst [vmem:[%s12603_s13 + $0x610] sm:$0xff] %v5490_v9  ;;  %v5614_v41 = vld [vmem:[%s11201_s23 + $0x500] sm:$0xff]  ;;  %v5616_v5 = vld [vmem:[%s11201_s23 + $0x508] sm:$0xff] }
 0x2c4   : > { %5493 = vst [vmem:[%s12603_s13 + $0x618] sm:$0xff] %v5492_v47  ;;  %5495 = vst [vmem:[%s12603_s13 + $0x620] sm:$0xff] %v5494_v37  ;;  %v5618_v9 = vld [vmem:[%s11201_s23 + $0x510] sm:$0xff]  ;;  %v5620_v47 = vld [vmem:[%s11201_s23 + $0x518] sm:$0xff] }
 0x2c5   : > { %5497 = vst [vmem:[%s12603_s13 + $0x628] sm:$0xff] %v5496_v15  ;;  %5499 = vst [vmem:[%s12603_s13 + $0x630] sm:$0xff] %v5498_v16  ;;  %v5622_v37 = vld [vmem:[%s11201_s23 + $0x520] sm:$0xff]  ;;  %v5624_v15 = vld [vmem:[%s11201_s23 + $0x528] sm:$0xff] }
 0x2c6   : > { %5501 = vst [vmem:[%s12603_s13 + $0x638] sm:$0xff] %v5500_v36  ;;  %5503 = vst [vmem:[%s12603_s13 + $0x640] sm:$0xff] %v5502_v61  ;;  %v5626_v16 = vld [vmem:[%s11201_s23 + $0x530] sm:$0xff]  ;;  %v5628_v36 = vld [vmem:[%s11201_s23 + $0x538] sm:$0xff] }
 0x2c7   : > { %5505 = vst [vmem:[%s12603_s13 + $0x648] sm:$0xff] %v5504_v18  ;;  %5507 = vst [vmem:[%s12603_s13 + $0x650] sm:$0xff] %v5506_v17  ;;  %v5630_v61 = vld [vmem:[%s11201_s23 + $0x540] sm:$0xff]  ;;  %v5632_v18 = vld [vmem:[%s11201_s23 + $0x548] sm:$0xff] }
 0x2c8   : > { %5509 = vst [vmem:[%s12603_s13 + $0x658] sm:$0xff] %v5508_v1  ;;  %5511 = vst [vmem:[%s12603_s13 + $0x660] sm:$0xff] %v5510_v60  ;;  %v5634_v17 = vld [vmem:[%s11201_s23 + $0x550] sm:$0xff]  ;;  %v5636_v1 = vld [vmem:[%s11201_s23 + $0x558] sm:$0xff] }
 0x2c9   : > { %5513 = vst [vmem:[%s12603_s13 + $0x668] sm:$0xff] %v5512_v22  ;;  %5515 = vst [vmem:[%s12603_s13 + $0x670] sm:$0xff] %v5514_v4  ;;  %v5638_v60 = vld [vmem:[%s11201_s23 + $0x560] sm:$0xff]  ;;  %v5640_v22 = vld [vmem:[%s11201_s23 + $0x568] sm:$0xff] }
 0x2ca   : > { %5517 = vst [vmem:[%s12603_s13 + $0x678] sm:$0xff] %v5516_v24  ;;  %5519 = vst [vmem:[%s12603_s13 + $0x700] sm:$0xff] %v5518_v23  ;;  %v5642_v4 = vld [vmem:[%s11201_s23 + $0x570] sm:$0xff]  ;;  %v5644_v24 = vld [vmem:[%s11201_s23 + $0x578] sm:$0xff] }
 0x2cb   : > { %5521 = vst [vmem:[%s12603_s13 + $0x708] sm:$0xff] %v5520_v25  ;;  %5523 = vst [vmem:[%s12603_s13 + $0x710] sm:$0xff] %v5522_v28  ;;  %v5646_v23 = vld [vmem:[%s11201_s23 + $0x580] sm:$0xff]  ;;  %v5648_v25 = vld [vmem:[%s11201_s23 + $0x588] sm:$0xff] }
 0x2cc   : > { %5525 = vst [vmem:[%s12603_s13 + $0x718] sm:$0xff] %v5524_v14  ;;  %5527 = vst [vmem:[%s12603_s13 + $0x720] sm:$0xff] %v5526_v31  ;;  %v5650_v28 = vld [vmem:[%s11201_s23 + $0x590] sm:$0xff]  ;;  %v5652_v14 = vld [vmem:[%s11201_s23 + $0x598] sm:$0xff] }
 0x2cd   : > { %5529 = vst [vmem:[%s12603_s13 + $0x728] sm:$0xff] %v5528_v34  ;;  %5531 = vst [vmem:[%s12603_s13 + $0x730] sm:$0xff] %v5530_v32  ;;  %v5654_v31 = vld [vmem:[%s11201_s23 + $0x5a0] sm:$0xff]  ;;  %v5656_v34 = vld [vmem:[%s11201_s23 + $0x5a8] sm:$0xff] }
 0x2ce   : > { %5533 = vst [vmem:[%s12603_s13 + $0x738] sm:$0xff] %v5532_v19  ;;  %5535 = vst [vmem:[%s12603_s13 + $0x740] sm:$0xff] %v5534_v42  ;;  %v5658_v32 = vld [vmem:[%s11201_s23 + $0x5b0] sm:$0xff]  ;;  %v5660_v19 = vld [vmem:[%s11201_s23 + $0x5b8] sm:$0xff] }
 0x2cf   : > { %5537 = vst [vmem:[%s12603_s13 + $0x748] sm:$0xff] %v5536_v38  ;;  %5539 = vst [vmem:[%s12603_s13 + $0x750] sm:$0xff] %v5538_v39  ;;  %v5662_v42 = vld [vmem:[%s11201_s23 + $0x5c0] sm:$0xff]  ;;  %v5664_v38 = vld [vmem:[%s11201_s23 + $0x5c8] sm:$0xff] }
 0x2d0   : > { %5541 = vst [vmem:[%s12603_s13 + $0x758] sm:$0xff] %v5540_v21  ;;  %5543 = vst [vmem:[%s12603_s13 + $0x760] sm:$0xff] %v5542_v35  ;;  %v5666_v39 = vld [vmem:[%s11201_s23 + $0x5d0] sm:$0xff]  ;;  %v5668_v21 = vld [vmem:[%s11201_s23 + $0x5d8] sm:$0xff] }
 0x2d1   : > { %5545 = vst [vmem:[%s12603_s13 + $0x768] sm:$0xff] %v5544_v45  ;;  %5547 = vst [vmem:[%s12603_s13 + $0x770] sm:$0xff] %v5546_v40  ;;  %v5670_v35 = vld [vmem:[%s11201_s23 + $0x5e0] sm:$0xff]  ;;  %v5672_v45 = vld [vmem:[%s11201_s23 + $0x5e8] sm:$0xff] }
 0x2d2   : > { %5549 = vst [vmem:[%s12603_s13 + $0x778] sm:$0xff] %v5548_v50  ;;  %5551 = vst [vmem:[%s12603_s13 + $0x800] sm:$0xff] %v5550_v27  ;;  %v5674_v40 = vld [vmem:[%s11201_s23 + $0x5f0] sm:$0xff]  ;;  %v5676_v50 = vld [vmem:[%s11201_s23 + $0x5f8] sm:$0xff] }
 0x2d3   : > { %5553 = vst [vmem:[%s12603_s13 + $0x808] sm:$0xff] %v5552_v44  ;;  %5555 = vst [vmem:[%s12603_s13 + $0x810] sm:$0xff] %v5554_v46  ;;  %v5678_v27 = vld [vmem:[%s11201_s23 + $0x600] sm:$0xff]  ;;  %v5680_v44 = vld [vmem:[%s11201_s23 + $0x608] sm:$0xff] }
 0x2d4   : > { %5557 = vst [vmem:[%s12603_s13 + $0x818] sm:$0xff] %v5556_v48  ;;  %5559 = vst [vmem:[%s12603_s13 + $0x820] sm:$0xff] %v5558_v29  ;;  %v5682_v46 = vld [vmem:[%s11201_s23 + $0x610] sm:$0xff]  ;;  %v5684_v48 = vld [vmem:[%s11201_s23 + $0x618] sm:$0xff] }
 0x2d5   : > { %5561 = vst [vmem:[%s12603_s13 + $0x828] sm:$0xff] %v5560_v43  ;;  %5563 = vst [vmem:[%s12603_s13 + $0x830] sm:$0xff] %v5562_v51  ;;  %v5686_v29 = vld [vmem:[%s11201_s23 + $0x620] sm:$0xff]  ;;  %v5688_v43 = vld [vmem:[%s11201_s23 + $0x628] sm:$0xff] }
 0x2d6   : > { %5565 = vst [vmem:[%s12603_s13 + $0x838] sm:$0xff] %v5564_v53  ;;  %5567 = vst [vmem:[%s12603_s13 + $0x840] sm:$0xff] %v5566_v54  ;;  %v5690_v51 = vld [vmem:[%s11201_s23 + $0x630] sm:$0xff]  ;;  %v5692_v53 = vld [vmem:[%s11201_s23 + $0x638] sm:$0xff] }
 0x2d7   : > { %5569 = vst [vmem:[%s12603_s13 + $0x848] sm:$0xff] %v5568_v55  ;;  %5571 = vst [vmem:[%s12603_s13 + $0x850] sm:$0xff] %v5570_v49  ;;  %v5694_v54 = vld [vmem:[%s11201_s23 + $0x640] sm:$0xff]  ;;  %v5696_v55 = vld [vmem:[%s11201_s23 + $0x648] sm:$0xff] }
 0x2d8   : > { %5573 = vst [vmem:[%s12603_s13 + $0x858] sm:$0xff] %v5572_v56  ;;  %5575 = vst [vmem:[%s12603_s13 + $0x860] sm:$0xff] %v5574_v58  ;;  %v5698_v49 = vld [vmem:[%s11201_s23 + $0x650] sm:$0xff]  ;;  %v5700_v56 = vld [vmem:[%s11201_s23 + $0x658] sm:$0xff] }
 0x2d9   : > { %5577 = vst [vmem:[%s12603_s13 + $0x868] sm:$0xff] %v5576_v62  ;;  %5579 = vst [vmem:[%s12603_s13 + $0x870] sm:$0xff] %v5578_v0  ;;  %v5702_v58 = vld [vmem:[%s11201_s23 + $0x660] sm:$0xff]  ;;  %v5704_v62 = vld [vmem:[%s11201_s23 + $0x668] sm:$0xff] }
 0x2da   : > { %5581 = vst [vmem:[%s12603_s13 + $0x878] sm:$0xff] %v5580_v26  ;;  %5583 = vst [vmem:[%s12603_s13 + $0x900] sm:$0xff] %v5582_v2  ;;  %v5706_v0 = vld [vmem:[%s11201_s23 + $0x670] sm:$0xff]  ;;  %v5708_v26 = vld [vmem:[%s11201_s23 + $0x678] sm:$0xff] }
 0x2db   : > { %5585 = vst [vmem:[%s12603_s13 + $0x908] sm:$0xff] %v5584_v3  ;;  %5587 = vst [vmem:[%s12603_s13 + $0x910] sm:$0xff] %v5586_v57  ;;  %v5710_v2 = vld [vmem:[%s11201_s23 + $0x680] sm:$0xff]  ;;  %v5712_v3 = vld [vmem:[%s11201_s23 + $0x688] sm:$0xff] }
 0x2dc   : > { %5589 = vst [vmem:[%s12603_s13 + $0x918] sm:$0xff] %v5588_v52  ;;  %5591 = vst [vmem:[%s12603_s13 + $0x920] sm:$0xff] %v5590_v6  ;;  %v5714_v57 = vld [vmem:[%s11201_s23 + $0x690] sm:$0xff]  ;;  %v5716_v52 = vld [vmem:[%s11201_s23 + $0x698] sm:$0xff] }
 0x2dd   : > { %5593 = vst [vmem:[%s12603_s13 + $0x928] sm:$0xff] %v5592_v59  ;;  %5595 = vst [vmem:[%s12603_s13 + $0x930] sm:$0xff] %v5594_v7  ;;  %v5718_v6 = vld [vmem:[%s11201_s23 + $0x6a0] sm:$0xff]  ;;  %v5720_v59 = vld [vmem:[%s11201_s23 + $0x6a8] sm:$0xff] }
 0x2de   : > { %5597 = vst [vmem:[%s12603_s13 + $0x938] sm:$0xff] %v5596_v10  ;;  %5599 = vst [vmem:[%s12603_s13 + $0x940] sm:$0xff] %v5598_v12  ;;  %v5722_v7 = vld [vmem:[%s11201_s23 + $0x6b0] sm:$0xff]  ;;  %v5724_v10 = vld [vmem:[%s11201_s23 + $0x6b8] sm:$0xff] }
 0x2df   : > { %5601 = vst [vmem:[%s12603_s13 + $0x948] sm:$0xff] %v5600_v8  ;;  %5603 = vst [vmem:[%s12603_s13 + $0x950] sm:$0xff] %v5602_v63  ;;  %v5726_v12 = vld [vmem:[%s11201_s23 + $0x6c0] sm:$0xff]  ;;  %v5728_v8 = vld [vmem:[%s11201_s23 + $0x6c8] sm:$0xff] }
 0x2e0   : > { %5605 = vst [vmem:[%s12603_s13 + $0x958] sm:$0xff] %v5604_v20  ;;  %5607 = vst [vmem:[%s12603_s13 + $0x960] sm:$0xff] %v5606_v30  ;;  %v5730_v63 = vld [vmem:[%s11201_s23 + $0x6d0] sm:$0xff]  ;;  %v5732_v20 = vld [vmem:[%s11201_s23 + $0x6d8] sm:$0xff] }
 0x2e1   : > { %5609 = vst [vmem:[%s12603_s13 + $0x968] sm:$0xff] %v5608_v11  ;;  %5611 = vst [vmem:[%s12603_s13 + $0x970] sm:$0xff] %v5610_v13  ;;  %v5734_v30 = vld [vmem:[%s11201_s23 + $0x6e0] sm:$0xff]  ;;  %v5736_v11 = vld [vmem:[%s11201_s23 + $0x6e8] sm:$0xff] }
 0x2e2   : > { %5613 = vst [vmem:[%s12603_s13 + $0x978] sm:$0xff] %v5612_v33  ;;  %5615 = vst [vmem:[%s12603_s13 + $0xa00] sm:$0xff] %v5614_v41  ;;  %v5738_v13 = vld [vmem:[%s11201_s23 + $0x6f0] sm:$0xff]  ;;  %v5740_v33 = vld [vmem:[%s11201_s23 + $0x6f8] sm:$0xff] }
 0x2e3   : > { %5617 = vst [vmem:[%s12603_s13 + $0xa08] sm:$0xff] %v5616_v5  ;;  %5619 = vst [vmem:[%s12603_s13 + $0xa10] sm:$0xff] %v5618_v9  ;;  %v5742_v41 = vld [vmem:[%s11201_s23 + $0x700] sm:$0xff]  ;;  %v5744_v5 = vld [vmem:[%s11201_s23 + $0x708] sm:$0xff] }
 0x2e4   : > { %5621 = vst [vmem:[%s12603_s13 + $0xa18] sm:$0xff] %v5620_v47  ;;  %5623 = vst [vmem:[%s12603_s13 + $0xa20] sm:$0xff] %v5622_v37  ;;  %v5746_v9 = vld [vmem:[%s11201_s23 + $0x710] sm:$0xff]  ;;  %v5748_v47 = vld [vmem:[%s11201_s23 + $0x718] sm:$0xff] }
 0x2e5   : > { %5625 = vst [vmem:[%s12603_s13 + $0xa28] sm:$0xff] %v5624_v15  ;;  %5627 = vst [vmem:[%s12603_s13 + $0xa30] sm:$0xff] %v5626_v16  ;;  %v5750_v37 = vld [vmem:[%s11201_s23 + $0x720] sm:$0xff]  ;;  %v5752_v15 = vld [vmem:[%s11201_s23 + $0x728] sm:$0xff] }
 0x2e6   : > { %5629 = vst [vmem:[%s12603_s13 + $0xa38] sm:$0xff] %v5628_v36  ;;  %5631 = vst [vmem:[%s12603_s13 + $0xa40] sm:$0xff] %v5630_v61  ;;  %v5754_v16 = vld [vmem:[%s11201_s23 + $0x730] sm:$0xff]  ;;  %v5756_v36 = vld [vmem:[%s11201_s23 + $0x738] sm:$0xff] }
 0x2e7   : > { %5633 = vst [vmem:[%s12603_s13 + $0xa48] sm:$0xff] %v5632_v18  ;;  %5635 = vst [vmem:[%s12603_s13 + $0xa50] sm:$0xff] %v5634_v17  ;;  %v5758_v61 = vld [vmem:[%s11201_s23 + $0x740] sm:$0xff]  ;;  %v5760_v18 = vld [vmem:[%s11201_s23 + $0x748] sm:$0xff] }
 0x2e8   : > { %5637 = vst [vmem:[%s12603_s13 + $0xa58] sm:$0xff] %v5636_v1  ;;  %5639 = vst [vmem:[%s12603_s13 + $0xa60] sm:$0xff] %v5638_v60  ;;  %v5762_v17 = vld [vmem:[%s11201_s23 + $0x750] sm:$0xff]  ;;  %v5764_v1 = vld [vmem:[%s11201_s23 + $0x758] sm:$0xff] }
 0x2e9   : > { %5641 = vst [vmem:[%s12603_s13 + $0xa68] sm:$0xff] %v5640_v22  ;;  %5643 = vst [vmem:[%s12603_s13 + $0xa70] sm:$0xff] %v5642_v4  ;;  %v5766_v60 = vld [vmem:[%s11201_s23 + $0x760] sm:$0xff]  ;;  %v5768_v22 = vld [vmem:[%s11201_s23 + $0x768] sm:$0xff] }
 0x2ea   : > { %5645 = vst [vmem:[%s12603_s13 + $0xa78] sm:$0xff] %v5644_v24  ;;  %5647 = vst [vmem:[%s12603_s13 + $0xb00] sm:$0xff] %v5646_v23  ;;  %v5770_v4 = vld [vmem:[%s11201_s23 + $0x770] sm:$0xff]  ;;  %v5772_v24 = vld [vmem:[%s11201_s23 + $0x778] sm:$0xff] }
 0x2eb   : > { %5649 = vst [vmem:[%s12603_s13 + $0xb08] sm:$0xff] %v5648_v25  ;;  %5651 = vst [vmem:[%s12603_s13 + $0xb10] sm:$0xff] %v5650_v28  ;;  %v5774_v23 = vld [vmem:[%s11201_s23 + $0x780] sm:$0xff]  ;;  %v5776_v25 = vld [vmem:[%s11201_s23 + $0x788] sm:$0xff] }
 0x2ec   : > { %5653 = vst [vmem:[%s12603_s13 + $0xb18] sm:$0xff] %v5652_v14  ;;  %5655 = vst [vmem:[%s12603_s13 + $0xb20] sm:$0xff] %v5654_v31  ;;  %v5778_v28 = vld [vmem:[%s11201_s23 + $0x790] sm:$0xff]  ;;  %v5780_v14 = vld [vmem:[%s11201_s23 + $0x798] sm:$0xff] }
 0x2ed   : > { %5657 = vst [vmem:[%s12603_s13 + $0xb28] sm:$0xff] %v5656_v34  ;;  %5659 = vst [vmem:[%s12603_s13 + $0xb30] sm:$0xff] %v5658_v32  ;;  %v5782_v31 = vld [vmem:[%s11201_s23 + $0x7a0] sm:$0xff]  ;;  %v5784_v34 = vld [vmem:[%s11201_s23 + $0x7a8] sm:$0xff] }
 0x2ee   : > { %5661 = vst [vmem:[%s12603_s13 + $0xb38] sm:$0xff] %v5660_v19  ;;  %5663 = vst [vmem:[%s12603_s13 + $0xb40] sm:$0xff] %v5662_v42  ;;  %v5786_v32 = vld [vmem:[%s11201_s23 + $0x7b0] sm:$0xff]  ;;  %v5788_v19 = vld [vmem:[%s11201_s23 + $0x7b8] sm:$0xff] }
 0x2ef   : > { %5665 = vst [vmem:[%s12603_s13 + $0xb48] sm:$0xff] %v5664_v38  ;;  %5667 = vst [vmem:[%s12603_s13 + $0xb50] sm:$0xff] %v5666_v39  ;;  %v5790_v42 = vld [vmem:[%s11201_s23 + $0x7c0] sm:$0xff]  ;;  %v5792_v38 = vld [vmem:[%s11201_s23 + $0x7c8] sm:$0xff] }
 0x2f0   : > { %5669 = vst [vmem:[%s12603_s13 + $0xb58] sm:$0xff] %v5668_v21  ;;  %5671 = vst [vmem:[%s12603_s13 + $0xb60] sm:$0xff] %v5670_v35  ;;  %v5794_v39 = vld [vmem:[%s11201_s23 + $0x7d0] sm:$0xff]  ;;  %v5796_v21 = vld [vmem:[%s11201_s23 + $0x7d8] sm:$0xff] }
 0x2f1   : > { %5673 = vst [vmem:[%s12603_s13 + $0xb68] sm:$0xff] %v5672_v45  ;;  %5675 = vst [vmem:[%s12603_s13 + $0xb70] sm:$0xff] %v5674_v40  ;;  %v5798_v35 = vld [vmem:[%s11201_s23 + $0x7e0] sm:$0xff]  ;;  %v5800_v45 = vld [vmem:[%s11201_s23 + $0x7e8] sm:$0xff] }
 0x2f2   : > { %5677 = vst [vmem:[%s12603_s13 + $0xb78] sm:$0xff] %v5676_v50  ;;  %5679 = vst [vmem:[%s12603_s13 + $0xc00] sm:$0xff] %v5678_v27  ;;  %v5802_v40 = vld [vmem:[%s11201_s23 + $0x7f0] sm:$0xff]  ;;  %v5804_v50 = vld [vmem:[%s11201_s23 + $0x7f8] sm:$0xff] }
 0x2f3   : > { %5681 = vst [vmem:[%s12603_s13 + $0xc08] sm:$0xff] %v5680_v44  ;;  %5683 = vst [vmem:[%s12603_s13 + $0xc10] sm:$0xff] %v5682_v46  ;;  %v5806_v27 = vld [vmem:[%s11201_s23 + $0x800] sm:$0xff]  ;;  %v5808_v44 = vld [vmem:[%s11201_s23 + $0x808] sm:$0xff] }
 0x2f4   : > { %5685 = vst [vmem:[%s12603_s13 + $0xc18] sm:$0xff] %v5684_v48  ;;  %5687 = vst [vmem:[%s12603_s13 + $0xc20] sm:$0xff] %v5686_v29  ;;  %v5810_v46 = vld [vmem:[%s11201_s23 + $0x810] sm:$0xff]  ;;  %v5812_v48 = vld [vmem:[%s11201_s23 + $0x818] sm:$0xff] }
 0x2f5   : > { %5689 = vst [vmem:[%s12603_s13 + $0xc28] sm:$0xff] %v5688_v43  ;;  %5691 = vst [vmem:[%s12603_s13 + $0xc30] sm:$0xff] %v5690_v51  ;;  %v5814_v29 = vld [vmem:[%s11201_s23 + $0x820] sm:$0xff]  ;;  %v5816_v43 = vld [vmem:[%s11201_s23 + $0x828] sm:$0xff] }
 0x2f6   : > { %5693 = vst [vmem:[%s12603_s13 + $0xc38] sm:$0xff] %v5692_v53  ;;  %5695 = vst [vmem:[%s12603_s13 + $0xc40] sm:$0xff] %v5694_v54  ;;  %v5818_v51 = vld [vmem:[%s11201_s23 + $0x830] sm:$0xff]  ;;  %v5820_v53 = vld [vmem:[%s11201_s23 + $0x838] sm:$0xff] }
 0x2f7   : > { %5697 = vst [vmem:[%s12603_s13 + $0xc48] sm:$0xff] %v5696_v55  ;;  %5699 = vst [vmem:[%s12603_s13 + $0xc50] sm:$0xff] %v5698_v49  ;;  %v5822_v54 = vld [vmem:[%s11201_s23 + $0x840] sm:$0xff]  ;;  %v5824_v55 = vld [vmem:[%s11201_s23 + $0x848] sm:$0xff] }
 0x2f8   : > { %5701 = vst [vmem:[%s12603_s13 + $0xc58] sm:$0xff] %v5700_v56  ;;  %5703 = vst [vmem:[%s12603_s13 + $0xc60] sm:$0xff] %v5702_v58  ;;  %v5826_v49 = vld [vmem:[%s11201_s23 + $0x850] sm:$0xff]  ;;  %v5828_v56 = vld [vmem:[%s11201_s23 + $0x858] sm:$0xff] }
 0x2f9   : > { %5705 = vst [vmem:[%s12603_s13 + $0xc68] sm:$0xff] %v5704_v62  ;;  %5707 = vst [vmem:[%s12603_s13 + $0xc70] sm:$0xff] %v5706_v0  ;;  %v5830_v58 = vld [vmem:[%s11201_s23 + $0x860] sm:$0xff]  ;;  %v5832_v62 = vld [vmem:[%s11201_s23 + $0x868] sm:$0xff] }
 0x2fa   : > { %5709 = vst [vmem:[%s12603_s13 + $0xc78] sm:$0xff] %v5708_v26  ;;  %5711 = vst [vmem:[%s12603_s13 + $0xd00] sm:$0xff] %v5710_v2  ;;  %v5834_v0 = vld [vmem:[%s11201_s23 + $0x870] sm:$0xff]  ;;  %v5836_v26 = vld [vmem:[%s11201_s23 + $0x878] sm:$0xff] }
 0x2fb   : > { %5713 = vst [vmem:[%s12603_s13 + $0xd08] sm:$0xff] %v5712_v3  ;;  %5715 = vst [vmem:[%s12603_s13 + $0xd10] sm:$0xff] %v5714_v57  ;;  %v5838_v2 = vld [vmem:[%s11201_s23 + $0x880] sm:$0xff]  ;;  %v5840_v3 = vld [vmem:[%s11201_s23 + $0x888] sm:$0xff] }
 0x2fc   : > { %5717 = vst [vmem:[%s12603_s13 + $0xd18] sm:$0xff] %v5716_v52  ;;  %5719 = vst [vmem:[%s12603_s13 + $0xd20] sm:$0xff] %v5718_v6  ;;  %v5842_v57 = vld [vmem:[%s11201_s23 + $0x890] sm:$0xff]  ;;  %v5844_v52 = vld [vmem:[%s11201_s23 + $0x898] sm:$0xff] }
 0x2fd   : > { %5721 = vst [vmem:[%s12603_s13 + $0xd28] sm:$0xff] %v5720_v59  ;;  %5723 = vst [vmem:[%s12603_s13 + $0xd30] sm:$0xff] %v5722_v7  ;;  %v5846_v6 = vld [vmem:[%s11201_s23 + $0x8a0] sm:$0xff]  ;;  %v5848_v59 = vld [vmem:[%s11201_s23 + $0x8a8] sm:$0xff] }
 0x2fe   : > { %5725 = vst [vmem:[%s12603_s13 + $0xd38] sm:$0xff] %v5724_v10  ;;  %5727 = vst [vmem:[%s12603_s13 + $0xd40] sm:$0xff] %v5726_v12  ;;  %v5850_v7 = vld [vmem:[%s11201_s23 + $0x8b0] sm:$0xff]  ;;  %v5852_v10 = vld [vmem:[%s11201_s23 + $0x8b8] sm:$0xff] }
 0x2ff   : > { %5729 = vst [vmem:[%s12603_s13 + $0xd48] sm:$0xff] %v5728_v8  ;;  %5731 = vst [vmem:[%s12603_s13 + $0xd50] sm:$0xff] %v5730_v63  ;;  %v5854_v12 = vld [vmem:[%s11201_s23 + $0x8c0] sm:$0xff]  ;;  %v5856_v8 = vld [vmem:[%s11201_s23 + $0x8c8] sm:$0xff] }
 0x300   : > { %5733 = vst [vmem:[%s12603_s13 + $0xd58] sm:$0xff] %v5732_v20  ;;  %5735 = vst [vmem:[%s12603_s13 + $0xd60] sm:$0xff] %v5734_v30  ;;  %v5858_v63 = vld [vmem:[%s11201_s23 + $0x8d0] sm:$0xff]  ;;  %v5860_v20 = vld [vmem:[%s11201_s23 + $0x8d8] sm:$0xff] }
 0x301   : > { %5737 = vst [vmem:[%s12603_s13 + $0xd68] sm:$0xff] %v5736_v11  ;;  %5739 = vst [vmem:[%s12603_s13 + $0xd70] sm:$0xff] %v5738_v13  ;;  %v5862_v30 = vld [vmem:[%s11201_s23 + $0x8e0] sm:$0xff]  ;;  %v5864_v11 = vld [vmem:[%s11201_s23 + $0x8e8] sm:$0xff] }
 0x302   : > { %5741 = vst [vmem:[%s12603_s13 + $0xd78] sm:$0xff] %v5740_v33  ;;  %5743 = vst [vmem:[%s12603_s13 + $0xe00] sm:$0xff] %v5742_v41  ;;  %v5866_v13 = vld [vmem:[%s11201_s23 + $0x8f0] sm:$0xff]  ;;  %v5868_v33 = vld [vmem:[%s11201_s23 + $0x8f8] sm:$0xff] }
 0x303   : > { %5745 = vst [vmem:[%s12603_s13 + $0xe08] sm:$0xff] %v5744_v5  ;;  %5747 = vst [vmem:[%s12603_s13 + $0xe10] sm:$0xff] %v5746_v9  ;;  %v5870_v41 = vld [vmem:[%s11201_s23 + $0x900] sm:$0xff]  ;;  %v5872_v5 = vld [vmem:[%s11201_s23 + $0x908] sm:$0xff] }
 0x304   : > { %5749 = vst [vmem:[%s12603_s13 + $0xe18] sm:$0xff] %v5748_v47  ;;  %5751 = vst [vmem:[%s12603_s13 + $0xe20] sm:$0xff] %v5750_v37  ;;  %v5874_v9 = vld [vmem:[%s11201_s23 + $0x910] sm:$0xff]  ;;  %v5876_v47 = vld [vmem:[%s11201_s23 + $0x918] sm:$0xff] }
 0x305   : > { %5753 = vst [vmem:[%s12603_s13 + $0xe28] sm:$0xff] %v5752_v15  ;;  %5755 = vst [vmem:[%s12603_s13 + $0xe30] sm:$0xff] %v5754_v16  ;;  %v5878_v37 = vld [vmem:[%s11201_s23 + $0x920] sm:$0xff]  ;;  %v5880_v15 = vld [vmem:[%s11201_s23 + $0x928] sm:$0xff] }
 0x306   : > { %5757 = vst [vmem:[%s12603_s13 + $0xe38] sm:$0xff] %v5756_v36  ;;  %5759 = vst [vmem:[%s12603_s13 + $0xe40] sm:$0xff] %v5758_v61  ;;  %v5882_v16 = vld [vmem:[%s11201_s23 + $0x930] sm:$0xff]  ;;  %v5884_v36 = vld [vmem:[%s11201_s23 + $0x938] sm:$0xff] }
 0x307   : > { %5761 = vst [vmem:[%s12603_s13 + $0xe48] sm:$0xff] %v5760_v18  ;;  %5763 = vst [vmem:[%s12603_s13 + $0xe50] sm:$0xff] %v5762_v17  ;;  %v5886_v61 = vld [vmem:[%s11201_s23 + $0x940] sm:$0xff]  ;;  %v5888_v18 = vld [vmem:[%s11201_s23 + $0x948] sm:$0xff] }
 0x308   : > { %5765 = vst [vmem:[%s12603_s13 + $0xe58] sm:$0xff] %v5764_v1  ;;  %5767 = vst [vmem:[%s12603_s13 + $0xe60] sm:$0xff] %v5766_v60  ;;  %v5890_v17 = vld [vmem:[%s11201_s23 + $0x950] sm:$0xff]  ;;  %v5892_v1 = vld [vmem:[%s11201_s23 + $0x958] sm:$0xff] }
 0x309   : > { %5769 = vst [vmem:[%s12603_s13 + $0xe68] sm:$0xff] %v5768_v22  ;;  %5771 = vst [vmem:[%s12603_s13 + $0xe70] sm:$0xff] %v5770_v4  ;;  %v5894_v60 = vld [vmem:[%s11201_s23 + $0x960] sm:$0xff]  ;;  %v5896_v22 = vld [vmem:[%s11201_s23 + $0x968] sm:$0xff] }
 0x30a   : > { %5773 = vst [vmem:[%s12603_s13 + $0xe78] sm:$0xff] %v5772_v24  ;;  %5775 = vst [vmem:[%s12603_s13 + $0xf00] sm:$0xff] %v5774_v23  ;;  %v5898_v4 = vld [vmem:[%s11201_s23 + $0x970] sm:$0xff]  ;;  %v5900_v24 = vld [vmem:[%s11201_s23 + $0x978] sm:$0xff] }
 0x30b   : > { %5777 = vst [vmem:[%s12603_s13 + $0xf08] sm:$0xff] %v5776_v25  ;;  %5779 = vst [vmem:[%s12603_s13 + $0xf10] sm:$0xff] %v5778_v28  ;;  %v5902_v23 = vld [vmem:[%s11201_s23 + $0x980] sm:$0xff]  ;;  %v5904_v25 = vld [vmem:[%s11201_s23 + $0x988] sm:$0xff] }
 0x30c   : > { %5781 = vst [vmem:[%s12603_s13 + $0xf18] sm:$0xff] %v5780_v14  ;;  %5783 = vst [vmem:[%s12603_s13 + $0xf20] sm:$0xff] %v5782_v31  ;;  %v5906_v28 = vld [vmem:[%s11201_s23 + $0x990] sm:$0xff]  ;;  %v5908_v14 = vld [vmem:[%s11201_s23 + $0x998] sm:$0xff] }
 0x30d   : > { %5785 = vst [vmem:[%s12603_s13 + $0xf28] sm:$0xff] %v5784_v34  ;;  %5787 = vst [vmem:[%s12603_s13 + $0xf30] sm:$0xff] %v5786_v32  ;;  %v5910_v31 = vld [vmem:[%s11201_s23 + $0x9a0] sm:$0xff]  ;;  %v5912_v34 = vld [vmem:[%s11201_s23 + $0x9a8] sm:$0xff] }
 0x30e   : > { %5789 = vst [vmem:[%s12603_s13 + $0xf38] sm:$0xff] %v5788_v19  ;;  %5791 = vst [vmem:[%s12603_s13 + $0xf40] sm:$0xff] %v5790_v42  ;;  %v5914_v32 = vld [vmem:[%s11201_s23 + $0x9b0] sm:$0xff]  ;;  %v5916_v19 = vld [vmem:[%s11201_s23 + $0x9b8] sm:$0xff] }
 0x30f   : > { %5793 = vst [vmem:[%s12603_s13 + $0xf48] sm:$0xff] %v5792_v38  ;;  %5795 = vst [vmem:[%s12603_s13 + $0xf50] sm:$0xff] %v5794_v39  ;;  %v5918_v42 = vld [vmem:[%s11201_s23 + $0x9c0] sm:$0xff]  ;;  %v5920_v38 = vld [vmem:[%s11201_s23 + $0x9c8] sm:$0xff] }
 0x310   : > { %5797 = vst [vmem:[%s12603_s13 + $0xf58] sm:$0xff] %v5796_v21  ;;  %5799 = vst [vmem:[%s12603_s13 + $0xf60] sm:$0xff] %v5798_v35  ;;  %v5922_v39 = vld [vmem:[%s11201_s23 + $0x9d0] sm:$0xff]  ;;  %v5924_v21 = vld [vmem:[%s11201_s23 + $0x9d8] sm:$0xff] }
 0x311   : > { %5801 = vst [vmem:[%s12603_s13 + $0xf68] sm:$0xff] %v5800_v45  ;;  %5803 = vst [vmem:[%s12603_s13 + $0xf70] sm:$0xff] %v5802_v40  ;;  %v5926_v35 = vld [vmem:[%s11201_s23 + $0x9e0] sm:$0xff]  ;;  %v5928_v45 = vld [vmem:[%s11201_s23 + $0x9e8] sm:$0xff] }
 0x312   : > { %5805 = vst [vmem:[%s12603_s13 + $0xf78] sm:$0xff] %v5804_v50  ;;  %5807 = vst [vmem:[%s12603_s13 + $0x1000] sm:$0xff] %v5806_v27  ;;  %v5930_v40 = vld [vmem:[%s11201_s23 + $0x9f0] sm:$0xff]  ;;  %v5932_v50 = vld [vmem:[%s11201_s23 + $0x9f8] sm:$0xff] }
 0x313   : > { %5809 = vst [vmem:[%s12603_s13 + $0x1008] sm:$0xff] %v5808_v44  ;;  %5811 = vst [vmem:[%s12603_s13 + $0x1010] sm:$0xff] %v5810_v46  ;;  %v5934_v27 = vld [vmem:[%s11201_s23 + $0xa00] sm:$0xff]  ;;  %v5936_v44 = vld [vmem:[%s11201_s23 + $0xa08] sm:$0xff] }
 0x314   : > { %5813 = vst [vmem:[%s12603_s13 + $0x1018] sm:$0xff] %v5812_v48  ;;  %5815 = vst [vmem:[%s12603_s13 + $0x1020] sm:$0xff] %v5814_v29  ;;  %v5938_v46 = vld [vmem:[%s11201_s23 + $0xa10] sm:$0xff]  ;;  %v5940_v48 = vld [vmem:[%s11201_s23 + $0xa18] sm:$0xff] }
 0x315   : > { %5817 = vst [vmem:[%s12603_s13 + $0x1028] sm:$0xff] %v5816_v43  ;;  %5819 = vst [vmem:[%s12603_s13 + $0x1030] sm:$0xff] %v5818_v51  ;;  %v5942_v29 = vld [vmem:[%s11201_s23 + $0xa20] sm:$0xff]  ;;  %v5944_v43 = vld [vmem:[%s11201_s23 + $0xa28] sm:$0xff] }
 0x316   : > { %5821 = vst [vmem:[%s12603_s13 + $0x1038] sm:$0xff] %v5820_v53  ;;  %5823 = vst [vmem:[%s12603_s13 + $0x1040] sm:$0xff] %v5822_v54  ;;  %v5946_v51 = vld [vmem:[%s11201_s23 + $0xa30] sm:$0xff]  ;;  %v5948_v53 = vld [vmem:[%s11201_s23 + $0xa38] sm:$0xff] }
 0x317   : > { %5825 = vst [vmem:[%s12603_s13 + $0x1048] sm:$0xff] %v5824_v55  ;;  %5827 = vst [vmem:[%s12603_s13 + $0x1050] sm:$0xff] %v5826_v49  ;;  %v5950_v54 = vld [vmem:[%s11201_s23 + $0xa40] sm:$0xff]  ;;  %v5952_v55 = vld [vmem:[%s11201_s23 + $0xa48] sm:$0xff] }
 0x318   : > { %5829 = vst [vmem:[%s12603_s13 + $0x1058] sm:$0xff] %v5828_v56  ;;  %5831 = vst [vmem:[%s12603_s13 + $0x1060] sm:$0xff] %v5830_v58  ;;  %v5954_v49 = vld [vmem:[%s11201_s23 + $0xa50] sm:$0xff]  ;;  %v5956_v56 = vld [vmem:[%s11201_s23 + $0xa58] sm:$0xff] }
 0x319   : > { %5833 = vst [vmem:[%s12603_s13 + $0x1068] sm:$0xff] %v5832_v62  ;;  %5835 = vst [vmem:[%s12603_s13 + $0x1070] sm:$0xff] %v5834_v0  ;;  %v5958_v58 = vld [vmem:[%s11201_s23 + $0xa60] sm:$0xff]  ;;  %v5960_v62 = vld [vmem:[%s11201_s23 + $0xa68] sm:$0xff] }
 0x31a   : > { %5837 = vst [vmem:[%s12603_s13 + $0x1078] sm:$0xff] %v5836_v26  ;;  %5839 = vst [vmem:[%s12603_s13 + $0x1100] sm:$0xff] %v5838_v2  ;;  %v5962_v0 = vld [vmem:[%s11201_s23 + $0xa70] sm:$0xff]  ;;  %v5964_v26 = vld [vmem:[%s11201_s23 + $0xa78] sm:$0xff] }
 0x31b   : > { %5841 = vst [vmem:[%s12603_s13 + $0x1108] sm:$0xff] %v5840_v3  ;;  %5843 = vst [vmem:[%s12603_s13 + $0x1110] sm:$0xff] %v5842_v57  ;;  %v5966_v2 = vld [vmem:[%s11201_s23 + $0xa80] sm:$0xff]  ;;  %v5968_v3 = vld [vmem:[%s11201_s23 + $0xa88] sm:$0xff] }
 0x31c   : > { %5845 = vst [vmem:[%s12603_s13 + $0x1118] sm:$0xff] %v5844_v52  ;;  %5847 = vst [vmem:[%s12603_s13 + $0x1120] sm:$0xff] %v5846_v6  ;;  %v5970_v57 = vld [vmem:[%s11201_s23 + $0xa90] sm:$0xff]  ;;  %v5972_v52 = vld [vmem:[%s11201_s23 + $0xa98] sm:$0xff] }
 0x31d   : > { %5849 = vst [vmem:[%s12603_s13 + $0x1128] sm:$0xff] %v5848_v59  ;;  %5851 = vst [vmem:[%s12603_s13 + $0x1130] sm:$0xff] %v5850_v7  ;;  %v5974_v6 = vld [vmem:[%s11201_s23 + $0xaa0] sm:$0xff]  ;;  %v5976_v59 = vld [vmem:[%s11201_s23 + $0xaa8] sm:$0xff] }
 0x31e   : > { %5853 = vst [vmem:[%s12603_s13 + $0x1138] sm:$0xff] %v5852_v10  ;;  %5855 = vst [vmem:[%s12603_s13 + $0x1140] sm:$0xff] %v5854_v12  ;;  %v5978_v7 = vld [vmem:[%s11201_s23 + $0xab0] sm:$0xff]  ;;  %v5980_v10 = vld [vmem:[%s11201_s23 + $0xab8] sm:$0xff] }
 0x31f   : > { %5857 = vst [vmem:[%s12603_s13 + $0x1148] sm:$0xff] %v5856_v8  ;;  %5859 = vst [vmem:[%s12603_s13 + $0x1150] sm:$0xff] %v5858_v63  ;;  %v5982_v12 = vld [vmem:[%s11201_s23 + $0xac0] sm:$0xff]  ;;  %v5984_v8 = vld [vmem:[%s11201_s23 + $0xac8] sm:$0xff] }
 0x320   : > { %5861 = vst [vmem:[%s12603_s13 + $0x1158] sm:$0xff] %v5860_v20  ;;  %5863 = vst [vmem:[%s12603_s13 + $0x1160] sm:$0xff] %v5862_v30  ;;  %v5986_v63 = vld [vmem:[%s11201_s23 + $0xad0] sm:$0xff]  ;;  %v5988_v20 = vld [vmem:[%s11201_s23 + $0xad8] sm:$0xff] }
 0x321   : > { %5865 = vst [vmem:[%s12603_s13 + $0x1168] sm:$0xff] %v5864_v11  ;;  %5867 = vst [vmem:[%s12603_s13 + $0x1170] sm:$0xff] %v5866_v13  ;;  %v5990_v30 = vld [vmem:[%s11201_s23 + $0xae0] sm:$0xff]  ;;  %v5992_v11 = vld [vmem:[%s11201_s23 + $0xae8] sm:$0xff] }
 0x322   : > { %5869 = vst [vmem:[%s12603_s13 + $0x1178] sm:$0xff] %v5868_v33  ;;  %5871 = vst [vmem:[%s12603_s13 + $0x1200] sm:$0xff] %v5870_v41  ;;  %v5994_v13 = vld [vmem:[%s11201_s23 + $0xaf0] sm:$0xff]  ;;  %v5996_v33 = vld [vmem:[%s11201_s23 + $0xaf8] sm:$0xff] }
 0x323   : > { %5873 = vst [vmem:[%s12603_s13 + $0x1208] sm:$0xff] %v5872_v5  ;;  %5875 = vst [vmem:[%s12603_s13 + $0x1210] sm:$0xff] %v5874_v9  ;;  %v5998_v41 = vld [vmem:[%s11201_s23 + $0xb00] sm:$0xff]  ;;  %v6000_v5 = vld [vmem:[%s11201_s23 + $0xb08] sm:$0xff] }
 0x324   : > { %5877 = vst [vmem:[%s12603_s13 + $0x1218] sm:$0xff] %v5876_v47  ;;  %5879 = vst [vmem:[%s12603_s13 + $0x1220] sm:$0xff] %v5878_v37  ;;  %v6002_v9 = vld [vmem:[%s11201_s23 + $0xb10] sm:$0xff]  ;;  %v6004_v47 = vld [vmem:[%s11201_s23 + $0xb18] sm:$0xff] }
 0x325   : > { %5881 = vst [vmem:[%s12603_s13 + $0x1228] sm:$0xff] %v5880_v15  ;;  %5883 = vst [vmem:[%s12603_s13 + $0x1230] sm:$0xff] %v5882_v16  ;;  %v6006_v37 = vld [vmem:[%s11201_s23 + $0xb20] sm:$0xff]  ;;  %v6008_v15 = vld [vmem:[%s11201_s23 + $0xb28] sm:$0xff] }
 0x326   : > { %5885 = vst [vmem:[%s12603_s13 + $0x1238] sm:$0xff] %v5884_v36  ;;  %5887 = vst [vmem:[%s12603_s13 + $0x1240] sm:$0xff] %v5886_v61  ;;  %v6010_v16 = vld [vmem:[%s11201_s23 + $0xb30] sm:$0xff]  ;;  %v6012_v36 = vld [vmem:[%s11201_s23 + $0xb38] sm:$0xff] }
 0x327   : > { %5889 = vst [vmem:[%s12603_s13 + $0x1248] sm:$0xff] %v5888_v18  ;;  %5891 = vst [vmem:[%s12603_s13 + $0x1250] sm:$0xff] %v5890_v17  ;;  %v6014_v61 = vld [vmem:[%s11201_s23 + $0xb40] sm:$0xff]  ;;  %v6016_v18 = vld [vmem:[%s11201_s23 + $0xb48] sm:$0xff] }
 0x328   : > { %5893 = vst [vmem:[%s12603_s13 + $0x1258] sm:$0xff] %v5892_v1  ;;  %5895 = vst [vmem:[%s12603_s13 + $0x1260] sm:$0xff] %v5894_v60  ;;  %v6018_v17 = vld [vmem:[%s11201_s23 + $0xb50] sm:$0xff]  ;;  %v6020_v1 = vld [vmem:[%s11201_s23 + $0xb58] sm:$0xff] }
 0x329   : > { %5897 = vst [vmem:[%s12603_s13 + $0x1268] sm:$0xff] %v5896_v22  ;;  %5899 = vst [vmem:[%s12603_s13 + $0x1270] sm:$0xff] %v5898_v4  ;;  %v6022_v60 = vld [vmem:[%s11201_s23 + $0xb60] sm:$0xff]  ;;  %v6024_v22 = vld [vmem:[%s11201_s23 + $0xb68] sm:$0xff] }
 0x32a   : > { %5901 = vst [vmem:[%s12603_s13 + $0x1278] sm:$0xff] %v5900_v24  ;;  %5903 = vst [vmem:[%s12603_s13 + $0x1300] sm:$0xff] %v5902_v23  ;;  %v6026_v4 = vld [vmem:[%s11201_s23 + $0xb70] sm:$0xff]  ;;  %v6028_v24 = vld [vmem:[%s11201_s23 + $0xb78] sm:$0xff] }
 0x32b   : > { %5905 = vst [vmem:[%s12603_s13 + $0x1308] sm:$0xff] %v5904_v25  ;;  %5907 = vst [vmem:[%s12603_s13 + $0x1310] sm:$0xff] %v5906_v28  ;;  %v6030_v23 = vld [vmem:[%s11201_s23 + $0xb80] sm:$0xff]  ;;  %v6032_v25 = vld [vmem:[%s11201_s23 + $0xb88] sm:$0xff] }
 0x32c   : > { %5909 = vst [vmem:[%s12603_s13 + $0x1318] sm:$0xff] %v5908_v14  ;;  %5911 = vst [vmem:[%s12603_s13 + $0x1320] sm:$0xff] %v5910_v31  ;;  %v6034_v28 = vld [vmem:[%s11201_s23 + $0xb90] sm:$0xff]  ;;  %v6036_v14 = vld [vmem:[%s11201_s23 + $0xb98] sm:$0xff] }
 0x32d   : > { %5913 = vst [vmem:[%s12603_s13 + $0x1328] sm:$0xff] %v5912_v34  ;;  %5915 = vst [vmem:[%s12603_s13 + $0x1330] sm:$0xff] %v5914_v32  ;;  %v6038_v31 = vld [vmem:[%s11201_s23 + $0xba0] sm:$0xff]  ;;  %v6040_v34 = vld [vmem:[%s11201_s23 + $0xba8] sm:$0xff] }
 0x32e   : > { %5917 = vst [vmem:[%s12603_s13 + $0x1338] sm:$0xff] %v5916_v19  ;;  %5919 = vst [vmem:[%s12603_s13 + $0x1340] sm:$0xff] %v5918_v42  ;;  %v6042_v32 = vld [vmem:[%s11201_s23 + $0xbb0] sm:$0xff]  ;;  %v6044_v19 = vld [vmem:[%s11201_s23 + $0xbb8] sm:$0xff] }
 0x32f   : > { %5921 = vst [vmem:[%s12603_s13 + $0x1348] sm:$0xff] %v5920_v38  ;;  %5923 = vst [vmem:[%s12603_s13 + $0x1350] sm:$0xff] %v5922_v39  ;;  %v6046_v42 = vld [vmem:[%s11201_s23 + $0xbc0] sm:$0xff]  ;;  %v6048_v38 = vld [vmem:[%s11201_s23 + $0xbc8] sm:$0xff] }
 0x330   : > { %5925 = vst [vmem:[%s12603_s13 + $0x1358] sm:$0xff] %v5924_v21  ;;  %5927 = vst [vmem:[%s12603_s13 + $0x1360] sm:$0xff] %v5926_v35  ;;  %v6050_v39 = vld [vmem:[%s11201_s23 + $0xbd0] sm:$0xff]  ;;  %v6052_v21 = vld [vmem:[%s11201_s23 + $0xbd8] sm:$0xff] }
 0x331   : > { %5929 = vst [vmem:[%s12603_s13 + $0x1368] sm:$0xff] %v5928_v45  ;;  %5931 = vst [vmem:[%s12603_s13 + $0x1370] sm:$0xff] %v5930_v40  ;;  %v6054_v35 = vld [vmem:[%s11201_s23 + $0xbe0] sm:$0xff]  ;;  %v6056_v45 = vld [vmem:[%s11201_s23 + $0xbe8] sm:$0xff] }
 0x332   : > { %5933 = vst [vmem:[%s12603_s13 + $0x1378] sm:$0xff] %v5932_v50  ;;  %5935 = vst [vmem:[%s12603_s13 + $0x1400] sm:$0xff] %v5934_v27  ;;  %v6058_v40 = vld [vmem:[%s11201_s23 + $0xbf0] sm:$0xff]  ;;  %v6060_v50 = vld [vmem:[%s11201_s23 + $0xbf8] sm:$0xff] }
 0x333   : > { %5937 = vst [vmem:[%s12603_s13 + $0x1408] sm:$0xff] %v5936_v44  ;;  %5939 = vst [vmem:[%s12603_s13 + $0x1410] sm:$0xff] %v5938_v46 }
 0x334   : > { %5941 = vst [vmem:[%s12603_s13 + $0x1418] sm:$0xff] %v5940_v48  ;;  %5943 = vst [vmem:[%s12603_s13 + $0x1420] sm:$0xff] %v5942_v29 }
 0x335   : > { %5945 = vst [vmem:[%s12603_s13 + $0x1428] sm:$0xff] %v5944_v43  ;;  %5947 = vst [vmem:[%s12603_s13 + $0x1430] sm:$0xff] %v5946_v51 }
 0x336   : > { %5949 = vst [vmem:[%s12603_s13 + $0x1438] sm:$0xff] %v5948_v53  ;;  %5951 = vst [vmem:[%s12603_s13 + $0x1440] sm:$0xff] %v5950_v54 }
 0x337   : > { %5953 = vst [vmem:[%s12603_s13 + $0x1448] sm:$0xff] %v5952_v55  ;;  %5955 = vst [vmem:[%s12603_s13 + $0x1450] sm:$0xff] %v5954_v49 }
 0x338   : > { %5957 = vst [vmem:[%s12603_s13 + $0x1458] sm:$0xff] %v5956_v56  ;;  %5959 = vst [vmem:[%s12603_s13 + $0x1460] sm:$0xff] %v5958_v58 }
 0x339   : > { %5961 = vst [vmem:[%s12603_s13 + $0x1468] sm:$0xff] %v5960_v62  ;;  %5963 = vst [vmem:[%s12603_s13 + $0x1470] sm:$0xff] %v5962_v0 }
 0x33a   : > { %5965 = vst [vmem:[%s12603_s13 + $0x1478] sm:$0xff] %v5964_v26  ;;  %5967 = vst [vmem:[%s12603_s13 + $0x1500] sm:$0xff] %v5966_v2 }
 0x33b   : > { %5969 = vst [vmem:[%s12603_s13 + $0x1508] sm:$0xff] %v5968_v3  ;;  %5971 = vst [vmem:[%s12603_s13 + $0x1510] sm:$0xff] %v5970_v57 }
 0x33c   : > { %5973 = vst [vmem:[%s12603_s13 + $0x1518] sm:$0xff] %v5972_v52  ;;  %5975 = vst [vmem:[%s12603_s13 + $0x1520] sm:$0xff] %v5974_v6 }
 0x33d   : > { %5977 = vst [vmem:[%s12603_s13 + $0x1528] sm:$0xff] %v5976_v59  ;;  %5979 = vst [vmem:[%s12603_s13 + $0x1530] sm:$0xff] %v5978_v7 }
 0x33e   : > { %5981 = vst [vmem:[%s12603_s13 + $0x1538] sm:$0xff] %v5980_v10  ;;  %5983 = vst [vmem:[%s12603_s13 + $0x1540] sm:$0xff] %v5982_v12 }
 0x33f   : > { %5985 = vst [vmem:[%s12603_s13 + $0x1548] sm:$0xff] %v5984_v8  ;;  %5987 = vst [vmem:[%s12603_s13 + $0x1550] sm:$0xff] %v5986_v63 }
 0x340   : > { %5989 = vst [vmem:[%s12603_s13 + $0x1558] sm:$0xff] %v5988_v20  ;;  %5991 = vst [vmem:[%s12603_s13 + $0x1560] sm:$0xff] %v5990_v30 }
 0x341   : > { %5993 = vst [vmem:[%s12603_s13 + $0x1568] sm:$0xff] %v5992_v11  ;;  %5995 = vst [vmem:[%s12603_s13 + $0x1570] sm:$0xff] %v5994_v13 }
 0x342   : > { %5997 = vst [vmem:[%s12603_s13 + $0x1578] sm:$0xff] %v5996_v33  ;;  %5999 = vst [vmem:[%s12603_s13 + $0x1600] sm:$0xff] %v5998_v41 }
 0x343   : > { %6001 = vst [vmem:[%s12603_s13 + $0x1608] sm:$0xff] %v6000_v5  ;;  %6003 = vst [vmem:[%s12603_s13 + $0x1610] sm:$0xff] %v6002_v9 }
 0x344   : > { %6005 = vst [vmem:[%s12603_s13 + $0x1618] sm:$0xff] %v6004_v47  ;;  %6007 = vst [vmem:[%s12603_s13 + $0x1620] sm:$0xff] %v6006_v37 }
 0x345   : > { %6009 = vst [vmem:[%s12603_s13 + $0x1628] sm:$0xff] %v6008_v15  ;;  %6011 = vst [vmem:[%s12603_s13 + $0x1630] sm:$0xff] %v6010_v16 }
 0x346   : > { %6013 = vst [vmem:[%s12603_s13 + $0x1638] sm:$0xff] %v6012_v36  ;;  %6015 = vst [vmem:[%s12603_s13 + $0x1640] sm:$0xff] %v6014_v61 }
 0x347   : > { %6017 = vst [vmem:[%s12603_s13 + $0x1648] sm:$0xff] %v6016_v18  ;;  %6019 = vst [vmem:[%s12603_s13 + $0x1650] sm:$0xff] %v6018_v17 }
 0x348   : > { %6021 = vst [vmem:[%s12603_s13 + $0x1658] sm:$0xff] %v6020_v1  ;;  %6023 = vst [vmem:[%s12603_s13 + $0x1660] sm:$0xff] %v6022_v60 }
 0x349   : > { %6025 = vst [vmem:[%s12603_s13 + $0x1668] sm:$0xff] %v6024_v22  ;;  %6027 = vst [vmem:[%s12603_s13 + $0x1670] sm:$0xff] %v6026_v4 }
 0x34a   : > { %6029 = vst [vmem:[%s12603_s13 + $0x1678] sm:$0xff] %v6028_v24  ;;  %6031 = vst [vmem:[%s12603_s13 + $0x1700] sm:$0xff] %v6030_v23 }
 0x34b   : > { %6033 = vst [vmem:[%s12603_s13 + $0x1708] sm:$0xff] %v6032_v25  ;;  %6035 = vst [vmem:[%s12603_s13 + $0x1710] sm:$0xff] %v6034_v28 }
 0x34c   : > { %6037 = vst [vmem:[%s12603_s13 + $0x1718] sm:$0xff] %v6036_v14  ;;  %6039 = vst [vmem:[%s12603_s13 + $0x1720] sm:$0xff] %v6038_v31 }
 0x34d   : > { %6041 = vst [vmem:[%s12603_s13 + $0x1728] sm:$0xff] %v6040_v34  ;;  %6043 = vst [vmem:[%s12603_s13 + $0x1730] sm:$0xff] %v6042_v32 }
 0x34e   : > { %6045 = vst [vmem:[%s12603_s13 + $0x1738] sm:$0xff] %v6044_v19  ;;  %6047 = vst [vmem:[%s12603_s13 + $0x1740] sm:$0xff] %v6046_v42 }
 0x34f   : > { %6049 = vst [vmem:[%s12603_s13 + $0x1748] sm:$0xff] %v6048_v38  ;;  %6051 = vst [vmem:[%s12603_s13 + $0x1750] sm:$0xff] %v6050_v39 }
 0x350   : > { %6053 = vst [vmem:[%s12603_s13 + $0x1758] sm:$0xff] %v6052_v21  ;;  %6055 = vst [vmem:[%s12603_s13 + $0x1760] sm:$0xff] %v6054_v35 }
 0x351   : > { %6057 = vst [vmem:[%s12603_s13 + $0x1768] sm:$0xff] %v6056_v45  ;;  %6059 = vst [vmem:[%s12603_s13 + $0x1770] sm:$0xff] %v6058_v40 }
 0x352   : > { %6061 = vst [vmem:[%s12603_s13 + $0x1778] sm:$0xff] %v6060_v50 }
 0x353 PF: > { %s15_s16 = sadd.s32 1, %s9978_s16   ;;  %s13394_s9 = smov %s9954_s10 }
 0x354   : > { %p12_p9 = scmp.ge.s32.totalorder %s15_s16, 6   ;;  %s13395_s10 = smov %s9958_s11 }
 0x355   : > { %s13396_s11 = smov %s10075_s29  ;;  %s13397_s12 = smov %s9970_s14 }
 0x356   : > { %s13398_s13 = smov %s9974_s15  ;;  %s13399_s14 = smov %s13402_s18 }
 0x357   : > { %s13400_s15 = smov %s13406_s19  ;;  %14 = sbr.rel (!%p12_p9) target bundleno = 5 (0x5), region = 152 }
 0x35e   :  { %6077 = vsyncpa [#allocation3], 1 }
 0x35f   :  { %6079 = vsyncpa [#allocation3 + $0x1], 1 }

</bundles_post_ra>
